<compile_context>
chip_gen: v7x
topology: tpu7x:2x2x1
jax: 0.10.0
libtpu: 0.0.40
codegen_flags: <defaults>
</compile_context>

<pallas_src>
import functools
import math

import numpy as np
import jax
import jax.numpy as jnp
from jax import lax
from jax.experimental import pallas as pl
from jax.experimental.pallas import tpu as pltpu

VMEM_SPEC = pl.BlockSpec(memory_space=pltpu.MemorySpace.VMEM)

_TILE_ROWS = 1024    # row tile for flattened pointwise layers
_TILE_N = 1024       # point tile for (B, N, C) layers
_TILE_COLS = 512     # column tile for fc3


# ----------------------------------------------------------------------------
# Generic row-tiled linear:  o = [relu](x @ w + b)      (w stored bf16)
# ----------------------------------------------------------------------------
def _linear_kernel(x_ref, w_ref, b_ref, o_ref, *, relu):
    y = jnp.dot(x_ref[...].astype(jnp.bfloat16), w_ref[...],
                preferred_element_type=jnp.float32) + b_ref[...]
    if relu:
        y = jnp.maximum(y, 0.0)
    o_ref[...] = y


def linear(x, w, b, relu=False, tile_rows=_TILE_ROWS):
    m, cin = x.shape
    cout = w.shape[1]
    tm = min(m, tile_rows)
    return pl.pallas_call(
        functools.partial(_linear_kernel, relu=relu),
        out_shape=jax.ShapeDtypeStruct((m, cout), jnp.float32),
        grid=(pl.cdiv(m, tm),),
        in_specs=[
            pl.BlockSpec((tm, cin), lambda i: (i, 0)),
            pl.BlockSpec((cin, cout), lambda i: (0, 0)),
            pl.BlockSpec((1, cout), lambda i: (0, 0)),
        ],
        out_specs=pl.BlockSpec((tm, cout), lambda i: (i, 0)),
        compiler_params=pltpu.CompilerParams(dimension_semantics=("parallel",)),
    )(x, w, b.reshape(1, cout))


# ----------------------------------------------------------------------------
# Column-tiled linear (decoder fc3):  o = x @ w + b, grid over output columns
# ----------------------------------------------------------------------------
def _linear_cols_kernel(x_ref, w_ref, b_ref, o_ref):
    o_ref[...] = jnp.dot(x_ref[...].astype(jnp.bfloat16), w_ref[...],
                         preferred_element_type=jnp.float32) + b_ref[...]


def linear_cols(x, w, b, tile_cols=_TILE_COLS):
    m, cin = x.shape
    cout = w.shape[1]
    tc = min(cout, tile_cols)
    return pl.pallas_call(
        _linear_cols_kernel,
        out_shape=jax.ShapeDtypeStruct((m, cout), jnp.float32),
        grid=(pl.cdiv(cout, tc),),
        in_specs=[
            pl.BlockSpec((m, cin), lambda j: (0, 0)),
            pl.BlockSpec((cin, tc), lambda j: (0, j)),
            pl.BlockSpec((1, tc), lambda j: (0, j)),
        ],
        out_specs=pl.BlockSpec((m, tc), lambda j: (0, j)),
        compiler_params=pltpu.CompilerParams(dimension_semantics=("parallel",)),
    )(x, w, b.reshape(1, cout))


# ----------------------------------------------------------------------------
# Fused 2-layer pointwise MLP (encoder conv1 + conv2, BN folded, both relu)
# ----------------------------------------------------------------------------
def _mlp2_kernel(x_ref, w1_ref, b1_ref, w2_ref, b2_ref, o_ref):
    h = jnp.dot(x_ref[...].astype(jnp.bfloat16), w1_ref[...],
                preferred_element_type=jnp.float32) + b1_ref[...]
    h = jnp.maximum(h, 0.0)
    h = jnp.dot(h.astype(jnp.bfloat16), w2_ref[...],
                preferred_element_type=jnp.float32) + b2_ref[...]
    o_ref[...] = jnp.maximum(h, 0.0)


def mlp2(x, w1, b1, w2, b2, tile_rows=_TILE_ROWS):
    m, cin = x.shape
    c_mid = w1.shape[1]
    cout = w2.shape[1]
    tm = min(m, tile_rows)
    # TODO(synk): pad Cin=78 -> 128 and the 32/64-wide lanes to 128 for unmasked
    # vst + fuller MXU columns on v6e/v7x.
    return pl.pallas_call(
        _mlp2_kernel,
        out_shape=jax.ShapeDtypeStruct((m, cout), jnp.float32),
        grid=(pl.cdiv(m, tm),),
        in_specs=[
            pl.BlockSpec((tm, cin), lambda i: (i, 0)),
            pl.BlockSpec((cin, c_mid), lambda i: (0, 0)),
            pl.BlockSpec((1, c_mid), lambda i: (0, 0)),
            pl.BlockSpec((c_mid, cout), lambda i: (0, 0)),
            pl.BlockSpec((1, cout), lambda i: (0, 0)),
        ],
        out_specs=pl.BlockSpec((tm, cout), lambda i: (i, 0)),
        compiler_params=pltpu.CompilerParams(dimension_semantics=("parallel",)),
    )(x, w1, b1.reshape(1, c_mid), w2, b2.reshape(1, cout))


# ----------------------------------------------------------------------------
# SA_Layer body (shared): q/k share weight (no bias) so e = q.q^T is symmetric.
# Instead of softmax(dim=-1) then column-normalization then a leading-axis
# contraction, compute attention^T directly:
#   c  = softmax(e, axis=0)                  (== a'^T since e symmetric)
#   aT = c / (1e-9 + sum(c, axis=-1))        (== a^T)
#   x_r = aT @ v                             (plain matmul, no transpose)
# ----------------------------------------------------------------------------
def _sa_attention(x, wqk, wv, bv, wt, bt):
    xb = x.astype(jnp.bfloat16)
    q = jnp.dot(xb, wqk, preferred_element_type=jnp.float32)          # (N, C)
    v = jnp.dot(xb, wv, preferred_element_type=jnp.float32) + bv      # (N, C)
    qb = q.astype(jnp.bfloat16)
    # e[n, m] = sum_c q[n, c] * q[m, c]   (flash-attention style q @ q^T)
    e = lax.dot_general(qb, qb, (((1,), (1,)), ((), ())),
                        preferred_element_type=jnp.float32)            # (N, N)
    c = jnp.exp(e - jnp.max(e, axis=0, keepdims=True))
    c = c / jnp.sum(c, axis=0, keepdims=True)                          # softmax axis 0
    aT = c / (1e-9 + jnp.sum(c, axis=-1, keepdims=True))               # == attention^T
    x_r = jnp.dot(aT.astype(jnp.bfloat16), v.astype(jnp.bfloat16),
                  preferred_element_type=jnp.float32)                  # (N, C)
    y = jnp.dot((x - x_r).astype(jnp.bfloat16), wt,
                preferred_element_type=jnp.float32) + bt               # trans_conv+BN
    return x + jnp.maximum(y, 0.0)
    # TODO(synk): for very large N (v7x 64 MiB VMEM) tile the (N,N) energy over
    # keys with a two-pass softmax; full-N per batch element is kept here.


# att1 + fused torch.max(x, 2) (second output, per-batch running max on the
# already-resident result — no (B,N,64) HBM re-read).
def _sa_max_kernel(x_ref, wqk_ref, wv_ref, bv_ref, wt_ref, bt_ref,
                   o_ref, gmax_ref):
    o = _sa_attention(x_ref[...], wqk_ref[...], wv_ref[...], bv_ref[...],
                      wt_ref[...], bt_ref[...])
    o_ref[...] = o
    gmax_ref[...] = jnp.max(o, axis=0, keepdims=True)


def sa_layer_with_max(x3, p):
    B, N, C = x3.shape
    wspec = pl.BlockSpec((C, C), lambda b: (0, 0))
    bspec = pl.BlockSpec((1, C), lambda b: (0, 0))
    out, gmax = pl.pallas_call(
        _sa_max_kernel,
        out_shape=(jax.ShapeDtypeStruct((B, N, C), jnp.float32),
                   jax.ShapeDtypeStruct((B, 1, C), jnp.float32)),
        grid=(B,),
        in_specs=[pl.BlockSpec((None, N, C), lambda b: (b, 0, 0)),
                  wspec, wspec, bspec, wspec, bspec],
        out_specs=(pl.BlockSpec((None, N, C), lambda b: (b, 0, 0)),
                   pl.BlockSpec((None, 1, C), lambda b: (b, 0, 0))),
        compiler_params=pltpu.CompilerParams(dimension_semantics=("parallel",)),
    )(x3, p["qk_w"], p["v_w"], p["v_b"].reshape(1, C),
      p["trans_w"], p["trans_b"].reshape(1, C))
    return out, gmax.reshape(B, C)


# encoder conv3 (per-point half, global half pre-applied as per-batch bias)
# fused as the prologue of the att2 SA kernel — no (B,N,256) HBM round trip.
def _conv3_sa_kernel(h_ref, w3_ref, gfb_ref, wqk_ref, wv_ref, bv_ref,
                     wt_ref, bt_ref, o_ref):
    x = jnp.maximum(
        jnp.dot(h_ref[...].astype(jnp.bfloat16), w3_ref[...],
                preferred_element_type=jnp.float32) + gfb_ref[...], 0.0)
    o_ref[...] = _sa_attention(x, wqk_ref[...], wv_ref[...], bv_ref[...],
                               wt_ref[...], bt_ref[...])


def conv3_sa_layer(h3, w3_point, gf_bias, p):
    B, N, Cin = h3.shape
    C = w3_point.shape[1]
    wspec = pl.BlockSpec((C, C), lambda b: (0, 0))
    bspec = pl.BlockSpec((1, C), lambda b: (0, 0))
    return pl.pallas_call(
        _conv3_sa_kernel,
        out_shape=jax.ShapeDtypeStruct((B, N, C), jnp.float32),
        grid=(B,),
        in_specs=[pl.BlockSpec((None, N, Cin), lambda b: (b, 0, 0)),
                  pl.BlockSpec((Cin, C), lambda b: (0, 0)),
                  pl.BlockSpec((None, 1, C), lambda b: (b, 0, 0)),
                  wspec, wspec, bspec, wspec, bspec],
        out_specs=pl.BlockSpec((None, N, C), lambda b: (b, 0, 0)),
        compiler_params=pltpu.CompilerParams(dimension_semantics=("parallel",)),
    )(h3, w3_point, gf_bias.reshape(B, 1, C),
      p["qk_w"], p["v_w"], p["v_b"].reshape(1, C),
      p["trans_w"], p["trans_b"].reshape(1, C))


# ----------------------------------------------------------------------------
# Decoder: fused fc1 -> fc2 plus the dconv1 code projection (same tiny code
# input, one DMA); fc3 is the separate column-tiled linear above.
# ----------------------------------------------------------------------------
def _code_mlp_kernel(code_ref, w1, b1, w2, b2, wc, bc, h2_ref, cproj_ref):
    cb = code_ref[...].astype(jnp.bfloat16)
    h = jnp.maximum(jnp.dot(cb, w1[...], preferred_element_type=jnp.float32)
                    + b1[...], 0.0)
    h = jnp.maximum(jnp.dot(h.astype(jnp.bfloat16), w2[...],
                            preferred_element_type=jnp.float32) + b2[...], 0.0)
    h2_ref[...] = h
    cproj_ref[...] = jnp.dot(cb, wc[...], preferred_element_type=jnp.float32) + bc[...]


def code_mlp(code, p):
    B = code.shape[0]
    c_mid = p["fc2_w"].shape[1]
    c_proj = p["pt"]["w1_code"].shape[1]
    return pl.pallas_call(
        _code_mlp_kernel,
        out_shape=(jax.ShapeDtypeStruct((B, c_mid), jnp.float32),
                   jax.ShapeDtypeStruct((B, c_proj), jnp.float32)),
        in_specs=[VMEM_SPEC] * 7,
        out_specs=(VMEM_SPEC, VMEM_SPEC),
    )(code, p["fc1_w"], p["fc1_b"].reshape(1, -1),
      p["fc2_w"], p["fc2_b"].reshape(1, -1),
      p["pt"]["w1_code"], p["pt"]["b1"].reshape(1, -1))


# ----------------------------------------------------------------------------
# Decoder: fused per-point MLP  dconv1(split) -> dconv2 -> dconv3 (+ center)
# Single (num_fine, 5) input carries [grid(2), xyz(3)]; the 1024-d code half of
# dconv1 enters as a per-batch bias row (computed once in code_mlp).
# ----------------------------------------------------------------------------
def _point_mlp_kernel(pg_ref, cproj_ref, w1_ref, w2_ref, b2_ref, w3_ref, b3_ref,
                      o_ref):
    pg = pg_ref[...]                                                   # (TF, 5)
    pts = pg[:, 2:5]                                                   # center
    h = jnp.maximum(jnp.dot(pg.astype(jnp.bfloat16), w1_ref[...],
                            preferred_element_type=jnp.float32) + cproj_ref[...], 0.0)
    h = jnp.maximum(jnp.dot(h.astype(jnp.bfloat16), w2_ref[...],
                            preferred_element_type=jnp.float32) + b2_ref[...], 0.0)
    o_ref[...] = (jnp.dot(h.astype(jnp.bfloat16), w3_ref[...],
                          preferred_element_type=jnp.float32) + b3_ref[...] + pts)


def point_mlp(pg, code_proj, p, tile_f=_TILE_N):
    B, num_fine, _ = pg.shape
    c_mid = p["w2"].shape[0]
    tf = min(num_fine, tile_f)
    return pl.pallas_call(
        _point_mlp_kernel,
        out_shape=jax.ShapeDtypeStruct((B, num_fine, 3), jnp.float32),
        grid=(B, pl.cdiv(num_fine, tf)),
        in_specs=[
            pl.BlockSpec((None, tf, 5), lambda b, f: (b, f, 0)),
            pl.BlockSpec((None, 1, c_mid), lambda b, f: (b, 0, 0)),
            pl.BlockSpec((5, c_mid), lambda b, f: (0, 0)),
            pl.BlockSpec((c_mid, c_mid), lambda b, f: (0, 0)),
            pl.BlockSpec((1, c_mid), lambda b, f: (0, 0)),
            pl.BlockSpec((c_mid, 3), lambda b, f: (0, 0)),
            pl.BlockSpec((1, 3), lambda b, f: (0, 0)),
        ],
        out_specs=pl.BlockSpec((None, tf, 3), lambda b, f: (b, f, 0)),
        compiler_params=pltpu.CompilerParams(dimension_semantics=("parallel", "parallel")),
    )(pg, code_proj.reshape(B, 1, c_mid),
      p["w1_pg"], p["w2"], p["b2"].reshape(1, c_mid),
      p["w3"], p["b3"].reshape(1, 3))


# ----------------------------------------------------------------------------
# BN folding (eval mode, default running stats) + bf16 weight cast — prep time.
# ----------------------------------------------------------------------------
def fold_bn(w, b, gamma, beta, eps=1e-5):
    # TODO(synk): with a real checkpoint substitute the stored running_mean /
    # running_var here; defaults (0 / 1) are used to match a fresh eval model.
    scale = gamma / jnp.sqrt(1.0 + eps)
    return w * scale[None, :], b * scale + beta


def _bf16(w):
    return w.astype(jnp.bfloat16)


def _prep_sa(p):
    tw, tb = fold_bn(p["trans_w"], p["trans_b"], p["bn_g"], p["bn_b"])
    return dict(qk_w=_bf16(p["qk_w"]), v_w=_bf16(p["v_w"]), v_b=p["v_b"],
                trans_w=_bf16(tw), trans_b=tb)


def prepare_params(raw):
    """Fold BN, split broadcast weights, cast matmul weights to bf16 (once)."""
    er, dr = raw["enc"], raw["dec"]
    enc = {}
    w1, b1 = fold_bn(er["conv1_w"], er["conv1_b"], er["bn1_g"], er["bn1_b"])
    w2, b2 = fold_bn(er["conv2_w"], er["conv2_b"], er["bn2_g"], er["bn2_b"])
    enc["w1"], enc["b1"] = _bf16(w1), b1
    enc["w2"], enc["b2"] = _bf16(w2), b2
    w3, b3 = fold_bn(er["conv3_w"], er["conv3_b"], er["bn3_g"], er["bn3_b"])
    enc["w3_point"] = _bf16(w3[:64])     # rows acting on per-point 64-d feature
    enc["w3_global"] = _bf16(w3[64:])    # rows acting on broadcast global feature
    enc["b3"] = b3
    enc["att1"] = _prep_sa(er["att1"])
    enc["att2"] = _prep_sa(er["att2"])

    dec = {}
    dec["fc1_w"], dec["fc1_b"] = _bf16(dr["fc1_w"]), dr["fc1_b"]
    dec["fc2_w"], dec["fc2_b"] = _bf16(dr["fc2_w"]), dr["fc2_b"]
    dec["fc3_w"], dec["fc3_b"] = _bf16(dr["fc3_w"]), dr["fc3_b"]
    w1d = dr["dconv1_w"]                 # (2 + 3 + 1024, 512), torch.cat row order
    dec["pt"] = dict(
        w1_pg=_bf16(w1d[:5]),            # [grid(2); xyz(3)] rows, merged
        w1_code=_bf16(w1d[5:]),
        b1=dr["dconv1_b"],
        w2=_bf16(dr["dconv2_w"]), b2=dr["dconv2_b"],
        w3=_bf16(dr["dconv3_w"]), b3=dr["dconv3_b"])
    return {"enc": enc, "dec": dec}


# ----------------------------------------------------------------------------
# PCN_encoder
# ----------------------------------------------------------------------------
def pcn_encoder(x, p):
    # x: (B, 78, N)  (PyTorch NCW layout)
    B, Cin, N = x.shape
    h = jnp.transpose(x, (0, 2, 1)).reshape(B * N, Cin)

    h = mlp2(h, p["w1"], p["b1"], p["w2"], p["b2"])          # conv1+bn1+relu, conv2+bn2+relu
    h3, gf = sa_layer_with_max(h.reshape(B, N, 64), p["att1"])  # att1 + torch.max fused

    gf_proj = linear(gf, p["w3_global"], p["b3"])            # (B, 256), conv3 global half + b3
    h3 = conv3_sa_layer(h3, p["w3_point"], gf_proj, p["att2"])  # conv3+bn3+relu fused into att2

    x_enc = jnp.transpose(h3, (0, 2, 1))                     # (B, 256, N) — PyTorch layout
    global_feature = h3.reshape(B * N, 256)                  # == x.transpose(2,1).reshape(B*N,-1)
    return x_enc, global_feature


# ----------------------------------------------------------------------------
# PCN_decoder
# ----------------------------------------------------------------------------
def gen_grid_up(up_ratio, grid_size=0.05):
    sqrted = int(math.sqrt(up_ratio)) + 1
    num_x, num_y = 1, up_ratio
    for i in range(sqrted, 0, -1):
        if up_ratio % i == 0:
            num_x, num_y = i, up_ratio // i
            break
    gx = np.linspace(-grid_size, grid_size, num_x)
    gy = np.linspace(-grid_size, grid_size, num_y)
    xx, yy = np.meshgrid(gx, gy, indexing="ij")
    grid = np.stack([xx, yy], axis=-1).reshape(-1, 2).T      # (2, up_ratio)
    return jnp.asarray(grid, dtype=jnp.float32)


def pcn_decoder(code, p, grid, num_coarse, num_fine, scale):
    # code: (B, 1024)
    B = code.shape[0]
    h2, code_proj = code_mlp(code, p)                        # fused fc1->fc2 + dconv1 code proj
    c = linear_cols(h2, p["fc3_w"], p["fc3_b"])              # column-tiled fc3, (B, 3*num_coarse)
    coarse_pts = jnp.transpose(c.reshape(B, 3, num_coarse), (0, 2, 1))   # (B, num_coarse, 3)

    point_pts = jnp.repeat(coarse_pts, scale, axis=1)        # (B, num_fine, 3) — also the center
    grid_cl = jnp.tile(grid.T, (num_coarse, 1))              # (num_fine, 2), shared across batch
    pg = jnp.concatenate(
        [jnp.broadcast_to(grid_cl[None], (B, num_fine, 2)), point_pts], axis=-1)  # (B, num_fine, 5)

    fine_pts = point_mlp(pg, code_proj, p["pt"])             # fused dconv1->dconv2->dconv3 + center
    return coarse_pts, fine_pts


# ----------------------------------------------------------------------------
# Model (inference path: prefix not in {'train', 'val'})
# ----------------------------------------------------------------------------
def model_forward(x, code, params, grid, *, num_coarse, num_points):
    # TODO(synk): the reference Model.forward feeds the encoder output *tuple*
    # straight into PCN_decoder (a type/shape bug in PyTorch — the decoder needs
    # a (B, 1024) code); we take the 1024-d latent `code` as an explicit input.
    # calc_emd / calc_cd ('train'/'val' branches) are undefined externals.
    scale = num_points // num_coarse
    x_enc, global_feature = pcn_encoder(x, params["enc"])
    out1, out2 = pcn_decoder(code, params["dec"], grid, num_coarse, num_points, scale)
    return {"result": out2, "coarse": out1,
            "enc_point_feat": x_enc, "enc_global_feat": global_feature}


# ----------------------------------------------------------------------------
# Deterministic parameter init (raw, PyTorch-like parameterization)
# ----------------------------------------------------------------------------
def _lin_init(key, fin, fout, bias=True):
    kw, kb = jax.random.split(key)
    bound = 1.0 / math.sqrt(fin)
    w = jax.random.uniform(kw, (fin, fout), jnp.float32, -bound, bound)
    if bias:
        b = jax.random.uniform(kb, (fout,), jnp.float32, -bound, bound)
    else:
        b = jnp.zeros((fout,), jnp.float32)
    return w, b


def _sa_init(key, c):
    k1, k2, k3 = jax.random.split(key, 3)
    qk_w, _ = _lin_init(k1, c, c, bias=False)    # q_conv weight shared with k_conv, no bias
    v_w, v_b = _lin_init(k2, c, c)
    t_w, t_b = _lin_init(k3, c, c)
    return dict(qk_w=qk_w, v_w=v_w, v_b=v_b, trans_w=t_w, trans_b=t_b,
                bn_g=jnp.ones((c,), jnp.float32), bn_b=jnp.zeros((c,), jnp.float32))


def init_params(key, num_coarse):
    ks = jax.random.split(key, 11)
    enc = {}
    enc["conv1_w"], enc["conv1_b"] = _lin_init(ks[0], 78, 32)
    enc["bn1_g"], enc["bn1_b"] = jnp.ones((32,), jnp.float32), jnp.zeros((32,), jnp.float32)
    enc["conv2_w"], enc["conv2_b"] = _lin_init(ks[1], 32, 64)
    enc["bn2_g"], enc["bn2_b"] = jnp.ones((64,), jnp.float32), jnp.zeros((64,), jnp.float32)
    enc["conv3_w"], enc["conv3_b"] = _lin_init(ks[2], 128, 256)
    enc["bn3_g"], enc["bn3_b"] = jnp.ones((256,), jnp.float32), jnp.zeros((256,), jnp.float32)
    enc["att1"] = _sa_init(ks[3], 64)
    enc["att2"] = _sa_init(ks[4], 256)
    # NOTE: encoder conv4 (128 -> 1024) is defined in __init__ but never used in forward.

    dec = {}
    dec["fc1_w"], dec["fc1_b"] = _lin_init(ks[5], 1024, 1024)
    dec["fc2_w"], dec["fc2_b"] = _lin_init(ks[6], 1024, 1024)
    dec["fc3_w"], dec["fc3_b"] = _lin_init(ks[7], 1024, num_coarse * 3)
    cat_feature_num = 2 + 3 + 1024
    dec["dconv1_w"], dec["dconv1_b"] = _lin_init(ks[8], cat_feature_num, 512)
    dec["dconv2_w"], dec["dconv2_b"] = _lin_init(ks[9], 512, 512)
    dec["dconv3_w"], dec["dconv3_b"] = _lin_init(ks[10], 512, 3)
    return {"enc": enc, "dec": dec}


# ----------------------------------------------------------------------------
if __name__ == "__main__":
    B, N_in = 2, 16                  # encoder input: 16 points x 78 features
    num_coarse, num_points = 8, 32   # scale = 4, num_fine = 32
    scale = num_points // num_coarse

    key = jax.random.PRNGKey(0)
    k_x, k_code, k_p = jax.random.split(key, 3)
    x = jax.random.normal(k_x, (B, 78, N_in), dtype=jnp.float32)      # PyTorch (B, C, N)
    code = jax.random.normal(k_code, (B, 1024), dtype=jnp.float32)    # decoder latent
    params = prepare_params(init_params(k_p, num_coarse))             # BN folded, bf16 weights
    grid = gen_grid_up(2 ** int(math.log2(scale)), 0.05)              # (2, scale) — matches reference

    fwd = jax.jit(functools.partial(model_forward,
                                    num_coarse=num_coarse, num_points=num_points))
    out = fwd(x, code, params, grid)
    jax.block_until_ready(out)

    assert out["result"].shape == (B, num_points, 3)
    assert out["coarse"].shape == (B, num_coarse, 3)
    assert out["enc_point_feat"].shape == (B, 256, N_in)
    assert out["enc_global_feat"].shape == (B * N_in, 256)
    assert all(bool(jnp.all(jnp.isfinite(v))) for v in out.values())
    print("KERNEL_OK")
</pallas_src>

<mosaic_0001>
module attributes {stable_mosaic.version = 11 : i64} {
  func.func @_linear_cols_kernel(%arg0: i32, %arg1: memref<2x1024xf32, #tpu.memory_space<vmem>>, %arg2: memref<1024x24xbf16, #tpu.memory_space<vmem>>, %arg3: memref<1x24xf32, #tpu.memory_space<vmem>>, %arg4: memref<2x24xf32, #tpu.memory_space<vmem>>) attributes {dimension_semantics = [#tpu.dimension_semantics<parallel>], iteration_bounds = array<i64: 1>, scalar_prefetch = 0 : i64, scratch_operands = 0 : i64, tpu.core_type = #tpu.core_type<tc>, window_params = [{pipeline_mode = #tpu.pipeline_mode<synchronous>, transform_indices = @transform_0, window_bounds = array<i64: 2, 1024>}, {transform_indices = @transform_1, window_bounds = array<i64: 1024, 24>}, {transform_indices = @transform_2, window_bounds = array<i64: 1, 24>}, {transform_indices = @transform_3, window_bounds = array<i64: 2, 24>}]} {
    %c0 = arith.constant 0 : index
    %c0_0 = arith.constant 0 : index
    %0 = vector.load %arg1[%c0, %c0_0] : memref<2x1024xf32, #tpu.memory_space<vmem>>, vector<2x1024xf32>
    %1 = arith.truncf %0 : vector<2x1024xf32> to vector<2x1024xbf16>
    %c0_1 = arith.constant 0 : index
    %c0_2 = arith.constant 0 : index
    %2 = vector.load %arg2[%c0_1, %c0_2] : memref<1024x24xbf16, #tpu.memory_space<vmem>>, vector<1024x24xbf16>
    %cst = arith.constant dense<0.000000e+00> : vector<2x24xf32>
    %3 = tpu.matmul %1, %2, %cst {dimension_numbers = #tpu.dot_dimension_numbers<[1], [0], [0], [1], [0, 0, 1, 1], [], []>} : vector<2x1024xbf16>, vector<1024x24xbf16>, vector<2x24xf32> -> vector<2x24xf32>
    %c0_3 = arith.constant 0 : index
    %c0_4 = arith.constant 0 : index
    %4 = vector.load %arg3[%c0_3, %c0_4] : memref<1x24xf32, #tpu.memory_space<vmem>>, vector<1x24xf32>
    %5 = vector.broadcast %4 : vector<1x24xf32> to vector<2x24xf32>
    %6 = arith.addf %3, %5 : vector<2x24xf32>
    %c0_5 = arith.constant 0 : index
    %c0_6 = arith.constant 0 : index
    %7 = vector.load %arg4[%c0_5, %c0_6] : memref<2x24xf32, #tpu.memory_space<vmem>>, vector<2x24xf32>
    tpu.vector_store %arg4[%c0_5, %c0_6], %6 {strides = array<i32>} : memref<2x24xf32, #tpu.memory_space<vmem>>, vector<2x24xf32>,
    return
  }
  func.func @transform_0(%arg0: i32) -> (i32, i32) {
    %c0_i32 = arith.constant 0 : i32
    %c0_i32_0 = arith.constant 0 : i32
    %c0_i32_1 = arith.constant 0 : i32
    return %c0_i32, %c0_i32_0 : i32, i32
  }
  func.func @transform_1(%arg0: i32) -> (i32, i32) {
    %c0_i32 = arith.constant 0 : i32
    %c0_i32_0 = arith.constant 0 : i32
    return %c0_i32, %arg0 : i32, i32
  }
  func.func @transform_2(%arg0: i32) -> (i32, i32) {
    %c0_i32 = arith.constant 0 : i32
    %c0_i32_0 = arith.constant 0 : i32
    return %c0_i32, %arg0 : i32, i32
  }
  func.func @transform_3(%arg0: i32) -> (i32, i32) {
    %c0_i32 = arith.constant 0 : i32
    %c0_i32_0 = arith.constant 0 : i32
    return %c0_i32, %arg0 : i32, i32
  }
}

module attributes {stable_mosaic.version = 11 : i64} {
  func.func @_code_mlp_kernel(%arg0: memref<2x1024xf32, #tpu.memory_space<vmem>>, %arg1: memref<1024x1024xbf16, #tpu.memory_space<vmem>>, %arg2: memref<1x1024xf32, #tpu.memory_space<vmem>>, %arg3: memref<1024x1024xbf16, #tpu.memory_space<vmem>>, %arg4: memref<1x1024xf32, #tpu.memory_space<vmem>>, %arg5: memref<1024x512xbf16, #tpu.memory_space<vmem>>, %arg6: memref<1x512xf32, #tpu.memory_space<vmem>>, %arg7: memref<2x1024xf32, #tpu.memory_space<vmem>>, %arg8: memref<2x512xf32, #tpu.memory_space<vmem>>) attributes {dimension_semantics = [], scalar_prefetch = 0 : i64, scratch_operands = 0 : i64, tpu.core_type = #tpu.core_type<tc>} {
    %c0 = arith.constant 0 : index
    %c0_0 = arith.constant 0 : index
    %0 = vector.load %arg0[%c0, %c0_0] : memref<2x1024xf32, #tpu.memory_space<vmem>>, vector<2x1024xf32>
    %1 = arith.truncf %0 : vector<2x1024xf32> to vector<2x1024xbf16>
    %c0_1 = arith.constant 0 : index
    %c0_2 = arith.constant 0 : index
    %2 = vector.load %arg1[%c0_1, %c0_2] : memref<1024x1024xbf16, #tpu.memory_space<vmem>>, vector<1024x1024xbf16>
    %cst = arith.constant dense<0.000000e+00> : vector<2x1024xf32>
    %3 = tpu.matmul %1, %2, %cst {dimension_numbers = #tpu.dot_dimension_numbers<[1], [0], [0], [1], [0, 0, 1, 1], [], []>} : vector<2x1024xbf16>, vector<1024x1024xbf16>, vector<2x1024xf32> -> vector<2x1024xf32>
    %c0_3 = arith.constant 0 : index
    %c0_4 = arith.constant 0 : index
    %4 = vector.load %arg2[%c0_3, %c0_4] : memref<1x1024xf32, #tpu.memory_space<vmem>>, vector<1x1024xf32>
    %5 = vector.broadcast %4 : vector<1x1024xf32> to vector<2x1024xf32>
    %6 = arith.addf %3, %5 : vector<2x1024xf32>
    %cst_5 = arith.constant 0.000000e+00 : f32
    %7 = vector.broadcast %cst_5 : f32 to vector<2x1024xf32>
    %8 = arith.maximumf %6, %7 : vector<2x1024xf32>
    %9 = arith.truncf %8 : vector<2x1024xf32> to vector<2x1024xbf16>
    %c0_6 = arith.constant 0 : index
    %c0_7 = arith.constant 0 : index
    %10 = vector.load %arg3[%c0_6, %c0_7] : memref<1024x1024xbf16, #tpu.memory_space<vmem>>, vector<1024x1024xbf16>
    %cst_8 = arith.constant dense<0.000000e+00> : vector<2x1024xf32>
    %11 = tpu.matmul %9, %10, %cst_8 {dimension_numbers = #tpu.dot_dimension_numbers<[1], [0], [0], [1], [0, 0, 1, 1], [], []>} : vector<2x1024xbf16>, vector<1024x1024xbf16>, vector<2x1024xf32> -> vector<2x1024xf32>
    %c0_9 = arith.constant 0 : index
    %c0_10 = arith.constant 0 : index
    %12 = vector.load %arg4[%c0_9, %c0_10] : memref<1x1024xf32, #tpu.memory_space<vmem>>, vector<1x1024xf32>
    %13 = vector.broadcast %12 : vector<1x1024xf32> to vector<2x1024xf32>
    %14 = arith.addf %11, %13 : vector<2x1024xf32>
    %cst_11 = arith.constant 0.000000e+00 : f32
    %15 = vector.broadcast %cst_11 : f32 to vector<2x1024xf32>
    %16 = arith.maximumf %14, %15 : vector<2x1024xf32>
    %c0_12 = arith.constant 0 : index
    %c0_13 = arith.constant 0 : index
    %17 = vector.load %arg7[%c0_12, %c0_13] : memref<2x1024xf32, #tpu.memory_space<vmem>>, vector<2x1024xf32>
    tpu.vector_store %arg7[%c0_12, %c0_13], %16 {strides = array<i32>} : memref<2x1024xf32, #tpu.memory_space<vmem>>, vector<2x1024xf32>,
    %c0_14 = arith.constant 0 : index
    %c0_15 = arith.constant 0 : index
    %18 = vector.load %arg5[%c0_14, %c0_15] : memref<1024x512xbf16, #tpu.memory_space<vmem>>, vector<1024x512xbf16>
    %cst_16 = arith.constant dense<0.000000e+00> : vector<2x512xf32>
    %19 = tpu.matmul %1, %18, %cst_16 {dimension_numbers = #tpu.dot_dimension_numbers<[1], [0], [0], [1], [0, 0, 1, 1], [], []>} : vector<2x1024xbf16>, vector<1024x512xbf16>, vector<2x512xf32> -> vector<2x512xf32>
    %c0_17 = arith.constant 0 : index
    %c0_18 = arith.constant 0 : index
    %20 = vector.load %arg6[%c0_17, %c0_18] : memref<1x512xf32, #tpu.memory_space<vmem>>, vector<1x512xf32>
    %21 = vector.broadcast %20 : vector<1x512xf32> to vector<2x512xf32>
    %22 = arith.addf %19, %21 : vector<2x512xf32>
    %c0_19 = arith.constant 0 : index
    %c0_20 = arith.constant 0 : index
    %23 = vector.load %arg8[%c0_19, %c0_20] : memref<2x512xf32, #tpu.memory_space<vmem>>, vector<2x512xf32>
    tpu.vector_store %arg8[%c0_19, %c0_20], %22 {strides = array<i32>} : memref<2x512xf32, #tpu.memory_space<vmem>>, vector<2x512xf32>,
    return
  }
}

module attributes {stable_mosaic.version = 11 : i64} {
  func.func @_point_mlp_kernel(%arg0: i32, %arg1: i32, %arg2: memref<1x32x5xf32, #tpu.memory_space<vmem>>, %arg3: memref<1x1x512xf32, #tpu.memory_space<vmem>>, %arg4: memref<5x512xbf16, #tpu.memory_space<vmem>>, %arg5: memref<512x512xbf16, #tpu.memory_space<vmem>>, %arg6: memref<1x512xf32, #tpu.memory_space<vmem>>, %arg7: memref<512x3xbf16, #tpu.memory_space<vmem>>, %arg8: memref<1x3xf32, #tpu.memory_space<vmem>>, %arg9: memref<1x32x3xf32, #tpu.memory_space<vmem>>) attributes {dimension_semantics = [#tpu.dimension_semantics<parallel>, #tpu.dimension_semantics<parallel>], iteration_bounds = array<i64: 2, 1>, scalar_prefetch = 0 : i64, scratch_operands = 0 : i64, tpu.core_type = #tpu.core_type<tc>, window_params = [{transform_indices = @transform_0, window_bounds = array<i64: 1, 32, 5>}, {transform_indices = @transform_1, window_bounds = array<i64: 1, 1, 512>}, {pipeline_mode = #tpu.pipeline_mode<synchronous>, transform_indices = @transform_2, window_bounds = array<i64: 5, 512>}, {pipeline_mode = #tpu.pipeline_mode<synchronous>, transform_indices = @transform_3, window_bounds = array<i64: 512, 512>}, {pipeline_mode = #tpu.pipeline_mode<synchronous>, transform_indices = @transform_4, window_bounds = array<i64: 1, 512>}, {pipeline_mode = #tpu.pipeline_mode<synchronous>, transform_indices = @transform_5, window_bounds = array<i64: 512, 3>}, {pipeline_mode = #tpu.pipeline_mode<synchronous>, transform_indices = @transform_6, window_bounds = array<i64: 1, 3>}, {transform_indices = @transform_7, window_bounds = array<i64: 1, 32, 3>}]} {
    %c0 = arith.constant 0 : index
    %c0_0 = arith.constant 0 : index
    %c0_1 = arith.constant 0 : index
    %0 = vector.load %arg2[%c0, %c0_0, %c0_1] : memref<1x32x5xf32, #tpu.memory_space<vmem>>, vector<1x32x5xf32>
    %1 = vector.shape_cast %0 : vector<1x32x5xf32> to vector<32x5xf32>
    %2 = vector.extract_strided_slice %1 {offsets = [0, 2], sizes = [32, 3], strides = [1, 1]} : vector<32x5xf32> to vector<32x3xf32>
    %3 = arith.truncf %1 : vector<32x5xf32> to vector<32x5xbf16>
    %c0_2 = arith.constant 0 : index
    %c0_3 = arith.constant 0 : index
    %4 = vector.load %arg4[%c0_2, %c0_3] : memref<5x512xbf16, #tpu.memory_space<vmem>>, vector<5x512xbf16>
    %cst = arith.constant dense<0.000000e+00> : vector<32x512xf32>
    %5 = tpu.matmul %3, %4, %cst {dimension_numbers = #tpu.dot_dimension_numbers<[1], [0], [0], [1], [0, 0, 1, 1], [], []>} : vector<32x5xbf16>, vector<5x512xbf16>, vector<32x512xf32> -> vector<32x512xf32>
    %c0_4 = arith.constant 0 : index
    %c0_5 = arith.constant 0 : index
    %c0_6 = arith.constant 0 : index
    %6 = vector.load %arg3[%c0_4, %c0_5, %c0_6] : memref<1x1x512xf32, #tpu.memory_space<vmem>>, vector<1x1x512xf32>
    %7 = vector.shape_cast %6 : vector<1x1x512xf32> to vector<1x512xf32>
    %8 = vector.broadcast %7 : vector<1x512xf32> to vector<32x512xf32>
    %9 = arith.addf %5, %8 : vector<32x512xf32>
    %cst_7 = arith.constant 0.000000e+00 : f32
    %10 = vector.broadcast %cst_7 : f32 to vector<32x512xf32>
    %11 = arith.maximumf %9, %10 : vector<32x512xf32>
    %12 = arith.truncf %11 : vector<32x512xf32> to vector<32x512xbf16>
    %c0_8 = arith.constant 0 : index
    %c0_9 = arith.constant 0 : index
    %13 = vector.load %arg5[%c0_8, %c0_9] : memref<512x512xbf16, #tpu.memory_space<vmem>>, vector<512x512xbf16>
    %cst_10 = arith.constant dense<0.000000e+00> : vector<32x512xf32>
    %14 = tpu.matmul %12, %13, %cst_10 {dimension_numbers = #tpu.dot_dimension_numbers<[1], [0], [0], [1], [0, 0, 1, 1], [], []>} : vector<32x512xbf16>, vector<512x512xbf16>, vector<32x512xf32> -> vector<32x512xf32>
    %c0_11 = arith.constant 0 : index
    %c0_12 = arith.constant 0 : index
    %15 = vector.load %arg6[%c0_11, %c0_12] : memref<1x512xf32, #tpu.memory_space<vmem>>, vector<1x512xf32>
    %16 = vector.broadcast %15 : vector<1x512xf32> to vector<32x512xf32>
    %17 = arith.addf %14, %16 : vector<32x512xf32>
    %cst_13 = arith.constant 0.000000e+00 : f32
    %18 = vector.broadcast %cst_13 : f32 to vector<32x512xf32>
    %19 = arith.maximumf %17, %18 : vector<32x512xf32>
    %20 = arith.truncf %19 : vector<32x512xf32> to vector<32x512xbf16>
    %c0_14 = arith.constant 0 : index
    %c0_15 = arith.constant 0 : index
    %21 = vector.load %arg7[%c0_14, %c0_15] : memref<512x3xbf16, #tpu.memory_space<vmem>>, vector<512x3xbf16>
    %cst_16 = arith.constant dense<0.000000e+00> : vector<32x3xf32>
    %22 = tpu.matmul %20, %21, %cst_16 {dimension_numbers = #tpu.dot_dimension_numbers<[1], [0], [0], [1], [0, 0, 1, 1], [], []>} : vector<32x512xbf16>, vector<512x3xbf16>, vector<32x3xf32> -> vector<32x3xf32>
    %c0_17 = arith.constant 0 : index
    %c0_18 = arith.constant 0 : index
    %23 = vector.load %arg8[%c0_17, %c0_18] : memref<1x3xf32, #tpu.memory_space<vmem>>, vector<1x3xf32>
    %24 = vector.broadcast %23 : vector<1x3xf32> to vector<32x3xf32>
    %25 = arith.addf %22, %24 : vector<32x3xf32>
    %26 = arith.addf %25, %2 : vector<32x3xf32>
    %c0_19 = arith.constant 0 : index
    %c0_20 = arith.constant 0 : index
    %c0_21 = arith.constant 0 : index
    %27 = vector.load %arg9[%c0_19, %c0_20, %c0_21] : memref<1x32x3xf32, #tpu.memory_space<vmem>>, vector<1x32x3xf32>
    %28 = vector.shape_cast %27 : vector<1x32x3xf32> to vector<32x3xf32>
    %29 = vector.shape_cast %26 : vector<32x3xf32> to vector<1x32x3xf32>
    tpu.vector_store %arg9[%c0_19, %c0_20, %c0_21], %29 {strides = array<i32>} : memref<1x32x3xf32, #tpu.memory_space<vmem>>, vector<1x32x3xf32>,
    return
  }
  func.func @transform_0(%arg0: i32, %arg1: i32) -> (i32, i32, i32) {
    %c0_i32 = arith.constant 0 : i32
    %c0_i32_0 = arith.constant 0 : i32
    return %arg0, %arg1, %c0_i32 : i32, i32, i32
  }
  func.func @transform_1(%arg0: i32, %arg1: i32) -> (i32, i32, i32) {
    %c0_i32 = arith.constant 0 : i32
    %c0_i32_0 = arith.constant 0 : i32
    %c0_i32_1 = arith.constant 0 : i32
    return %arg0, %c0_i32, %c0_i32_0 : i32, i32, i32
  }
  func.func @transform_2(%arg0: i32, %arg1: i32) -> (i32, i32) {
    %c0_i32 = arith.constant 0 : i32
    %c0_i32_0 = arith.constant 0 : i32
    %c0_i32_1 = arith.constant 0 : i32
    return %c0_i32, %c0_i32_0 : i32, i32
  }
  func.func @transform_3(%arg0: i32, %arg1: i32) -> (i32, i32) {
    %c0_i32 = arith.constant 0 : i32
    %c0_i32_0 = arith.constant 0 : i32
    %c0_i32_1 = arith.constant 0 : i32
    return %c0_i32, %c0_i32_0 : i32, i32
  }
  func.func @transform_4(%arg0: i32, %arg1: i32) -> (i32, i32) {
    %c0_i32 = arith.constant 0 : i32
    %c0_i32_0 = arith.constant 0 : i32
    %c0_i32_1 = arith.constant 0 : i32
    return %c0_i32, %c0_i32_0 : i32, i32
  }
  func.func @transform_5(%arg0: i32, %arg1: i32) -> (i32, i32) {
    %c0_i32 = arith.constant 0 : i32
    %c0_i32_0 = arith.constant 0 : i32
    %c0_i32_1 = arith.constant 0 : i32
    return %c0_i32, %c0_i32_0 : i32, i32
  }
  func.func @transform_6(%arg0: i32, %arg1: i32) -> (i32, i32) {
    %c0_i32 = arith.constant 0 : i32
    %c0_i32_0 = arith.constant 0 : i32
    %c0_i32_1 = arith.constant 0 : i32
    return %c0_i32, %c0_i32_0 : i32, i32
  }
  func.func @transform_7(%arg0: i32, %arg1: i32) -> (i32, i32, i32) {
    %c0_i32 = arith.constant 0 : i32
    %c0_i32_0 = arith.constant 0 : i32
    return %arg0, %arg1, %c0_i32 : i32, i32, i32
  }
}

module attributes {stable_mosaic.version = 11 : i64} {
  func.func @_sa_max_kernel(%arg0: i32, %arg1: memref<1x16x64xf32, #tpu.memory_space<vmem>>, %arg2: memref<64x64xbf16, #tpu.memory_space<vmem>>, %arg3: memref<64x64xbf16, #tpu.memory_space<vmem>>, %arg4: memref<1x64xf32, #tpu.memory_space<vmem>>, %arg5: memref<64x64xbf16, #tpu.memory_space<vmem>>, %arg6: memref<1x64xf32, #tpu.memory_space<vmem>>, %arg7: memref<1x16x64xf32, #tpu.memory_space<vmem>>, %arg8: memref<1x1x64xf32, #tpu.memory_space<vmem>>) attributes {dimension_semantics = [#tpu.dimension_semantics<parallel>], iteration_bounds = array<i64: 2>, scalar_prefetch = 0 : i64, scratch_operands = 0 : i64, tpu.core_type = #tpu.core_type<tc>, window_params = [{transform_indices = @transform_0, window_bounds = array<i64: 1, 16, 64>}, {pipeline_mode = #tpu.pipeline_mode<synchronous>, transform_indices = @transform_1, window_bounds = array<i64: 64, 64>}, {pipeline_mode = #tpu.pipeline_mode<synchronous>, transform_indices = @transform_2, window_bounds = array<i64: 64, 64>}, {pipeline_mode = #tpu.pipeline_mode<synchronous>, transform_indices = @transform_3, window_bounds = array<i64: 1, 64>}, {pipeline_mode = #tpu.pipeline_mode<synchronous>, transform_indices = @transform_4, window_bounds = array<i64: 64, 64>}, {pipeline_mode = #tpu.pipeline_mode<synchronous>, transform_indices = @transform_5, window_bounds = array<i64: 1, 64>}, {transform_indices = @transform_6, window_bounds = array<i64: 1, 16, 64>}, {transform_indices = @transform_7, window_bounds = array<i64: 1, 1, 64>}]} {
    %c0 = arith.constant 0 : index
    %c0_0 = arith.constant 0 : index
    %c0_1 = arith.constant 0 : index
    %0 = vector.load %arg1[%c0, %c0_0, %c0_1] : memref<1x16x64xf32, #tpu.memory_space<vmem>>, vector<1x16x64xf32>
    %1 = vector.shape_cast %0 : vector<1x16x64xf32> to vector<16x64xf32>
    %c0_2 = arith.constant 0 : index
    %c0_3 = arith.constant 0 : index
    %2 = vector.load %arg2[%c0_2, %c0_3] : memref<64x64xbf16, #tpu.memory_space<vmem>>, vector<64x64xbf16>
    %c0_4 = arith.constant 0 : index
    %c0_5 = arith.constant 0 : index
    %3 = vector.load %arg3[%c0_4, %c0_5] : memref<64x64xbf16, #tpu.memory_space<vmem>>, vector<64x64xbf16>
    %c0_6 = arith.constant 0 : index
    %c0_7 = arith.constant 0 : index
    %4 = vector.load %arg4[%c0_6, %c0_7] : memref<1x64xf32, #tpu.memory_space<vmem>>, vector<1x64xf32>
    %c0_8 = arith.constant 0 : index
    %c0_9 = arith.constant 0 : index
    %5 = vector.load %arg5[%c0_8, %c0_9] : memref<64x64xbf16, #tpu.memory_space<vmem>>, vector<64x64xbf16>
    %c0_10 = arith.constant 0 : index
    %c0_11 = arith.constant 0 : index
    %6 = vector.load %arg6[%c0_10, %c0_11] : memref<1x64xf32, #tpu.memory_space<vmem>>, vector<1x64xf32>
    %7 = arith.truncf %1 : vector<16x64xf32> to vector<16x64xbf16>
    %cst = arith.constant dense<0.000000e+00> : vector<16x64xf32>
    %8 = tpu.matmul %7, %2, %cst {dimension_numbers = #tpu.dot_dimension_numbers<[1], [0], [0], [1], [0, 0, 1, 1], [], []>} : vector<16x64xbf16>, vector<64x64xbf16>, vector<16x64xf32> -> vector<16x64xf32>
    %cst_12 = arith.constant dense<0.000000e+00> : vector<16x64xf32>
    %9 = tpu.matmul %7, %3, %cst_12 {dimension_numbers = #tpu.dot_dimension_numbers<[1], [0], [0], [1], [0, 0, 1, 1], [], []>} : vector<16x64xbf16>, vector<64x64xbf16>, vector<16x64xf32> -> vector<16x64xf32>
    %10 = vector.broadcast %4 : vector<1x64xf32> to vector<16x64xf32>
    %11 = arith.addf %9, %10 : vector<16x64xf32>
    %12 = arith.truncf %8 : vector<16x64xf32> to vector<16x64xbf16>
    %cst_13 = arith.constant dense<0.000000e+00> : vector<16x16xf32>
    %13 = tpu.matmul %12, %12, %cst_13 {dimension_numbers = #tpu.dot_dimension_numbers<[1], [1], [0], [0], [0, 0, 1, 0], [], []>} : vector<16x64xbf16>, vector<16x64xbf16>, vector<16x16xf32> -> vector<16x16xf32>
    %cst_14 = arith.constant dense<0xFF800000> : vector<16xf32>
    %14 = vector.multi_reduction <maximumf>, %13, %cst_14 [0] : vector<16x16xf32> to vector<16xf32>
    %15 = vector.shape_cast %14 : vector<16xf32> to vector<1x16xf32>
    %16 = vector.broadcast %15 : vector<1x16xf32> to vector<16x16xf32>
    %17 = arith.subf %13, %16 : vector<16x16xf32>
    %18 = math.exp %17 : vector<16x16xf32>
    %cst_15 = arith.constant dense<0.000000e+00> : vector<16xf32>
    %19 = vector.multi_reduction <add>, %18, %cst_15 [0] : vector<16x16xf32> to vector<16xf32>
    %20 = vector.shape_cast %19 : vector<16xf32> to vector<1x16xf32>
    %21 = vector.broadcast %20 : vector<1x16xf32> to vector<16x16xf32>
    %22 = arith.divf %18, %21 : vector<16x16xf32>
    %cst_16 = arith.constant dense<0.000000e+00> : vector<16xf32>
    %23 = vector.multi_reduction <add>, %22, %cst_16 [1] : vector<16x16xf32> to vector<16xf32>
    %24 = vector.shape_cast %23 : vector<16xf32> to vector<16x1xf32>
    %cst_17 = arith.constant 9.99999971E-10 : f32
    %25 = vector.broadcast %cst_17 : f32 to vector<16x1xf32>
    %26 = arith.addf %25, %24 : vector<16x1xf32>
    %27 = vector.broadcast %26 : vector<16x1xf32> to vector<16x16xf32>
    %28 = arith.divf %22, %27 : vector<16x16xf32>
    %29 = arith.truncf %28 : vector<16x16xf32> to vector<16x16xbf16>
    %30 = arith.truncf %11 : vector<16x64xf32> to vector<16x64xbf16>
    %cst_18 = arith.constant dense<0.000000e+00> : vector<16x64xf32>
    %31 = tpu.matmul %29, %30, %cst_18 {dimension_numbers = #tpu.dot_dimension_numbers<[1], [0], [0], [1], [0, 0, 1, 1], [], []>} : vector<16x16xbf16>, vector<16x64xbf16>, vector<16x64xf32> -> vector<16x64xf32>
    %32 = arith.subf %1, %31 : vector<16x64xf32>
    %33 = arith.truncf %32 : vector<16x64xf32> to vector<16x64xbf16>
    %cst_19 = arith.constant dense<0.000000e+00> : vector<16x64xf32>
    %34 = tpu.matmul %33, %5, %cst_19 {dimension_numbers = #tpu.dot_dimension_numbers<[1], [0], [0], [1], [0, 0, 1, 1], [], []>} : vector<16x64xbf16>, vector<64x64xbf16>, vector<16x64xf32> -> vector<16x64xf32>
    %35 = vector.broadcast %6 : vector<1x64xf32> to vector<16x64xf32>
    %36 = arith.addf %34, %35 : vector<16x64xf32>
    %cst_20 = arith.constant 0.000000e+00 : f32
    %37 = vector.broadcast %cst_20 : f32 to vector<16x64xf32>
    %38 = arith.maximumf %36, %37 : vector<16x64xf32>
    %39 = arith.addf %1, %38 : vector<16x64xf32>
    %c0_21 = arith.constant 0 : index
    %c0_22 = arith.constant 0 : index
    %c0_23 = arith.constant 0 : index
    %40 = vector.load %arg7[%c0_21, %c0_22, %c0_23] : memref<1x16x64xf32, #tpu.memory_space<vmem>>, vector<1x16x64xf32>
    %41 = vector.shape_cast %40 : vector<1x16x64xf32> to vector<16x64xf32>
    %42 = vector.shape_cast %39 : vector<16x64xf32> to vector<1x16x64xf32>
    tpu.vector_store %arg7[%c0_21, %c0_22, %c0_23], %42 {strides = array<i32>} : memref<1x16x64xf32, #tpu.memory_space<vmem>>, vector<1x16x64xf32>,
    %cst_24 = arith.constant dense<0xFF800000> : vector<64xf32>
    %43 = vector.multi_reduction <maximumf>, %39, %cst_24 [0] : vector<16x64xf32> to vector<64xf32>
    %44 = vector.shape_cast %43 : vector<64xf32> to vector<1x64xf32>
    %c0_25 = arith.constant 0 : index
    %c0_26 = arith.constant 0 : index
    %c0_27 = arith.constant 0 : index
    %45 = vector.load %arg8[%c0_25, %c0_26, %c0_27] : memref<1x1x64xf32, #tpu.memory_space<vmem>>, vector<1x1x64xf32>
    %46 = vector.shape_cast %45 : vector<1x1x64xf32> to vector<1x64xf32>
    %47 = vector.shape_cast %44 : vector<1x64xf32> to vector<1x1x64xf32>
    tpu.vector_store %arg8[%c0_25, %c0_26, %c0_27], %47 {strides = array<i32>} : memref<1x1x64xf32, #tpu.memory_space<vmem>>, vector<1x1x64xf32>,
    return
  }
  func.func @transform_0(%arg0: i32) -> (i32, i32, i32) {
    %c0_i32 = arith.constant 0 : i32
    %c0_i32_0 = arith.constant 0 : i32
    %c0_i32_1 = arith.constant 0 : i32
    return %arg0, %c0_i32, %c0_i32_0 : i32, i32, i32
  }
  func.func @transform_1(%arg0: i32) -> (i32, i32) {
    %c0_i32 = arith.constant 0 : i32
    %c0_i32_0 = arith.constant 0 : i32
    %c0_i32_1 = arith.constant 0 : i32
    return %c0_i32, %c0_i32_0 : i32, i32
  }
  func.func @transform_2(%arg0: i32) -> (i32, i32) {
    %c0_i32 = arith.constant 0 : i32
    %c0_i32_0 = arith.constant 0 : i32
    %c0_i32_1 = arith.constant 0 : i32
    return %c0_i32, %c0_i32_0 : i32, i32
  }
  func.func @transform_3(%arg0: i32) -> (i32, i32) {
    %c0_i32 = arith.constant 0 : i32
    %c0_i32_0 = arith.constant 0 : i32
    %c0_i32_1 = arith.constant 0 : i32
    return %c0_i32, %c0_i32_0 : i32, i32
  }
  func.func @transform_4(%arg0: i32) -> (i32, i32) {
    %c0_i32 = arith.constant 0 : i32
    %c0_i32_0 = arith.constant 0 : i32
    %c0_i32_1 = arith.constant 0 : i32
    return %c0_i32, %c0_i32_0 : i32, i32
  }
  func.func @transform_5(%arg0: i32) -> (i32, i32) {
    %c0_i32 = arith.constant 0 : i32
    %c0_i32_0 = arith.constant 0 : i32
    %c0_i32_1 = arith.constant 0 : i32
    return %c0_i32, %c0_i32_0 : i32, i32
  }
  func.func @transform_6(%arg0: i32) -> (i32, i32, i32) {
    %c0_i32 = arith.constant 0 : i32
    %c0_i32_0 = arith.constant 0 : i32
    %c0_i32_1 = arith.constant 0 : i32
    return %arg0, %c0_i32, %c0_i32_0 : i32, i32, i32
  }
  func.func @transform_7(%arg0: i32) -> (i32, i32, i32) {
    %c0_i32 = arith.constant 0 : i32
    %c0_i32_0 = arith.constant 0 : i32
    %c0_i32_1 = arith.constant 0 : i32
    return %arg0, %c0_i32, %c0_i32_0 : i32, i32, i32
  }
}

module attributes {stable_mosaic.version = 11 : i64} {
  func.func @_mlp2_kernel(%arg0: i32, %arg1: memref<32x78xf32, #tpu.memory_space<vmem>>, %arg2: memref<78x32xbf16, #tpu.memory_space<vmem>>, %arg3: memref<1x32xf32, #tpu.memory_space<vmem>>, %arg4: memref<32x64xbf16, #tpu.memory_space<vmem>>, %arg5: memref<1x64xf32, #tpu.memory_space<vmem>>, %arg6: memref<32x64xf32, #tpu.memory_space<vmem>>) attributes {dimension_semantics = [#tpu.dimension_semantics<parallel>], iteration_bounds = array<i64: 1>, scalar_prefetch = 0 : i64, scratch_operands = 0 : i64, tpu.core_type = #tpu.core_type<tc>, window_params = [{transform_indices = @transform_0, window_bounds = array<i64: 32, 78>}, {pipeline_mode = #tpu.pipeline_mode<synchronous>, transform_indices = @transform_1, window_bounds = array<i64: 78, 32>}, {pipeline_mode = #tpu.pipeline_mode<synchronous>, transform_indices = @transform_2, window_bounds = array<i64: 1, 32>}, {pipeline_mode = #tpu.pipeline_mode<synchronous>, transform_indices = @transform_3, window_bounds = array<i64: 32, 64>}, {pipeline_mode = #tpu.pipeline_mode<synchronous>, transform_indices = @transform_4, window_bounds = array<i64: 1, 64>}, {transform_indices = @transform_5, window_bounds = array<i64: 32, 64>}]} {
    %c0 = arith.constant 0 : index
    %c0_0 = arith.constant 0 : index
    %0 = vector.load %arg1[%c0, %c0_0] : memref<32x78xf32, #tpu.memory_space<vmem>>, vector<32x78xf32>
    %1 = arith.truncf %0 : vector<32x78xf32> to vector<32x78xbf16>
    %c0_1 = arith.constant 0 : index
    %c0_2 = arith.constant 0 : index
    %2 = vector.load %arg2[%c0_1, %c0_2] : memref<78x32xbf16, #tpu.memory_space<vmem>>, vector<78x32xbf16>
    %cst = arith.constant dense<0.000000e+00> : vector<32x32xf32>
    %3 = tpu.matmul %1, %2, %cst {dimension_numbers = #tpu.dot_dimension_numbers<[1], [0], [0], [1], [0, 0, 1, 1], [], []>} : vector<32x78xbf16>, vector<78x32xbf16>, vector<32x32xf32> -> vector<32x32xf32>
    %c0_3 = arith.constant 0 : index
    %c0_4 = arith.constant 0 : index
    %4 = vector.load %arg3[%c0_3, %c0_4] : memref<1x32xf32, #tpu.memory_space<vmem>>, vector<1x32xf32>
    %5 = vector.broadcast %4 : vector<1x32xf32> to vector<32x32xf32>
    %6 = arith.addf %3, %5 : vector<32x32xf32>
    %cst_5 = arith.constant 0.000000e+00 : f32
    %7 = vector.broadcast %cst_5 : f32 to vector<32x32xf32>
    %8 = arith.maximumf %6, %7 : vector<32x32xf32>
    %9 = arith.truncf %8 : vector<32x32xf32> to vector<32x32xbf16>
    %c0_6 = arith.constant 0 : index
    %c0_7 = arith.constant 0 : index
    %10 = vector.load %arg4[%c0_6, %c0_7] : memref<32x64xbf16, #tpu.memory_space<vmem>>, vector<32x64xbf16>
    %cst_8 = arith.constant dense<0.000000e+00> : vector<32x64xf32>
    %11 = tpu.matmul %9, %10, %cst_8 {dimension_numbers = #tpu.dot_dimension_numbers<[1], [0], [0], [1], [0, 0, 1, 1], [], []>} : vector<32x32xbf16>, vector<32x64xbf16>, vector<32x64xf32> -> vector<32x64xf32>
    %c0_9 = arith.constant 0 : index
    %c0_10 = arith.constant 0 : index
    %12 = vector.load %arg5[%c0_9, %c0_10] : memref<1x64xf32, #tpu.memory_space<vmem>>, vector<1x64xf32>
    %13 = vector.broadcast %12 : vector<1x64xf32> to vector<32x64xf32>
    %14 = arith.addf %11, %13 : vector<32x64xf32>
    %cst_11 = arith.constant 0.000000e+00 : f32
    %15 = vector.broadcast %cst_11 : f32 to vector<32x64xf32>
    %16 = arith.maximumf %14, %15 : vector<32x64xf32>
    %c0_12 = arith.constant 0 : index
    %c0_13 = arith.constant 0 : index
    %17 = vector.load %arg6[%c0_12, %c0_13] : memref<32x64xf32, #tpu.memory_space<vmem>>, vector<32x64xf32>
    tpu.vector_store %arg6[%c0_12, %c0_13], %16 {strides = array<i32>} : memref<32x64xf32, #tpu.memory_space<vmem>>, vector<32x64xf32>,
    return
  }
  func.func @transform_0(%arg0: i32) -> (i32, i32) {
    %c0_i32 = arith.constant 0 : i32
    %c0_i32_0 = arith.constant 0 : i32
    return %arg0, %c0_i32 : i32, i32
  }
  func.func @transform_1(%arg0: i32) -> (i32, i32) {
    %c0_i32 = arith.constant 0 : i32
    %c0_i32_0 = arith.constant 0 : i32
    %c0_i32_1 = arith.constant 0 : i32
    return %c0_i32, %c0_i32_0 : i32, i32
  }
  func.func @transform_2(%arg0: i32) -> (i32, i32) {
    %c0_i32 = arith.constant 0 : i32
    %c0_i32_0 = arith.constant 0 : i32
    %c0_i32_1 = arith.constant 0 : i32
    return %c0_i32, %c0_i32_0 : i32, i32
  }
  func.func @transform_3(%arg0: i32) -> (i32, i32) {
    %c0_i32 = arith.constant 0 : i32
    %c0_i32_0 = arith.constant 0 : i32
    %c0_i32_1 = arith.constant 0 : i32
    return %c0_i32, %c0_i32_0 : i32, i32
  }
  func.func @transform_4(%arg0: i32) -> (i32, i32) {
    %c0_i32 = arith.constant 0 : i32
    %c0_i32_0 = arith.constant 0 : i32
    %c0_i32_1 = arith.constant 0 : i32
    return %c0_i32, %c0_i32_0 : i32, i32
  }
  func.func @transform_5(%arg0: i32) -> (i32, i32) {
    %c0_i32 = arith.constant 0 : i32
    %c0_i32_0 = arith.constant 0 : i32
    return %arg0, %c0_i32 : i32, i32
  }
}

module attributes {stable_mosaic.version = 11 : i64} {
  func.func @_linear_kernel(%arg0: i32, %arg1: memref<2x64xf32, #tpu.memory_space<vmem>>, %arg2: memref<64x256xbf16, #tpu.memory_space<vmem>>, %arg3: memref<1x256xf32, #tpu.memory_space<vmem>>, %arg4: memref<2x256xf32, #tpu.memory_space<vmem>>) attributes {dimension_semantics = [#tpu.dimension_semantics<parallel>], iteration_bounds = array<i64: 1>, scalar_prefetch = 0 : i64, scratch_operands = 0 : i64, tpu.core_type = #tpu.core_type<tc>, window_params = [{transform_indices = @transform_0, window_bounds = array<i64: 2, 64>}, {pipeline_mode = #tpu.pipeline_mode<synchronous>, transform_indices = @transform_1, window_bounds = array<i64: 64, 256>}, {pipeline_mode = #tpu.pipeline_mode<synchronous>, transform_indices = @transform_2, window_bounds = array<i64: 1, 256>}, {transform_indices = @transform_3, window_bounds = array<i64: 2, 256>}]} {
    %c0 = arith.constant 0 : index
    %c0_0 = arith.constant 0 : index
    %0 = vector.load %arg1[%c0, %c0_0] : memref<2x64xf32, #tpu.memory_space<vmem>>, vector<2x64xf32>
    %1 = arith.truncf %0 : vector<2x64xf32> to vector<2x64xbf16>
    %c0_1 = arith.constant 0 : index
    %c0_2 = arith.constant 0 : index
    %2 = vector.load %arg2[%c0_1, %c0_2] : memref<64x256xbf16, #tpu.memory_space<vmem>>, vector<64x256xbf16>
    %cst = arith.constant dense<0.000000e+00> : vector<2x256xf32>
    %3 = tpu.matmul %1, %2, %cst {dimension_numbers = #tpu.dot_dimension_numbers<[1], [0], [0], [1], [0, 0, 1, 1], [], []>} : vector<2x64xbf16>, vector<64x256xbf16>, vector<2x256xf32> -> vector<2x256xf32>
    %c0_3 = arith.constant 0 : index
    %c0_4 = arith.constant 0 : index
    %4 = vector.load %arg3[%c0_3, %c0_4] : memref<1x256xf32, #tpu.memory_space<vmem>>, vector<1x256xf32>
    %5 = vector.broadcast %4 : vector<1x256xf32> to vector<2x256xf32>
    %6 = arith.addf %3, %5 : vector<2x256xf32>
    %c0_5 = arith.constant 0 : index
    %c0_6 = arith.constant 0 : index
    %7 = vector.load %arg4[%c0_5, %c0_6] : memref<2x256xf32, #tpu.memory_space<vmem>>, vector<2x256xf32>
    tpu.vector_store %arg4[%c0_5, %c0_6], %6 {strides = array<i32>} : memref<2x256xf32, #tpu.memory_space<vmem>>, vector<2x256xf32>,
    return
  }
  func.func @transform_0(%arg0: i32) -> (i32, i32) {
    %c0_i32 = arith.constant 0 : i32
    %c0_i32_0 = arith.constant 0 : i32
    return %arg0, %c0_i32 : i32, i32
  }
  func.func @transform_1(%arg0: i32) -> (i32, i32) {
    %c0_i32 = arith.constant 0 : i32
    %c0_i32_0 = arith.constant 0 : i32
    %c0_i32_1 = arith.constant 0 : i32
    return %c0_i32, %c0_i32_0 : i32, i32
  }
  func.func @transform_2(%arg0: i32) -> (i32, i32) {
    %c0_i32 = arith.constant 0 : i32
    %c0_i32_0 = arith.constant 0 : i32
    %c0_i32_1 = arith.constant 0 : i32
    return %c0_i32, %c0_i32_0 : i32, i32
  }
  func.func @transform_3(%arg0: i32) -> (i32, i32) {
    %c0_i32 = arith.constant 0 : i32
    %c0_i32_0 = arith.constant 0 : i32
    return %arg0, %c0_i32 : i32, i32
  }
}

module attributes {stable_mosaic.version = 11 : i64} {
  func.func @_conv3_sa_kernel(%arg0: i32, %arg1: memref<1x16x64xf32, #tpu.memory_space<vmem>>, %arg2: memref<64x256xbf16, #tpu.memory_space<vmem>>, %arg3: memref<1x1x256xf32, #tpu.memory_space<vmem>>, %arg4: memref<256x256xbf16, #tpu.memory_space<vmem>>, %arg5: memref<256x256xbf16, #tpu.memory_space<vmem>>, %arg6: memref<1x256xf32, #tpu.memory_space<vmem>>, %arg7: memref<256x256xbf16, #tpu.memory_space<vmem>>, %arg8: memref<1x256xf32, #tpu.memory_space<vmem>>, %arg9: memref<1x16x256xf32, #tpu.memory_space<vmem>>) attributes {dimension_semantics = [#tpu.dimension_semantics<parallel>], iteration_bounds = array<i64: 2>, scalar_prefetch = 0 : i64, scratch_operands = 0 : i64, tpu.core_type = #tpu.core_type<tc>, window_params = [{transform_indices = @transform_0, window_bounds = array<i64: 1, 16, 64>}, {pipeline_mode = #tpu.pipeline_mode<synchronous>, transform_indices = @transform_1, window_bounds = array<i64: 64, 256>}, {transform_indices = @transform_2, window_bounds = array<i64: 1, 1, 256>}, {pipeline_mode = #tpu.pipeline_mode<synchronous>, transform_indices = @transform_3, window_bounds = array<i64: 256, 256>}, {pipeline_mode = #tpu.pipeline_mode<synchronous>, transform_indices = @transform_4, window_bounds = array<i64: 256, 256>}, {pipeline_mode = #tpu.pipeline_mode<synchronous>, transform_indices = @transform_5, window_bounds = array<i64: 1, 256>}, {pipeline_mode = #tpu.pipeline_mode<synchronous>, transform_indices = @transform_6, window_bounds = array<i64: 256, 256>}, {pipeline_mode = #tpu.pipeline_mode<synchronous>, transform_indices = @transform_7, window_bounds = array<i64: 1, 256>}, {transform_indices = @transform_8, window_bounds = array<i64: 1, 16, 256>}]} {
    %c0 = arith.constant 0 : index
    %c0_0 = arith.constant 0 : index
    %c0_1 = arith.constant 0 : index
    %0 = vector.load %arg1[%c0, %c0_0, %c0_1] : memref<1x16x64xf32, #tpu.memory_space<vmem>>, vector<1x16x64xf32>
    %1 = vector.shape_cast %0 : vector<1x16x64xf32> to vector<16x64xf32>
    %2 = arith.truncf %1 : vector<16x64xf32> to vector<16x64xbf16>
    %c0_2 = arith.constant 0 : index
    %c0_3 = arith.constant 0 : index
    %3 = vector.load %arg2[%c0_2, %c0_3] : memref<64x256xbf16, #tpu.memory_space<vmem>>, vector<64x256xbf16>
    %cst = arith.constant dense<0.000000e+00> : vector<16x256xf32>
    %4 = tpu.matmul %2, %3, %cst {dimension_numbers = #tpu.dot_dimension_numbers<[1], [0], [0], [1], [0, 0, 1, 1], [], []>} : vector<16x64xbf16>, vector<64x256xbf16>, vector<16x256xf32> -> vector<16x256xf32>
    %c0_4 = arith.constant 0 : index
    %c0_5 = arith.constant 0 : index
    %c0_6 = arith.constant 0 : index
    %5 = vector.load %arg3[%c0_4, %c0_5, %c0_6] : memref<1x1x256xf32, #tpu.memory_space<vmem>>, vector<1x1x256xf32>
    %6 = vector.shape_cast %5 : vector<1x1x256xf32> to vector<1x256xf32>
    %7 = vector.broadcast %6 : vector<1x256xf32> to vector<16x256xf32>
    %8 = arith.addf %4, %7 : vector<16x256xf32>
    %cst_7 = arith.constant 0.000000e+00 : f32
    %9 = vector.broadcast %cst_7 : f32 to vector<16x256xf32>
    %10 = arith.maximumf %8, %9 : vector<16x256xf32>
    %c0_8 = arith.constant 0 : index
    %c0_9 = arith.constant 0 : index
    %11 = vector.load %arg4[%c0_8, %c0_9] : memref<256x256xbf16, #tpu.memory_space<vmem>>, vector<256x256xbf16>
    %c0_10 = arith.constant 0 : index
    %c0_11 = arith.constant 0 : index
    %12 = vector.load %arg5[%c0_10, %c0_11] : memref<256x256xbf16, #tpu.memory_space<vmem>>, vector<256x256xbf16>
    %c0_12 = arith.constant 0 : index
    %c0_13 = arith.constant 0 : index
    %13 = vector.load %arg6[%c0_12, %c0_13] : memref<1x256xf32, #tpu.memory_space<vmem>>, vector<1x256xf32>
    %c0_14 = arith.constant 0 : index
    %c0_15 = arith.constant 0 : index
    %14 = vector.load %arg7[%c0_14, %c0_15] : memref<256x256xbf16, #tpu.memory_space<vmem>>, vector<256x256xbf16>
    %c0_16 = arith.constant 0 : index
    %c0_17 = arith.constant 0 : index
    %15 = vector.load %arg8[%c0_16, %c0_17] : memref<1x256xf32, #tpu.memory_space<vmem>>, vector<1x256xf32>
    %16 = arith.truncf %10 : vector<16x256xf32> to vector<16x256xbf16>
    %cst_18 = arith.constant dense<0.000000e+00> : vector<16x256xf32>
    %17 = tpu.matmul %16, %11, %cst_18 {dimension_numbers = #tpu.dot_dimension_numbers<[1], [0], [0], [1], [0, 0, 1, 1], [], []>} : vector<16x256xbf16>, vector<256x256xbf16>, vector<16x256xf32> -> vector<16x256xf32>
    %cst_19 = arith.constant dense<0.000000e+00> : vector<16x256xf32>
    %18 = tpu.matmul %16, %12, %cst_19 {dimension_numbers = #tpu.dot_dimension_numbers<[1], [0], [0], [1], [0, 0, 1, 1], [], []>} : vector<16x256xbf16>, vector<256x256xbf16>, vector<16x256xf32> -> vector<16x256xf32>
    %19 = vector.broadcast %13 : vector<1x256xf32> to vector<16x256xf32>
    %20 = arith.addf %18, %19 : vector<16x256xf32>
    %21 = arith.truncf %17 : vector<16x256xf32> to vector<16x256xbf16>
    %cst_20 = arith.constant dense<0.000000e+00> : vector<16x16xf32>
    %22 = tpu.matmul %21, %21, %cst_20 {dimension_numbers = #tpu.dot_dimension_numbers<[1], [1], [0], [0], [0, 0, 1, 0], [], []>} : vector<16x256xbf16>, vector<16x256xbf16>, vector<16x16xf32> -> vector<16x16xf32>
    %cst_21 = arith.constant dense<0xFF800000> : vector<16xf32>
    %23 = vector.multi_reduction <maximumf>, %22, %cst_21 [0] : vector<16x16xf32> to vector<16xf32>
    %24 = vector.shape_cast %23 : vector<16xf32> to vector<1x16xf32>
    %25 = vector.broadcast %24 : vector<1x16xf32> to vector<16x16xf32>
    %26 = arith.subf %22, %25 : vector<16x16xf32>
    %27 = math.exp %26 : vector<16x16xf32>
    %cst_22 = arith.constant dense<0.000000e+00> : vector<16xf32>
    %28 = vector.multi_reduction <add>, %27, %cst_22 [0] : vector<16x16xf32> to vector<16xf32>
    %29 = vector.shape_cast %28 : vector<16xf32> to vector<1x16xf32>
    %30 = vector.broadcast %29 : vector<1x16xf32> to vector<16x16xf32>
    %31 = arith.divf %27, %30 : vector<16x16xf32>
    %cst_23 = arith.constant dense<0.000000e+00> : vector<16xf32>
    %32 = vector.multi_reduction <add>, %31, %cst_23 [1] : vector<16x16xf32> to vector<16xf32>
    %33 = vector.shape_cast %32 : vector<16xf32> to vector<16x1xf32>
    %cst_24 = arith.constant 9.99999971E-10 : f32
    %34 = vector.broadcast %cst_24 : f32 to vector<16x1xf32>
    %35 = arith.addf %34, %33 : vector<16x1xf32>
    %36 = vector.broadcast %35 : vector<16x1xf32> to vector<16x16xf32>
    %37 = arith.divf %31, %36 : vector<16x16xf32>
    %38 = arith.truncf %37 : vector<16x16xf32> to vector<16x16xbf16>
    %39 = arith.truncf %20 : vector<16x256xf32> to vector<16x256xbf16>
    %cst_25 = arith.constant dense<0.000000e+00> : vector<16x256xf32>
    %40 = tpu.matmul %38, %39, %cst_25 {dimension_numbers = #tpu.dot_dimension_numbers<[1], [0], [0], [1], [0, 0, 1, 1], [], []>} : vector<16x16xbf16>, vector<16x256xbf16>, vector<16x256xf32> -> vector<16x256xf32>
    %41 = arith.subf %10, %40 : vector<16x256xf32>
    %42 = arith.truncf %41 : vector<16x256xf32> to vector<16x256xbf16>
    %cst_26 = arith.constant dense<0.000000e+00> : vector<16x256xf32>
    %43 = tpu.matmul %42, %14, %cst_26 {dimension_numbers = #tpu.dot_dimension_numbers<[1], [0], [0], [1], [0, 0, 1, 1], [], []>} : vector<16x256xbf16>, vector<256x256xbf16>, vector<16x256xf32> -> vector<16x256xf32>
    %44 = vector.broadcast %15 : vector<1x256xf32> to vector<16x256xf32>
    %45 = arith.addf %43, %44 : vector<16x256xf32>
    %cst_27 = arith.constant 0.000000e+00 : f32
    %46 = vector.broadcast %cst_27 : f32 to vector<16x256xf32>
    %47 = arith.maximumf %45, %46 : vector<16x256xf32>
    %48 = arith.addf %10, %47 : vector<16x256xf32>
    %c0_28 = arith.constant 0 : index
    %c0_29 = arith.constant 0 : index
    %c0_30 = arith.constant 0 : index
    %49 = vector.load %arg9[%c0_28, %c0_29, %c0_30] : memref<1x16x256xf32, #tpu.memory_space<vmem>>, vector<1x16x256xf32>
    %50 = vector.shape_cast %49 : vector<1x16x256xf32> to vector<16x256xf32>
    %51 = vector.shape_cast %48 : vector<16x256xf32> to vector<1x16x256xf32>
    tpu.vector_store %arg9[%c0_28, %c0_29, %c0_30], %51 {strides = array<i32>} : memref<1x16x256xf32, #tpu.memory_space<vmem>>, vector<1x16x256xf32>,
    return
  }
  func.func @transform_0(%arg0: i32) -> (i32, i32, i32) {
    %c0_i32 = arith.constant 0 : i32
    %c0_i32_0 = arith.constant 0 : i32
    %c0_i32_1 = arith.constant 0 : i32
    return %arg0, %c0_i32, %c0_i32_0 : i32, i32, i32
  }
  func.func @transform_1(%arg0: i32) -> (i32, i32) {
    %c0_i32 = arith.constant 0 : i32
    %c0_i32_0 = arith.constant 0 : i32
    %c0_i32_1 = arith.constant 0 : i32
    return %c0_i32, %c0_i32_0 : i32, i32
  }
  func.func @transform_2(%arg0: i32) -> (i32, i32, i32) {
    %c0_i32 = arith.constant 0 : i32
    %c0_i32_0 = arith.constant 0 : i32
    %c0_i32_1 = arith.constant 0 : i32
    return %arg0, %c0_i32, %c0_i32_0 : i32, i32, i32
  }
  func.func @transform_3(%arg0: i32) -> (i32, i32) {
    %c0_i32 = arith.constant 0 : i32
    %c0_i32_0 = arith.constant 0 : i32
    %c0_i32_1 = arith.constant 0 : i32
    return %c0_i32, %c0_i32_0 : i32, i32
  }
  func.func @transform_4(%arg0: i32) -> (i32, i32) {
    %c0_i32 = arith.constant 0 : i32
    %c0_i32_0 = arith.constant 0 : i32
    %c0_i32_1 = arith.constant 0 : i32
    return %c0_i32, %c0_i32_0 : i32, i32
  }
  func.func @transform_5(%arg0: i32) -> (i32, i32) {
    %c0_i32 = arith.constant 0 : i32
    %c0_i32_0 = arith.constant 0 : i32
    %c0_i32_1 = arith.constant 0 : i32
    return %c0_i32, %c0_i32_0 : i32, i32
  }
  func.func @transform_6(%arg0: i32) -> (i32, i32) {
    %c0_i32 = arith.constant 0 : i32
    %c0_i32_0 = arith.constant 0 : i32
    %c0_i32_1 = arith.constant 0 : i32
    return %c0_i32, %c0_i32_0 : i32, i32
  }
  func.func @transform_7(%arg0: i32) -> (i32, i32) {
    %c0_i32 = arith.constant 0 : i32
    %c0_i32_0 = arith.constant 0 : i32
    %c0_i32_1 = arith.constant 0 : i32
    return %c0_i32, %c0_i32_0 : i32, i32
  }
  func.func @transform_8(%arg0: i32) -> (i32, i32, i32) {
    %c0_i32 = arith.constant 0 : i32
    %c0_i32_0 = arith.constant 0 : i32
    %c0_i32_1 = arith.constant 0 : i32
    return %arg0, %c0_i32, %c0_i32_0 : i32, i32, i32
  }
}

</mosaic_0001>

<bundles_post_ra>
// kernel: model_forward.12
= control target key start
LH: loop header
LB: loop body
LE: loop exit
PB: predicated region body
PF: predicated region fallthrough
CT: control target
= control target key end

     0   :  { %v974_v22 = vmov 1983009808   ;;  %v23_v24 = vlaneseq  ;;  %vm748_vm0 = vcmask 189440   ;;  %s1211_s1 = inlined_call_operand.vmem [shape: bf16[1024,24], index: 1, kind: input, shape index: {}]   ;;  %s1212_s0 = inlined_call_operand.vmem [shape: f32[2,1024], index: 0, kind: input, shape index: {}]   ;;  %s1213_s2 = inlined_call_operand.vmem [shape: f32[1,24], index: 2, kind: input, shape index: {}]   ;;  %s1214_s3 = inlined_call_operand.vmem [shape: f32[2,24], index: 3, kind: output, shape index: {}]  }
   0x1   :  { %v908_v0 = vld [vmem:[%s1211_s1 + $0x40] sm:$0xff]   ;;  %v912_v4 = vld [vmem:[%s1211_s1 + $0x48] sm:$0xff]   ;;  %v916_v8 = vld [vmem:[%s1211_s1 + $0x50] sm:$0xff]   ;;  %v21_v23 = vunpack.c.l.s4 %v974_v22 }
   0x2   :  { %v909_v1 = vld [vmem:[%s1211_s1 + $0xc0] sm:$0xff]   ;;  %819 = vmatprep.subr.bf16.mxu0 %v908_v0  ;;  %v913_v5 = vld [vmem:[%s1211_s1 + $0xc8] sm:$0xff]   ;;  %v917_v9 = vld [vmem:[%s1211_s1 + $0xd0] sm:$0xff]   ;;  %v24_v30 = vshrl.u32 %v23_v24, 7 }
   0x3   :  { %v910_v2 = vld [vmem:[%s1211_s1] sm:$0xff]   ;;  %841 = vmatprep.subr.bf16.mxu1 %v909_v1  ;;  %v914_v6 = vld [vmem:[%s1211_s1 + $0x8] sm:$0xff]   ;;  %v918_v10 = vld [vmem:[%s1211_s1 + $0x10] sm:$0xff]   ;;  %v22_v29 = vunpack.c.0.s8 %v21_v23 }
   0x4   :  { %v911_v3 = vld [vmem:[%s1211_s1 + $0x80] sm:$0xff]   ;;  %820 = vmatpush3.bf16.msra.mxu0 %v910_v2  ;;  %v915_v7 = vld [vmem:[%s1211_s1 + $0x88] sm:$0xff]   ;;  %v919_v11 = vld [vmem:[%s1211_s1 + $0x90] sm:$0xff]  }
   0x5   :  { %842 = vmatpush3.bf16.msra.mxu1 %v911_v3  ;;  %821 = vmatprep.subr.bf16.mxu0 %v912_v4  ;;  %v920_v12 = vld [vmem:[%s1211_s1 + $0x58] sm:$0xff]   ;;  %v924_v16 = vld [vmem:[%s1211_s1 + $0x60] sm:$0xff]   ;;  %v928_v20 = vld [vmem:[%s1211_s1 + $0x68] sm:$0xff]   ;;  %v25_v35 = vsub.s32 %v22_v29, %v24_v30 }
   0x6   :  { %843 = vmatprep.subr.bf16.mxu1 %v913_v5  ;;  %v921_v13 = vld [vmem:[%s1211_s1 + $0xd8] sm:$0xff]   ;;  %v925_v17 = vld [vmem:[%s1211_s1 + $0xe0] sm:$0xff]   ;;  %v929_v21 = vld [vmem:[%s1211_s1 + $0xe8] sm:$0xff]  }
   0x7   :  { %v922_v14 = vld [vmem:[%s1211_s1 + $0x18] sm:$0xff]   ;;  %v926_v18 = vld [vmem:[%s1211_s1 + $0x20] sm:$0xff]   ;;  %v930_v25 = vld [vmem:[%s1211_s1 + $0x28] sm:$0xff]  }
   0x8   :  { %822 = vmatpush3.bf16.msra.mxu0 %v914_v6  ;;  %v923_v15 = vld [vmem:[%s1211_s1 + $0x98] sm:$0xff]   ;;  %v927_v19 = vld [vmem:[%s1211_s1 + $0xa0] sm:$0xff]   ;;  %v931_v26 = vld [vmem:[%s1211_s1 + $0xa8] sm:$0xff]  }
   0x9   :  { %844 = vmatpush3.bf16.msra.mxu1 %v915_v7  ;;  %823 = vmatprep.subr.bf16.mxu0 %v916_v8  ;;  %v932_v27 = vld [vmem:[%s1211_s1 + $0x70] sm:$0xff]   ;;  %v936_v33 = vld [vmem:[%s1211_s1 + $0x78] sm:$0xff]   ;;  %v15_v38 = vld [vmem:[%s1212_s0] sm:$0xff] }
   0xa   :  { %845 = vmatprep.subr.bf16.mxu1 %v917_v9  ;;  %v933_v28 = vld [vmem:[%s1211_s1 + $0xf0] sm:$0xff]   ;;  %v937_v34 = vld [vmem:[%s1211_s1 + $0xf8] sm:$0xff]   ;;  %v16_v39 = vld [vmem:[%s1212_s0 + $0x8] sm:$0xff]  ;;  %v26_v40 = vrot.slane %v15_v38, %v25_v35  ;;  %v19_v42 = vcombine.high %v15_v38, %v15_v38 }
   0xb   :  { %v934_v31 = vld [vmem:[%s1211_s1 + $0x30] sm:$0xff]   ;;  %v938_v36 = vld [vmem:[%s1211_s1 + $0x38] sm:$0xff]   ;;  %v36_v41 = vcombine.high %v16_v39, %v16_v39  ;;  %v942_v43 = vld [vmem:[%s1211_s1 + $0x140] sm:$0xff]   ;;  %v1100_v44 = vrot.slane %v16_v39, %v25_v35 }
   0xc   :  { %824 = vmatpush3.bf16.msra.mxu0 %v918_v10  ;;  %v935_v32 = vld [vmem:[%s1211_s1 + $0xb0] sm:$0xff]   ;;  %v939_v37 = vld [vmem:[%s1211_s1 + $0xb8] sm:$0xff]   ;;  %v943_v45 = vld [vmem:[%s1211_s1 + $0x1c0] sm:$0xff]   ;;  %v34_v46 = vcombine.high %v26_v40, %v26_v40  ;;  %v33_v47 = vrot.slane %v19_v42, %v25_v35  ;;  %v61_v49 = vpack.c.bf16 %v26_v40, %v26_v40 }
   0xd   :  { %846 = vmatpush3.bf16.msra.mxu1 %v919_v11  ;;  %825 = vmatprep.subr.bf16.mxu0 %v920_v12  ;;  %v51_v48 = vcombine.high %v1100_v44, %v1100_v44  ;;  %v1107_v50 = vrot.slane %v36_v41, %v25_v35  ;;  %v944_v53 = vld [vmem:[%s1211_s1 + $0x100] sm:$0xff]   ;;  %v946_v55 = vld [vmem:[%s1211_s1 + $0x148] sm:$0xff]   ;;  %v950_v63 = vld [vmem:[%s1211_s1 + $0x150] sm:$0xff]   ;;  %v65_v24 = vpack.c.bf16 %v1100_v44, %v1100_v44 }
   0xe   :  { %847 = vmatprep.subr.bf16.mxu1 %v921_v13  ;;  %v62_v51 = vpack.c.bf16 %v34_v46, %v34_v46  ;;  %v35_v52 = vcombine.high %v33_v47, %v33_v47  ;;  %v63_v54 = vpack.c.bf16 %v33_v47, %v33_v47  ;;  %v945_v58 = vld [vmem:[%s1211_s1 + $0x180] sm:$0xff]   ;;  %v947_v60 = vld [vmem:[%s1211_s1 + $0x1c8] sm:$0xff]   ;;  %v951_v1 = vld [vmem:[%s1211_s1 + $0x1d0] sm:$0xff]  }
   0xf   :  { %v52_v56 = vcombine.high %v1107_v50, %v1107_v50  ;;  %v66_v59 = vpack.c.bf16 %v51_v48, %v51_v48  ;;  %v948_v62 = vld [vmem:[%s1211_s1 + $0x108] sm:$0xff]   ;;  %v952_v2 = vld [vmem:[%s1211_s1 + $0x110] sm:$0xff]   ;;  %v954_v3 = vld [vmem:[%s1211_s1 + $0x158] sm:$0xff]  }
  0x10   :  { %826 = vmatpush3.bf16.msra.mxu0 %v922_v14  ;;  %620 = vmatprep.mubr.bf16.mxu0 %v62_v51  ;;  %v64_v57 = vpack.c.bf16 %v35_v52, %v35_v52  ;;  %v949_v0 = vld [vmem:[%s1211_s1 + $0x188] sm:$0xff]   ;;  %v953_v4 = vld [vmem:[%s1211_s1 + $0x190] sm:$0xff]   ;;  %v955_v5 = vld [vmem:[%s1211_s1 + $0x1d8] sm:$0xff]  }
  0x11   :  { %848 = vmatpush3.bf16.msra.mxu1 %v923_v15  ;;  %827 = vmatprep.subr.bf16.mxu0 %v924_v16  ;;  %v68_v61 = vpack.c.bf16 %v52_v56, %v52_v56  ;;  %v956_v6 = vld [vmem:[%s1211_s1 + $0x118] sm:$0xff]   ;;  %v958_v7 = vld [vmem:[%s1211_s1 + $0x160] sm:$0xff]   ;;  %v962_v11 = vld [vmem:[%s1211_s1 + $0x168] sm:$0xff]  }
  0x12   :  { %849 = vmatprep.subr.bf16.mxu1 %v925_v17  ;;  %660 = vmatprep.mubr.bf16.mxu1 %v64_v57  ;;  %v957_v8 = vld [vmem:[%s1211_s1 + $0x198] sm:$0xff]   ;;  %v959_v9 = vld [vmem:[%s1211_s1 + $0x1e0] sm:$0xff]   ;;  %v963_v13 = vld [vmem:[%s1211_s1 + $0x1e8] sm:$0xff]  }
  0x13   :  { %v960_v10 = vld [vmem:[%s1211_s1 + $0x120] sm:$0xff]   ;;  %v964_v14 = vld [vmem:[%s1211_s1 + $0x128] sm:$0xff]   ;;  %v966_v15 = vld [vmem:[%s1211_s1 + $0x170] sm:$0xff]  }
  0x14   :  { %828 = vmatpush3.bf16.msra.mxu0 %v926_v18  ;;  %v961_v12 = vld [vmem:[%s1211_s1 + $0x1a0] sm:$0xff]   ;;  %v965_v16 = vld [vmem:[%s1211_s1 + $0x1a8] sm:$0xff]   ;;  %v967_v17 = vld [vmem:[%s1211_s1 + $0x1f0] sm:$0xff]  }
  0x15   :  { %850 = vmatpush3.bf16.msra.mxu1 %v927_v19  ;;  %829 = vmatprep.subr.bf16.mxu0 %v928_v20  ;;  %v968_v18 = vld [vmem:[%s1211_s1 + $0x130] sm:$0xff]   ;;  %v970_v19 = vld [vmem:[%s1211_s1 + $0x178] sm:$0xff]  }
  0x16   :  { %851 = vmatprep.subr.bf16.mxu1 %v929_v21  ;;  %v969_v20 = vld [vmem:[%s1211_s1 + $0x1b0] sm:$0xff]   ;;  %v971_v21 = vld [vmem:[%s1211_s1 + $0x1f8] sm:$0xff]  }
  0x17   :  { %v972_v22 = vld [vmem:[%s1211_s1 + $0x138] sm:$0xff]  }
  0x18   :  { %830 = vmatpush3.bf16.msra.mxu0 %v930_v25  ;;  %v973_v23 = vld [vmem:[%s1211_s1 + $0x1b8] sm:$0xff]   ;;  %v67_v25 = vpack.c.bf16 %v1107_v50, %v1107_v50 }
  0x19   :  { %852 = vmatpush3.bf16.msra.mxu1 %v931_v26  ;;  %831 = vmatprep.subr.bf16.mxu0 %v932_v27  ;;  %v754_v27 = vld [vmem:[%s1213_s2] ss:$0 sm:$0xff] }
  0x1a   :  { %853 = vmatprep.subr.bf16.mxu1 %v933_v28 }
  0x1c   :  { %832 = vmatpush3.bf16.msra.mxu0 %v934_v31 }
  0x1d   :  { %854 = vmatpush3.bf16.msra.mxu1 %v935_v32  ;;  %833 = vmatprep.subr.bf16.mxu0 %v936_v33 }
  0x1e   :  { %855 = vmatprep.subr.bf16.mxu1 %v937_v34 }
  0x20   :  { %834 = vmatpush3.bf16.msra.mxu0 %v938_v36 }
  0x21   :  { %856 = vmatpush3.bf16.msra.mxu1 %v939_v37  ;;  %863 = vmatprep.subr.bf16.mxu0 %v942_v43 }
  0x22   :  { %885 = vmatprep.subr.bf16.mxu1 %v943_v45 }
  0x23   :  { %621 = vmatmul.mubr.bf16.vlgmr.msra.gmra.mrb[0].mxu0 %v61_v49 }
  0x24   :  { %864 = vmatpush3.bf16.msra.mxu0 %v944_v53  ;;  %661 = vmatmul.mubr.bf16.vlgmr.msra.gmra.mrb[0].mxu1 %v63_v54 }
  0x25   :  { %865 = vmatprep.subr.bf16.mxu0 %v946_v55  ;;  %886 = vmatpush3.bf16.msra.mxu1 %v945_v58 }
  0x26   :  { %700 = vmatprep.mubr.bf16.mxu0 %v66_v59  ;;  %887 = vmatprep.subr.bf16.mxu1 %v947_v60 }
  0x27   :  { %740 = vmatprep.mubr.bf16.mxu1 %v68_v61 }
  0x28   :  { %866 = vmatpush3.bf16.msra.mxu0 %v948_v62 }
  0x29   :  { %867 = vmatprep.subr.bf16.mxu0 %v950_v63  ;;  %888 = vmatpush3.bf16.msra.mxu1 %v949_v0 }
  0x2a   :  { %889 = vmatprep.subr.bf16.mxu1 %v951_v1 }
  0x2c   :  { %868 = vmatpush3.bf16.msra.mxu0 %v952_v2 }
  0x2d   :  { %869 = vmatprep.subr.bf16.mxu0 %v954_v3  ;;  %890 = vmatpush3.bf16.msra.mxu1 %v953_v4 }
  0x2e   :  { %891 = vmatprep.subr.bf16.mxu1 %v955_v5 }
  0x30   :  { %870 = vmatpush3.bf16.msra.mxu0 %v956_v6 }
  0x31   :  { %871 = vmatprep.subr.bf16.mxu0 %v958_v7  ;;  %892 = vmatpush3.bf16.msra.mxu1 %v957_v8 }
  0x32   :  { %893 = vmatprep.subr.bf16.mxu1 %v959_v9 }
  0x34   :  { %872 = vmatpush3.bf16.msra.mxu0 %v960_v10 }
  0x35   :  { %873 = vmatprep.subr.bf16.mxu0 %v962_v11  ;;  %894 = vmatpush3.bf16.msra.mxu1 %v961_v12 }
  0x36   :  { %895 = vmatprep.subr.bf16.mxu1 %v963_v13 }
  0x38   :  { %874 = vmatpush3.bf16.msra.mxu0 %v964_v14 }
  0x39   :  { %875 = vmatprep.subr.bf16.mxu0 %v966_v15  ;;  %896 = vmatpush3.bf16.msra.mxu1 %v965_v16 }
  0x3a   :  { %897 = vmatprep.subr.bf16.mxu1 %v967_v17 }
  0x3c   :  { %876 = vmatpush3.bf16.msra.mxu0 %v968_v18 }
  0x3d   :  { %877 = vmatprep.subr.bf16.mxu0 %v970_v19  ;;  %898 = vmatpush3.bf16.msra.mxu1 %v969_v20 }
  0x3e   :  { %899 = vmatprep.subr.bf16.mxu1 %v971_v21 }
  0x40   :  { %878 = vmatpush3.bf16.msra.mxu0 %v972_v22 }
  0x41   :  { %900 = vmatpush3.bf16.msra.mxu1 %v973_v23 }
  0x43   :  { %701 = vmatmul.mubr.bf16.vlgmr.msra.gmra.mrb[4].mxu0 %v65_v24 }
  0x44   :  { %741 = vmatmul.mubr.bf16.vlgmr.msra.gmra.mrb[4].mxu1 %v67_v25 }
  0xf6   :  { %v835_v26 = vpop.f32.mrb[0].mxu0 }
  0xf7   :  { %v836_v28 = vpop.f32.mrb[1].mxu0  ;;  %v857_v29 = vpop.f32.mrb[0].mxu1 }
  0xf8   :  { %v837_v30 = vadd.f32 %v836_v28, %v835_v26  ;;  %v838_v31 = vpop.f32.mrb[2].mxu0  ;;  %v858_v32 = vpop.f32.mrb[1].mxu1 }
  0xf9   :  { %v839_v33 = vpop.f32.mrb[3].mxu0  ;;  %v859_v35 = vadd.f32 %v858_v32, %v857_v29  ;;  %v860_v36 = vpop.f32.mrb[2].mxu1 }
  0xfa   :  { %v623_v34 = vadd.f32 %v837_v30, %v754_v27  ;;  %v861_v37 = vpop.f32.mrb[3].mxu1 }
  0xfc   :  { %v663_v38 = vadd.f32 %v859_v35, %v623_v34 }
 0x116   :  { %v879_v39 = vpop.f32.mrb[4].mxu0 }
 0x117   :  { %v880_v40 = vpop.f32.mrb[5].mxu0  ;;  %v901_v41 = vpop.f32.mrb[4].mxu1 }
 0x118   :  { %v881_v42 = vadd.f32 %v880_v40, %v879_v39  ;;  %v882_v43 = vpop.f32.mrb[6].mxu0  ;;  %v902_v44 = vpop.f32.mrb[5].mxu1 }
 0x119   :  { %v883_v45 = vpop.f32.mrb[7].mxu0  ;;  %v903_v47 = vadd.f32 %v902_v44, %v901_v41  ;;  %v904_v48 = vpop.f32.mrb[6].mxu1 }
 0x11a   :  { %v703_v46 = vadd.f32 %v881_v42, %v663_v38  ;;  %v905_v49 = vpop.f32.mrb[7].mxu1 }
 0x11c   :  { %v743_v50 = vadd.f32 %v903_v47, %v703_v46 }
 0x11e   :  { %749 = vst.msk [vmem:[%s1214_s3] sm:$0x3] %vm748_vm0, %v743_v50 }

// kernel: model_forward.7
= control target key start
LH: loop header
LB: loop body
LE: loop exit
PB: predicated region body
PF: predicated region fallthrough
CT: control target
= control target key end

     0   :  { %vm73_vm0 = vcmask 637952   ;;  %vm80_vm1 = vcmask 1046528   ;;  %vm162_vm2 = vcmask 261120   ;;  %vm222_vm3 = vcmask 523264   ;;  %s368_s1 = inlined_call_operand.vmem [shape: bf16[78,32], index: 1, kind: input, shape index: {}]   ;;  %s369_s0 = inlined_call_operand.vmem [shape: f32[32,78], index: 0, kind: input, shape index: {}]   ;;  %s370_s3 = inlined_call_operand.vmem [shape: bf16[32,64], index: 3, kind: input, shape index: {}]   ;;  %s371_s2 = inlined_call_operand.vmem [shape: f32[1,32], index: 2, kind: input, shape index: {}]   ;;  %s372_s4 = inlined_call_operand.vmem [shape: f32[1,64], index: 4, kind: input, shape index: {}]   ;;  %s373_s5 = inlined_call_operand.vmem [shape: f32[32,64], index: 5, kind: output, shape index: {}]  }
   0x1   :  { %v278_v0 = vld [vmem:[%s368_s1] sm:$0xff]   ;;  %v279_v1 = vld [vmem:[%s368_s1 + $0x8] sm:$0xff]   ;;  %v280_v2 = vld [vmem:[%s368_s1 + $0x10] sm:$0xff]  }
   0x2   :  { %255 = vmatprep.subr.bf16.mxu0 %v278_v0  ;;  %v21_v3 = vld [vmem:[%s369_s0] sm:$0xff]  ;;  %v22_v4 = vld [vmem:[%s369_s0 + $0x8] sm:$0xff]  ;;  %v281_v6 = vld [vmem:[%s368_s1 + $0x18] sm:$0xff]  }
   0x3   :  { %256 = vmatpush3.bf16.msra.mxu0 %v278_v0  ;;  %v25_v5 = vpack.c.bf16 %v22_v4, %v21_v3  ;;  %v282_v7 = vld [vmem:[%s368_s1 + $0x20] sm:$0x7f]   ;;  %v23_v8 = vld [vmem:[%s369_s0 + $0x10] sm:$0xff]  ;;  %v24_v9 = vld [vmem:[%s369_s0 + $0x18] sm:$0xff] }
   0x4   :  { %257 = vmatprep.subr.bf16.mxu0 %v279_v1  ;;  %v82_v10 = vsel %vm80_vm1, %v282_v7, 0  ;;  %v26_v11 = vpack.c.bf16 %v24_v9, %v23_v8  ;;  %v283_v12 = vld [vmem:[%s370_s3] sm:$0xff]   ;;  %v284_v13 = vld [vmem:[%s370_s3 + $0x8] sm:$0xff]  }
   0x5   :  { %265 = vmatprep.mubr.msk.bf16.mxu0 %vm73_vm0, %v25_v5  ;;  %269 = vmatprep.subr.bf16.mxu1 %v283_v12  ;;  %v231_v14 = vld [vmem:[%s371_s2] ss:$0 sm:$0xff] }
   0x6   :  { %270 = vmatpush3.bf16.msra.mxu1 %v283_v12  ;;  %v239_v29 = vld [vmem:[%s372_s4] ss:$0 sm:$0xff] }
   0x7   :  { %258 = vmatpush3.bf16.msra.mxu0 %v279_v1  ;;  %271 = vmatprep.subr.bf16.mxu1 %v284_v13 }
   0x8   :  { %259 = vmatprep.subr.bf16.mxu0 %v280_v2 }
   0xa   :  { %272 = vmatpush3.bf16.msra.mxu1 %v284_v13 }
   0xb   :  { %260 = vmatpush3.bf16.msra.mxu0 %v280_v2 }
   0xc   :  { %261 = vmatprep.subr.bf16.mxu0 %v281_v6 }
   0xf   :  { %262 = vmatpush3.bf16.msra.mxu0 %v281_v6 }
  0x10   :  { %277 = vmatprep.subr.msk.bf16.mxu0 %vm80_vm1, %v282_v7 }
  0x13   :  { %264 = vmatpush3.bf16.msra.mxu0 %v82_v10 }
  0x16   :  { %266 = vmatmul.mubr.msk.bf16.vlgmr.msra.gmra.mrb[0].mxu0 %vm73_vm0, %v26_v11 }
  0xe9   :  { %v267_v15 = vpop.f32.mrb[0].mxu0 }
  0xea   :  { %v127_v16 = vadd.f32 %v267_v15, %v231_v14  ;;  %v118_v17 = vpop.f32.mrb[1].mxu0 }
  0xeb   :  { %v119_v18 = vadd.f32 %v231_v14, %v118_v17  ;;  %v268_v19 = vpop.f32.mrb[2].mxu0 }
  0xec   :  { %v130_v20 = vadd.f32 %v268_v19, %v231_v14  ;;  %v121_v21 = vpop.f32.mrb[3].mxu0  ;;  %v135_v23 = vmax.f32 %v127_v16, 0.0 }
  0xed   :  { %v122_v22 = vadd.f32 %v231_v14, %v121_v21  ;;  %v133_v25 = vmax.f32 %v119_v18, 0.0 }
  0xee   :  { %v136_v24 = vmax.f32 %v130_v20, 0.0 }
  0xef   :  { %v134_v26 = vmax.f32 %v122_v22, 0.0 }
  0xf0   :  { %v138_v27 = vpack.c.bf16 %v136_v24, %v135_v23 }
  0xf1   :  { %v137_v28 = vpack.c.bf16 %v134_v26, %v133_v25 }
  0xf3   :  { %273 = vmatprep.mubr.msk.bf16.mxu1 %vm162_vm2, %v137_v28 }
  0xf4   :  { %274 = vmatmul.mubr.msk.bf16.vlgmr.msra.gmra.mrb[0].mxu1 %vm162_vm2, %v138_v27 }
 0x1c7   :  { %v275_v30 = vpop.f32.mrb[0].mxu1 }
 0x1c8   :  { %v212_v31 = vadd.f32 %v275_v30, %v239_v29  ;;  %v203_v32 = vpop.f32.mrb[1].mxu1 }
 0x1c9   :  { %v204_v33 = vadd.f32 %v239_v29, %v203_v32  ;;  %v276_v34 = vpop.f32.mrb[2].mxu1 }
 0x1ca   :  { %v220_v35 = vmax.f32 %v212_v31, 0.0  ;;  %v215_v36 = vadd.f32 %v276_v34, %v239_v29  ;;  %v206_v37 = vpop.f32.mrb[3].mxu1 }
 0x1cb   :  { %v218_v38 = vmax.f32 %v204_v33, 0.0  ;;  %v207_v39 = vadd.f32 %v239_v29, %v206_v37 }
 0x1cc   :  { %225 = vst.msk [vmem:[%s373_s5 + $0x10] sm:$0xff] %vm222_vm3, %v220_v35  ;;  %v221_v40 = vmax.f32 %v215_v36, 0.0 }
 0x1cd   :  { %223 = vst.msk [vmem:[%s373_s5] sm:$0xff] %vm222_vm3, %v218_v38  ;;  %v219_v41 = vmax.f32 %v207_v39, 0.0 }
 0x1ce   :  { %226 = vst.msk [vmem:[%s373_s5 + $0x18] sm:$0xff] %vm222_vm3, %v221_v40 }
 0x1cf   :  { %224 = vst.msk [vmem:[%s373_s5 + $0x8] sm:$0xff] %vm222_vm3, %v219_v41 }

// kernel: model_forward.8
= control target key start
LH: loop header
LB: loop body
LE: loop exit
PB: predicated region body
PF: predicated region fallthrough
CT: control target
= control target key end

     0   :  { %s944_s24 = smov 0   ;;  %s1064_s0 = inlined_call_operand.vmem [shape: f32[2,16,64], index: 0, kind: input, shape index: {}]   ;;  %s1065_s1 = inlined_call_operand.vmem [shape: bf16[64,64], index: 1, kind: input, shape index: {}]   ;;  %s1066_s2 = inlined_call_operand.vmem [shape: bf16[64,64], index: 2, kind: input, shape index: {}]   ;;  %s1067_s3 = inlined_call_operand.vmem [shape: f32[1,64], index: 3, kind: input, shape index: {}]   ;;  %s1068_s4 = inlined_call_operand.vmem [shape: bf16[64,64], index: 4, kind: input, shape index: {}]   ;;  %s1069_s5 = inlined_call_operand.vmem [shape: f32[1,64], index: 5, kind: input, shape index: {}]   ;;  %s1070_s6 = inlined_call_operand.vmem [shape: f32[2,16,64], index: 6, kind: output, shape index: {0}]   ;;  %s1071_s7 = inlined_call_operand.vmem [shape: f32[2,1,64], index: 7, kind: output, shape index: {1}]  }
   0x1 LB: > { %s763_s25 = sadd.s32 4294967295, %s900_s24   ;;  %p767_p0 = scmp.ge.s32.totalorder %s900_s24, 1  ;;  %s900_s24 = sphi %s944_s24, %s18_s24  }
   0x2   : > { %p240_p1 = scmp.lt.s32.totalorder %s900_s24, 3 }
   0x4   : > { %p241_p2 = pnand %p767_p0, %p240_p1 }
   0x5   : > { %v872_v0 = vld [vmem:[%s1065_s1] sm:$0xff] (!%p241_p2)   ;;  %v902_v1 = vmov (!%p241_p2), 0.0   ;;  %v873_v2 = vld [vmem:[%s1065_s1 + $0x8] sm:$0xff] (!%p241_p2)   ;;  %vm903_vm0 = vmmov (!%p241_p2), 0   ;;  %p275_p3 = scmp.lt.s32.totalorder (!%p241_p2), %s763_s25, 1  ;;  %v874_v4 = vld [vmem:[%s1065_s1 + $0x10] sm:$0xff] (!%p241_p2)  }
   0x6   : > { %244 = sbr.rel (%p241_p2) target bundleno = 1137 (0x471), region = 44  ;;  %814 = vmatprep.subr.bf16.mxu0 (!%p241_p2), %v902_v1  ;;  %826 = vmatprep.subr.bf16.mxu1 (!%p241_p2), %v902_v1  ;;  %v876_v3 = vld [vmem:[%s1066_s2] sm:$0xff] (!%p241_p2)   ;;  %v877_v5 = vld [vmem:[%s1066_s2 + $0x8] sm:$0xff] (!%p241_p2)   ;;  %v875_v6 = vld [vmem:[%s1065_s1 + $0x18] sm:$0xff] (!%p241_p2)   ;;  %vm342_vm1 = vcmask (!%p241_p2), 523264   ;;  %vm503_vm2 = vcmask (!%p241_p2), 130048  }
   0x7   : > { %815 = vmatpush3.bf16.msra.mxu0 (!%p241_p2), %v872_v0  ;;  %822 = vmatprep.mubr.msk.bf16.mxu0 (!%p241_p2), %vm903_vm0, %v902_v1  ;;  %v878_v9 = vld [vmem:[%s1066_s2 + $0x10] sm:$0xff] (!%p241_p2)   ;;  %v879_v11 = vld [vmem:[%s1066_s2 + $0x18] sm:$0xff] (!%p241_p2)   ;;  %v777_v15 = vld [vmem:[%s1067_s3] ss:$0 sm:$0xff] (!%p241_p2)  ;;  %vm681_vm3 = vcmask (!%p241_p2), 516096  }
   0x8   : > { %816 = vmatprep.subr.bf16.mxu0 (!%p241_p2), %v902_v1  ;;  %834 = vmatprep.mubr.msk.bf16.mxu1 (!%p241_p2), %vm903_vm0, %v902_v1  ;;  %v880_v59 = vld [vmem:[%s1068_s4] sm:$0xff] (!%p241_p2)   ;;  %v881_v60 = vld [vmem:[%s1068_s4 + $0x8] sm:$0xff] (!%p241_p2)  }
   0x9   : > { %827 = vmatpush3.bf16.msra.mxu1 (!%p241_p2), %v876_v3 }
   0xa   : > { %828 = vmatprep.subr.bf16.mxu1 (!%p241_p2), %v902_v1 }
   0xb   : > { %817 = vmatpush3.bf16.msra.mxu0 (!%p241_p2), %v873_v2 }
   0xc   : > { %818 = vmatprep.subr.bf16.mxu0 (!%p241_p2), %v902_v1 }
   0xd   : > { %s1073_s25 = smov (!%p275_p3, %s763_s25), 1  ;;  %829 = vmatpush3.bf16.msra.mxu1 %v877_v5 }
   0xe   : > { %s793_s11 = sshll.u32 %s1073_s25, 4  ;;  %830 = vmatprep.subr.bf16.mxu1 %v902_v1  ;;  %s287_s19 = scalar_lea.vmem %s1071_s7, %s1073_s25 }
   0xf   : > { %s279_s16 = scalar_lea.vmem %s1064_s0, %s793_s11  ;;  %819 = vmatpush3.bf16.msra.mxu0 %v874_v4  ;;  %s284_s17 = scalar_lea.vmem %s1070_s6, %s793_s11 }
  0x10   : > { %v987_v7 = vld [vmem:[%s279_s16] sm:$0xff]  ;;  %v989_v8 = vld [vmem:[%s279_s16 + $0x8] sm:$0xff]  ;;  %820 = vmatprep.subr.bf16.mxu0 %v902_v1 }
  0x11   : > { %v317_v10 = vpack.c.bf16 %v989_v8, %v987_v7  ;;  %831 = vmatpush3.bf16.msra.mxu1 %v878_v9  ;;  %v882_v9 = vld [vmem:[%s1068_s4 + $0x10] sm:$0xff]  }
  0x12   : > { %832 = vmatprep.subr.bf16.mxu1 %v902_v1 }
  0x13   : > { %821 = vmatpush3.bf16.msra.mxu0 %v875_v6 }
  0x14   : > { %850 = vmatprep.subr.bf16.mxu0 %v902_v1 }
  0x15   : > { %833 = vmatpush3.bf16.msra.mxu1 %v879_v11 }
  0x16   : > { %823 = vmatmul.mubr.msk.bf16.vlgmr.msra.gmra.mrb[0].mxu0 %vm342_vm1, %v317_v10  ;;  %838 = vmatprep.subr.bf16.mxu1 %v902_v1 }
  0x17   : > { %858 = vmatprep.mubr.msk.bf16.mxu0 %vm903_vm0, %v902_v1  ;;  %851 = vmatpush3.bf16.msra.mxu0 %v880_v59 }
  0x18   : > { %835 = vmatmul.mubr.msk.bf16.vlgmr.msra.gmra.mrb[0].mxu1 %vm342_vm1, %v317_v10  ;;  %852 = vmatprep.subr.bf16.mxu0 %v902_v1  ;;  %v883_v10 = vld [vmem:[%s1068_s4 + $0x18] sm:$0xff]  }
  0x19   : > { %840 = vmatprep.mubr.msk.bf16.mxu1 %vm903_vm0, %v902_v1 }
  0x1b   : > { %853 = vmatpush3.bf16.msra.mxu0 %v881_v60 }
  0x1c   : > { %854 = vmatprep.subr.bf16.mxu0 %v902_v1 }
  0x1f   : > { %855 = vmatpush3.bf16.msra.mxu0 %v882_v9 }
  0x20   : > { %856 = vmatprep.subr.bf16.mxu0 %v902_v1 }
  0x23   : > { %857 = vmatpush3.bf16.msra.mxu0 %v883_v10 }
  0xe9   : > { %v380_v12 = vpop.f32.mrb[0].mxu0 }
  0xea   : > { %v824_v13 = vpop.f32.mrb[1].mxu0 }
  0xeb   : > { %v383_v14 = vpop.f32.mrb[2].mxu0  ;;  %v451_v18 = vpop.f32.mrb[0].mxu1 }
  0xec   : > { %v458_v16 = vpack.c.bf16 %v383_v14, %v380_v12  ;;  %v825_v17 = vpop.f32.mrb[3].mxu0  ;;  %v452_v20 = vadd.f32 %v777_v15, %v451_v18  ;;  %v836_v21 = vpop.f32.mrb[1].mxu1 }
  0xed   : > { %v454_v22 = vpop.f32.mrb[2].mxu1 }
  0xee   : > { %v460_v19 = vsel %vm342_vm1, %v458_v16, 0  ;;  %v455_v23 = vadd.f32 %v777_v15, %v454_v22  ;;  %v837_v24 = vpop.f32.mrb[3].mxu1 }
  0xef   : > { %839 = vmatpush3.bf16.xpose.msra.mxu1 %v460_v19 }
  0xf0   : > { %844 = vmatprep.subr.bf16.mxu1 %v902_v1  ;;  %v544_v25 = vpack.c.bf16 %v455_v23, %v452_v20 }
  0xf6   : > { %841 = vmatmul.mubr.msk.bf16.vlgmr.msra.gmra.mrb[4].mxu1 %vm342_vm1, %v458_v16 }
  0xf7   : > { %845 = vmatpush3.bf16.msra.mxu1 %v544_v25  ;;  %846 = vmatprep.mubr.msk.bf16.mxu1 %vm903_vm0, %v902_v1  ;;  %v785_v1 = vld [vmem:[%s1069_s5] ss:$0 sm:$0xff] }
 0x1c9   : > { %v496_v26 = vpop.f32.mrb[4].mxu1 }
 0x1ca   : > { %v842_v27 = vpop.f32.mrb[5].mxu1  ;;  %v504_v29 = vsel %vm503_vm2, %v496_v26, -inf }
 0x1cb   : > { %v499_v28 = vpop.f32.mrb[6].mxu1 }
 0x1cc   : > { %v505_v30 = vsel %vm503_vm2, %v499_v28, -inf  ;;  %v843_v31 = vpop.f32.mrb[7].mxu1 }
 0x1cd   : > { %v506_v32 = vmax.f32 %v504_v29, %v505_v30 }
 0x1cf   : > { %v507_v33 = vrot.slane %v506_v32, 4 }
 0x1d1   : > { %v508_v34 = vmax.f32 %v506_v32, %v507_v33 }
 0x1d3   : > { %v509_v35 = vrot.slane %v508_v34, 2 }
 0x1d5   : > { %v510_v36 = vmax.f32 %v508_v34, %v509_v35 }
 0x1d7   : > { %v511_v37 = vrot.slane %v510_v36, 1 }
 0x1d9   : > { %v512_v38 = vmax.f32 %v510_v36, %v511_v37 }
 0x1db   : > { %v513_v39 = vsub.f32 %v496_v26, %v512_v38  ;;  %v514_v40 = vsub.f32 %v499_v28, %v512_v38 }
 0x1dd   : > { %v515_v41 = vmul.f32 1.442695, %v513_v39  ;;  %v517_v42 = vmul.f32 1.442695, %v514_v40 }
 0x1df   : > { %884 = vpow2.f32 %v515_v41 }
 0x1e0   : > { %886 = vpow2.f32 %v517_v42 }
 0x1e9   : > { %v885_v43 = vpop.eup %884 }
 0x1ea   : > { %v887_v44 = vpop.eup %886  ;;  %v519_v45 = vsel %vm503_vm2, %v885_v43, 0.0 }
 0x1eb   : > { %v520_v46 = vsel %vm503_vm2, %v887_v44, 0.0 }
 0x1ec   : > { %v521_v47 = vadd.f32 %v520_v46, %v519_v45 }
 0x1ee   : > { %v522_v48 = vrot.slane %v521_v47, 4 }
 0x1f0   : > { %v523_v49 = vadd.f32 %v522_v48, %v521_v47 }
 0x1f2   : > { %v524_v50 = vrot.slane %v523_v49, 2 }
 0x1f4   : > { %v525_v51 = vadd.f32 %v524_v50, %v523_v49 }
 0x1f6   : > { %v526_v52 = vrot.slane %v525_v51, 1 }
 0x1f8   : > { %v527_v53 = vadd.f32 %v526_v52, %v525_v51 }
 0x1fa   : > { %888 = vrcp.f32 %v527_v53 }
 0x204   : > { %v889_v54 = vpop.eup %888 }
 0x205   : > { %v529_v55 = vmul.f32 %v889_v54, %v885_v43  ;;  %v530_v56 = vmul.f32 %v889_v54, %v887_v44 }
 0x207   : > { %v531_v57 = vsel %vm503_vm2, %v529_v55, 0.0  ;;  %v534_v58 = vsel %vm503_vm2, %v530_v56, 0.0 }
 0x208   : > { %532 = vadd.xlane.f32.xlu0 %v531_v57 }
 0x20c   : > { %535 = vadd.xlane.f32.xlu0 %v534_v58 }
 0x295   : > { %v533_v61 = vpop.xlane.xlu0 %532 }
 0x296   : > { %v537_v62 = vadd.f32 1e-09, %v533_v61 }
 0x298   : > { %890 = vrcp.f32 %v537_v62 }
 0x299   : > { %v536_v63 = vpop.xlane.xlu0 %535 }
 0x29a   : > { %v538_v0 = vadd.f32 1e-09, %v536_v63 }
 0x29c   : > { %892 = vrcp.f32 %v538_v0 }
 0x2a2   : > { %v891_v2 = vpop.eup %890 }
 0x2a3   : > { %v540_v4 = vmul.f32 %v891_v2, %v529_v55 }
 0x2a6   : > { %v893_v3 = vpop.eup %892 }
 0x2a7   : > { %v542_v5 = vmul.f32 %v893_v3, %v530_v56 }
 0x2a9   : > { %v543_v6 = vpack.c.bf16 %v542_v5, %v540_v4 }
 0x2ab   : > { %847 = vmatmul.mubr.msk.bf16.vlgmr.msra.gmra.mrb[8].mxu1 %vm503_vm2, %v543_v6 }
 0x37e   : > { %v582_v11 = vpop.f32.mrb[8].mxu1 }
 0x37f   : > { %v848_v12 = vpop.f32.mrb[9].mxu1  ;;  %v589_v14 = vsub.f32 %v987_v7, %v582_v11 }
 0x380   : > { %v585_v13 = vpop.f32.mrb[10].mxu1 }
 0x381   : > { %v590_v15 = vsub.f32 %v989_v8, %v585_v13  ;;  %v849_v16 = vpop.f32.mrb[11].mxu1 }
 0x383   : > { %v591_v17 = vpack.c.bf16 %v590_v15, %v589_v14 }
 0x385   : > { %859 = vmatmul.mubr.msk.bf16.vlgmr.msra.gmra.mrb[4].mxu0 %vm342_vm1, %v591_v17 }
 0x458   : > { %v659_v18 = vpop.f32.mrb[4].mxu0 }
 0x459   : > { %v660_v19 = vadd.f32 %v785_v1, %v659_v18  ;;  %v860_v20 = vpop.f32.mrb[5].mxu0 }
 0x45a   : > { %v662_v21 = vpop.f32.mrb[6].mxu0 }
 0x45b   : > { %v666_v22 = vmax.f32 %v660_v19, 0.0  ;;  %v663_v23 = vadd.f32 %v785_v1, %v662_v21  ;;  %v861_v24 = vpop.f32.mrb[7].mxu0 }
 0x45d   : > { %v668_v25 = vadd.f32 %v666_v22, %v987_v7  ;;  %v667_v26 = vmax.f32 %v663_v23, 0.0 }
 0x45f   : > { %670 = vst.msk [vmem:[%s284_s17] sm:$0xff] %vm342_vm1, %v668_v25  ;;  %v669_v27 = vadd.f32 %v667_v26, %v989_v8  ;;  %v672_v28 = vsel %vm342_vm1, %v668_v25, -inf }
 0x461   : > { %671 = vst.msk [vmem:[%s284_s17 + $0x8] sm:$0xff] %vm342_vm1, %v669_v27  ;;  %v673_v29 = vsel %vm342_vm1, %v669_v27, -inf }
 0x462   : > { %v674_v30 = vmax.f32 %v672_v28, %v673_v29 }
 0x464   : > { %v675_v31 = vrot.slane %v674_v30, 4 }
 0x466   : > { %v676_v32 = vmax.f32 %v674_v30, %v675_v31 }
 0x468   : > { %v677_v33 = vrot.slane %v676_v32, 2 }
 0x46a   : > { %v678_v34 = vmax.f32 %v676_v32, %v677_v33 }
 0x46c   : > { %v679_v35 = vrot.slane %v678_v34, 1 }
 0x46e   : > { %v680_v7 = vmax.f32 %v678_v34, %v679_v35 }
 0x470   : > { %682 = vst.msk [vmem:[%s287_s19] sm:$0x1] %vm681_vm3, %v680_v7 }
 0x471 PF: > { %s18_s24 = sadd.s32 1, %s900_s24  }
 0x472   : > { %p15_p4 = scmp.ge.s32.totalorder %s18_s24, 4  }
 0x474   :  { %17 = sbr.rel (!%p15_p4) target bundleno = 1 (0x1), region = 86 }

// kernel: model_forward.13
= control target key start
LH: loop header
LB: loop body
LE: loop exit
PB: predicated region body
PF: predicated region fallthrough
CT: control target
= control target key end

     0   :  { %s2637_s24 = smov 0   ;;  %s2639_s25 = smov 0   ;;  %s3225_s0 = inlined_call_operand.vmem [shape: f32[2,32,5], index: 0, kind: input, shape index: {}]   ;;  %s3226_s1 = inlined_call_operand.vmem [shape: f32[2,1,512], index: 1, kind: input, shape index: {}]   ;;  %s3227_s2 = inlined_call_operand.vmem [shape: bf16[5,512], index: 2, kind: input, shape index: {}]   ;;  %s3228_s3 = inlined_call_operand.vmem [shape: bf16[512,512], index: 3, kind: input, shape index: {}]   ;;  %s3229_s4 = inlined_call_operand.vmem [shape: f32[1,512], index: 4, kind: input, shape index: {}]   ;;  %s3230_s5 = inlined_call_operand.vmem [shape: bf16[512,3], index: 5, kind: input, shape index: {}]   ;;  %s3231_s6 = inlined_call_operand.vmem [shape: f32[1,3], index: 6, kind: input, shape index: {}]   ;;  %s3232_s7 = inlined_call_operand.vmem [shape: f32[2,32,3], index: 7, kind: output, shape index: {}]  }
   0x1   :  { %s2641_s26 = smov 0  }
   0x2 LB: > { %s29_s27 = sadd.s32 1, %s2588_s25  ;;  %p2044_p0 = scmp.ge.s32.totalorder %s2592_s26, 1  ;;  %s2592_s26 = sphi %s2641_s26, %s17_s26   ;;  %s2588_s25 = sphi %s2639_s25, %s3234_s25   ;;  %s2584_s24 = sphi %s2637_s24, %s3233_s24  }
   0x3   : > { %p31_p1 = scmp.ge.s32.totalorder %s29_s27, 2  ;;  %p267_p2 = scmp.lt.s32.totalorder %s2592_s26, 3 }
   0x5   : > { %s3236_s27 = smov (%p31_p1, %s29_s27), 0  ;;  %p268_p3 = pnand %p2044_p0, %p267_p2 }
   0x6   : > { %v342_v0 = vld [vmem:[%s3227_s2] sm:$0x77] (!%p268_p3)  ;;  %vm383_vm0 = vcmask (!%p268_p3), 1041408   ;;  %vm384_vm1 = vcmask (!%p268_p3), 1042432   ;;  %v2594_v2 = vmov (!%p268_p3), 65535   ;;  %v2595_v5 = vmov (!%p268_p3), 0  }
   0x7   : > { %271 = sbr.rel (%p268_p3) target bundleno = 760 (0x2f8), region = 48  ;;  %v2051_v1 = vcombine.high (!%p268_p3), %v342_v0, %v342_v0  ;;  %v385_v3 = vsel (!%p268_p3), %vm383_vm0, 4294967295, %v2594_v2  ;;  %v2050_v4 = vcombine.low (!%p268_p3), %v342_v0, %v342_v0  ;;  %431 = vmatprep.mubr.bf16.mxu0 (!%p268_p3), %v2595_v5  ;;  %p312_p4 = scmp.lt.s32.totalorder (!%p268_p3), %s2584_s24, 1  ;;  %v343_v6 = vld [vmem:[%s3227_s2 + $0x8] sm:$0x77] (!%p268_p3)  ;;  %484 = vmatprep.mubr.bf16.mxu1 (!%p268_p3), %v2595_v5  ;;  %vm376_vm2 = vcmask (!%p268_p3), 39936  }
   0x8   : > { %v386_v7 = vsel (!%p268_p3), %vm384_vm1, %v385_v3, 0  ;;  %v2053_v8 = vcombine.high (!%p268_p3), %v343_v6, %v343_v6  ;;  %v2052_v9 = vcombine.low (!%p268_p3), %v343_v6, %v343_v6  ;;  %v2344_v12 = vld [vmem:[%s3228_s3 + $0x4] ss:$16 sps:$4 sm:$0xff] (!%p268_p3)   ;;  %v2347_v15 = vld [vmem:[%s3228_s3 + $0xc] ss:$16 sps:$4 sm:$0xff] (!%p268_p3)   ;;  %s2596_s12 = smov (!%p268_p3), 126  }
   0x9   : > { %v391_v10 = vand.u32 (!%p268_p3), %v2051_v1, %v386_v7  ;;  %v388_v11 = vand.u32 (!%p268_p3), %v2050_v4, %v386_v7  ;;  %v2342_v18 = vld [vmem:[%s3228_s3] ss:$16 sps:$4 sm:$0xff] (!%p268_p3)   ;;  %v2345_v20 = vld [vmem:[%s3228_s3 + $0x8] ss:$16 sps:$4 sm:$0xff] (!%p268_p3)   ;;  %v2350_v21 = vld [vmem:[%s3228_s3 + $0x24] ss:$16 sps:$4 sm:$0xff] (!%p268_p3)  }
   0xa   : > { %v397_v13 = vand.u32 (!%p268_p3), %v2053_v8, %v386_v7  ;;  %v394_v14 = vand.u32 (!%p268_p3), %v2052_v9, %v386_v7  ;;  %v2353_v22 = vld [vmem:[%s3228_s3 + $0x2c] ss:$16 sps:$4 sm:$0xff] (!%p268_p3)   ;;  %v2348_v24 = vld [vmem:[%s3228_s3 + $0x20] ss:$16 sps:$4 sm:$0xff] (!%p268_p3)   ;;  %v2351_v26 = vld [vmem:[%s3228_s3 + $0x28] ss:$16 sps:$4 sm:$0xff] (!%p268_p3)  }
   0xb   : > { %399 = vmatprep.subr.bf16.mxu0 (!%p268_p3), %v391_v10  ;;  %v2356_v27 = vld [vmem:[%s3228_s3 + $0x44] ss:$16 sps:$4 sm:$0xff] (!%p268_p3)   ;;  %v2359_v28 = vld [vmem:[%s3228_s3 + $0x4c] ss:$16 sps:$4 sm:$0xff] (!%p268_p3)   ;;  %v2354_v30 = vld [vmem:[%s3228_s3 + $0x40] ss:$16 sps:$4 sm:$0xff] (!%p268_p3)  }
   0xc   : > { %400 = vmatpush1.bf16.msra.mxu0 (!%p268_p3), %v388_v11  ;;  %452 = vmatprep.subr.bf16.mxu1 (!%p268_p3), %v397_v13  ;;  %v2357_v31 = vld [vmem:[%s3228_s3 + $0x48] ss:$16 sps:$4 sm:$0xff] (!%p268_p3)   ;;  %v2362_v32 = vld [vmem:[%s3228_s3 + $0x64] ss:$16 sps:$4 sm:$0xff] (!%p268_p3)   ;;  %v2365_v33 = vld [vmem:[%s3228_s3 + $0x6c] ss:$16 sps:$4 sm:$0xff] (!%p268_p3)  }
   0xd   : > { %453 = vmatpush1.bf16.msra.mxu1 (!%p268_p3), %v394_v14  ;;  %1319 = vmatprep.subr.bf16.mxu0 (!%p268_p3), %v2344_v12  ;;  %v2360_v34 = vld [vmem:[%s3228_s3 + $0x60] ss:$16 sps:$4 sm:$0xff] (!%p268_p3)   ;;  %v2363_v35 = vld [vmem:[%s3228_s3 + $0x68] ss:$16 sps:$4 sm:$0xff] (!%p268_p3)   ;;  %v2368_v36 = vld [vmem:[%s3228_s3 + $0x84] ss:$16 sps:$4 sm:$0xff] (!%p268_p3)  }
   0xe   : > { %s3238_s24 = smov (!%p312_p4, %s2584_s24), 1  ;;  %1425 = vmatprep.subr.bf16.mxu1 %v2347_v15  ;;  %v2371_v37 = vld [vmem:[%s3228_s3 + $0x8c] ss:$16 sps:$4 sm:$0xff]   ;;  %v2366_v38 = vld [vmem:[%s3228_s3 + $0x80] ss:$16 sps:$4 sm:$0xff]   ;;  %vm1936_vm3 = vcmask 23552  }
   0xf   : > { %s2221_s13 = sshll.u32 %s3238_s24, 5  ;;  %v2369_v39 = vld [vmem:[%s3228_s3 + $0x88] ss:$16 sps:$4 sm:$0xff]   ;;  %v2374_v40 = vld [vmem:[%s3228_s3 + $0xa4] ss:$16 sps:$4 sm:$0xff]   ;;  %s2047_s30 = sshll.u32 %s3238_s24, 2 }
  0x10   : > { %s2675_s16 = scalar_lea.vmem %s3225_s0, %s2221_s13  ;;  %v2377_v41 = vld [vmem:[%s3228_s3 + $0xac] ss:$16 sps:$4 sm:$0xff]   ;;  %v2372_v42 = vld [vmem:[%s3228_s3 + $0xa0] ss:$16 sps:$4 sm:$0xff]   ;;  %v2375_v43 = vld [vmem:[%s3228_s3 + $0xa8] ss:$16 sps:$4 sm:$0xff]   ;;  %s324_s10 = scalar_lea.vmem %s3226_s1, %s2047_s30 }
  0x11   : > { %v336_v16 = vld [vmem:[%s2675_s16] sm:$0xff]  ;;  %v337_v17 = vld [vmem:[%s2675_s16 + $0x8] sm:$0xff]  ;;  %v338_v23 = vld [vmem:[%s2675_s16 + $0x10] sm:$0xff]  ;;  %s333_s20 = scalar_lea.vmem %s3232_s7, %s2221_s13 }
  0x12   : > { %v340_v19 = vpack.c.bf16 %v337_v17, %v336_v16  ;;  %v339_v25 = vld [vmem:[%s2675_s16 + $0x18] sm:$0xff]  ;;  %v2380_v44 = vld [vmem:[%s3228_s3 + $0xc4] ss:$16 sps:$4 sm:$0xff]   ;;  %v2378_v46 = vld [vmem:[%s3228_s3 + $0xc0] ss:$16 sps:$4 sm:$0xff]  }
  0x13   : > { %v341_v29 = vpack.c.bf16 %v339_v25, %v338_v23  ;;  %v2383_v45 = vld [vmem:[%s3228_s3 + $0xcc] ss:$16 sps:$4 sm:$0xff]   ;;  %v2381_v47 = vld [vmem:[%s3228_s3 + $0xc8] ss:$16 sps:$4 sm:$0xff]   ;;  %v2386_v48 = vld [vmem:[%s3228_s3 + $0xe4] ss:$16 sps:$4 sm:$0xff]  }
  0x14   : > { %2054 = vmatmul.mubr.msk.bf16.vlgmr.msra.gmra.mrb[0].mxu0 %vm376_vm2, %v340_v19  ;;  %2056 = vmatmul.mubr.msk.bf16.vlgmr.msra.gmra.mrb[0].mxu1 %vm376_vm2, %v340_v19  ;;  %v2389_v49 = vld [vmem:[%s3228_s3 + $0xec] ss:$16 sps:$4 sm:$0xff]   ;;  %v2384_v50 = vld [vmem:[%s3228_s3 + $0xe0] ss:$16 sps:$4 sm:$0xff]   ;;  %v2387_v51 = vld [vmem:[%s3228_s3 + $0xe8] ss:$16 sps:$4 sm:$0xff]  }
  0x15   : > { %441 = vmatprep.mubr.bf16.mxu0 %v2595_v5  ;;  %494 = vmatprep.mubr.bf16.mxu1 %v2595_v5  ;;  %v2392_v52 = vld [vmem:[%s3228_s3 + $0x104] ss:$16 sps:$4 sm:$0xff]   ;;  %v2395_v53 = vld [vmem:[%s3228_s3 + $0x10c] ss:$16 sps:$4 sm:$0xff]   ;;  %v2390_v54 = vld [vmem:[%s3228_s3 + $0x100] ss:$16 sps:$4 sm:$0xff]  }
  0x16   : > { %1320 = vmatpush1.bf16.msra.mxu0 %v2342_v18  ;;  %1426 = vmatpush1.bf16.msra.mxu1 %v2345_v20  ;;  %v2393_v55 = vld [vmem:[%s3228_s3 + $0x108] ss:$16 sps:$4 sm:$0xff]   ;;  %v2398_v56 = vld [vmem:[%s3228_s3 + $0x124] ss:$16 sps:$4 sm:$0xff]   ;;  %v2401_v57 = vld [vmem:[%s3228_s3 + $0x12c] ss:$16 sps:$4 sm:$0xff]  }
  0x17   : > { %1321 = vmatprep.subr.bf16.mxu0 %v2350_v21  ;;  %1427 = vmatprep.subr.bf16.mxu1 %v2353_v22  ;;  %v2396_v58 = vld [vmem:[%s3228_s3 + $0x120] ss:$16 sps:$4 sm:$0xff]   ;;  %v2399_v59 = vld [vmem:[%s3228_s3 + $0x128] ss:$16 sps:$4 sm:$0xff]   ;;  %v2404_v60 = vld [vmem:[%s3228_s3 + $0x144] ss:$16 sps:$4 sm:$0xff]   ;;  %v346_v22 = vlaneseq }
  0x18   : > { %v2407_v61 = vld [vmem:[%s3228_s3 + $0x14c] ss:$16 sps:$4 sm:$0xff]   ;;  %v2402_v62 = vld [vmem:[%s3228_s3 + $0x140] ss:$16 sps:$4 sm:$0xff]   ;;  %v2405_v63 = vld [vmem:[%s3228_s3 + $0x148] ss:$16 sps:$4 sm:$0xff]  }
  0x19   : > { %v2410_v0 = vld [vmem:[%s3228_s3 + $0x164] ss:$16 sps:$4 sm:$0xff]   ;;  %v2413_v1 = vld [vmem:[%s3228_s3 + $0x16c] ss:$16 sps:$4 sm:$0xff]   ;;  %v2408_v2 = vld [vmem:[%s3228_s3 + $0x160] ss:$16 sps:$4 sm:$0xff]  }
  0x1a   : > { %1322 = vmatpush1.bf16.msra.mxu0 %v2348_v24  ;;  %1428 = vmatpush1.bf16.msra.mxu1 %v2351_v26  ;;  %v2411_v3 = vld [vmem:[%s3228_s3 + $0x168] ss:$16 sps:$4 sm:$0xff]   ;;  %v2416_v4 = vld [vmem:[%s3228_s3 + $0x184] ss:$16 sps:$4 sm:$0xff]   ;;  %v2419_v5 = vld [vmem:[%s3228_s3 + $0x18c] ss:$16 sps:$4 sm:$0xff]  }
  0x1b   : > { %1323 = vmatprep.subr.bf16.mxu0 %v2356_v27  ;;  %1429 = vmatprep.subr.bf16.mxu1 %v2359_v28  ;;  %v2414_v6 = vld [vmem:[%s3228_s3 + $0x180] ss:$16 sps:$4 sm:$0xff]   ;;  %v2417_v7 = vld [vmem:[%s3228_s3 + $0x188] ss:$16 sps:$4 sm:$0xff]   ;;  %v2422_v8 = vld [vmem:[%s3228_s3 + $0x1a4] ss:$16 sps:$4 sm:$0xff]  }
  0x1c   : > { %2055 = vmatmul.mubr.msk.bf16.gmra.mrb[4].mxu0 %vm376_vm2, %v341_v29  ;;  %2057 = vmatmul.mubr.msk.bf16.gmra.mrb[4].mxu1 %vm376_vm2, %v341_v29  ;;  %v2425_v9 = vld [vmem:[%s3228_s3 + $0x1ac] ss:$16 sps:$4 sm:$0xff]   ;;  %v2420_v10 = vld [vmem:[%s3228_s3 + $0x1a0] ss:$16 sps:$4 sm:$0xff]   ;;  %v2423_v11 = vld [vmem:[%s3228_s3 + $0x1a8] ss:$16 sps:$4 sm:$0xff]  }
  0x1d   : > { %v2428_v12 = vld [vmem:[%s3228_s3 + $0x1c4] ss:$16 sps:$4 sm:$0xff]   ;;  %v2431_v13 = vld [vmem:[%s3228_s3 + $0x1cc] ss:$16 sps:$4 sm:$0xff]   ;;  %v2426_v14 = vld [vmem:[%s3228_s3 + $0x1c0] ss:$16 sps:$4 sm:$0xff]  }
  0x1e   : > { %1324 = vmatpush1.bf16.msra.mxu0 %v2354_v30  ;;  %1430 = vmatpush1.bf16.msra.mxu1 %v2357_v31  ;;  %v2429_v15 = vld [vmem:[%s3228_s3 + $0x1c8] ss:$16 sps:$4 sm:$0xff]   ;;  %v2434_v16 = vld [vmem:[%s3228_s3 + $0x1e4] ss:$16 sps:$4 sm:$0xff]   ;;  %v2437_v17 = vld [vmem:[%s3228_s3 + $0x1ec] ss:$16 sps:$4 sm:$0xff]  }
  0x1f   : > { %1325 = vmatprep.subr.bf16.mxu0 %v2362_v32  ;;  %1431 = vmatprep.subr.bf16.mxu1 %v2365_v33  ;;  %v2432_v18 = vld [vmem:[%s3228_s3 + $0x1e0] ss:$16 sps:$4 sm:$0xff]   ;;  %v2435_v19 = vld [vmem:[%s3228_s3 + $0x1e8] ss:$16 sps:$4 sm:$0xff]   ;;  %v2440_v20 = vld [vmem:[%s3228_s3 + $0x204] ss:$16 sps:$4 sm:$0xff]  }
  0x20   : > { %v2443_v21 = vld [vmem:[%s3228_s3 + $0x20c] ss:$16 sps:$4 sm:$0xff]   ;;  %v2878_v23 = vshrl.u32 %v346_v22, 7  ;;  %v344_v26 = vld [vmem:[%s324_s10] sm:$0xf] }
  0x22   : > { %1326 = vmatpush1.bf16.msra.mxu0 %v2360_v34  ;;  %1432 = vmatpush1.bf16.msra.mxu1 %v2363_v35  ;;  %v348_v24 = vsub.s32 0, %v2878_v23  ;;  %v356_v25 = vsub.s32 2, %v2878_v23  ;;  %v352_v27 = vsub.s32 1, %v2878_v23  ;;  %v360_v28 = vsub.s32 3, %v2878_v23 }
  0x23   : > { %1327 = vmatprep.subr.bf16.mxu0 %v2368_v36  ;;  %1433 = vmatprep.subr.bf16.mxu1 %v2371_v37 }
  0x24   : > { %v349_v29 = vrot.slane %v344_v26, %v348_v24  ;;  %v357_v30 = vrot.slane %v344_v26, %v356_v25  ;;  %v353_v31 = vrot.slane %v344_v26, %v352_v27  ;;  %v361_v32 = vrot.slane %v344_v26, %v360_v28  ;;  %v2452_v26 = vld [vmem:[%s3228_s3 + $0x244] ss:$16 sps:$4 sm:$0xff]  }
  0x26   : > { %1328 = vmatpush1.bf16.msra.mxu0 %v2366_v38  ;;  %1434 = vmatpush1.bf16.msra.mxu1 %v2369_v39 }
  0x27   : > { %1329 = vmatprep.subr.bf16.mxu0 %v2374_v40  ;;  %1435 = vmatprep.subr.bf16.mxu1 %v2377_v41 }
  0x2a   : > { %1330 = vmatpush1.bf16.msra.mxu0 %v2372_v42  ;;  %1436 = vmatpush1.bf16.msra.mxu1 %v2375_v43 }
  0x2b   : > { %1331 = vmatprep.subr.bf16.mxu0 %v2380_v44  ;;  %1437 = vmatprep.subr.bf16.mxu1 %v2383_v45 }
  0x2e   : > { %1332 = vmatpush1.bf16.msra.mxu0 %v2378_v46  ;;  %1438 = vmatpush1.bf16.msra.mxu1 %v2381_v47 }
  0x2f   : > { %1333 = vmatprep.subr.bf16.mxu0 %v2386_v48  ;;  %1439 = vmatprep.subr.bf16.mxu1 %v2389_v49 }
  0x32   : > { %1334 = vmatpush1.bf16.msra.mxu0 %v2384_v50  ;;  %1440 = vmatpush1.bf16.msra.mxu1 %v2387_v51 }
  0x33   : > { %1335 = vmatprep.subr.bf16.mxu0 %v2392_v52  ;;  %1441 = vmatprep.subr.bf16.mxu1 %v2395_v53 }
  0x36   : > { %1336 = vmatpush1.bf16.msra.mxu0 %v2390_v54  ;;  %1442 = vmatpush1.bf16.msra.mxu1 %v2393_v55 }
  0x37   : > { %1337 = vmatprep.subr.bf16.mxu0 %v2398_v56  ;;  %1443 = vmatprep.subr.bf16.mxu1 %v2401_v57 }
  0x3a   : > { %1338 = vmatpush1.bf16.msra.mxu0 %v2396_v58  ;;  %1444 = vmatpush1.bf16.msra.mxu1 %v2399_v59 }
  0x3b   : > { %1339 = vmatprep.subr.bf16.mxu0 %v2404_v60  ;;  %1445 = vmatprep.subr.bf16.mxu1 %v2407_v61  ;;  %v2438_v60 = vld [vmem:[%s3228_s3 + $0x200] ss:$16 sps:$4 sm:$0xff]   ;;  %v2441_v61 = vld [vmem:[%s3228_s3 + $0x208] ss:$16 sps:$4 sm:$0xff]  }
  0x3e   : > { %1340 = vmatpush1.bf16.msra.mxu0 %v2402_v62  ;;  %1446 = vmatpush1.bf16.msra.mxu1 %v2405_v63 }
  0x3f   : > { %1341 = vmatprep.subr.bf16.mxu0 %v2410_v0  ;;  %1447 = vmatprep.subr.bf16.mxu1 %v2413_v1  ;;  %v2446_v1 = vld [vmem:[%s3228_s3 + $0x224] ss:$16 sps:$4 sm:$0xff]  }
  0x42   : > { %1342 = vmatpush1.bf16.msra.mxu0 %v2408_v2  ;;  %1448 = vmatpush1.bf16.msra.mxu1 %v2411_v3  ;;  %v2449_v2 = vld [vmem:[%s3228_s3 + $0x22c] ss:$16 sps:$4 sm:$0xff]  }
  0x43   : > { %1343 = vmatprep.subr.bf16.mxu0 %v2416_v4  ;;  %1449 = vmatprep.subr.bf16.mxu1 %v2419_v5 }
  0x46   : > { %1344 = vmatpush1.bf16.msra.mxu0 %v2414_v6  ;;  %1450 = vmatpush1.bf16.msra.mxu1 %v2417_v7 }
  0x47   : > { %1345 = vmatprep.subr.bf16.mxu0 %v2422_v8  ;;  %1451 = vmatprep.subr.bf16.mxu1 %v2425_v9 }
  0x4a   : > { %1346 = vmatpush1.bf16.msra.mxu0 %v2420_v10  ;;  %1452 = vmatpush1.bf16.msra.mxu1 %v2423_v11 }
  0x4b   : > { %1347 = vmatprep.subr.bf16.mxu0 %v2428_v12  ;;  %1453 = vmatprep.subr.bf16.mxu1 %v2431_v13 }
  0x4e   : > { %1348 = vmatpush1.bf16.msra.mxu0 %v2426_v14  ;;  %1454 = vmatpush1.bf16.msra.mxu1 %v2429_v15 }
  0x4f   : > { %1349 = vmatprep.subr.bf16.mxu0 %v2434_v16  ;;  %1455 = vmatprep.subr.bf16.mxu1 %v2437_v17  ;;  %v2444_v17 = vld [vmem:[%s3228_s3 + $0x220] ss:$16 sps:$4 sm:$0xff]  }
  0x52   : > { %1350 = vmatpush1.bf16.msra.mxu0 %v2432_v18  ;;  %1456 = vmatpush1.bf16.msra.mxu1 %v2435_v19  ;;  %v2447_v18 = vld [vmem:[%s3228_s3 + $0x228] ss:$16 sps:$4 sm:$0xff]  }
  0x53   : > { %1372 = vmatprep.subr.bf16.mxu0 %v2440_v20  ;;  %1478 = vmatprep.subr.bf16.mxu1 %v2443_v21 }
  0xe7   : > { %v433_v33 = vpop.f32.mrb[0].mxu0  ;;  %v486_v34 = vpop.f32.mrb[0].mxu1 }
  0xe8   : > { %v434_v35 = vadd.f32 %v433_v33, %v349_v29  ;;  %v435_v36 = vpop.f32.mrb[1].mxu0  ;;  %v487_v37 = vadd.f32 %v486_v34, %v357_v30  ;;  %v488_v38 = vpop.f32.mrb[1].mxu1 }
  0xe9   : > { %v436_v39 = vadd.f32 %v435_v36, %v353_v31  ;;  %v437_v40 = vpop.f32.mrb[2].mxu0  ;;  %v489_v41 = vadd.f32 %v488_v38, %v361_v32  ;;  %v490_v42 = vpop.f32.mrb[2].mxu1 }
  0xea   : > { %v438_v43 = vadd.f32 %v437_v40, %v349_v29  ;;  %v439_v44 = vpop.f32.mrb[3].mxu0  ;;  %v507_v45 = vmax.f32 %v487_v37, 0.0  ;;  %v491_v46 = vadd.f32 %v490_v42, %v357_v30  ;;  %v492_v47 = vpop.f32.mrb[3].mxu1  ;;  %v505_v51 = vmax.f32 %v434_v35, 0.0  ;;  %v2458_v40 = vld [vmem:[%s3228_s3 + $0x264] ss:$16 sps:$4 sm:$0xff]  }
  0xeb   : > { %v440_v48 = vadd.f32 %v439_v44, %v353_v31  ;;  %v508_v49 = vmax.f32 %v489_v41, 0.0  ;;  %v493_v50 = vadd.f32 %v492_v47, %v361_v32  ;;  %v506_v54 = vmax.f32 %v436_v39, 0.0  ;;  %v2461_v41 = vld [vmem:[%s3228_s3 + $0x26c] ss:$16 sps:$4 sm:$0xff]   ;;  %v2456_v42 = vld [vmem:[%s3228_s3 + $0x260] ss:$16 sps:$4 sm:$0xff]  }
  0xec   : > { %v509_v52 = vmax.f32 %v438_v43, 0.0  ;;  %v511_v53 = vmax.f32 %v491_v46, 0.0  ;;  %v2459_v43 = vld [vmem:[%s3228_s3 + $0x268] ss:$16 sps:$4 sm:$0xff]   ;;  %v2464_v44 = vld [vmem:[%s3228_s3 + $0x284] ss:$16 sps:$4 sm:$0xff]  }
  0xed   : > { %v510_v55 = vmax.f32 %v440_v48, 0.0  ;;  %v512_v56 = vmax.f32 %v493_v50, 0.0  ;;  %v2462_v46 = vld [vmem:[%s3228_s3 + $0x280] ss:$16 sps:$4 sm:$0xff]   ;;  %v2465_v47 = vld [vmem:[%s3228_s3 + $0x288] ss:$16 sps:$4 sm:$0xff]  }
  0xee   : > { %v521_v57 = vpack.c.bf16 %v509_v52, %v505_v51  ;;  %v2895_v58 = vpack.c.bf16 %v511_v53, %v507_v45  ;;  %v2467_v45 = vld [vmem:[%s3228_s3 + $0x28c] ss:$16 sps:$4 sm:$0xff]   ;;  %v2470_v48 = vld [vmem:[%s3228_s3 + $0x2a4] ss:$16 sps:$4 sm:$0xff]   ;;  %v2468_v50 = vld [vmem:[%s3228_s3 + $0x2a0] ss:$16 sps:$4 sm:$0xff]  }
  0xef   : > { %v522_v59 = vpack.c.bf16 %v510_v55, %v506_v54  ;;  %v443_v62 = vpop.f32.mrb[4].mxu0  ;;  %v524_v63 = vpack.c.bf16 %v512_v56, %v508_v49  ;;  %v496_v0 = vpop.f32.mrb[4].mxu1  ;;  %v2473_v49 = vld [vmem:[%s3228_s3 + $0x2ac] ss:$16 sps:$4 sm:$0xff]   ;;  %v2471_v51 = vld [vmem:[%s3228_s3 + $0x2a8] ss:$16 sps:$4 sm:$0xff]  }
  0xf0   : > { %v444_v3 = vadd.f32 %v443_v62, %v349_v29  ;;  %v445_v4 = vpop.f32.mrb[5].mxu0  ;;  %v497_v5 = vadd.f32 %v496_v0, %v357_v30  ;;  %v498_v6 = vpop.f32.mrb[5].mxu1  ;;  %v2476_v52 = vld [vmem:[%s3228_s3 + $0x2c4] ss:$16 sps:$4 sm:$0xff]   ;;  %v2479_v53 = vld [vmem:[%s3228_s3 + $0x2cc] ss:$16 sps:$4 sm:$0xff]  }
  0xf1   : > { %1351 = vmatprep.mubr.bf16.mxu0 %v522_v59  ;;  %1457 = vmatprep.mubr.bf16.mxu1 %v522_v59  ;;  %v446_v7 = vadd.f32 %v445_v4, %v353_v31  ;;  %v447_v8 = vpop.f32.mrb[6].mxu0  ;;  %v499_v9 = vadd.f32 %v498_v6, %v361_v32  ;;  %v500_v10 = vpop.f32.mrb[6].mxu1  ;;  %v2474_v54 = vld [vmem:[%s3228_s3 + $0x2c0] ss:$16 sps:$4 sm:$0xff]   ;;  %v2477_v55 = vld [vmem:[%s3228_s3 + $0x2c8] ss:$16 sps:$4 sm:$0xff]  }
  0xf2   : > { %1352 = vmatmul.mubr.bf16.vlgmr.msra.gmra.mrb[8].mxu0 %v521_v57  ;;  %1458 = vmatmul.mubr.bf16.vlgmr.msra.gmra.mrb[8].mxu1 %v521_v57  ;;  %v513_v11 = vmax.f32 %v444_v3, 0.0  ;;  %v448_v12 = vadd.f32 %v447_v8, %v349_v29  ;;  %v449_v13 = vpop.f32.mrb[7].mxu0  ;;  %v515_v14 = vmax.f32 %v497_v5, 0.0  ;;  %v501_v15 = vadd.f32 %v500_v10, %v357_v30  ;;  %v502_v16 = vpop.f32.mrb[7].mxu1  ;;  %v2455_v29 = vld [vmem:[%s3228_s3 + $0x24c] ss:$16 sps:$4 sm:$0xff]  }
  0xf3   : > { %1373 = vmatpush1.bf16.msra.mxu0 %v2438_v60  ;;  %1479 = vmatpush1.bf16.msra.mxu1 %v2441_v61  ;;  %v514_v19 = vmax.f32 %v446_v7, 0.0  ;;  %v450_v20 = vadd.f32 %v449_v13, %v353_v31  ;;  %v516_v21 = vmax.f32 %v499_v9, 0.0  ;;  %v503_v22 = vadd.f32 %v502_v16, %v361_v32  ;;  %v2450_v31 = vld [vmem:[%s3228_s3 + $0x240] ss:$16 sps:$4 sm:$0xff]   ;;  %v2453_v32 = vld [vmem:[%s3228_s3 + $0x248] ss:$16 sps:$4 sm:$0xff]  }
  0xf4   : > { %1374 = vmatprep.subr.bf16.mxu0 %v2446_v1  ;;  %1480 = vmatprep.subr.bf16.mxu1 %v2449_v2  ;;  %v517_v30 = vmax.f32 %v448_v12, 0.0  ;;  %v519_v33 = vmax.f32 %v501_v15, 0.0  ;;  %v2482_v56 = vld [vmem:[%s3228_s3 + $0x2e4] ss:$16 sps:$4 sm:$0xff]   ;;  %v2485_v57 = vld [vmem:[%s3228_s3 + $0x2ec] ss:$16 sps:$4 sm:$0xff]  }
  0xf5   : > { %v518_v34 = vmax.f32 %v450_v20, 0.0  ;;  %v520_v35 = vmax.f32 %v503_v22, 0.0  ;;  %v2480_v59 = vld [vmem:[%s3228_s3 + $0x2e0] ss:$16 sps:$4 sm:$0xff]   ;;  %v2483_v60 = vld [vmem:[%s3228_s3 + $0x2e8] ss:$16 sps:$4 sm:$0xff]  }
  0xf6   : > { %v525_v36 = vpack.c.bf16 %v517_v30, %v513_v11  ;;  %v2921_v37 = vpack.c.bf16 %v519_v33, %v515_v14  ;;  %v2488_v61 = vld [vmem:[%s3228_s3 + $0x304] ss:$16 sps:$4 sm:$0xff]   ;;  %v2491_v62 = vld [vmem:[%s3228_s3 + $0x30c] ss:$16 sps:$4 sm:$0xff]   ;;  %v2489_v0 = vld [vmem:[%s3228_s3 + $0x308] ss:$16 sps:$4 sm:$0xff]  }
  0xf7   : > { %1375 = vmatpush1.bf16.msra.mxu0 %v2444_v17  ;;  %1481 = vmatpush1.bf16.msra.mxu1 %v2447_v18  ;;  %v526_v38 = vpack.c.bf16 %v518_v34, %v514_v19  ;;  %v2929_v39 = vpack.c.bf16 %v520_v35, %v516_v21  ;;  %v2494_v1 = vld [vmem:[%s3228_s3 + $0x324] ss:$16 sps:$4 sm:$0xff]   ;;  %v2497_v2 = vld [vmem:[%s3228_s3 + $0x32c] ss:$16 sps:$4 sm:$0xff]   ;;  %v2492_v3 = vld [vmem:[%s3228_s3 + $0x320] ss:$16 sps:$4 sm:$0xff]  }
  0xf8   : > { %1376 = vmatprep.subr.bf16.mxu0 %v2452_v26  ;;  %1482 = vmatprep.subr.bf16.mxu1 %v2455_v29  ;;  %v2495_v4 = vld [vmem:[%s3228_s3 + $0x328] ss:$16 sps:$4 sm:$0xff]   ;;  %v2500_v5 = vld [vmem:[%s3228_s3 + $0x344] ss:$16 sps:$4 sm:$0xff]   ;;  %v2503_v6 = vld [vmem:[%s3228_s3 + $0x34c] ss:$16 sps:$4 sm:$0xff]  }
  0xf9   : > { %1361 = vmatprep.mubr.bf16.mxu0 %v526_v38  ;;  %1467 = vmatprep.mubr.bf16.mxu1 %v526_v38  ;;  %v2498_v7 = vld [vmem:[%s3228_s3 + $0x340] ss:$16 sps:$4 sm:$0xff]   ;;  %v2501_v8 = vld [vmem:[%s3228_s3 + $0x348] ss:$16 sps:$4 sm:$0xff]   ;;  %v2506_v9 = vld [vmem:[%s3228_s3 + $0x364] ss:$16 sps:$4 sm:$0xff]  }
  0xfa   : > { %1362 = vmatmul.mubr.bf16.gmra.mrb[12].mxu0 %v525_v36  ;;  %1468 = vmatmul.mubr.bf16.gmra.mrb[12].mxu1 %v525_v36  ;;  %v2509_v10 = vld [vmem:[%s3228_s3 + $0x36c] ss:$16 sps:$4 sm:$0xff]   ;;  %v2504_v11 = vld [vmem:[%s3228_s3 + $0x360] ss:$16 sps:$4 sm:$0xff]   ;;  %v2507_v12 = vld [vmem:[%s3228_s3 + $0x368] ss:$16 sps:$4 sm:$0xff]  }
  0xfb   : > { %1377 = vmatpush1.bf16.msra.mxu0 %v2450_v31  ;;  %1483 = vmatpush1.bf16.msra.mxu1 %v2453_v32  ;;  %v2512_v13 = vld [vmem:[%s3228_s3 + $0x384] ss:$16 sps:$4 sm:$0xff]   ;;  %v2515_v14 = vld [vmem:[%s3228_s3 + $0x38c] ss:$16 sps:$4 sm:$0xff]   ;;  %v2510_v15 = vld [vmem:[%s3228_s3 + $0x380] ss:$16 sps:$4 sm:$0xff]  }
  0xfc   : > { %1378 = vmatprep.subr.bf16.mxu0 %v2458_v40  ;;  %1484 = vmatprep.subr.bf16.mxu1 %v2461_v41  ;;  %v2513_v16 = vld [vmem:[%s3228_s3 + $0x388] ss:$16 sps:$4 sm:$0xff]   ;;  %v2518_v17 = vld [vmem:[%s3228_s3 + $0x3a4] ss:$16 sps:$4 sm:$0xff]   ;;  %v2521_v18 = vld [vmem:[%s3228_s3 + $0x3ac] ss:$16 sps:$4 sm:$0xff]  }
  0xfd   : > { %1404 = vmatprep.mubr.bf16.mxu0 %v524_v63  ;;  %1510 = vmatprep.mubr.bf16.mxu1 %v524_v63  ;;  %v2486_v63 = vld [vmem:[%s3228_s3 + $0x300] ss:$16 sps:$4 sm:$0xff]   ;;  %v2519_v20 = vld [vmem:[%s3228_s3 + $0x3a8] ss:$16 sps:$4 sm:$0xff]   ;;  %v2524_v21 = vld [vmem:[%s3228_s3 + $0x3c4] ss:$16 sps:$4 sm:$0xff]  }
  0xfe   : > { %v2516_v19 = vld [vmem:[%s3228_s3 + $0x3a0] ss:$16 sps:$4 sm:$0xff]   ;;  %v2527_v22 = vld [vmem:[%s3228_s3 + $0x3cc] ss:$16 sps:$4 sm:$0xff]   ;;  %v2525_v29 = vld [vmem:[%s3228_s3 + $0x3c8] ss:$16 sps:$4 sm:$0xff]  }
  0xff   : > { %1379 = vmatpush1.bf16.msra.mxu0 %v2456_v42  ;;  %1485 = vmatpush1.bf16.msra.mxu1 %v2459_v43  ;;  %v2522_v26 = vld [vmem:[%s3228_s3 + $0x3c0] ss:$16 sps:$4 sm:$0xff]   ;;  %v2530_v30 = vld [vmem:[%s3228_s3 + $0x3e4] ss:$16 sps:$4 sm:$0xff]   ;;  %v2533_v33 = vld [vmem:[%s3228_s3 + $0x3ec] ss:$16 sps:$4 sm:$0xff]  }
 0x100   : > { %1380 = vmatprep.subr.bf16.mxu0 %v2464_v44  ;;  %1486 = vmatprep.subr.bf16.mxu1 %v2467_v45  ;;  %v2528_v34 = vld [vmem:[%s3228_s3 + $0x3e0] ss:$16 sps:$4 sm:$0xff]   ;;  %v2531_v35 = vld [vmem:[%s3228_s3 + $0x3e8] ss:$16 sps:$4 sm:$0xff]  }
 0x101   : > { %v2534_v36 = vld [vmem:[%s3230_s5 + $0x40] sm:$0xff]   ;;  %v2538_v40 = vld [vmem:[%s3230_s5 + $0x48] sm:$0xff]   ;;  %v2544_v44 = vld [vmem:[%s3230_s5 + $0x10] sm:$0xff]  }
 0x102   : > { %v2535_v31 = vld [vmem:[%s3230_s5 + $0xc0] sm:$0xff]   ;;  %v2539_v41 = vld [vmem:[%s3230_s5 + $0xc8] sm:$0xff]   ;;  %v2545_v45 = vld [vmem:[%s3230_s5 + $0x90] sm:$0xff]  }
 0x103   : > { %1381 = vmatpush1.bf16.msra.mxu0 %v2462_v46  ;;  %1487 = vmatpush1.bf16.msra.mxu1 %v2465_v47  ;;  %v2536_v32 = vld [vmem:[%s3230_s5] sm:$0xff]   ;;  %v2540_v42 = vld [vmem:[%s3230_s5 + $0x8] sm:$0xff]   ;;  %v2546_v46 = vld [vmem:[%s3230_s5 + $0x58] sm:$0xff]  }
 0x104   : > { %1382 = vmatprep.subr.bf16.mxu0 %v2470_v48  ;;  %1488 = vmatprep.subr.bf16.mxu1 %v2473_v49  ;;  %v2537_v38 = vld [vmem:[%s3230_s5 + $0x80] sm:$0xff]   ;;  %v2541_v43 = vld [vmem:[%s3230_s5 + $0x88] sm:$0xff]   ;;  %v2547_v47 = vld [vmem:[%s3230_s5 + $0xd8] sm:$0xff]  }
 0x105   : > { %v2548_v48 = vld [vmem:[%s3230_s5 + $0x18] sm:$0xff]  }
 0x106   : > { %v2549_v49 = vld [vmem:[%s3230_s5 + $0x98] sm:$0xff]  }
 0x107   : > { %1383 = vmatpush1.bf16.msra.mxu0 %v2468_v50  ;;  %1489 = vmatpush1.bf16.msra.mxu1 %v2471_v51  ;;  %v2550_v50 = vld [vmem:[%s3230_s5 + $0x60] sm:$0xff]  }
 0x108   : > { %1384 = vmatprep.subr.bf16.mxu0 %v2476_v52  ;;  %1490 = vmatprep.subr.bf16.mxu1 %v2479_v53  ;;  %v2552_v51 = vld [vmem:[%s3230_s5 + $0x20] sm:$0xff]   ;;  %v2554_v53 = vld [vmem:[%s3230_s5 + $0x68] sm:$0xff]  }
 0x109   : > { %v2553_v52 = vld [vmem:[%s3230_s5 + $0xa0] sm:$0xff]  }
 0x10b   : > { %1385 = vmatpush1.bf16.msra.mxu0 %v2474_v54  ;;  %1491 = vmatpush1.bf16.msra.mxu1 %v2477_v55  ;;  %v2555_v54 = vld [vmem:[%s3230_s5 + $0xe8] sm:$0xff]  }
 0x10c   : > { %1386 = vmatprep.subr.bf16.mxu0 %v2482_v56  ;;  %1492 = vmatprep.subr.bf16.mxu1 %v2485_v57  ;;  %v2556_v55 = vld [vmem:[%s3230_s5 + $0x28] sm:$0xff]   ;;  %v2558_v57 = vld [vmem:[%s3230_s5 + $0x70] sm:$0xff]  }
 0x10d   : > { %v2557_v56 = vld [vmem:[%s3230_s5 + $0xa8] sm:$0xff]  }
 0x10f   : > { %1387 = vmatpush1.bf16.msra.mxu0 %v2480_v59  ;;  %1493 = vmatpush1.bf16.msra.mxu1 %v2483_v60  ;;  %v2559_v59 = vld [vmem:[%s3230_s5 + $0xf0] sm:$0xff]  }
 0x110   : > { %1388 = vmatprep.subr.bf16.mxu0 %v2488_v61  ;;  %1494 = vmatprep.subr.bf16.mxu1 %v2491_v62  ;;  %v2560_v60 = vld [vmem:[%s3230_s5 + $0x30] sm:$0xff]   ;;  %v2562_v62 = vld [vmem:[%s3230_s5 + $0x78] sm:$0xff]  }
 0x111   : > { %v2561_v61 = vld [vmem:[%s3230_s5 + $0xb0] sm:$0xff]  }
 0x113   : > { %1389 = vmatpush1.bf16.msra.mxu0 %v2486_v63  ;;  %1495 = vmatpush1.bf16.msra.mxu1 %v2489_v0  ;;  %v2563_v63 = vld [vmem:[%s3230_s5 + $0xf8] sm:$0xff]  }
 0x114   : > { %1390 = vmatprep.subr.bf16.mxu0 %v2494_v1  ;;  %1496 = vmatprep.subr.bf16.mxu1 %v2497_v2  ;;  %v2564_v0 = vld [vmem:[%s3230_s5 + $0x38] sm:$0xff]   ;;  %v2566_v2 = vld [vmem:[%s2675_s16] sm:$0xff] }
 0x115   : > { %v2565_v1 = vld [vmem:[%s3230_s5 + $0xb8] sm:$0xff]   ;;  %1920 = vrot.lane.b32.xlu0 %v2566_v2, %s2596_s12 }
 0x117   : > { %1391 = vmatpush1.bf16.msra.mxu0 %v2492_v3  ;;  %1497 = vmatpush1.bf16.msra.mxu1 %v2495_v4  ;;  %v2567_v3 = vld [vmem:[%s2675_s16 + $0x10] sm:$0xff]  ;;  %v2568_v4 = vld [vmem:[%s2675_s16 + $0x8] sm:$0xff] }
 0x118   : > { %1392 = vmatprep.subr.bf16.mxu0 %v2500_v5  ;;  %1498 = vmatprep.subr.bf16.mxu1 %v2503_v6  ;;  %v2569_v5 = vld [vmem:[%s2675_s16 + $0x18] sm:$0xff]  ;;  %v657_v6 = vld [vmem:[%s3229_s4] sm:$0xf] }
 0x119   : > { %1924 = vrot.lane.b32.xlu1 %v2567_v3, %s2596_s12  ;;  %1922 = vrot.lane.b32.xlu0 %v2568_v4, %s2596_s12 }
 0x11b   : > { %1393 = vmatpush1.bf16.msra.mxu0 %v2498_v7  ;;  %1499 = vmatpush1.bf16.msra.mxu1 %v2501_v8  ;;  %v662_v7 = vrot.slane %v657_v6, %v348_v24  ;;  %v670_v8 = vrot.slane %v657_v6, %v356_v25 }
 0x11c   : > { %1394 = vmatprep.subr.bf16.mxu0 %v2506_v9  ;;  %1500 = vmatprep.subr.bf16.mxu1 %v2509_v10  ;;  %v666_v9 = vrot.slane %v657_v6, %v352_v27  ;;  %v674_v10 = vrot.slane %v657_v6, %v360_v28  ;;  %v2186_v6 = vld [vmem:[%s3231_s6] ss:$0 sm:$0xff] }
 0x11d   : > { %1926 = vrot.lane.b32.xlu1 %v2569_v5, %s2596_s12 }
 0x11f   : > { %1395 = vmatpush1.bf16.msra.mxu0 %v2504_v11  ;;  %1501 = vmatpush1.bf16.msra.mxu1 %v2507_v12 }
 0x120   : > { %1396 = vmatprep.subr.bf16.mxu0 %v2512_v13  ;;  %1502 = vmatprep.subr.bf16.mxu1 %v2515_v14 }
 0x123   : > { %1397 = vmatpush1.bf16.msra.mxu0 %v2510_v15  ;;  %1503 = vmatpush1.bf16.msra.mxu1 %v2513_v16 }
 0x124   : > { %1398 = vmatprep.subr.bf16.mxu0 %v2518_v17  ;;  %1504 = vmatprep.subr.bf16.mxu1 %v2521_v18 }
 0x127   : > { %1399 = vmatpush1.bf16.msra.mxu0 %v2516_v19  ;;  %1505 = vmatpush1.bf16.msra.mxu1 %v2519_v20 }
 0x128   : > { %1400 = vmatprep.subr.bf16.mxu0 %v2524_v21  ;;  %1506 = vmatprep.subr.bf16.mxu1 %v2527_v22 }
 0x12b   : > { %1401 = vmatpush1.bf16.msra.mxu0 %v2522_v26  ;;  %1507 = vmatpush1.bf16.msra.mxu1 %v2525_v29 }
 0x12c   : > { %1402 = vmatprep.subr.bf16.mxu0 %v2530_v30  ;;  %1508 = vmatprep.subr.bf16.mxu1 %v2533_v33 }
 0x12f   : > { %1403 = vmatpush1.bf16.msra.mxu0 %v2528_v34  ;;  %1509 = vmatpush1.bf16.msra.mxu1 %v2531_v35 }
 0x130   : > { %2223 = vmatprep.subr.bf16.mxu0 %v2534_v36  ;;  %2251 = vmatprep.subr.bf16.mxu1 %v2535_v31 }
 0x132   : > { %1405 = vmatmul.mubr.bf16.vlgmr.msra.gmra.mrb[8].mxu0 %v2895_v58  ;;  %1511 = vmatmul.mubr.bf16.vlgmr.msra.gmra.mrb[8].mxu1 %v2895_v58  ;;  %v2542_v58 = vld [vmem:[%s3230_s5 + $0x50] sm:$0xff]  }
 0x133   : > { %1414 = vmatprep.mubr.bf16.mxu0 %v2929_v39  ;;  %1520 = vmatprep.mubr.bf16.mxu1 %v2929_v39  ;;  %v2543_v39 = vld [vmem:[%s3230_s5 + $0xd0] sm:$0xff]  }
 0x134   : > { %2224 = vmatpush3.bf16.msra.mxu0 %v2536_v32  ;;  %2252 = vmatpush3.bf16.msra.mxu1 %v2537_v38 }
 0x135   : > { %2225 = vmatprep.subr.bf16.mxu0 %v2538_v40  ;;  %2253 = vmatprep.subr.bf16.mxu1 %v2539_v41 }
 0x138   : > { %2226 = vmatpush3.bf16.msra.mxu0 %v2540_v42  ;;  %2254 = vmatpush3.bf16.msra.mxu1 %v2541_v43 }
 0x139   : > { %2227 = vmatprep.subr.bf16.mxu0 %v2542_v58  ;;  %2255 = vmatprep.subr.bf16.mxu1 %v2543_v39 }
 0x13a   : > { %1415 = vmatmul.mubr.bf16.gmra.mrb[12].mxu0 %v2921_v37  ;;  %1521 = vmatmul.mubr.bf16.gmra.mrb[12].mxu1 %v2921_v37  ;;  %v2551_v37 = vld [vmem:[%s3230_s5 + $0xe0] sm:$0xff]  }
 0x13c   : > { %2228 = vmatpush3.bf16.msra.mxu0 %v2544_v44  ;;  %2256 = vmatpush3.bf16.msra.mxu1 %v2545_v45 }
 0x13d   : > { %2229 = vmatprep.subr.bf16.mxu0 %v2546_v46  ;;  %2257 = vmatprep.subr.bf16.mxu1 %v2547_v47 }
 0x140   : > { %2230 = vmatpush3.bf16.msra.mxu0 %v2548_v48  ;;  %2258 = vmatpush3.bf16.msra.mxu1 %v2549_v49 }
 0x141   : > { %2231 = vmatprep.subr.bf16.mxu0 %v2550_v50  ;;  %2259 = vmatprep.subr.bf16.mxu1 %v2551_v37 }
 0x144   : > { %2232 = vmatpush3.bf16.msra.mxu0 %v2552_v51  ;;  %2260 = vmatpush3.bf16.msra.mxu1 %v2553_v52 }
 0x145   : > { %2233 = vmatprep.subr.bf16.mxu0 %v2554_v53  ;;  %2261 = vmatprep.subr.bf16.mxu1 %v2555_v54 }
 0x148   : > { %2234 = vmatpush3.bf16.msra.mxu0 %v2556_v55  ;;  %2262 = vmatpush3.bf16.msra.mxu1 %v2557_v56 }
 0x149   : > { %2235 = vmatprep.subr.bf16.mxu0 %v2558_v57  ;;  %2263 = vmatprep.subr.bf16.mxu1 %v2559_v59 }
 0x14c   : > { %2236 = vmatpush3.bf16.msra.mxu0 %v2560_v60  ;;  %2264 = vmatpush3.bf16.msra.mxu1 %v2561_v61 }
 0x14d   : > { %2237 = vmatprep.subr.bf16.mxu0 %v2562_v62  ;;  %2265 = vmatprep.subr.bf16.mxu1 %v2563_v63 }
 0x150   : > { %2238 = vmatpush3.bf16.msra.mxu0 %v2564_v0  ;;  %2266 = vmatpush3.bf16.msra.mxu1 %v2565_v1 }
 0x187   : > { %v1921_v3 = vpop.permute.xlu0 %1920 }
 0x205   : > { %v1406_v11 = vpop.f32.mrb[8].mxu0  ;;  %v1512_v12 = vpop.f32.mrb[8].mxu1 }
 0x206   : > { %v2279_v13 = vadd.f32 %v1406_v11, %v662_v7  ;;  %v2287_v14 = vadd.f32 %v1512_v12, %v670_v8  ;;  %v1408_v15 = vpop.f32.mrb[9].mxu0  ;;  %v1514_v16 = vpop.f32.mrb[9].mxu1 }
 0x207   : > { %v2280_v17 = vadd.f32 %v1408_v15, %v666_v9  ;;  %v2288_v18 = vadd.f32 %v1514_v16, %v674_v10  ;;  %v1410_v19 = vpop.f32.mrb[10].mxu0  ;;  %v1516_v20 = vpop.f32.mrb[10].mxu1 }
 0x208   : > { %v2281_v24 = vadd.f32 %v1410_v19, %v662_v7  ;;  %v2289_v21 = vadd.f32 %v1516_v20, %v670_v8  ;;  %v1412_v22 = vpop.f32.mrb[11].mxu0  ;;  %v1518_v25 = vpop.f32.mrb[11].mxu1  ;;  %v1531_v27 = vmax.f32 %v2279_v13, 0.0  ;;  %v1533_v30 = vmax.f32 %v2287_v14, 0.0 }
 0x209   : > { %v2282_v26 = vadd.f32 %v1412_v22, %v666_v9  ;;  %v2290_v29 = vadd.f32 %v1518_v25, %v674_v10  ;;  %v1532_v33 = vmax.f32 %v2280_v17, 0.0  ;;  %v1534_v34 = vmax.f32 %v2288_v18, 0.0  ;;  %v1923_v20 = vpop.permute.xlu0 %1922 }
 0x20a   : > { %v1535_v23 = vmax.f32 %v2281_v24, 0.0  ;;  %v1537_v28 = vmax.f32 %v2289_v21, 0.0  ;;  %v1925_v24 = vpop.permute.xlu1 %1924 }
 0x20b   : > { %v1536_v35 = vmax.f32 %v2282_v26, 0.0  ;;  %v1538_v36 = vmax.f32 %v2290_v29, 0.0 }
 0x20c   : > { %v1547_v31 = vpack.c.bf16 %v1535_v23, %v1531_v27  ;;  %v1549_v32 = vpack.c.bf16 %v1537_v28, %v1533_v30 }
 0x20d   : > { %v1548_v38 = vpack.c.bf16 %v1536_v35, %v1532_v33  ;;  %v1550_v40 = vpack.c.bf16 %v1538_v36, %v1534_v34  ;;  %v1416_v41 = vpop.f32.mrb[12].mxu0  ;;  %v1522_v42 = vpop.f32.mrb[12].mxu1 }
 0x20e   : > { %v2283_v43 = vadd.f32 %v1416_v41, %v662_v7  ;;  %v2291_v58 = vadd.f32 %v1522_v42, %v670_v8  ;;  %v1418_v39 = vpop.f32.mrb[13].mxu0  ;;  %v1524_v44 = vpop.f32.mrb[13].mxu1 }
 0x20f   : > { %v2284_v45 = vadd.f32 %v1418_v39, %v666_v9  ;;  %v2292_v46 = vadd.f32 %v1524_v44, %v674_v10  ;;  %v1420_v47 = vpop.f32.mrb[14].mxu0  ;;  %v1526_v48 = vpop.f32.mrb[14].mxu1  ;;  %1850 = vmatprep.mubr.bf16.mxu0 %v1548_v38  ;;  %1899 = vmatprep.mubr.bf16.mxu1 %v1550_v40 }
 0x210   : > { %v2285_v49 = vadd.f32 %v1420_v47, %v662_v7  ;;  %v2293_v50 = vadd.f32 %v1526_v48, %v670_v8  ;;  %v1422_v37 = vpop.f32.mrb[15].mxu0  ;;  %v1528_v51 = vpop.f32.mrb[15].mxu1  ;;  %1851 = vmatmul.mubr.bf16.vlgmr.msra.gmra.mrb[16].mxu0 %v1547_v31  ;;  %1900 = vmatmul.mubr.bf16.vlgmr.msra.gmra.mrb[16].mxu1 %v1549_v32  ;;  %v1539_v54 = vmax.f32 %v2283_v43, 0.0  ;;  %v1541_v55 = vmax.f32 %v2291_v58, 0.0 }
 0x211   : > { %v2286_v52 = vadd.f32 %v1422_v37, %v666_v9  ;;  %v2294_v53 = vadd.f32 %v1528_v51, %v674_v10  ;;  %v1540_v59 = vmax.f32 %v2284_v45, 0.0  ;;  %v1542_v60 = vmax.f32 %v2292_v46, 0.0  ;;  %v1927_v42 = vpop.permute.xlu1 %1926 }
 0x212   : > { %v1543_v56 = vmax.f32 %v2285_v49, 0.0  ;;  %v1545_v57 = vmax.f32 %v2293_v50, 0.0 }
 0x213   : > { %v1544_v61 = vmax.f32 %v2286_v52, 0.0  ;;  %v1546_v62 = vmax.f32 %v2294_v53, 0.0 }
 0x214   : > { %v1551_v63 = vpack.c.bf16 %v1543_v56, %v1539_v54  ;;  %v1553_v0 = vpack.c.bf16 %v1545_v57, %v1541_v55 }
 0x215   : > { %v1552_v1 = vpack.c.bf16 %v1544_v61, %v1540_v59  ;;  %v1554_v2 = vpack.c.bf16 %v1546_v62, %v1542_v60 }
 0x217   : > { %1858 = vmatprep.mubr.bf16.mxu0 %v1552_v1  ;;  %1907 = vmatprep.mubr.bf16.mxu1 %v1554_v2 }
 0x218   : > { %1859 = vmatmul.mubr.bf16.gmra.mrb[20].mxu0 %v1551_v63  ;;  %1908 = vmatmul.mubr.bf16.gmra.mrb[20].mxu1 %v1553_v0 }
 0x2e3   : > { %v2239_v4 = vpop.f32.mrb[16].mxu0  ;;  %v2267_v5 = vpop.f32.mrb[16].mxu1 }
 0x2e4   : > { %v2240_v7 = vpop.f32.mrb[17].mxu0  ;;  %v2268_v8 = vpop.f32.mrb[17].mxu1 }
 0x2e5   : > { %v2241_v9 = vadd.f32 %v2240_v7, %v2239_v4  ;;  %v2269_v10 = vadd.f32 %v2268_v8, %v2267_v5  ;;  %v2242_v11 = vpop.f32.mrb[18].mxu0  ;;  %v2270_v12 = vpop.f32.mrb[18].mxu1 }
 0x2e6   : > { %v2243_v13 = vpop.f32.mrb[19].mxu0  ;;  %v2271_v14 = vpop.f32.mrb[19].mxu1 }
 0x2e7   : > { %v1853_v15 = vadd.f32 %v2241_v9, %v2186_v6  ;;  %v2244_v16 = vadd.f32 %v2243_v13, %v2242_v11  ;;  %v2272_v17 = vadd.f32 %v2271_v14, %v2270_v12 }
 0x2e9   : > { %v1856_v18 = vadd.f32 %v2244_v16, %v2186_v6  ;;  %v1902_v19 = vadd.f32 %v2269_v10, %v1853_v15 }
 0x2eb   : > { %v1932_v21 = vadd.f32 %v1921_v3, %v1902_v19  ;;  %v2245_v22 = vpop.f32.mrb[20].mxu0  ;;  %v2273_v25 = vpop.f32.mrb[20].mxu1  ;;  %v1905_v26 = vadd.f32 %v2272_v17, %v1856_v18 }
 0x2ec   : > { %v2246_v29 = vpop.f32.mrb[21].mxu0  ;;  %v2274_v27 = vpop.f32.mrb[21].mxu1 }
 0x2ed   : > { %1937 = vst.msk [vmem:[%s333_s20] sm:$0xff] %vm1936_vm3, %v1932_v21  ;;  %v1933_v30 = vadd.f32 %v1923_v20, %v1905_v26  ;;  %v2247_v23 = vadd.f32 %v2246_v29, %v2245_v22  ;;  %v2275_v28 = vadd.f32 %v2274_v27, %v2273_v25  ;;  %v2248_v33 = vpop.f32.mrb[22].mxu0  ;;  %v2276_v34 = vpop.f32.mrb[22].mxu1 }
 0x2ee   : > { %v2249_v35 = vpop.f32.mrb[23].mxu0  ;;  %v2277_v36 = vpop.f32.mrb[23].mxu1 }
 0x2ef   : > { %1938 = vst.msk [vmem:[%s333_s20 + $0x8] sm:$0xff] %vm1936_vm3, %v1933_v30  ;;  %v1861_v31 = vadd.f32 %v2247_v23, %v2186_v6  ;;  %v2250_v32 = vadd.f32 %v2249_v35, %v2248_v33  ;;  %v2278_v38 = vadd.f32 %v2277_v36, %v2276_v34 }
 0x2f1   : > { %v1864_v40 = vadd.f32 %v2250_v32, %v2186_v6  ;;  %v1910_v41 = vadd.f32 %v2275_v28, %v1861_v31 }
 0x2f3   : > { %v1934_v43 = vadd.f32 %v1925_v24, %v1910_v41  ;;  %v1913_v58 = vadd.f32 %v2278_v38, %v1864_v40 }
 0x2f5   : > { %1939 = vst.msk [vmem:[%s333_s20 + $0x10] sm:$0xff] %vm1936_vm3, %v1934_v43  ;;  %v1935_v39 = vadd.f32 %v1927_v42, %v1913_v58 }
 0x2f7   : > { %1940 = vst.msk [vmem:[%s333_s20 + $0x18] sm:$0xff] %vm1936_vm3, %v1935_v39 }
 0x2f8 PF: > { %s17_s26 = sadd.s32 1, %s2592_s26   ;;  %s3233_s24 = smov %s2588_s25 }
 0x2f9   : > { %p14_p5 = scmp.ge.s32.totalorder %s17_s26, 4   ;;  %s3234_s25 = smov %s3236_s27 }
 0x2fb   :  { %16 = sbr.rel (!%p14_p5) target bundleno = 2 (0x2), region = 81 }

// kernel: model_forward.9
= control target key start
LH: loop header
LB: loop body
LE: loop exit
PB: predicated region body
PF: predicated region fallthrough
CT: control target
= control target key end

     0   :  { %v161_v1 = vmov 0   ;;  %vm77_vm0 = vcmask 523264   ;;  %v27_v11 = vlaneseq  ;;  %s215_s1 = inlined_call_operand.vmem [shape: bf16[64,256], index: 1, kind: input, shape index: {}]   ;;  %s216_s0 = inlined_call_operand.vmem [shape: f32[2,64], index: 0, kind: input, shape index: {}]   ;;  %s217_s2 = inlined_call_operand.vmem [shape: f32[1,256], index: 2, kind: input, shape index: {}]   ;;  %s218_s3 = inlined_call_operand.vmem [shape: f32[2,256], index: 3, kind: output, shape index: {}]  }
   0x1   :  { %v149_v0 = vld [vmem:[%s215_s1 + $0x4] ss:$8 sps:$4 sm:$0xff]   ;;  %113 = vmatprep.mubr.bf16.mxu0 %v161_v1  ;;  %v151_v2 = vld [vmem:[%s215_s1] ss:$8 sps:$4 sm:$0xff]   ;;  %v152_v3 = vld [vmem:[%s215_s1 + $0x14] ss:$8 sps:$4 sm:$0xff]  }
   0x2   :  { %81 = vmatprep.subr.bf16.mxu0 %v149_v0  ;;  %v154_v4 = vld [vmem:[%s215_s1 + $0x10] ss:$8 sps:$4 sm:$0xff]   ;;  %v155_v5 = vld [vmem:[%s215_s1 + $0x24] ss:$8 sps:$4 sm:$0xff]   ;;  %v157_v6 = vld [vmem:[%s215_s1 + $0x20] ss:$8 sps:$4 sm:$0xff]  }
   0x3   :  { %82 = vmatpush1.bf16.msra.mxu0 %v151_v2  ;;  %v158_v7 = vld [vmem:[%s215_s1 + $0x34] ss:$8 sps:$4 sm:$0xff]   ;;  %v160_v8 = vld [vmem:[%s215_s1 + $0x30] ss:$8 sps:$4 sm:$0xff]   ;;  %v15_v9 = vld [vmem:[%s216_s0] sm:$0x3] }
   0x4   :  { %83 = vmatprep.subr.bf16.mxu0 %v152_v3  ;;  %v16_v10 = vpack.c.bf16 %v15_v9, %v15_v9  ;;  %v28_v12 = vshrl.u32 %v27_v11, 7  ;;  %v25_v14 = vld [vmem:[%s217_s2] sm:$0x3] }
   0x6   :  { %v29_v13 = vsub.s32 0, %v28_v12  ;;  %v33_v15 = vsub.s32 1, %v28_v12 }
   0x7   :  { %84 = vmatpush1.bf16.msra.mxu0 %v154_v4 }
   0x8   :  { %85 = vmatprep.subr.bf16.mxu0 %v155_v5  ;;  %v30_v16 = vrot.slane %v25_v14, %v29_v13  ;;  %v34_v17 = vrot.slane %v25_v14, %v33_v15 }
   0xb   :  { %86 = vmatpush1.bf16.msra.mxu0 %v157_v6 }
   0xc   :  { %87 = vmatprep.subr.bf16.mxu0 %v158_v7 }
   0xf   :  { %88 = vmatpush1.bf16.msra.mxu0 %v160_v8 }
  0x12   :  { %146 = vmatmul.mubr.msk.bf16.vlgmr.msra.gmra.mrb[0].mxu0 %vm77_vm0, %v16_v10 }
  0xe5   :  { %v115_v18 = vpop.f32.mrb[0].mxu0 }
  0xe6   :  { %v116_v19 = vadd.f32 %v115_v18, %v30_v16  ;;  %v117_v20 = vpop.f32.mrb[1].mxu0 }
  0xe7   :  { %v118_v21 = vadd.f32 %v117_v20, %v34_v17  ;;  %v119_v22 = vpop.f32.mrb[2].mxu0 }
  0xe8   :  { %v120_v23 = vpop.f32.mrb[3].mxu0 }
  0xe9   :  { %v124_v24 = vcombine.low %v116_v19, %v118_v21 }
  0xeb   :  { %147 = vst.sshfl [vmem:[%s218_s3] sm:$0x33 pattern:$0x76325410] %v124_v24 }

// kernel: model_forward.10
= control target key start
LH: loop header
LB: loop body
LE: loop exit
PB: predicated region body
PF: predicated region fallthrough
CT: control target
= control target key end

     0   :  { %s1735_s27 = smov 0   ;;  %s2125_s0 = inlined_call_operand.vmem [shape: f32[2,16,64], index: 0, kind: input, shape index: {}]   ;;  %s2126_s1 = inlined_call_operand.vmem [shape: bf16[64,256], index: 1, kind: input, shape index: {}]   ;;  %s2127_s2 = inlined_call_operand.vmem [shape: f32[2,1,256], index: 2, kind: input, shape index: {}]   ;;  %s2128_s3 = inlined_call_operand.vmem [shape: bf16[256,256], index: 3, kind: input, shape index: {}]   ;;  %s2129_s4 = inlined_call_operand.vmem [shape: bf16[256,256], index: 4, kind: input, shape index: {}]   ;;  %s2130_s5 = inlined_call_operand.vmem [shape: f32[1,256], index: 5, kind: input, shape index: {}]   ;;  %s2131_s6 = inlined_call_operand.vmem [shape: bf16[256,256], index: 6, kind: input, shape index: {}]   ;;  %s2132_s7 = inlined_call_operand.vmem [shape: f32[1,256], index: 7, kind: input, shape index: {}]   ;;  %s2133_s8 = inlined_call_operand.vmem [shape: f32[2,16,256], index: 8, kind: output, shape index: {}]  }
   0x1 LB: > { %s1386_s28 = sadd.s32 4294967295, %s1687_s27   ;;  %p1390_p0 = scmp.ge.s32.totalorder %s1687_s27, 1  ;;  %s1687_s27 = sphi %s1735_s27, %s18_s27  }
   0x2   : > { %p271_p1 = scmp.lt.s32.totalorder %s1687_s27, 3 }
   0x4   : > { %p272_p2 = pnand %p1390_p0, %p271_p1 }
   0x5   : > { %v1515_v0 = vld [vmem:[%s2126_s1 + $0x4] ss:$8 sps:$4 sm:$0xff] (!%p272_p2)   ;;  %p309_p3 = scmp.lt.s32.totalorder (!%p272_p2), %s1386_s28, 1  ;;  %v1517_v1 = vld [vmem:[%s2126_s1] ss:$8 sps:$4 sm:$0xff] (!%p272_p2)   ;;  %v1689_v2 = vmov (!%p272_p2), 0  }
   0x6   : > { %275 = sbr.rel (%p272_p2) target bundleno = 1348 (0x544), region = 52  ;;  %423 = vmatprep.mubr.bf16.mxu1 (!%p272_p2), %v1689_v2  ;;  %391 = vmatprep.subr.bf16.mxu1 (!%p272_p2), %v1515_v0  ;;  %v1518_v3 = vld [vmem:[%s2126_s1 + $0x14] ss:$8 sps:$4 sm:$0xff] (!%p272_p2)   ;;  %v1520_v4 = vld [vmem:[%s2126_s1 + $0x10] ss:$8 sps:$4 sm:$0xff] (!%p272_p2)   ;;  %vm387_vm0 = vcmask (!%p272_p2), 523264  }
   0x7   : > { %392 = vmatpush1.bf16.msra.mxu1 (!%p272_p2), %v1517_v1  ;;  %v1521_v5 = vld [vmem:[%s2126_s1 + $0x24] ss:$8 sps:$4 sm:$0xff] (!%p272_p2)   ;;  %v1523_v6 = vld [vmem:[%s2126_s1 + $0x20] ss:$8 sps:$4 sm:$0xff] (!%p272_p2)   ;;  %v1524_v7 = vld [vmem:[%s2126_s1 + $0x34] ss:$8 sps:$4 sm:$0xff] (!%p272_p2)  }
   0x8   : > { %393 = vmatprep.subr.bf16.mxu1 (!%p272_p2), %v1518_v3  ;;  %v1530_v8 = vld [vmem:[%s2129_s4 + $0x4] ss:$8 sps:$4 sm:$0xff] (!%p272_p2)   ;;  %v1532_v9 = vld [vmem:[%s2129_s4] ss:$8 sps:$4 sm:$0xff] (!%p272_p2)   ;;  %v1526_v10 = vld [vmem:[%s2126_s1 + $0x30] ss:$8 sps:$4 sm:$0xff] (!%p272_p2)  }
   0x9   : > { %912 = vmatprep.subr.bf16.mxu0 (!%p272_p2), %v1530_v8  ;;  %v1536_v13 = vld [vmem:[%s2129_s4 + $0x14] ss:$8 sps:$4 sm:$0xff] (!%p272_p2)   ;;  %v1538_v14 = vld [vmem:[%s2129_s4 + $0x10] ss:$8 sps:$4 sm:$0xff] (!%p272_p2)   ;;  %v1529_v15 = vld [vmem:[%s2128_s3 + $0x4] ss:$8 sps:$4 sm:$0xff] (!%p272_p2)  }
   0xa   : > { %913 = vmatpush1.bf16.msra.mxu0 (!%p272_p2), %v1532_v9  ;;  %v1542_v16 = vld [vmem:[%s2129_s4 + $0x24] ss:$8 sps:$4 sm:$0xff] (!%p272_p2)   ;;  %v1527_v18 = vld [vmem:[%s2128_s3] ss:$8 sps:$4 sm:$0xff] (!%p272_p2)   ;;  %v1535_v20 = vld [vmem:[%s2128_s3 + $0x14] ss:$8 sps:$4 sm:$0xff] (!%p272_p2)  }
   0xb   : > { %394 = vmatpush1.bf16.msra.mxu1 (!%p272_p2), %v1520_v4  ;;  %914 = vmatprep.subr.bf16.mxu0 (!%p272_p2), %v1536_v13  ;;  %v1544_v19 = vld [vmem:[%s2129_s4 + $0x20] ss:$8 sps:$4 sm:$0xff] (!%p272_p2)   ;;  %v1548_v21 = vld [vmem:[%s2129_s4 + $0x34] ss:$8 sps:$4 sm:$0xff] (!%p272_p2)   ;;  %v1533_v22 = vld [vmem:[%s2128_s3 + $0x10] ss:$8 sps:$4 sm:$0xff] (!%p272_p2)   ;;  %v337_v13 = vlaneseq (!%p272_p2) }
   0xc   : > { %395 = vmatprep.subr.bf16.mxu1 (!%p272_p2), %v1521_v5  ;;  %v1550_v23 = vld [vmem:[%s2129_s4 + $0x30] ss:$8 sps:$4 sm:$0xff] (!%p272_p2)   ;;  %v1541_v24 = vld [vmem:[%s2128_s3 + $0x24] ss:$8 sps:$4 sm:$0xff] (!%p272_p2)   ;;  %v1539_v26 = vld [vmem:[%s2128_s3 + $0x20] ss:$8 sps:$4 sm:$0xff] (!%p272_p2)  }
   0xd   : > { %s2135_s28 = smov (!%p309_p3, %s1386_s28), 1  ;;  %v1554_v25 = vld [vmem:[%s2129_s4 + $0x44] ss:$8 sps:$4 sm:$0xff]   ;;  %v1556_v27 = vld [vmem:[%s2129_s4 + $0x40] ss:$8 sps:$4 sm:$0xff]   ;;  %vm998_vm1 = vcmask 130048  }
   0xe   : > { %s1504_s17 = sshll.u32 %s2135_s28, 4  ;;  %915 = vmatpush1.bf16.msra.mxu0 %v1538_v14  ;;  %v1547_v28 = vld [vmem:[%s2128_s3 + $0x34] ss:$8 sps:$4 sm:$0xff]   ;;  %v1545_v30 = vld [vmem:[%s2128_s3 + $0x30] ss:$8 sps:$4 sm:$0xff]   ;;  %s1393_s15 = sshll.u32 %s2135_s28, 1 }
   0xf   : > { %s313_s22 = scalar_lea.vmem %s2125_s0, %s1504_s17  ;;  %396 = vmatpush1.bf16.msra.mxu1 %v1523_v6  ;;  %916 = vmatprep.subr.bf16.mxu0 %v1542_v16  ;;  %v1560_v29 = vld [vmem:[%s2129_s4 + $0x54] ss:$8 sps:$4 sm:$0xff]   ;;  %v1562_v31 = vld [vmem:[%s2129_s4 + $0x50] ss:$8 sps:$4 sm:$0xff]   ;;  %v1553_v32 = vld [vmem:[%s2128_s3 + $0x44] ss:$8 sps:$4 sm:$0xff]   ;;  %s317_s18 = scalar_lea.vmem %s2127_s2, %s1393_s15 }
  0x10   : > { %v324_v11 = vld [vmem:[%s313_s22] sm:$0xff]  ;;  %v325_v12 = vld [vmem:[%s313_s22 + $0x8] sm:$0xff]  ;;  %397 = vmatprep.subr.bf16.mxu1 %v1524_v7  ;;  %v1559_v36 = vld [vmem:[%s2128_s3 + $0x54] ss:$8 sps:$4 sm:$0xff]   ;;  %v338_v14 = vshrl.u32 %v337_v13, 7  ;;  %s1505_s29 = sshll.u32 %s2135_s28, 5 }
  0x11   : > { %v326_v17 = vpack.c.bf16 %v325_v12, %v324_v11  ;;  %v1566_v33 = vld [vmem:[%s2129_s4 + $0x64] ss:$8 sps:$4 sm:$0xff]   ;;  %v1551_v34 = vld [vmem:[%s2128_s3 + $0x40] ss:$8 sps:$4 sm:$0xff]   ;;  %v1572_v37 = vld [vmem:[%s2129_s4 + $0x74] ss:$8 sps:$4 sm:$0xff]   ;;  %s322_s10 = scalar_lea.vmem %s2133_s8, %s1505_s29 }
  0x12   : > { %917 = vmatpush1.bf16.msra.mxu0 %v1544_v19  ;;  %v1568_v35 = vld [vmem:[%s2129_s4 + $0x60] ss:$8 sps:$4 sm:$0xff]   ;;  %v1557_v38 = vld [vmem:[%s2128_s3 + $0x50] ss:$8 sps:$4 sm:$0xff]   ;;  %v1565_v40 = vld [vmem:[%s2128_s3 + $0x64] ss:$8 sps:$4 sm:$0xff]  }
  0x13   : > { %398 = vmatpush1.bf16.msra.mxu1 %v1526_v10  ;;  %918 = vmatprep.subr.bf16.mxu0 %v1548_v21  ;;  %v1574_v39 = vld [vmem:[%s2129_s4 + $0x70] ss:$8 sps:$4 sm:$0xff]   ;;  %v1578_v41 = vld [vmem:[%s2129_s4 + $0x84] ss:$8 sps:$4 sm:$0xff]   ;;  %v1563_v42 = vld [vmem:[%s2128_s3 + $0x60] ss:$8 sps:$4 sm:$0xff]  }
  0x14   : > { %698 = vmatprep.subr.bf16.mxu1 %v1529_v15  ;;  %v1580_v43 = vld [vmem:[%s2129_s4 + $0x80] ss:$8 sps:$4 sm:$0xff]   ;;  %v1571_v44 = vld [vmem:[%s2128_s3 + $0x74] ss:$8 sps:$4 sm:$0xff]   ;;  %v1569_v46 = vld [vmem:[%s2128_s3 + $0x70] ss:$8 sps:$4 sm:$0xff]  }
  0x15   : > { %v1584_v45 = vld [vmem:[%s2129_s4 + $0x94] ss:$8 sps:$4 sm:$0xff]   ;;  %v1577_v47 = vld [vmem:[%s2128_s3 + $0x84] ss:$8 sps:$4 sm:$0xff]   ;;  %v1586_v48 = vld [vmem:[%s2129_s4 + $0x90] ss:$8 sps:$4 sm:$0xff]  }
  0x16   : > { %1404 = vmatmul.mubr.msk.bf16.vlgmr.msra.gmra.mrb[0].mxu1 %vm387_vm0, %v326_v17  ;;  %919 = vmatpush1.bf16.msra.mxu0 %v1550_v23  ;;  %v1590_v49 = vld [vmem:[%s2129_s4 + $0xa4] ss:$8 sps:$4 sm:$0xff]   ;;  %v1575_v50 = vld [vmem:[%s2128_s3 + $0x80] ss:$8 sps:$4 sm:$0xff]   ;;  %v1583_v52 = vld [vmem:[%s2128_s3 + $0x94] ss:$8 sps:$4 sm:$0xff]  }
  0x17   : > { %699 = vmatpush1.bf16.msra.mxu1 %v1527_v18  ;;  %920 = vmatprep.subr.bf16.mxu0 %v1554_v25  ;;  %v1592_v51 = vld [vmem:[%s2129_s4 + $0xa0] ss:$8 sps:$4 sm:$0xff]   ;;  %v1596_v53 = vld [vmem:[%s2129_s4 + $0xb4] ss:$8 sps:$4 sm:$0xff]   ;;  %v1581_v54 = vld [vmem:[%s2128_s3 + $0x90] ss:$8 sps:$4 sm:$0xff]  }
  0x18   : > { %700 = vmatprep.subr.bf16.mxu1 %v1535_v20  ;;  %v1598_v55 = vld [vmem:[%s2129_s4 + $0xb0] ss:$8 sps:$4 sm:$0xff]   ;;  %v1589_v56 = vld [vmem:[%s2128_s3 + $0xa4] ss:$8 sps:$4 sm:$0xff]   ;;  %v1587_v58 = vld [vmem:[%s2128_s3 + $0xa0] ss:$8 sps:$4 sm:$0xff]  }
  0x19   : > { %v1602_v57 = vld [vmem:[%s2129_s4 + $0xc4] ss:$8 sps:$4 sm:$0xff]   ;;  %v1604_v59 = vld [vmem:[%s2129_s4 + $0xc0] ss:$8 sps:$4 sm:$0xff]   ;;  %v1595_v60 = vld [vmem:[%s2128_s3 + $0xb4] ss:$8 sps:$4 sm:$0xff]  }
  0x1a   : > { %921 = vmatpush1.bf16.msra.mxu0 %v1556_v27  ;;  %v1608_v61 = vld [vmem:[%s2129_s4 + $0xd4] ss:$8 sps:$4 sm:$0xff]   ;;  %v1593_v62 = vld [vmem:[%s2128_s3 + $0xb0] ss:$8 sps:$4 sm:$0xff]   ;;  %v1601_v63 = vld [vmem:[%s2128_s3 + $0xc4] ss:$8 sps:$4 sm:$0xff]  }
  0x1b   : > { %701 = vmatpush1.bf16.msra.mxu1 %v1533_v22  ;;  %922 = vmatprep.subr.bf16.mxu0 %v1560_v29  ;;  %v1599_v0 = vld [vmem:[%s2128_s3 + $0xc0] ss:$8 sps:$4 sm:$0xff]   ;;  %v1607_v1 = vld [vmem:[%s2128_s3 + $0xd4] ss:$8 sps:$4 sm:$0xff]   ;;  %v1605_v3 = vld [vmem:[%s2128_s3 + $0xd0] ss:$8 sps:$4 sm:$0xff]  }
  0x1c   : > { %702 = vmatprep.subr.bf16.mxu1 %v1541_v24  ;;  %v1610_v4 = vld [vmem:[%s2129_s4 + $0xd0] ss:$8 sps:$4 sm:$0xff]   ;;  %v1613_v5 = vld [vmem:[%s2128_s3 + $0xe4] ss:$8 sps:$4 sm:$0xff]   ;;  %v1611_v7 = vld [vmem:[%s2128_s3 + $0xe0] ss:$8 sps:$4 sm:$0xff]  }
  0x1d   : > { %v1614_v6 = vld [vmem:[%s2129_s4 + $0xe4] ss:$8 sps:$4 sm:$0xff]   ;;  %v1616_v8 = vld [vmem:[%s2129_s4 + $0xe0] ss:$8 sps:$4 sm:$0xff]   ;;  %v1619_v9 = vld [vmem:[%s2128_s3 + $0xf4] ss:$8 sps:$4 sm:$0xff]  }
  0x1e   : > { %923 = vmatpush1.bf16.msra.mxu0 %v1562_v31  ;;  %v1620_v10 = vld [vmem:[%s2129_s4 + $0xf4] ss:$8 sps:$4 sm:$0xff]   ;;  %v1617_v11 = vld [vmem:[%s2128_s3 + $0xf0] ss:$8 sps:$4 sm:$0xff]   ;;  %v1970_v15 = vsub.s32 1, %v338_v14  ;;  %v1972_v17 = vsub.s32 0, %v338_v14 }
  0x1f   : > { %703 = vmatpush1.bf16.msra.mxu1 %v1539_v26  ;;  %924 = vmatprep.subr.bf16.mxu0 %v1566_v33  ;;  %v1622_v12 = vld [vmem:[%s2129_s4 + $0xf0] ss:$8 sps:$4 sm:$0xff]   ;;  %v335_v16 = vld [vmem:[%s317_s18] sm:$0x3] }
  0x20   : > { %704 = vmatprep.subr.bf16.mxu1 %v1547_v28  ;;  %v344_v18 = vrot.slane %v335_v16, %v1970_v15  ;;  %v340_v19 = vrot.slane %v335_v16, %v1972_v17 }
  0x22   : > { %925 = vmatpush1.bf16.msra.mxu0 %v1568_v35 }
  0x23   : > { %705 = vmatpush1.bf16.msra.mxu1 %v1545_v30  ;;  %926 = vmatprep.subr.bf16.mxu0 %v1572_v37 }
  0x24   : > { %706 = vmatprep.subr.bf16.mxu1 %v1553_v32 }
  0x26   : > { %927 = vmatpush1.bf16.msra.mxu0 %v1574_v39 }
  0x27   : > { %707 = vmatpush1.bf16.msra.mxu1 %v1551_v34  ;;  %928 = vmatprep.subr.bf16.mxu0 %v1578_v41  ;;  %v502_v34 = vld [vmem:[%s2130_s5] sm:$0x3] }
  0x28   : > { %708 = vmatprep.subr.bf16.mxu1 %v1559_v36  ;;  %v745_v35 = vrot.slane %v502_v34, %v1972_v17 }
  0x2a   : > { %929 = vmatpush1.bf16.msra.mxu0 %v1580_v43 }
  0x2b   : > { %709 = vmatpush1.bf16.msra.mxu1 %v1557_v38  ;;  %930 = vmatprep.subr.bf16.mxu0 %v1584_v45  ;;  %v749_v38 = vrot.slane %v502_v34, %v1970_v15  ;;  %v1634_v34 = vld [vmem:[%s2131_s6 + $0x34] ss:$8 sps:$4 sm:$0xff]  }
  0x2c   : > { %710 = vmatprep.subr.bf16.mxu1 %v1565_v40 }
  0x2e   : > { %931 = vmatpush1.bf16.msra.mxu0 %v1586_v48 }
  0x2f   : > { %711 = vmatpush1.bf16.msra.mxu1 %v1563_v42  ;;  %932 = vmatprep.subr.bf16.mxu0 %v1590_v49 }
  0x30   : > { %712 = vmatprep.subr.bf16.mxu1 %v1571_v44 }
  0x32   : > { %933 = vmatpush1.bf16.msra.mxu0 %v1592_v51 }
  0x33   : > { %713 = vmatpush1.bf16.msra.mxu1 %v1569_v46  ;;  %934 = vmatprep.subr.bf16.mxu0 %v1596_v53 }
  0x34   : > { %714 = vmatprep.subr.bf16.mxu1 %v1577_v47 }
  0x36   : > { %935 = vmatpush1.bf16.msra.mxu0 %v1598_v55 }
  0x37   : > { %715 = vmatpush1.bf16.msra.mxu1 %v1575_v50  ;;  %936 = vmatprep.subr.bf16.mxu0 %v1602_v57 }
  0x38   : > { %716 = vmatprep.subr.bf16.mxu1 %v1583_v52 }
  0x3a   : > { %937 = vmatpush1.bf16.msra.mxu0 %v1604_v59 }
  0x3b   : > { %717 = vmatpush1.bf16.msra.mxu1 %v1581_v54  ;;  %938 = vmatprep.subr.bf16.mxu0 %v1608_v61 }
  0x3c   : > { %718 = vmatprep.subr.bf16.mxu1 %v1589_v56 }
  0x3e   : > { %939 = vmatpush1.bf16.msra.mxu0 %v1610_v4 }
  0x3f   : > { %719 = vmatpush1.bf16.msra.mxu1 %v1587_v58  ;;  %940 = vmatprep.subr.bf16.mxu0 %v1614_v6 }
  0x40   : > { %720 = vmatprep.subr.bf16.mxu1 %v1595_v60 }
  0x42   : > { %941 = vmatpush1.bf16.msra.mxu0 %v1616_v8 }
  0x43   : > { %721 = vmatpush1.bf16.msra.mxu1 %v1593_v62  ;;  %942 = vmatprep.subr.bf16.mxu0 %v1620_v10 }
  0x44   : > { %722 = vmatprep.subr.bf16.mxu1 %v1601_v63 }
  0x46   : > { %943 = vmatpush1.bf16.msra.mxu0 %v1622_v12 }
  0x47   : > { %723 = vmatpush1.bf16.msra.mxu1 %v1599_v0 }
  0x48   : > { %724 = vmatprep.subr.bf16.mxu1 %v1607_v1 }
  0x4b   : > { %725 = vmatpush1.bf16.msra.mxu1 %v1605_v3 }
  0x4c   : > { %726 = vmatprep.subr.bf16.mxu1 %v1613_v5 }
  0x4f   : > { %727 = vmatpush1.bf16.msra.mxu1 %v1611_v7 }
  0x50   : > { %728 = vmatprep.subr.bf16.mxu1 %v1619_v9 }
  0x53   : > { %729 = vmatpush1.bf16.msra.mxu1 %v1617_v11 }
  0xe9   : > { %v425_v20 = vpop.f32.mrb[0].mxu1 }
  0xea   : > { %v427_v21 = vpop.f32.mrb[1].mxu1  ;;  %v426_v24 = vadd.f32 %v425_v20, %v340_v19 }
  0xeb   : > { %v428_v22 = vadd.f32 %v427_v21, %v344_v18  ;;  %v429_v23 = vpop.f32.mrb[2].mxu1 }
  0xec   : > { %v430_v25 = vadd.f32 %v429_v23, %v340_v19  ;;  %v431_v26 = vpop.f32.mrb[3].mxu1  ;;  %v1982_v31 = vmax.f32 %v426_v24, 0.0  ;;  %v1623_v24 = vld [vmem:[%s2131_s6] ss:$8 sps:$4 sm:$0xff]  }
  0xed   : > { %v432_v27 = vadd.f32 %v431_v26, %v344_v18  ;;  %v1978_v29 = vmax.f32 %v428_v22, 0.0  ;;  %v1628_v26 = vld [vmem:[%s2131_s6 + $0x14] ss:$8 sps:$4 sm:$0xff]  }
  0xee   : > { %v1976_v28 = vmax.f32 %v430_v25, 0.0  ;;  %v1625_v25 = vld [vmem:[%s2131_s6 + $0x4] ss:$8 sps:$4 sm:$0xff]  }
  0xef   : > { %v1980_v30 = vmax.f32 %v432_v27, 0.0  ;;  %1264 = vmatprep.subr.bf16.mxu0 %v1625_v25  ;;  %v1626_v27 = vld [vmem:[%s2131_s6 + $0x10] ss:$8 sps:$4 sm:$0xff]  }
  0xf0   : > { %v536_v33 = vpack.c.bf16 %v1976_v28, %v1982_v31 }
  0xf1   : > { %v537_v32 = vpack.c.bf16 %v1980_v30, %v1978_v29 }
  0xf3   : > { %730 = vmatprep.mubr.bf16.mxu1 %v537_v32  ;;  %944 = vmatprep.mubr.bf16.mxu0 %v537_v32  ;;  %v1631_v32 = vld [vmem:[%s2131_s6 + $0x24] ss:$8 sps:$4 sm:$0xff]  }
  0xf4   : > { %731 = vmatmul.mubr.bf16.vlgmr.msra.gmra.mrb[4].mxu1 %v536_v33  ;;  %945 = vmatmul.mubr.bf16.vlgmr.msra.gmra.mrb[0].mxu0 %v536_v33  ;;  %v1629_v33 = vld [vmem:[%s2131_s6 + $0x20] ss:$8 sps:$4 sm:$0xff]  }
  0xf5   : > { %1265 = vmatpush1.bf16.msra.mxu0 %v1623_v24 }
  0xf6   : > { %1266 = vmatprep.subr.bf16.mxu0 %v1628_v26 }
  0xf9   : > { %1267 = vmatpush1.bf16.msra.mxu0 %v1626_v27 }
  0xfa   : > { %1268 = vmatprep.subr.bf16.mxu0 %v1631_v32 }
  0xfd   : > { %1269 = vmatpush1.bf16.msra.mxu0 %v1629_v33 }
  0xfe   : > { %1270 = vmatprep.subr.bf16.mxu0 %v1634_v34 }
 0x1c7   : > { %v732_v36 = vpop.f32.mrb[4].mxu1  ;;  %v946_v37 = vpop.f32.mrb[0].mxu0 }
 0x1c8   : > { %v734_v39 = vpop.f32.mrb[5].mxu1  ;;  %v948_v40 = vpop.f32.mrb[1].mxu0  ;;  %v947_v43 = vadd.f32 %v946_v37, %v745_v35  ;;  %v1635_v37 = vld [vmem:[%s2131_s6 + $0x40] ss:$8 sps:$4 sm:$0xff]  }
 0x1c9   : > { %v736_v41 = vpop.f32.mrb[6].mxu1  ;;  %v950_v42 = vpop.f32.mrb[2].mxu0  ;;  %v949_v48 = vadd.f32 %v948_v40, %v749_v38  ;;  %v1643_v40 = vld [vmem:[%s2131_s6 + $0x64] ss:$8 sps:$4 sm:$0xff]  }
 0x1ca   : > { %v955_v44 = vpack.c.bf16 %v736_v41, %v732_v36  ;;  %v951_v45 = vadd.f32 %v950_v42, %v745_v35  ;;  %v738_v46 = vpop.f32.mrb[7].mxu1  ;;  %v952_v47 = vpop.f32.mrb[3].mxu0  ;;  %v1632_v35 = vld [vmem:[%s2131_s6 + $0x30] ss:$8 sps:$4 sm:$0xff]   ;;  %v1637_v36 = vld [vmem:[%s2131_s6 + $0x44] ss:$8 sps:$4 sm:$0xff]  }
 0x1cb   : > { %v956_v49 = vpack.c.bf16 %v738_v46, %v734_v39  ;;  %v953_v50 = vadd.f32 %v952_v47, %v749_v38  ;;  %1271 = vmatpush1.bf16.msra.mxu0 %v1632_v35  ;;  %v1640_v38 = vld [vmem:[%s2131_s6 + $0x54] ss:$8 sps:$4 sm:$0xff]   ;;  %v1638_v39 = vld [vmem:[%s2131_s6 + $0x50] ss:$8 sps:$4 sm:$0xff]   ;;  %v1641_v41 = vld [vmem:[%s2131_s6 + $0x60] ss:$8 sps:$4 sm:$0xff]  }
 0x1cc   : > { %v1039_v51 = vpack.c.bf16 %v951_v45, %v947_v43  ;;  %1272 = vmatprep.subr.bf16.mxu0 %v1637_v36  ;;  %v1646_v42 = vld [vmem:[%s2131_s6 + $0x74] ss:$8 sps:$4 sm:$0xff]   ;;  %v1644_v43 = vld [vmem:[%s2131_s6 + $0x70] ss:$8 sps:$4 sm:$0xff]   ;;  %v1647_v45 = vld [vmem:[%s2131_s6 + $0x80] ss:$8 sps:$4 sm:$0xff]  }
 0x1cd   : > { %v1040_v52 = vpack.c.bf16 %v953_v50, %v949_v48  ;;  %957 = vmatprep.subr.bf16.mxu1 %v956_v49  ;;  %989 = vmatprep.mubr.bf16.mxu1 %v956_v49  ;;  %v1652_v46 = vld [vmem:[%s2131_s6 + $0x94] ss:$8 sps:$4 sm:$0xff]   ;;  %v1650_v47 = vld [vmem:[%s2131_s6 + $0x90] ss:$8 sps:$4 sm:$0xff]   ;;  %v1655_v48 = vld [vmem:[%s2131_s6 + $0xa4] ss:$8 sps:$4 sm:$0xff]  }
 0x1ce   : > { %958 = vmatpush1.bf16.xpose.msra.mxu1 %v955_v44  ;;  %v1653_v49 = vld [vmem:[%s2131_s6 + $0xa0] ss:$8 sps:$4 sm:$0xff]   ;;  %v1658_v50 = vld [vmem:[%s2131_s6 + $0xb4] ss:$8 sps:$4 sm:$0xff]  }
 0x1cf   : > { %1044 = vmatprep.subr.bf16.mxu1 %v1040_v52  ;;  %1273 = vmatpush1.bf16.msra.mxu0 %v1635_v37  ;;  %v1661_v52 = vld [vmem:[%s2131_s6 + $0xc4] ss:$8 sps:$4 sm:$0xff]  }
 0x1d0   : > { %1274 = vmatprep.subr.bf16.mxu0 %v1640_v38 }
 0x1d3   : > { %1275 = vmatpush1.bf16.msra.mxu0 %v1638_v39 }
 0x1d4   : > { %1276 = vmatprep.subr.bf16.mxu0 %v1643_v40 }
 0x1d5   : > { %990 = vmatmul.mubr.bf16.vlgmr.msra.gmra.mrb[8].mxu1 %v955_v44  ;;  %v1649_v44 = vld [vmem:[%s2131_s6 + $0x84] ss:$8 sps:$4 sm:$0xff]  }
 0x1d6   : > { %1045 = vmatpush1.bf16.msra.mxu1 %v1039_v51  ;;  %1076 = vmatprep.mubr.bf16.mxu1 %v1689_v2  ;;  %v1656_v51 = vld [vmem:[%s2131_s6 + $0xb0] ss:$8 sps:$4 sm:$0xff]  }
 0x1d7   : > { %1277 = vmatpush1.bf16.msra.mxu0 %v1641_v41 }
 0x1d8   : > { %1278 = vmatprep.subr.bf16.mxu0 %v1646_v42 }
 0x1db   : > { %1279 = vmatpush1.bf16.msra.mxu0 %v1644_v43 }
 0x1dc   : > { %1280 = vmatprep.subr.bf16.mxu0 %v1649_v44 }
 0x1df   : > { %1281 = vmatpush1.bf16.msra.mxu0 %v1647_v45 }
 0x1e0   : > { %1282 = vmatprep.subr.bf16.mxu0 %v1652_v46 }
 0x1e3   : > { %1283 = vmatpush1.bf16.msra.mxu0 %v1650_v47 }
 0x1e4   : > { %1284 = vmatprep.subr.bf16.mxu0 %v1655_v48 }
 0x1e7   : > { %1285 = vmatpush1.bf16.msra.mxu0 %v1653_v49 }
 0x1e8   : > { %1286 = vmatprep.subr.bf16.mxu0 %v1658_v50 }
 0x1eb   : > { %1287 = vmatpush1.bf16.msra.mxu0 %v1656_v51 }
 0x1ec   : > { %1288 = vmatprep.subr.bf16.mxu0 %v1661_v52 }
 0x2a8   : > { %v991_v53 = vpop.f32.mrb[8].mxu1 }
 0x2a9   : > { %v993_v54 = vpop.f32.mrb[9].mxu1  ;;  %v999_v56 = vsel %vm998_vm1, %v991_v53, -inf }
 0x2aa   : > { %v994_v55 = vpop.f32.mrb[10].mxu1  ;;  %v1664_v54 = vld [vmem:[%s2131_s6 + $0xd4] ss:$8 sps:$4 sm:$0xff]  }
 0x2ab   : > { %v1000_v57 = vsel %vm998_vm1, %v994_v55, -inf  ;;  %v996_v58 = vpop.f32.mrb[11].mxu1 }
 0x2ac   : > { %v1001_v59 = vmax.f32 %v999_v56, %v1000_v57 }
 0x2ae   : > { %v1002_v60 = vrot.slane %v1001_v59, 4 }
 0x2b0   : > { %v1003_v61 = vmax.f32 %v1001_v59, %v1002_v60 }
 0x2b2   : > { %v1004_v62 = vrot.slane %v1003_v61, 2 }
 0x2b4   : > { %v1005_v63 = vmax.f32 %v1003_v61, %v1004_v62 }
 0x2b6   : > { %v1006_v0 = vrot.slane %v1005_v63, 1 }
 0x2b8   : > { %v1007_v1 = vmax.f32 %v1005_v63, %v1006_v0 }
 0x2ba   : > { %v1008_v3 = vsub.f32 %v991_v53, %v1007_v1  ;;  %v1009_v4 = vsub.f32 %v994_v55, %v1007_v1  ;;  %v1659_v53 = vld [vmem:[%s2131_s6 + $0xc0] ss:$8 sps:$4 sm:$0xff]   ;;  %v1662_v55 = vld [vmem:[%s2131_s6 + $0xd0] ss:$8 sps:$4 sm:$0xff]   ;;  %v1667_v1 = vld [vmem:[%s2131_s6 + $0xe4] ss:$8 sps:$4 sm:$0xff]  }
 0x2bb   : > { %1289 = vmatpush1.bf16.msra.mxu0 %v1659_v53 }
 0x2bc   : > { %v1010_v5 = vmul.f32 1.442695, %v1008_v3  ;;  %v1012_v2 = vmul.f32 1.442695, %v1009_v4  ;;  %1290 = vmatprep.subr.bf16.mxu0 %v1664_v54  ;;  %v1665_v3 = vld [vmem:[%s2131_s6 + $0xe0] ss:$8 sps:$4 sm:$0xff]  }
 0x2bd   : > { %v1670_v4 = vld [vmem:[%s2131_s6 + $0xf4] ss:$8 sps:$4 sm:$0xff]  }
 0x2be   : > { %1671 = vpow2.f32 %v1010_v5  ;;  %v1668_v5 = vld [vmem:[%s2131_s6 + $0xf0] ss:$8 sps:$4 sm:$0xff]  }
 0x2bf   : > { %1673 = vpow2.f32 %v1012_v2  ;;  %1291 = vmatpush1.bf16.msra.mxu0 %v1662_v55 }
 0x2c0   : > { %1292 = vmatprep.subr.bf16.mxu0 %v1667_v1 }
 0x2c3   : > { %1293 = vmatpush1.bf16.msra.mxu0 %v1665_v3 }
 0x2c4   : > { %1294 = vmatprep.subr.bf16.mxu0 %v1670_v4 }
 0x2c7   : > { %1295 = vmatpush1.bf16.msra.mxu0 %v1668_v5 }
 0x2c8   : > { %v1672_v6 = vpop.eup %1671 }
 0x2c9   : > { %v1674_v7 = vpop.eup %1673  ;;  %v1014_v8 = vsel %vm998_vm1, %v1672_v6, 0.0 }
 0x2ca   : > { %v1015_v9 = vsel %vm998_vm1, %v1674_v7, 0.0 }
 0x2cb   : > { %v1016_v10 = vadd.f32 %v1015_v9, %v1014_v8 }
 0x2cd   : > { %v1017_v11 = vrot.slane %v1016_v10, 4 }
 0x2cf   : > { %v1018_v12 = vadd.f32 %v1017_v11, %v1016_v10 }
 0x2d1   : > { %v1019_v13 = vrot.slane %v1018_v12, 2 }
 0x2d3   : > { %v1020_v14 = vadd.f32 %v1019_v13, %v1018_v12 }
 0x2d5   : > { %v1021_v16 = vrot.slane %v1020_v14, 1 }
 0x2d7   : > { %v1022_v18 = vadd.f32 %v1021_v16, %v1020_v14  ;;  %v535_v16 = vld [vmem:[%s2132_s7] sm:$0x3] }
 0x2d9   : > { %1675 = vrcp.f32 %v1022_v18  ;;  %v1097_v18 = vrot.slane %v535_v16, %v1972_v17 }
 0x2e3   : > { %v1676_v19 = vpop.eup %1675 }
 0x2e4   : > { %v1998_v20 = vmul.f32 %v1676_v19, %v1672_v6  ;;  %v2000_v21 = vmul.f32 %v1676_v19, %v1674_v7  ;;  %v1101_v19 = vrot.slane %v535_v16, %v1970_v15 }
 0x2e6   : > { %v1026_v22 = vsel %vm998_vm1, %v1998_v20, 0.0  ;;  %v1029_v23 = vsel %vm998_vm1, %v2000_v21, 0.0 }
 0x2e7   : > { %1027 = vadd.xlane.f32.xlu0 %v1026_v22 }
 0x2eb   : > { %1030 = vadd.xlane.f32.xlu0 %v1029_v23 }
 0x374   : > { %v1028_v56 = vpop.xlane.xlu0 %1027 }
 0x375   : > { %v1032_v57 = vadd.f32 1e-09, %v1028_v56 }
 0x377   : > { %1677 = vrcp.f32 %v1032_v57 }
 0x378   : > { %v1031_v58 = vpop.xlane.xlu0 %1030 }
 0x379   : > { %v1033_v59 = vadd.f32 1e-09, %v1031_v58 }
 0x37b   : > { %1679 = vrcp.f32 %v1033_v59 }
 0x381   : > { %v1678_v60 = vpop.eup %1677 }
 0x382   : > { %v1035_v62 = vmul.f32 %v1678_v60, %v1998_v20 }
 0x385   : > { %v1680_v61 = vpop.eup %1679 }
 0x386   : > { %v1037_v63 = vmul.f32 %v1680_v61, %v2000_v21 }
 0x388   : > { %v1038_v0 = vpack.c.bf16 %v1037_v63, %v1035_v62 }
 0x38a   : > { %1469 = vmatmul.mubr.msk.bf16.vlgmr.msra.gmra.mrb[12].mxu1 %vm998_vm1, %v1038_v0 }
 0x45d   : > { %v1078_v2 = vpop.f32.mrb[12].mxu1 }
 0x45e   : > { %v1080_v6 = vpop.f32.mrb[13].mxu1  ;;  %v1087_v8 = vsub.f32 %v1982_v31, %v1078_v2 }
 0x45f   : > { %v1082_v7 = vpop.f32.mrb[14].mxu1  ;;  %v1088_v11 = vsub.f32 %v1978_v29, %v1080_v6 }
 0x460   : > { %v1089_v9 = vsub.f32 %v1976_v28, %v1082_v7  ;;  %v1084_v10 = vpop.f32.mrb[15].mxu1 }
 0x461   : > { %v1090_v12 = vsub.f32 %v1980_v30, %v1084_v10 }
 0x462   : > { %v1091_v13 = vpack.c.bf16 %v1089_v9, %v1087_v8 }
 0x463   : > { %v1092_v14 = vpack.c.bf16 %v1090_v12, %v1088_v11 }
 0x465   : > { %1296 = vmatprep.mubr.bf16.mxu0 %v1092_v14 }
 0x466   : > { %1297 = vmatmul.mubr.bf16.vlgmr.msra.gmra.mrb[4].mxu0 %v1091_v13 }
 0x539   : > { %v1298_v20 = vpop.f32.mrb[4].mxu0 }
 0x53a   : > { %v1299_v21 = vadd.f32 %v1298_v20, %v1097_v18  ;;  %v1300_v22 = vpop.f32.mrb[5].mxu0 }
 0x53b   : > { %v1301_v23 = vadd.f32 %v1300_v22, %v1101_v19  ;;  %v1302_v24 = vpop.f32.mrb[6].mxu0 }
 0x53c   : > { %v1307_v25 = vmax.f32 %v1299_v21, 0.0  ;;  %v1303_v26 = vadd.f32 %v1302_v24, %v1097_v18  ;;  %v1304_v27 = vpop.f32.mrb[7].mxu0 }
 0x53d   : > { %v1308_v32 = vmax.f32 %v1301_v23, 0.0  ;;  %v1305_v33 = vadd.f32 %v1304_v27, %v1101_v19 }
 0x53e   : > { %v1311_v34 = vadd.f32 %v1307_v25, %v1982_v31  ;;  %v1309_v17 = vmax.f32 %v1303_v26, 0.0 }
 0x53f   : > { %v1312_v15 = vadd.f32 %v1308_v32, %v1978_v29  ;;  %v1310_v35 = vmax.f32 %v1305_v33, 0.0 }
 0x540   : > { %1315 = vst [vmem:[%s322_s10] sm:$0xff] %v1311_v34  ;;  %v1313_v36 = vadd.f32 %v1309_v17, %v1976_v28 }
 0x541   : > { %1316 = vst [vmem:[%s322_s10 + $0x8] sm:$0xff] %v1312_v15  ;;  %v1314_v37 = vadd.f32 %v1310_v35, %v1980_v30 }
 0x542   : > { %1317 = vst [vmem:[%s322_s10 + $0x10] sm:$0xff] %v1313_v36 }
 0x543   : > { %1318 = vst [vmem:[%s322_s10 + $0x18] sm:$0xff] %v1314_v37 }
 0x544 PF: > { %s18_s27 = sadd.s32 1, %s1687_s27  }
 0x545   : > { %p15_p4 = scmp.ge.s32.totalorder %s18_s27, 4  }
 0x547   :  { %17 = sbr.rel (!%p15_p4) target bundleno = 1 (0x1), region = 85 }

// kernel: model_forward.11
= control target key start
LH: loop header
LB: loop body
LE: loop exit
PB: predicated region body
PF: predicated region fallthrough
CT: control target
= control target key end

     0   :  { %14 = vsyncpa [#allocation3], 0  ;;  %s12064_s0 = inlined_call_operand.hbm [shape: f32[2,1024], index: 0, kind: input, shape index: {}]   ;;  %s12065_s1 = inlined_call_operand.hbm [shape: bf16[1024,1024], index: 1, kind: input, shape index: {}]   ;;  %s12066_s2 = inlined_call_operand.hbm [shape: f32[1,1024], index: 2, kind: input, shape index: {}]   ;;  %s12067_s3 = inlined_call_operand.hbm [shape: bf16[1024,1024], index: 3, kind: input, shape index: {}]   ;;  %s12068_s4 = inlined_call_operand.hbm [shape: f32[1,1024], index: 4, kind: input, shape index: {}]   ;;  %s12069_s5 = inlined_call_operand.hbm [shape: bf16[1024,512], index: 5, kind: input, shape index: {}]   ;;  %s12070_s6 = inlined_call_operand.hbm [shape: f32[1,512], index: 6, kind: input, shape index: {}]   ;;  %s12071_s7 = inlined_call_operand.vmem [shape: f32[2,1024], index: 7, kind: output, shape index: {0}]   ;;  %s12072_s8 = inlined_call_operand.vmem [shape: f32[2,512], index: 8, kind: output, shape index: {1}]  }
   0x1   :  { %15 = vsyncpa [#allocation5], 0 }
   0x2   :  { %16 = vsyncpa [#allocation8], 0 }
   0x3   :  { %17 = vsyncpa [#allocation11], 0  ;;  %s11682_s27 = smov [#allocation4]   ;;  %s11520_s9 = scalar_lea.hbm %s12065_s1, 65536 }
   0x4   :  { %s33_s28 = sshll.u32 %s11682_s27, 4  ;;  %p11521_p0 = scmp.ne.s32.totalorder %s12065_s1, %s11520_s9  ;;  %s34_s28 = int_to_ptr.vmem [resolvable:$true] %s33_s28 }
   0x5   :  { %p11524_p1 = scmp.lt.u32.totalorder %s11520_s9, %s12065_s1 }
   0x7   :  { %p11526_p2 = pnand %p11524_p1, %p11521_p0 }
   0x9   :  { %11529 = shalt.err (!%p11526_p2)
}
   0xa   :  { %s11530_s14 = scalar_lea.vmem %s34_s28, 65536  ;;  %p11535_p4 = scmp.lt.s32.totalorder %s34_s28, %s34_s28 }
   0xb   :  { %p11531_p3 = scmp.ne.s32.totalorder %s34_s28, %s11530_s14  ;;  %p11536_p5 = scmp.lt.s32.totalorder %s11530_s14, %s11530_s14 }
   0xd   :  { %p11537_p6 = por %p11536_p5, %p11535_p4 }
   0xf   :  { %p11538_p7 = pnand %p11537_p6, %p11531_p3 }
  0x11   :  { %11541 = shalt.err (!%p11538_p7)
}
  0x12   :  { %s11683_s15 = smov 512   ;;  %s11684_s16 = smov 32  }
  0x13   :  { %39 = dma.hbm_to_vmem [thread:$0]  %s12065_s1, 65536, %s34_s28, [#allocation5], %s11683_s15, %s11683_s15, %s11684_s16  }
  0x14   :  { %s11685_s19 = smov [#allocation7]   ;;  %s11686_s21 = smov [#allocation10]  }
  0x15   :  { %s55_s20 = sshll.u32 %s11685_s19, 4  ;;  %s77_s22 = sshll.u32 %s11686_s21, 4  ;;  %s56_s20 = int_to_ptr.vmem [resolvable:$true] %s55_s20  ;;  %s78_s22 = int_to_ptr.vmem [resolvable:$true] %s77_s22 }
  0x16   :  { %s11542_s25 = scalar_lea.hbm %s12067_s3, 65536 }
  0x17   :  { %p11543_p8 = scmp.ne.s32.totalorder %s12067_s3, %s11542_s25  ;;  %p11546_p9 = scmp.lt.u32.totalorder %s11542_s25, %s12067_s3 }
  0x19   :  { %p11548_p10 = pnand %p11546_p9, %p11543_p8 }
  0x1b   :  { %11551 = shalt.err (!%p11548_p10)
}
  0x1c   :  { %s11552_s1 = scalar_lea.vmem %s56_s20, 65536  ;;  %p11557_p12 = scmp.lt.s32.totalorder %s56_s20, %s56_s20 }
  0x1d   :  { %p11553_p11 = scmp.ne.s32.totalorder %s56_s20, %s11552_s1  ;;  %p11558_p13 = scmp.lt.s32.totalorder %s11552_s1, %s11552_s1 }
  0x1f   :  { %p11559_p0 = por %p11558_p13, %p11557_p12 }
  0x21   :  { %p11560_p1 = pnand %p11559_p0, %p11553_p11 }
  0x23   :  { %11563 = shalt.err (!%p11560_p1)
}
  0x24   :  { %61 = dma.hbm_to_vmem [thread:$0]  %s12067_s3, 65536, %s56_s20, [#allocation8], %s11683_s15, %s11683_s15, %s11684_s16  }
  0x25   :  { %s11564_s12 = scalar_lea.hbm %s12069_s5, 32768 }
  0x26   :  { %p11565_p2 = scmp.ne.s32.totalorder %s12069_s5, %s11564_s12  ;;  %p11568_p3 = scmp.lt.u32.totalorder %s11564_s12, %s12069_s5 }
  0x28   :  { %p11570_p4 = pnand %p11568_p3, %p11565_p2 }
  0x2a   :  { %11573 = shalt.err (!%p11570_p4)
}
  0x2b   :  { %s11574_s19 = scalar_lea.vmem %s78_s22, 32768  ;;  %p11579_p6 = scmp.lt.s32.totalorder %s78_s22, %s78_s22 }
  0x2c   :  { %p11575_p5 = scmp.ne.s32.totalorder %s78_s22, %s11574_s19  ;;  %p11580_p7 = scmp.lt.s32.totalorder %s11574_s19, %s11574_s19 }
  0x2e   :  { %p11581_p8 = por %p11580_p7, %p11579_p6 }
  0x30   :  { %p11582_p9 = pnand %p11581_p8, %p11575_p5 }
  0x32   :  { %11585 = shalt.err (!%p11582_p9)
}
  0x33   :  { %s11687_s3 = smov 256   ;;  %s11688_s15 = smov 16  }
  0x34   :  { %83 = dma.hbm_to_vmem [thread:$0]  %s12069_s5, 32768, %s78_s22, [#allocation11], %s11687_s3, %s11687_s3, %s11688_s15  }
  0x35   :  { %s11689_s21 = smov [#allocation2]   ;;  %s11690_s24 = smov [#allocation6]  }
  0x36   :  { %s24_s23 = sshll.u32 %s11689_s21, 4  ;;  %s46_s25 = sshll.u32 %s11690_s24, 4  ;;  %s25_s23 = int_to_ptr.vmem [resolvable:$true] %s24_s23  ;;  %s47_s25 = int_to_ptr.vmem [resolvable:$true] %s46_s25 }
  0x37   :  { %s11586_s29 = scalar_lea.hbm %s12064_s0, 256 }
  0x38   :  { %p11587_p10 = scmp.ne.s32.totalorder %s12064_s0, %s11586_s29  ;;  %p11590_p11 = scmp.lt.u32.totalorder %s11586_s29, %s12064_s0 }
  0x3a   :  { %p11592_p12 = pnand %p11590_p11, %p11587_p10 }
  0x3c   :  { %11595 = shalt.err (!%p11592_p12)
}
  0x3d   :  { %s11596_s5 = scalar_lea.vmem %s25_s23, 256  ;;  %p11601_p0 = scmp.lt.s32.totalorder %s25_s23, %s25_s23 }
  0x3e   :  { %p11597_p13 = scmp.ne.s32.totalorder %s25_s23, %s11596_s5  ;;  %p11602_p1 = scmp.lt.s32.totalorder %s11596_s5, %s11596_s5 }
  0x40   :  { %p11603_p2 = por %p11602_p1, %p11601_p0 }
  0x42   :  { %p11604_p3 = pnand %p11603_p2, %p11597_p13 }
  0x44   :  { %11607 = shalt.err (!%p11604_p3)
}
  0x45   :  { %27 = dma.hbm_to_vmem [thread:$0]  %s12064_s0, 256, %s25_s23, [#allocation3]  }
  0x46   :  { %s11608_s13 = scalar_lea.hbm %s12066_s2, 128 }
  0x47   :  { %p11609_p4 = scmp.ne.s32.totalorder %s12066_s2, %s11608_s13  ;;  %p11612_p5 = scmp.lt.u32.totalorder %s11608_s13, %s12066_s2 }
  0x49   :  { %p11614_p6 = pnand %p11612_p5, %p11609_p4 }
  0x4b   :  { %11617 = shalt.err (!%p11614_p6)
}
  0x4c   :  { %s11618_s3 = scalar_lea.vmem %s47_s25, 128  ;;  %p11623_p8 = scmp.lt.s32.totalorder %s47_s25, %s47_s25 }
  0x4d   :  { %p11619_p7 = scmp.ne.s32.totalorder %s47_s25, %s11618_s3  ;;  %p11624_p9 = scmp.lt.s32.totalorder %s11618_s3, %s11618_s3 }
  0x4f   :  { %p11625_p10 = por %p11624_p9, %p11623_p8 }
  0x51   :  { %p11626_p11 = pnand %p11625_p10, %p11619_p7 }
  0x53   :  { %11629 = shalt.err (!%p11626_p11)
}
  0x54   :  { %49 = dma.hbm_to_vmem [thread:$0]  %s12066_s2, 128, %s47_s25, [#allocation5]  }
  0x55   :  { %s11691_s16 = smov [#allocation9]   ;;  %s11692_s21 = smov [#allocation12]  }
  0x56   :  { %s68_s20 = sshll.u32 %s11691_s16, 4  ;;  %s90_s23 = sshll.u32 %s11692_s21, 4  ;;  %s69_s20 = int_to_ptr.vmem [resolvable:$true] %s68_s20  ;;  %s91_s23 = int_to_ptr.vmem [resolvable:$true] %s90_s23 }
  0x57   :  { %s11630_s27 = scalar_lea.hbm %s12068_s4, 128 }
  0x58   :  { %p11631_p12 = scmp.ne.s32.totalorder %s12068_s4, %s11630_s27  ;;  %p11634_p13 = scmp.lt.u32.totalorder %s11630_s27, %s12068_s4 }
  0x5a   :  { %p11636_p0 = pnand %p11634_p13, %p11631_p12 }
  0x5c   :  { %11639 = shalt.err (!%p11636_p0)
}
  0x5d   :  { %s11640_s2 = scalar_lea.vmem %s69_s20, 128  ;;  %p11645_p2 = scmp.lt.s32.totalorder %s69_s20, %s69_s20 }
  0x5e   :  { %p11641_p1 = scmp.ne.s32.totalorder %s69_s20, %s11640_s2  ;;  %p11646_p3 = scmp.lt.s32.totalorder %s11640_s2, %s11640_s2 }
  0x60   :  { %p11647_p4 = por %p11646_p3, %p11645_p2 }
  0x62   :  { %p11648_p5 = pnand %p11647_p4, %p11641_p1 }
  0x64   :  { %11651 = shalt.err (!%p11648_p5)
}
  0x65   :  { %71 = dma.hbm_to_vmem [thread:$0]  %s12068_s4, 128, %s69_s20, [#allocation8]  }
  0x66   :  { %s11652_s10 = scalar_lea.hbm %s12070_s6, 64 }
  0x67   :  { %p11653_p6 = scmp.ne.s32.totalorder %s12070_s6, %s11652_s10  ;;  %p11656_p7 = scmp.lt.u32.totalorder %s11652_s10, %s12070_s6 }
  0x69   :  { %p11658_p8 = pnand %p11656_p7, %p11653_p6 }
  0x6b   :  { %11661 = shalt.err (!%p11658_p8)
}
  0x6c   :  { %s11662_s17 = scalar_lea.vmem %s91_s23, 64  ;;  %p11667_p10 = scmp.lt.s32.totalorder %s91_s23, %s91_s23 }
  0x6d   :  { %p11663_p9 = scmp.ne.s32.totalorder %s91_s23, %s11662_s17  ;;  %p11668_p11 = scmp.lt.s32.totalorder %s11662_s17, %s11662_s17 }
  0x6f   :  { %p11669_p12 = por %p11668_p11, %p11667_p10 }
  0x71   :  { %p11670_p13 = pnand %p11669_p12, %p11663_p9 }
  0x73   :  { %11673 = shalt.err (!%p11670_p13)
}
  0x74   :  { %93 = dma.hbm_to_vmem [thread:$0]  %s12070_s6, 64, %s91_s23, [#allocation11]  }
  0x75   :  { %11674 = dma.done.wait [#allocation3], 256  }
  0x76   :  { %11675 = vsyncadd [#allocation3], 4294967040 }
  0x77   :  { %11676 = dma.done.wait [#allocation5], 65664  }
  0x78   :  { %11677 = vsyncadd [#allocation5], 4294901632 }
  0x79   :  { %11678 = dma.done.wait [#allocation8], 65664  }
  0x7a   :  { %11679 = vsyncadd [#allocation8], 4294901632 }
  0x7b   :  { %11680 = dma.done.wait [#allocation11], 32832  }
  0x7c   :  { %11681 = vsyncadd [#allocation11], 4294934464  ;;  %v169_v0 = vld [vmem:[#allocation4] sm:$0xff]  ;;  %v170_v2 = vld [vmem:[#allocation4 + $0x8] sm:$0xff]  ;;  %v11693_v32 = vmov 1983009808   ;;  %v123_v34 = vlaneseq }
  0x7d   :  { %v173_v1 = vld [vmem:[#allocation4 + $0x20] sm:$0xff]  ;;  %v174_v4 = vld [vmem:[#allocation4 + $0x28] sm:$0xff]  ;;  %v121_v33 = vunpack.c.l.s4 %v11693_v32  ;;  %v11828_v59 = vld [vmem:[#allocation2] sm:$0xff] }
  0x7e   :  { %v9701_v3 = vcombine.high %v169_v0, %v173_v1  ;;  %v9700_v5 = vcombine.low %v169_v0, %v173_v1  ;;  %v177_v6 = vld [vmem:[#allocation4 + $0x40] sm:$0xff]  ;;  %v9703_v8 = vcombine.high %v170_v2, %v174_v4  ;;  %v9702_v9 = vcombine.low %v170_v2, %v174_v4  ;;  %v178_v11 = vld [vmem:[#allocation4 + $0x48] sm:$0xff] }
  0x7f   :  { %v181_v7 = vld [vmem:[#allocation4 + $0x60] sm:$0xff]  ;;  %v182_v12 = vld [vmem:[#allocation4 + $0x68] sm:$0xff]  ;;  %v122_v43 = vunpack.c.0.s8 %v121_v33  ;;  %v11823_v44 = vshrl.u32 %v123_v34, 7 }
  0x80   :  { %v9709_v10 = vcombine.high %v177_v6, %v181_v7  ;;  %v185_v13 = vld [vmem:[#allocation4 + $0x80] sm:$0xff]  ;;  %3283 = vmatprep.subr.bf16.mxu0 %v9701_v3  ;;  %v9711_v14 = vcombine.high %v178_v11, %v182_v12  ;;  %v186_v16 = vld [vmem:[#allocation4 + $0x88] sm:$0xff]  ;;  %3447 = vmatprep.subr.bf16.mxu1 %v9703_v8  ;;  %v9708_v18 = vcombine.low %v177_v6, %v181_v7 }
  0x81   :  { %v189_v15 = vld [vmem:[#allocation4 + $0xa0] sm:$0xff]  ;;  %v190_v17 = vld [vmem:[#allocation4 + $0xa8] sm:$0xff]  ;;  %3284 = vmatpush1.bf16.msra.mxu0 %v9700_v5  ;;  %3448 = vmatpush1.bf16.msra.mxu1 %v9702_v9  ;;  %v9710_v19 = vcombine.low %v178_v11, %v182_v12  ;;  %v11826_v53 = vsub.s32 %v122_v43, %v11823_v44 }
  0x82   :  { %3285 = vmatprep.subr.bf16.mxu0 %v9709_v10  ;;  %v9717_v20 = vcombine.high %v185_v13, %v189_v15  ;;  %3449 = vmatprep.subr.bf16.mxu1 %v9711_v14  ;;  %v9719_v21 = vcombine.high %v186_v16, %v190_v17  ;;  %v193_v22 = vld [vmem:[#allocation4 + $0xc0] sm:$0xff]  ;;  %v194_v24 = vld [vmem:[#allocation4 + $0xc8] sm:$0xff]  ;;  %v9716_v26 = vcombine.low %v185_v13, %v189_v15 }
  0x83   :  { %v197_v23 = vld [vmem:[#allocation4 + $0xe0] sm:$0xff]  ;;  %v198_v25 = vld [vmem:[#allocation4 + $0xe8] sm:$0xff]  ;;  %v9718_v27 = vcombine.low %v186_v16, %v190_v17  ;;  %v11832_v63 = vrot.slane %v11828_v59, %v11826_v53 }
  0x84   :  { %v9725_v28 = vcombine.high %v193_v22, %v197_v23  ;;  %v9727_v29 = vcombine.high %v194_v24, %v198_v25  ;;  %v201_v30 = vld [vmem:[#allocation4 + $0x100] sm:$0xff]  ;;  %v202_v35 = vld [vmem:[#allocation4 + $0x108] sm:$0xff]  ;;  %v9724_v37 = vcombine.low %v193_v22, %v197_v23  ;;  %v9726_v38 = vcombine.low %v194_v24, %v198_v25 }
  0x85   :  { %3286 = vmatpush1.bf16.msra.mxu0 %v9708_v18  ;;  %3450 = vmatpush1.bf16.msra.mxu1 %v9710_v19  ;;  %v205_v31 = vld [vmem:[#allocation4 + $0x120] sm:$0xff]  ;;  %v206_v36 = vld [vmem:[#allocation4 + $0x128] sm:$0xff]  ;;  %v134_v3 = vcombine.high %v11832_v63, %v11832_v63 }
  0x86   :  { %3287 = vmatprep.subr.bf16.mxu0 %v9717_v20  ;;  %3451 = vmatprep.subr.bf16.mxu1 %v9719_v21  ;;  %v9733_v39 = vcombine.high %v201_v30, %v205_v31  ;;  %v9735_v40 = vcombine.high %v202_v35, %v206_v36  ;;  %v209_v41 = vld [vmem:[#allocation4 + $0x140] sm:$0xff]  ;;  %v210_v45 = vld [vmem:[#allocation4 + $0x148] sm:$0xff]  ;;  %v9732_v47 = vcombine.low %v201_v30, %v205_v31 }
  0x87   :  { %v213_v42 = vld [vmem:[#allocation4 + $0x160] sm:$0xff]  ;;  %v214_v46 = vld [vmem:[#allocation4 + $0x168] sm:$0xff]  ;;  %v9734_v48 = vcombine.low %v202_v35, %v206_v36  ;;  %v11836_v9 = vpack.c.bf16 %v134_v3, %v134_v3 }
  0x88   :  { %v9741_v49 = vcombine.high %v209_v41, %v213_v42  ;;  %v9743_v50 = vcombine.high %v210_v45, %v214_v46  ;;  %v217_v51 = vld [vmem:[#allocation4 + $0x180] sm:$0xff]  ;;  %v218_v54 = vld [vmem:[#allocation4 + $0x188] sm:$0xff]  ;;  %v9740_v56 = vcombine.low %v209_v41, %v213_v42  ;;  %v9742_v57 = vcombine.low %v210_v45, %v214_v46 }
  0x89   :  { %3288 = vmatpush1.bf16.msra.mxu0 %v9716_v26  ;;  %3452 = vmatpush1.bf16.msra.mxu1 %v9718_v27  ;;  %v221_v52 = vld [vmem:[#allocation4 + $0x1a0] sm:$0xff]  ;;  %v222_v55 = vld [vmem:[#allocation4 + $0x1a8] sm:$0xff] }
  0x8a   :  { %3289 = vmatprep.subr.bf16.mxu0 %v9725_v28  ;;  %3453 = vmatprep.subr.bf16.mxu1 %v9727_v29  ;;  %v9749_v58 = vcombine.high %v217_v51, %v221_v52  ;;  %v9751_v60 = vcombine.high %v218_v54, %v222_v55  ;;  %v225_v61 = vld [vmem:[#allocation4 + $0x1c0] sm:$0xff]  ;;  %v226_v0 = vld [vmem:[#allocation4 + $0x1c8] sm:$0xff]  ;;  %v9748_v2 = vcombine.low %v217_v51, %v221_v52 }
  0x8b   :  { %v229_v62 = vld [vmem:[#allocation4 + $0x1e0] sm:$0xff]  ;;  %v230_v1 = vld [vmem:[#allocation4 + $0x1e8] sm:$0xff]  ;;  %v9750_v4 = vcombine.low %v218_v54, %v222_v55  ;;  %3315 = vmatprep.mubr.bf16.mxu0 %v11836_v9  ;;  %3479 = vmatprep.mubr.bf16.mxu1 %v11836_v9 }
  0x8c   :  { %v9757_v5 = vcombine.high %v225_v61, %v229_v62  ;;  %v9759_v6 = vcombine.high %v226_v0, %v230_v1  ;;  %v233_v7 = vld [vmem:[#allocation4 + $0x200] sm:$0xff]  ;;  %v234_v10 = vld [vmem:[#allocation4 + $0x208] sm:$0xff]  ;;  %v9756_v12 = vcombine.low %v225_v61, %v229_v62  ;;  %v9758_v13 = vcombine.low %v226_v0, %v230_v1 }
  0x8d   :  { %3290 = vmatpush1.bf16.msra.mxu0 %v9724_v37  ;;  %3454 = vmatpush1.bf16.msra.mxu1 %v9726_v38  ;;  %v237_v8 = vld [vmem:[#allocation4 + $0x220] sm:$0xff]  ;;  %v238_v11 = vld [vmem:[#allocation4 + $0x228] sm:$0xff] }
  0x8e   :  { %3291 = vmatprep.subr.bf16.mxu0 %v9733_v39  ;;  %3455 = vmatprep.subr.bf16.mxu1 %v9735_v40  ;;  %v9765_v14 = vcombine.high %v233_v7, %v237_v8  ;;  %v9767_v15 = vcombine.high %v234_v10, %v238_v11  ;;  %v241_v16 = vld [vmem:[#allocation4 + $0x240] sm:$0xff]  ;;  %v242_v18 = vld [vmem:[#allocation4 + $0x248] sm:$0xff]  ;;  %v9764_v20 = vcombine.low %v233_v7, %v237_v8 }
  0x8f   :  { %v245_v17 = vld [vmem:[#allocation4 + $0x260] sm:$0xff]  ;;  %v246_v19 = vld [vmem:[#allocation4 + $0x268] sm:$0xff]  ;;  %v9766_v21 = vcombine.low %v234_v10, %v238_v11 }
  0x90   :  { %v9773_v22 = vcombine.high %v241_v16, %v245_v17  ;;  %v9775_v23 = vcombine.high %v242_v18, %v246_v19  ;;  %v249_v24 = vld [vmem:[#allocation4 + $0x280] sm:$0xff]  ;;  %v250_v26 = vld [vmem:[#allocation4 + $0x288] sm:$0xff]  ;;  %v9772_v28 = vcombine.low %v241_v16, %v245_v17  ;;  %v9774_v29 = vcombine.low %v242_v18, %v246_v19 }
  0x91   :  { %3292 = vmatpush1.bf16.msra.mxu0 %v9732_v47  ;;  %3456 = vmatpush1.bf16.msra.mxu1 %v9734_v48  ;;  %v253_v25 = vld [vmem:[#allocation4 + $0x2a0] sm:$0xff]  ;;  %v254_v27 = vld [vmem:[#allocation4 + $0x2a8] sm:$0xff] }
  0x92   :  { %3293 = vmatprep.subr.bf16.mxu0 %v9741_v49  ;;  %3457 = vmatprep.subr.bf16.mxu1 %v9743_v50  ;;  %v9781_v30 = vcombine.high %v249_v24, %v253_v25  ;;  %v9783_v31 = vcombine.high %v250_v26, %v254_v27  ;;  %v257_v32 = vld [vmem:[#allocation4 + $0x2c0] sm:$0xff]  ;;  %v258_v34 = vld [vmem:[#allocation4 + $0x2c8] sm:$0xff]  ;;  %v9780_v36 = vcombine.low %v249_v24, %v253_v25 }
  0x93   :  { %v261_v33 = vld [vmem:[#allocation4 + $0x2e0] sm:$0xff]  ;;  %v262_v35 = vld [vmem:[#allocation4 + $0x2e8] sm:$0xff]  ;;  %v9782_v37 = vcombine.low %v250_v26, %v254_v27  ;;  %v11849_v25 = vpack.c.bf16 %v11832_v63, %v11832_v63 }
  0x94   :  { %v9789_v38 = vcombine.high %v257_v32, %v261_v33  ;;  %v9791_v39 = vcombine.high %v258_v34, %v262_v35  ;;  %v265_v40 = vld [vmem:[#allocation4 + $0x300] sm:$0xff]  ;;  %v266_v42 = vld [vmem:[#allocation4 + $0x308] sm:$0xff]  ;;  %v9788_v45 = vcombine.low %v257_v32, %v261_v33  ;;  %v9790_v46 = vcombine.low %v258_v34, %v262_v35 }
  0x95   :  { %3294 = vmatpush1.bf16.msra.mxu0 %v9740_v56  ;;  %3458 = vmatpush1.bf16.msra.mxu1 %v9742_v57  ;;  %v269_v41 = vld [vmem:[#allocation4 + $0x320] sm:$0xff]  ;;  %v270_v43 = vld [vmem:[#allocation4 + $0x328] sm:$0xff] }
  0x96   :  { %3295 = vmatprep.subr.bf16.mxu0 %v9749_v58  ;;  %3459 = vmatprep.subr.bf16.mxu1 %v9751_v60  ;;  %v9797_v47 = vcombine.high %v265_v40, %v269_v41  ;;  %v9799_v48 = vcombine.high %v266_v42, %v270_v43  ;;  %v273_v49 = vld [vmem:[#allocation4 + $0x340] sm:$0xff]  ;;  %v274_v51 = vld [vmem:[#allocation4 + $0x348] sm:$0xff]  ;;  %v9796_v54 = vcombine.low %v265_v40, %v269_v41 }
  0x97   :  { %v277_v50 = vld [vmem:[#allocation4 + $0x360] sm:$0xff]  ;;  %v278_v52 = vld [vmem:[#allocation4 + $0x368] sm:$0xff]  ;;  %v9798_v55 = vcombine.low %v266_v42, %v270_v43 }
  0x98   :  { %v9805_v56 = vcombine.high %v273_v49, %v277_v50  ;;  %v9807_v57 = vcombine.high %v274_v51, %v278_v52  ;;  %v281_v58 = vld [vmem:[#allocation4 + $0x380] sm:$0xff]  ;;  %v282_v61 = vld [vmem:[#allocation4 + $0x388] sm:$0xff]  ;;  %v9804_v0 = vcombine.low %v273_v49, %v277_v50  ;;  %v9806_v1 = vcombine.low %v274_v51, %v278_v52 }
  0x99   :  { %3296 = vmatpush1.bf16.msra.mxu0 %v9748_v2  ;;  %3460 = vmatpush1.bf16.msra.mxu1 %v9750_v4  ;;  %v285_v60 = vld [vmem:[#allocation4 + $0x3a0] sm:$0xff]  ;;  %v286_v62 = vld [vmem:[#allocation4 + $0x3a8] sm:$0xff] }
  0x9a   :  { %3297 = vmatprep.subr.bf16.mxu0 %v9757_v5  ;;  %3461 = vmatprep.subr.bf16.mxu1 %v9759_v6  ;;  %v9813_v2 = vcombine.high %v281_v58, %v285_v60  ;;  %v9815_v3 = vcombine.high %v282_v61, %v286_v62  ;;  %v289_v4 = vld [vmem:[#allocation4 + $0x3c0] sm:$0xff]  ;;  %v119_v6 = vcombine.high %v11828_v59, %v11828_v59  ;;  %v290_v7 = vld [vmem:[#allocation4 + $0x3c8] sm:$0xff] }
  0x9b   :  { %v293_v5 = vld [vmem:[#allocation4 + $0x3e0] sm:$0xff]  ;;  %v294_v8 = vld [vmem:[#allocation4 + $0x3e8] sm:$0xff]  ;;  %v9812_v10 = vcombine.low %v281_v58, %v285_v60  ;;  %v9814_v11 = vcombine.low %v282_v61, %v286_v62 }
  0x9c   :  { %v11843_v16 = vrot.slane %v119_v6, %v11826_v53  ;;  %v298_v17 = vld [vmem:[#allocation4 + $0x408] sm:$0xff]  ;;  %v9820_v19 = vcombine.low %v289_v4, %v293_v5  ;;  %v9822_v59 = vcombine.low %v290_v7, %v294_v8  ;;  %v317_v32 = vld [vmem:[#allocation4 + $0x4a0] sm:$0xff] }
  0x9d   :  { %3298 = vmatpush1.bf16.msra.mxu0 %v9756_v12  ;;  %3462 = vmatpush1.bf16.msra.mxu1 %v9758_v13  ;;  %v9821_v12 = vcombine.high %v289_v4, %v293_v5  ;;  %v9823_v13 = vcombine.high %v290_v7, %v294_v8  ;;  %v302_v18 = vld [vmem:[#allocation4 + $0x428] sm:$0xff]  ;;  %v325_v40 = vld [vmem:[#allocation4 + $0x4e0] sm:$0xff] }
  0x9e   :  { %3299 = vmatprep.subr.bf16.mxu0 %v9765_v14  ;;  %3463 = vmatprep.subr.bf16.mxu1 %v9767_v15  ;;  %v297_v14 = vld [vmem:[#allocation4 + $0x400] sm:$0xff]  ;;  %v135_v24 = vcombine.high %v11843_v16, %v11843_v16  ;;  %v306_v26 = vld [vmem:[#allocation4 + $0x448] sm:$0xff] }
  0x9f   :  { %v301_v15 = vld [vmem:[#allocation4 + $0x420] sm:$0xff]  ;;  %v310_v27 = vld [vmem:[#allocation4 + $0x468] sm:$0xff] }
  0xa0   :  { %v314_v33 = vld [vmem:[#allocation4 + $0x488] sm:$0xff]  ;;  %v9839_v34 = vcombine.high %v306_v26, %v310_v27  ;;  %v333_v49 = vld [vmem:[#allocation4 + $0x520] sm:$0xff] }
  0xa1   :  { %3300 = vmatpush1.bf16.msra.mxu0 %v9764_v20  ;;  %3464 = vmatpush1.bf16.msra.mxu1 %v9766_v21  ;;  %v9829_v20 = vcombine.high %v297_v14, %v301_v15  ;;  %v9831_v21 = vcombine.high %v298_v17, %v302_v18  ;;  %v318_v35 = vld [vmem:[#allocation4 + $0x4a8] sm:$0xff]  ;;  %v341_v58 = vld [vmem:[#allocation4 + $0x560] sm:$0xff] }
  0xa2   :  { %3301 = vmatprep.subr.bf16.mxu0 %v9773_v22  ;;  %3465 = vmatprep.subr.bf16.mxu1 %v9775_v23  ;;  %v305_v22 = vld [vmem:[#allocation4 + $0x440] sm:$0xff]  ;;  %v322_v41 = vld [vmem:[#allocation4 + $0x4c8] sm:$0xff]  ;;  %v9847_v42 = vcombine.high %v314_v33, %v318_v35 }
  0xa3   :  { %v309_v23 = vld [vmem:[#allocation4 + $0x460] sm:$0xff]  ;;  %v326_v43 = vld [vmem:[#allocation4 + $0x4e8] sm:$0xff] }
  0xa4   :  { %v9836_v63 = vcombine.low %v305_v22, %v309_v23  ;;  %v330_v50 = vld [vmem:[#allocation4 + $0x508] sm:$0xff]  ;;  %v9855_v51 = vcombine.high %v322_v41, %v326_v43  ;;  %v349_v4 = vld [vmem:[#allocation4 + $0x5a0] sm:$0xff] }
  0xa5   :  { %3302 = vmatpush1.bf16.msra.mxu0 %v9772_v28  ;;  %3466 = vmatpush1.bf16.msra.mxu1 %v9774_v29  ;;  %v9828_v28 = vcombine.low %v297_v14, %v301_v15  ;;  %v9830_v29 = vcombine.low %v298_v17, %v302_v18  ;;  %v334_v52 = vld [vmem:[#allocation4 + $0x528] sm:$0xff] }
  0xa6   :  { %3303 = vmatprep.subr.bf16.mxu0 %v9781_v30  ;;  %3467 = vmatprep.subr.bf16.mxu1 %v9783_v31  ;;  %v9837_v30 = vcombine.high %v305_v22, %v309_v23  ;;  %v313_v31 = vld [vmem:[#allocation4 + $0x480] sm:$0xff]  ;;  %v338_v60 = vld [vmem:[#allocation4 + $0x548] sm:$0xff]  ;;  %v9863_v61 = vcombine.high %v330_v50, %v334_v52 }
  0xa7   :  { %v342_v62 = vld [vmem:[#allocation4 + $0x568] sm:$0xff] }
  0xa8   :  { %v346_v5 = vld [vmem:[#allocation4 + $0x588] sm:$0xff]  ;;  %v9871_v6 = vcombine.high %v338_v60, %v342_v62 }
  0xa9   :  { %3304 = vmatpush1.bf16.msra.mxu0 %v9780_v36  ;;  %3468 = vmatpush1.bf16.msra.mxu1 %v9782_v37  ;;  %v11851_v36 = vpack.c.bf16 %v135_v24, %v135_v24  ;;  %v9838_v37 = vcombine.low %v306_v26, %v310_v27  ;;  %v350_v7 = vld [vmem:[#allocation4 + $0x5a8] sm:$0xff] }
  0xaa   :  { %3305 = vmatprep.subr.bf16.mxu0 %v9789_v38  ;;  %3469 = vmatprep.subr.bf16.mxu1 %v9791_v39  ;;  %v9845_v38 = vcombine.high %v313_v31, %v317_v32  ;;  %v321_v39 = vld [vmem:[#allocation4 + $0x4c0] sm:$0xff]  ;;  %v354_v14 = vld [vmem:[#allocation4 + $0x5c8] sm:$0xff]  ;;  %v9879_v15 = vcombine.high %v346_v5, %v350_v7 }
  0xab   :  { %v358_v17 = vld [vmem:[#allocation4 + $0x5e8] sm:$0xff] }
  0xac   :  { %v362_v22 = vld [vmem:[#allocation4 + $0x608] sm:$0xff]  ;;  %v9887_v23 = vcombine.high %v354_v14, %v358_v17  ;;  %v9886_v27 = vcombine.low %v354_v14, %v358_v17  ;;  %v417_v17 = vld [vmem:[#allocation4 + $0x7c0] sm:$0xff] }
  0xad   :  { %3306 = vmatpush1.bf16.msra.mxu0 %v9788_v45  ;;  %3470 = vmatpush1.bf16.msra.mxu1 %v9790_v46  ;;  %v9844_v45 = vcombine.low %v313_v31, %v317_v32  ;;  %v9846_v46 = vcombine.low %v314_v33, %v318_v35  ;;  %v366_v24 = vld [vmem:[#allocation4 + $0x628] sm:$0xff] }
  0xae   :  { %3307 = vmatprep.subr.bf16.mxu0 %v9797_v47  ;;  %3471 = vmatprep.subr.bf16.mxu1 %v9799_v48  ;;  %v9853_v47 = vcombine.high %v321_v39, %v325_v40  ;;  %v329_v48 = vld [vmem:[#allocation4 + $0x500] sm:$0xff]  ;;  %v370_v31 = vld [vmem:[#allocation4 + $0x648] sm:$0xff]  ;;  %v9895_v32 = vcombine.high %v362_v22, %v366_v24  ;;  %v9894_v35 = vcombine.low %v362_v22, %v366_v24 }
  0xaf   :  { %v374_v33 = vld [vmem:[#allocation4 + $0x668] sm:$0xff] }
  0xb0   :  { %v414_v14 = vld [vmem:[#allocation4 + $0x7a8] sm:$0xff] }
  0xb1   :  { %3308 = vmatpush1.bf16.msra.mxu0 %v9796_v54  ;;  %3472 = vmatpush1.bf16.msra.mxu1 %v9798_v55  ;;  %v9852_v54 = vcombine.low %v321_v39, %v325_v40  ;;  %v9854_v55 = vcombine.low %v322_v41, %v326_v43  ;;  %v378_v39 = vld [vmem:[#allocation4 + $0x688] sm:$0xff]  ;;  %v9903_v40 = vcombine.high %v370_v31, %v374_v33 }
  0xb2   :  { %3309 = vmatprep.subr.bf16.mxu0 %v9805_v56  ;;  %3473 = vmatprep.subr.bf16.mxu1 %v9807_v57  ;;  %v9861_v56 = vcombine.high %v329_v48, %v333_v49  ;;  %v337_v57 = vld [vmem:[#allocation4 + $0x540] sm:$0xff]  ;;  %v382_v41 = vld [vmem:[#allocation4 + $0x6a8] sm:$0xff]  ;;  %v9902_v43 = vcombine.low %v370_v31, %v374_v33 }
  0xb3   :  { %v9868_v8 = vcombine.low %v337_v57, %v341_v58 }
  0xb5   :  { %3310 = vmatpush1.bf16.msra.mxu0 %v9804_v0  ;;  %3474 = vmatpush1.bf16.msra.mxu1 %v9806_v1  ;;  %v9860_v0 = vcombine.low %v329_v48, %v333_v49  ;;  %v9862_v1 = vcombine.low %v330_v50, %v334_v52  ;;  %v386_v48 = vld [vmem:[#allocation4 + $0x6c8] sm:$0xff]  ;;  %v9911_v49 = vcombine.high %v378_v39, %v382_v41 }
  0xb6   :  { %3311 = vmatprep.subr.bf16.mxu0 %v9813_v2  ;;  %3475 = vmatprep.subr.bf16.mxu1 %v9815_v3  ;;  %v9869_v2 = vcombine.high %v337_v57, %v341_v58  ;;  %v345_v3 = vld [vmem:[#allocation4 + $0x580] sm:$0xff]  ;;  %v390_v50 = vld [vmem:[#allocation4 + $0x6e8] sm:$0xff]  ;;  %v9910_v52 = vcombine.low %v378_v39, %v382_v41 }
  0xb7   :  { %v9876_v18 = vcombine.low %v345_v3, %v349_v4  ;;  %v394_v57 = vld [vmem:[#allocation4 + $0x708] sm:$0xff]  ;;  %v9919_v58 = vcombine.high %v386_v48, %v390_v50 }
  0xb8   :  { %v434_v39 = vld [vmem:[#allocation4 + $0x848] sm:$0xff] }
  0xb9   :  { %3312 = vmatpush1.bf16.msra.mxu0 %v9812_v10  ;;  %3476 = vmatpush1.bf16.msra.mxu1 %v9814_v11  ;;  %v9870_v10 = vcombine.low %v338_v60, %v342_v62  ;;  %v9877_v11 = vcombine.high %v345_v3, %v349_v4  ;;  %v398_v60 = vld [vmem:[#allocation4 + $0x728] sm:$0xff]  ;;  %v9918_v62 = vcombine.low %v386_v48, %v390_v50  ;;  %v441_v48 = vld [vmem:[#allocation4 + $0x880] sm:$0xff] }
  0xba   :  { %3313 = vmatprep.subr.bf16.mxu0 %v9821_v12  ;;  %3477 = vmatprep.subr.bf16.mxu1 %v9823_v13  ;;  %v353_v12 = vld [vmem:[#allocation4 + $0x5c0] sm:$0xff]  ;;  %v402_v3 = vld [vmem:[#allocation4 + $0x748] sm:$0xff]  ;;  %v9927_v4 = vcombine.high %v394_v57, %v398_v60 }
  0xbb   :  { %v357_v13 = vld [vmem:[#allocation4 + $0x5e0] sm:$0xff]  ;;  %v438_v41 = vld [vmem:[#allocation4 + $0x868] sm:$0xff] }
  0xbc   :  { %v9884_v26 = vcombine.low %v353_v12, %v357_v13  ;;  %v442_v50 = vld [vmem:[#allocation4 + $0x888] sm:$0xff] }
  0xbd   :  { %3314 = vmatpush1.bf16.msra.mxu0 %v9820_v19  ;;  %3478 = vmatpush1.bf16.msra.mxu1 %v9822_v59  ;;  %v9878_v19 = vcombine.low %v346_v5, %v350_v7  ;;  %v9885_v59 = vcombine.high %v353_v12, %v357_v13  ;;  %v406_v5 = vld [vmem:[#allocation4 + $0x768] sm:$0xff]  ;;  %v9926_v7 = vcombine.low %v394_v57, %v398_v60  ;;  %v449_v57 = vld [vmem:[#allocation4 + $0x8c0] sm:$0xff] }
  0xbe   :  { %3324 = vmatprep.subr.bf16.mxu0 %v9829_v20  ;;  %3488 = vmatprep.subr.bf16.mxu1 %v9831_v21  ;;  %v361_v20 = vld [vmem:[#allocation4 + $0x600] sm:$0xff]  ;;  %v410_v12 = vld [vmem:[#allocation4 + $0x788] sm:$0xff]  ;;  %v9935_v13 = vcombine.high %v402_v3, %v406_v5 }
  0xbf   :  { %v365_v21 = vld [vmem:[#allocation4 + $0x620] sm:$0xff]  ;;  %v9943_v22 = vcombine.high %v410_v12, %v414_v14  ;;  %v450_v60 = vld [vmem:[#allocation4 + $0x8c8] sm:$0xff] }
  0xc0   :  { %3316 = vmatmul.mubr.bf16.vlgmr.msra.gmra.mrb[0].mxu0 %v11849_v25  ;;  %3480 = vmatmul.mubr.bf16.vlgmr.msra.gmra.mrb[0].mxu1 %v11849_v25 }
  0xc1   :  { %3325 = vmatpush1.bf16.msra.mxu0 %v9828_v28  ;;  %3489 = vmatpush1.bf16.msra.mxu1 %v9830_v29  ;;  %v9893_v28 = vcombine.high %v361_v20, %v365_v21  ;;  %v369_v29 = vld [vmem:[#allocation4 + $0x640] sm:$0xff] }
  0xc2   :  { %3326 = vmatprep.subr.bf16.mxu0 %v9837_v30  ;;  %3490 = vmatprep.subr.bf16.mxu1 %v9839_v34  ;;  %v373_v30 = vld [vmem:[#allocation4 + $0x660] sm:$0xff]  ;;  %v9892_v34 = vcombine.low %v361_v20, %v365_v21  ;;  %v418_v20 = vld [vmem:[#allocation4 + $0x7c8] sm:$0xff] }
  0xc3   :  { %3356 = vmatprep.mubr.bf16.mxu0 %v11851_v36  ;;  %3520 = vmatprep.mubr.bf16.mxu1 %v11851_v36  ;;  %v422_v21 = vld [vmem:[#allocation4 + $0x7e8] sm:$0xff] }
  0xc4   :  { %v9951_v31 = vcombine.high %v418_v20, %v422_v21 }
  0xc5   :  { %3327 = vmatpush1.bf16.msra.mxu0 %v9836_v63  ;;  %3491 = vmatpush1.bf16.msra.mxu1 %v9838_v37  ;;  %v9901_v63 = vcombine.high %v369_v29, %v373_v30  ;;  %v377_v37 = vld [vmem:[#allocation4 + $0x680] sm:$0xff] }
  0xc6   :  { %3328 = vmatprep.subr.bf16.mxu0 %v9845_v38  ;;  %3492 = vmatprep.subr.bf16.mxu1 %v9847_v42  ;;  %v381_v38 = vld [vmem:[#allocation4 + $0x6a0] sm:$0xff]  ;;  %v9900_v42 = vcombine.low %v369_v29, %v373_v30  ;;  %v426_v30 = vld [vmem:[#allocation4 + $0x808] sm:$0xff] }
  0xc7   :  { %v429_v29 = vld [vmem:[#allocation4 + $0x820] sm:$0xff] }
  0xc9   :  { %3329 = vmatpush1.bf16.msra.mxu0 %v9844_v45  ;;  %3493 = vmatpush1.bf16.msra.mxu1 %v9846_v46  ;;  %v9909_v45 = vcombine.high %v377_v37, %v381_v38  ;;  %v385_v46 = vld [vmem:[#allocation4 + $0x6c0] sm:$0xff] }
  0xca   :  { %3330 = vmatprep.subr.bf16.mxu0 %v9853_v47  ;;  %3494 = vmatprep.subr.bf16.mxu1 %v9855_v51  ;;  %v389_v47 = vld [vmem:[#allocation4 + $0x6e0] sm:$0xff]  ;;  %v9908_v51 = vcombine.low %v377_v37, %v381_v38 }
  0xcb   :  { %v433_v37 = vld [vmem:[#allocation4 + $0x840] sm:$0xff] }
  0xcc   :  { %v437_v38 = vld [vmem:[#allocation4 + $0x860] sm:$0xff] }
  0xcd   :  { %3331 = vmatpush1.bf16.msra.mxu0 %v9852_v54  ;;  %3495 = vmatpush1.bf16.msra.mxu1 %v9854_v55  ;;  %v9917_v54 = vcombine.high %v385_v46, %v389_v47  ;;  %v393_v55 = vld [vmem:[#allocation4 + $0x700] sm:$0xff] }
  0xce   :  { %3332 = vmatprep.subr.bf16.mxu0 %v9861_v56  ;;  %3496 = vmatprep.subr.bf16.mxu1 %v9863_v61  ;;  %v397_v56 = vld [vmem:[#allocation4 + $0x720] sm:$0xff]  ;;  %v9916_v61 = vcombine.low %v385_v46, %v389_v47  ;;  %v9965_v47 = vcombine.high %v433_v37, %v437_v38 }
  0xd1   :  { %3333 = vmatpush1.bf16.msra.mxu0 %v9860_v0  ;;  %3497 = vmatpush1.bf16.msra.mxu1 %v9862_v1  ;;  %v9925_v0 = vcombine.high %v393_v55, %v397_v56  ;;  %v401_v1 = vld [vmem:[#allocation4 + $0x740] sm:$0xff] }
  0xd2   :  { %3334 = vmatprep.subr.bf16.mxu0 %v9869_v2  ;;  %3498 = vmatprep.subr.bf16.mxu1 %v9871_v6  ;;  %v405_v2 = vld [vmem:[#allocation4 + $0x760] sm:$0xff]  ;;  %v9924_v6 = vcombine.low %v393_v55, %v397_v56  ;;  %v9966_v55 = vcombine.low %v434_v39, %v438_v41 }
  0xd5   :  { %3335 = vmatpush1.bf16.msra.mxu0 %v9868_v8  ;;  %3499 = vmatpush1.bf16.msra.mxu1 %v9870_v10  ;;  %v9933_v8 = vcombine.high %v401_v1, %v405_v2  ;;  %v409_v10 = vld [vmem:[#allocation4 + $0x780] sm:$0xff] }
  0xd6   :  { %3336 = vmatprep.subr.bf16.mxu0 %v9877_v11  ;;  %3500 = vmatprep.subr.bf16.mxu1 %v9879_v15  ;;  %v413_v11 = vld [vmem:[#allocation4 + $0x7a0] sm:$0xff]  ;;  %v9932_v15 = vcombine.low %v401_v1, %v405_v2 }
  0xd7   :  { %v9940_v24 = vcombine.low %v409_v10, %v413_v11 }
  0xd9   :  { %3337 = vmatpush1.bf16.msra.mxu0 %v9876_v18  ;;  %3501 = vmatpush1.bf16.msra.mxu1 %v9878_v19  ;;  %v9934_v18 = vcombine.low %v402_v3, %v406_v5  ;;  %v9941_v19 = vcombine.high %v409_v10, %v413_v11  ;;  %v457_v3 = vld [vmem:[#allocation4 + $0x900] sm:$0xff]  ;;  %v458_v5 = vld [vmem:[#allocation4 + $0x908] sm:$0xff] }
  0xda   :  { %3338 = vmatprep.subr.bf16.mxu0 %v9885_v59  ;;  %3502 = vmatprep.subr.bf16.mxu1 %v9887_v23  ;;  %v421_v59 = vld [vmem:[#allocation4 + $0x7e0] sm:$0xff]  ;;  %v11857_v23 = vld [vmem:[#allocation2 + $0x8] sm:$0xff] }
  0xdb   :  { %v11861_v33 = vrot.slane %v11857_v23, %v11826_v53 }
  0xdd   :  { %3339 = vmatpush1.bf16.msra.mxu0 %v9884_v26  ;;  %3503 = vmatpush1.bf16.msra.mxu1 %v9886_v27  ;;  %v9942_v26 = vcombine.low %v410_v12, %v414_v14  ;;  %v9949_v27 = vcombine.high %v417_v17, %v421_v59  ;;  %v465_v12 = vld [vmem:[#allocation4 + $0x940] sm:$0xff]  ;;  %v466_v14 = vld [vmem:[#allocation4 + $0x948] sm:$0xff] }
  0xde   :  { %3340 = vmatprep.subr.bf16.mxu0 %v9893_v28  ;;  %3504 = vmatprep.subr.bf16.mxu1 %v9895_v32  ;;  %v425_v28 = vld [vmem:[#allocation4 + $0x800] sm:$0xff]  ;;  %v430_v32 = vld [vmem:[#allocation4 + $0x828] sm:$0xff] }
  0xdf   :  { %v9958_v46 = vcombine.low %v426_v30, %v430_v32 }
  0xe1   :  { %3341 = vmatpush1.bf16.msra.mxu0 %v9892_v34  ;;  %3505 = vmatpush1.bf16.msra.mxu1 %v9894_v35  ;;  %v9948_v34 = vcombine.low %v417_v17, %v421_v59  ;;  %v9950_v35 = vcombine.low %v418_v20, %v422_v21  ;;  %v470_v17 = vld [vmem:[#allocation4 + $0x968] sm:$0xff]  ;;  %v473_v20 = vld [vmem:[#allocation4 + $0x980] sm:$0xff] }
  0xe2   :  { %3342 = vmatprep.subr.bf16.mxu0 %v9901_v63  ;;  %3506 = vmatprep.subr.bf16.mxu1 %v9903_v40  ;;  %v9957_v63 = vcombine.high %v425_v28, %v429_v29  ;;  %v9959_v40 = vcombine.high %v426_v30, %v430_v32  ;;  %v477_v21 = vld [vmem:[#allocation4 + $0x9a0] sm:$0xff]  ;;  %v482_v32 = vld [vmem:[#allocation4 + $0x9c8] sm:$0xff] }
  0xe3   :  { %v481_v30 = vld [vmem:[#allocation4 + $0x9c0] sm:$0xff] }
  0xe5   :  { %3343 = vmatpush1.bf16.msra.mxu0 %v9900_v42  ;;  %3507 = vmatpush1.bf16.msra.mxu1 %v9902_v43  ;;  %v151_v42 = vcombine.high %v11861_v33, %v11861_v33  ;;  %v11867_v43 = vpack.c.bf16 %v11843_v16, %v11843_v16  ;;  %v9964_v16 = vcombine.low %v433_v37, %v437_v38 }
  0xe6   :  { %3344 = vmatprep.subr.bf16.mxu0 %v9909_v45  ;;  %3508 = vmatprep.subr.bf16.mxu1 %v9911_v49  ;;  %v9956_v45 = vcombine.low %v425_v28, %v429_v29  ;;  %v445_v49 = vld [vmem:[#allocation4 + $0x8a0] sm:$0xff]  ;;  %v9998_v28 = vcombine.low %v466_v14, %v470_v17  ;;  %v10005_v29 = vcombine.high %v473_v20, %v477_v21 }
  0xe7   :  { %v9973_v56 = vcombine.high %v441_v48, %v445_v49 }
  0xe9   :  { %3345 = vmatpush1.bf16.msra.mxu0 %v9908_v51  ;;  %3509 = vmatpush1.bf16.msra.mxu1 %v9910_v52  ;;  %v9967_v51 = vcombine.high %v434_v39, %v438_v41  ;;  %v446_v52 = vld [vmem:[#allocation4 + $0x8a8] sm:$0xff]  ;;  %v489_v39 = vld [vmem:[#allocation4 + $0xa00] sm:$0xff] }
  0xea   :  { %3346 = vmatprep.subr.bf16.mxu0 %v9917_v54  ;;  %3510 = vmatprep.subr.bf16.mxu1 %v9919_v58  ;;  %v11869_v54 = vpack.c.bf16 %v151_v42, %v151_v42  ;;  %v453_v58 = vld [vmem:[#allocation4 + $0x8e0] sm:$0xff]  ;;  %v9974_v1 = vcombine.low %v442_v50, %v446_v52  ;;  %v490_v41 = vld [vmem:[#allocation4 + $0xa08] sm:$0xff] }
  0xeb   :  { %v9981_v2 = vcombine.high %v449_v57, %v453_v58 }
  0xed   :  { %3347 = vmatpush1.bf16.msra.mxu0 %v9916_v61  ;;  %3511 = vmatpush1.bf16.msra.mxu1 %v9918_v62  ;;  %v9975_v61 = vcombine.high %v442_v50, %v446_v52  ;;  %v454_v62 = vld [vmem:[#allocation4 + $0x8e8] sm:$0xff]  ;;  %v501_v50 = vld [vmem:[#allocation4 + $0xa60] sm:$0xff] }
  0xee   :  { %3348 = vmatprep.subr.bf16.mxu0 %v9925_v0  ;;  %3512 = vmatprep.subr.bf16.mxu1 %v9927_v4  ;;  %v9972_v0 = vcombine.low %v441_v48, %v445_v49  ;;  %v461_v4 = vld [vmem:[#allocation4 + $0x920] sm:$0xff]  ;;  %v9982_v10 = vcombine.low %v450_v60, %v454_v62 }
  0xef   :  { %v9989_v11 = vcombine.high %v457_v3, %v461_v4  ;;  %v497_v49 = vld [vmem:[#allocation4 + $0xa40] sm:$0xff] }
  0xf1   :  { %3349 = vmatpush1.bf16.msra.mxu0 %v9924_v6  ;;  %3513 = vmatpush1.bf16.msra.mxu1 %v9926_v7  ;;  %v9983_v6 = vcombine.high %v450_v60, %v454_v62  ;;  %v462_v7 = vld [vmem:[#allocation4 + $0x928] sm:$0xff]  ;;  %v509_v60 = vld [vmem:[#allocation4 + $0xaa0] sm:$0xff] }
  0xf2   :  { %3350 = vmatprep.subr.bf16.mxu0 %v9933_v8  ;;  %3514 = vmatprep.subr.bf16.mxu1 %v9935_v13  ;;  %v9980_v8 = vcombine.low %v449_v57, %v453_v58  ;;  %v469_v13 = vld [vmem:[#allocation4 + $0x960] sm:$0xff]  ;;  %v10029_v57 = vcombine.high %v497_v49, %v501_v50 }
  0xf3   :  { %v9997_v59 = vcombine.high %v465_v12, %v469_v13  ;;  %v505_v58 = vld [vmem:[#allocation4 + $0xa80] sm:$0xff] }
  0xf5   :  { %3351 = vmatpush1.bf16.msra.mxu0 %v9932_v15  ;;  %3515 = vmatpush1.bf16.msra.mxu1 %v9934_v18  ;;  %v9991_v15 = vcombine.high %v458_v5, %v462_v7  ;;  %v9988_v18 = vcombine.low %v457_v3, %v461_v4  ;;  %v10037_v3 = vcombine.high %v505_v58, %v509_v60  ;;  %v513_v4 = vld [vmem:[#allocation4 + $0xac0] sm:$0xff] }
  0xf6   :  { %3352 = vmatprep.subr.bf16.mxu0 %v9941_v19  ;;  %3516 = vmatprep.subr.bf16.mxu1 %v9943_v22  ;;  %v9990_v19 = vcombine.low %v458_v5, %v462_v7  ;;  %v474_v22 = vld [vmem:[#allocation4 + $0x988] sm:$0xff]  ;;  %v517_v5 = vld [vmem:[#allocation4 + $0xae0] sm:$0xff] }
  0xf9   :  { %3353 = vmatpush1.bf16.msra.mxu0 %v9940_v24  ;;  %3517 = vmatpush1.bf16.msra.mxu1 %v9942_v26  ;;  %v9999_v24 = vcombine.high %v466_v14, %v470_v17  ;;  %v478_v26 = vld [vmem:[#allocation4 + $0x9a8] sm:$0xff]  ;;  %v525_v14 = vld [vmem:[#allocation4 + $0xb20] sm:$0xff] }
  0xfa   :  { %3354 = vmatprep.subr.bf16.mxu0 %v9949_v27  ;;  %3518 = vmatprep.subr.bf16.mxu1 %v9951_v31  ;;  %v9996_v27 = vcombine.low %v465_v12, %v469_v13  ;;  %v485_v31 = vld [vmem:[#allocation4 + $0x9e0] sm:$0xff]  ;;  %v10006_v37 = vcombine.low %v474_v22, %v478_v26  ;;  %v10045_v12 = vcombine.high %v513_v4, %v517_v5 }
  0xfb   :  { %v10013_v38 = vcombine.high %v481_v30, %v485_v31  ;;  %v521_v13 = vld [vmem:[#allocation4 + $0xb00] sm:$0xff] }
  0xfd   :  { %3355 = vmatpush1.bf16.msra.mxu0 %v9948_v34  ;;  %3519 = vmatpush1.bf16.msra.mxu1 %v9950_v35  ;;  %v10007_v34 = vcombine.high %v474_v22, %v478_v26  ;;  %v486_v35 = vld [vmem:[#allocation4 + $0x9e8] sm:$0xff]  ;;  %v533_v22 = vld [vmem:[#allocation4 + $0xb60] sm:$0xff] }
  0xfe   :  { %3365 = vmatprep.subr.bf16.mxu0 %v9957_v63  ;;  %3529 = vmatprep.subr.bf16.mxu1 %v9959_v40  ;;  %v10004_v63 = vcombine.low %v473_v20, %v477_v21  ;;  %v493_v40 = vld [vmem:[#allocation4 + $0xa20] sm:$0xff]  ;;  %v10015_v42 = vcombine.high %v482_v32, %v486_v35  ;;  %v10053_v20 = vcombine.high %v521_v13, %v525_v14 }
  0xff   :  { %v10021_v48 = vcombine.high %v489_v39, %v493_v40  ;;  %v529_v21 = vld [vmem:[#allocation4 + $0xb40] sm:$0xff] }
 0x100   :  { %3357 = vmatmul.mubr.bf16.vlgmr.msra.gmra.mrb[0].mxu0 %v11867_v43  ;;  %3521 = vmatmul.mubr.bf16.vlgmr.msra.gmra.mrb[0].mxu1 %v11867_v43 }
 0x101   :  { %3366 = vmatpush1.bf16.msra.mxu0 %v9956_v45  ;;  %3530 = vmatpush1.bf16.msra.mxu1 %v9958_v46  ;;  %v494_v45 = vld [vmem:[#allocation4 + $0xa28] sm:$0xff]  ;;  %v10012_v46 = vcombine.low %v481_v30, %v485_v31  ;;  %v10061_v30 = vcombine.high %v529_v21, %v533_v22  ;;  %v537_v31 = vld [vmem:[#allocation4 + $0xb80] sm:$0xff] }
 0x102   :  { %3367 = vmatprep.subr.bf16.mxu0 %v9965_v47  ;;  %3531 = vmatprep.subr.bf16.mxu1 %v9967_v51  ;;  %v10014_v47 = vcombine.low %v482_v32, %v486_v35  ;;  %v498_v51 = vld [vmem:[#allocation4 + $0xa48] sm:$0xff]  ;;  %v10023_v52 = vcombine.high %v490_v41, %v494_v45  ;;  %v541_v32 = vld [vmem:[#allocation4 + $0xba0] sm:$0xff] }
 0x103   :  { %3397 = vmatprep.mubr.bf16.mxu0 %v11869_v54  ;;  %3561 = vmatprep.mubr.bf16.mxu1 %v11869_v54 }
 0x105   :  { %3368 = vmatpush1.bf16.msra.mxu0 %v9964_v16  ;;  %3532 = vmatpush1.bf16.msra.mxu1 %v9966_v55  ;;  %v502_v16 = vld [vmem:[#allocation4 + $0xa68] sm:$0xff]  ;;  %v10020_v55 = vcombine.low %v489_v39, %v493_v40  ;;  %v10069_v39 = vcombine.high %v537_v31, %v541_v32  ;;  %v545_v40 = vld [vmem:[#allocation4 + $0xbc0] sm:$0xff] }
 0x106   :  { %3369 = vmatprep.subr.bf16.mxu0 %v9973_v56  ;;  %3533 = vmatprep.subr.bf16.mxu1 %v9975_v61  ;;  %v10022_v56 = vcombine.low %v490_v41, %v494_v45  ;;  %v506_v61 = vld [vmem:[#allocation4 + $0xa88] sm:$0xff]  ;;  %v10031_v62 = vcombine.high %v498_v51, %v502_v16  ;;  %v549_v41 = vld [vmem:[#allocation4 + $0xbe0] sm:$0xff] }
 0x109   :  { %3370 = vmatpush1.bf16.msra.mxu0 %v9972_v0  ;;  %3534 = vmatpush1.bf16.msra.mxu1 %v9974_v1  ;;  %v510_v0 = vld [vmem:[#allocation4 + $0xaa8] sm:$0xff]  ;;  %v10028_v1 = vcombine.low %v497_v49, %v501_v50  ;;  %v10077_v50 = vcombine.high %v545_v40, %v549_v41 }
 0x10a   :  { %3371 = vmatprep.subr.bf16.mxu0 %v9981_v2  ;;  %3535 = vmatprep.subr.bf16.mxu1 %v9983_v6  ;;  %v10030_v2 = vcombine.low %v498_v51, %v502_v16  ;;  %v514_v6 = vld [vmem:[#allocation4 + $0xac8] sm:$0xff]  ;;  %v10039_v7 = vcombine.high %v506_v61, %v510_v0  ;;  %v553_v51 = vld [vmem:[#allocation4 + $0xc00] sm:$0xff] }
 0x10b   :  { %v554_v16 = vld [vmem:[#allocation4 + $0xc08] sm:$0xff] }
 0x10d   :  { %3372 = vmatpush1.bf16.msra.mxu0 %v9980_v8  ;;  %3536 = vmatpush1.bf16.msra.mxu1 %v9982_v10  ;;  %v518_v8 = vld [vmem:[#allocation4 + $0xae8] sm:$0xff]  ;;  %v10036_v10 = vcombine.low %v505_v58, %v509_v60  ;;  %v10076_v58 = vcombine.low %v545_v40, %v549_v41 }
 0x10e   :  { %3373 = vmatprep.subr.bf16.mxu0 %v9989_v11  ;;  %3537 = vmatprep.subr.bf16.mxu1 %v9991_v15  ;;  %v10038_v11 = vcombine.low %v506_v61, %v510_v0  ;;  %v522_v15 = vld [vmem:[#allocation4 + $0xb08] sm:$0xff]  ;;  %v10047_v17 = vcombine.high %v514_v6, %v518_v8  ;;  %v561_v61 = vld [vmem:[#allocation4 + $0xc40] sm:$0xff] }
 0x10f   :  { %v562_v0 = vld [vmem:[#allocation4 + $0xc48] sm:$0xff] }
 0x110   :  { %v598_v40 = vld [vmem:[#allocation4 + $0xd68] sm:$0xff] }
 0x111   :  { %3374 = vmatpush1.bf16.msra.mxu0 %v9988_v18  ;;  %3538 = vmatpush1.bf16.msra.mxu1 %v9990_v19  ;;  %v526_v18 = vld [vmem:[#allocation4 + $0xb28] sm:$0xff]  ;;  %v10044_v19 = vcombine.low %v513_v4, %v517_v5  ;;  %v11884_v4 = vpack.c.bf16 %v11861_v33, %v11861_v33 }
 0x112   :  { %3375 = vmatprep.subr.bf16.mxu0 %v9997_v59  ;;  %3539 = vmatprep.subr.bf16.mxu1 %v9999_v24  ;;  %v10046_v59 = vcombine.low %v514_v6, %v518_v8  ;;  %v530_v24 = vld [vmem:[#allocation4 + $0xb48] sm:$0xff]  ;;  %v10055_v26 = vcombine.high %v522_v15, %v526_v18 }
 0x115   :  { %3376 = vmatpush1.bf16.msra.mxu0 %v9996_v27  ;;  %3540 = vmatpush1.bf16.msra.mxu1 %v9998_v28  ;;  %v534_v27 = vld [vmem:[#allocation4 + $0xb68] sm:$0xff]  ;;  %v10052_v28 = vcombine.low %v521_v13, %v525_v14 }
 0x116   :  { %3377 = vmatprep.subr.bf16.mxu0 %v10005_v29  ;;  %3541 = vmatprep.subr.bf16.mxu1 %v10007_v34  ;;  %v10054_v29 = vcombine.low %v522_v15, %v526_v18  ;;  %v538_v34 = vld [vmem:[#allocation4 + $0xb88] sm:$0xff]  ;;  %v10063_v35 = vcombine.high %v530_v24, %v534_v27 }
 0x117   :  { %v570_v13 = vld [vmem:[#allocation4 + $0xc88] sm:$0xff] }
 0x118   :  { %v574_v14 = vld [vmem:[#allocation4 + $0xca8] sm:$0xff] }
 0x119   :  { %3378 = vmatpush1.bf16.msra.mxu0 %v10004_v63  ;;  %3542 = vmatpush1.bf16.msra.mxu1 %v10006_v37  ;;  %v542_v63 = vld [vmem:[#allocation4 + $0xba8] sm:$0xff]  ;;  %v10060_v37 = vcombine.low %v529_v21, %v533_v22  ;;  %v10103_v18 = vcombine.high %v570_v13, %v574_v14 }
 0x11a   :  { %3379 = vmatprep.subr.bf16.mxu0 %v10013_v38  ;;  %3543 = vmatprep.subr.bf16.mxu1 %v10015_v42  ;;  %v10062_v38 = vcombine.low %v530_v24, %v534_v27  ;;  %v546_v42 = vld [vmem:[#allocation4 + $0xbc8] sm:$0xff]  ;;  %v10071_v45 = vcombine.high %v538_v34, %v542_v63  ;;  %v10070_v49 = vcombine.low %v538_v34, %v542_v63 }
 0x11b   :  { %v582_v21 = vld [vmem:[#allocation4 + $0xce8] sm:$0xff]  ;;  %v10102_v24 = vcombine.low %v570_v13, %v574_v14  ;;  %v625_v13 = vld [vmem:[#allocation4 + $0xe40] sm:$0xff] }
 0x11c   :  { %v629_v14 = vld [vmem:[#allocation4 + $0xe60] sm:$0xff] }
 0x11d   :  { %3380 = vmatpush1.bf16.msra.mxu0 %v10012_v46  ;;  %3544 = vmatpush1.bf16.msra.mxu1 %v10014_v47  ;;  %v550_v46 = vld [vmem:[#allocation4 + $0xbe8] sm:$0xff]  ;;  %v136_v47 = vcombine.high %v11857_v23, %v11857_v23 }
 0x11e   :  { %3381 = vmatprep.subr.bf16.mxu0 %v10021_v48  ;;  %3545 = vmatprep.subr.bf16.mxu1 %v10023_v52  ;;  %v10068_v48 = vcombine.low %v537_v31, %v541_v32  ;;  %v557_v52 = vld [vmem:[#allocation4 + $0xc20] sm:$0xff]  ;;  %v10078_v23 = vcombine.low %v546_v42, %v550_v46  ;;  %v590_v31 = vld [vmem:[#allocation4 + $0xd28] sm:$0xff] }
 0x11f   :  { %v10085_v60 = vcombine.high %v553_v51, %v557_v52  ;;  %v10084_v5 = vcombine.low %v553_v51, %v557_v52 }
 0x121   :  { %3382 = vmatpush1.bf16.msra.mxu0 %v10020_v55  ;;  %3546 = vmatpush1.bf16.msra.mxu1 %v10022_v56  ;;  %v10079_v55 = vcombine.high %v546_v42, %v550_v46  ;;  %v558_v56 = vld [vmem:[#allocation4 + $0xc28] sm:$0xff] }
 0x122   :  { %3383 = vmatprep.subr.bf16.mxu0 %v10029_v57  ;;  %3547 = vmatprep.subr.bf16.mxu1 %v10031_v62  ;;  %v11878_v57 = vrot.slane %v136_v47, %v11826_v53  ;;  %v565_v62 = vld [vmem:[#allocation4 + $0xc60] sm:$0xff]  ;;  %v10086_v6 = vcombine.low %v554_v16, %v558_v56 }
 0x123   :  { %v10092_v33 = vcombine.low %v561_v61, %v565_v62  ;;  %v601_v47 = vld [vmem:[#allocation4 + $0xd80] sm:$0xff] }
 0x125   :  { %3384 = vmatpush1.bf16.msra.mxu0 %v10028_v1  ;;  %3548 = vmatpush1.bf16.msra.mxu1 %v10030_v2  ;;  %v10087_v1 = vcombine.high %v554_v16, %v558_v56  ;;  %v566_v2 = vld [vmem:[#allocation4 + $0xc68] sm:$0xff]  ;;  %v609_v56 = vld [vmem:[#allocation4 + $0xdc0] sm:$0xff] }
 0x126   :  { %3385 = vmatprep.subr.bf16.mxu0 %v10037_v3  ;;  %3549 = vmatprep.subr.bf16.mxu1 %v10039_v7  ;;  %v152_v3 = vcombine.high %v11878_v57, %v11878_v57  ;;  %v10093_v7 = vcombine.high %v561_v61, %v565_v62  ;;  %v10095_v8 = vcombine.high %v562_v0, %v566_v2 }
 0x127   :  { %v10094_v15 = vcombine.low %v562_v0, %v566_v2  ;;  %v617_v2 = vld [vmem:[#allocation4 + $0xe00] sm:$0xff] }
 0x129   :  { %3386 = vmatpush1.bf16.msra.mxu0 %v10036_v10  ;;  %3550 = vmatpush1.bf16.msra.mxu1 %v10038_v11  ;;  %v569_v10 = vld [vmem:[#allocation4 + $0xc80] sm:$0xff] }
 0x12a   :  { %3387 = vmatprep.subr.bf16.mxu0 %v10045_v12  ;;  %3551 = vmatprep.subr.bf16.mxu1 %v10047_v17  ;;  %v573_v11 = vld [vmem:[#allocation4 + $0xca0] sm:$0xff]  ;;  %v11886_v12 = vpack.c.bf16 %v152_v3, %v152_v3 }
 0x12b   :  { %v10101_v17 = vcombine.high %v569_v10, %v573_v11  ;;  %v10100_v22 = vcombine.low %v569_v10, %v573_v11  ;;  %v621_v3 = vld [vmem:[#allocation4 + $0xe20] sm:$0xff] }
 0x12c   :  { %v10149_v10 = vcombine.high %v617_v2, %v621_v3 }
 0x12d   :  { %3388 = vmatpush1.bf16.msra.mxu0 %v10044_v19  ;;  %3552 = vmatpush1.bf16.msra.mxu1 %v10046_v59  ;;  %v577_v19 = vld [vmem:[#allocation4 + $0xcc0] sm:$0xff] }
 0x12e   :  { %3389 = vmatprep.subr.bf16.mxu0 %v10053_v20  ;;  %3553 = vmatprep.subr.bf16.mxu1 %v10055_v26  ;;  %v581_v59 = vld [vmem:[#allocation4 + $0xce0] sm:$0xff]  ;;  %v578_v20 = vld [vmem:[#allocation4 + $0xcc8] sm:$0xff] }
 0x12f   :  { %v10109_v26 = vcombine.high %v577_v19, %v581_v59  ;;  %v10111_v27 = vcombine.high %v578_v20, %v582_v21  ;;  %v10108_v32 = vcombine.low %v577_v19, %v581_v59  ;;  %v10110_v34 = vcombine.low %v578_v20, %v582_v21  ;;  %v633_v20 = vld [vmem:[#allocation4 + $0xe80] sm:$0xff] }
 0x130   :  { %v10157_v19 = vcombine.high %v625_v13, %v629_v14  ;;  %v637_v21 = vld [vmem:[#allocation4 + $0xea0] sm:$0xff] }
 0x131   :  { %3390 = vmatpush1.bf16.msra.mxu0 %v10052_v28  ;;  %3554 = vmatpush1.bf16.msra.mxu1 %v10054_v29  ;;  %v585_v28 = vld [vmem:[#allocation4 + $0xd00] sm:$0xff] }
 0x132   :  { %3391 = vmatprep.subr.bf16.mxu0 %v10061_v30  ;;  %3555 = vmatprep.subr.bf16.mxu1 %v10063_v35  ;;  %v589_v29 = vld [vmem:[#allocation4 + $0xd20] sm:$0xff]  ;;  %v586_v30 = vld [vmem:[#allocation4 + $0xd08] sm:$0xff] }
 0x133   :  { %v10117_v35 = vcombine.high %v585_v28, %v589_v29  ;;  %v10119_v63 = vcombine.high %v586_v30, %v590_v31  ;;  %v10116_v41 = vcombine.low %v585_v28, %v589_v29  ;;  %v10118_v42 = vcombine.low %v586_v30, %v590_v31  ;;  %v641_v30 = vld [vmem:[#allocation4 + $0xec0] sm:$0xff] }
 0x134   :  { %v10165_v28 = vcombine.high %v633_v20, %v637_v21  ;;  %v645_v31 = vld [vmem:[#allocation4 + $0xee0] sm:$0xff] }
 0x135   :  { %3392 = vmatpush1.bf16.msra.mxu0 %v10060_v37  ;;  %3556 = vmatpush1.bf16.msra.mxu1 %v10062_v38  ;;  %v593_v37 = vld [vmem:[#allocation4 + $0xd40] sm:$0xff] }
 0x136   :  { %3393 = vmatprep.subr.bf16.mxu0 %v10069_v39  ;;  %3557 = vmatprep.subr.bf16.mxu1 %v10071_v45  ;;  %v597_v38 = vld [vmem:[#allocation4 + $0xd60] sm:$0xff]  ;;  %v594_v39 = vld [vmem:[#allocation4 + $0xd48] sm:$0xff] }
 0x137   :  { %v10125_v45 = vcombine.high %v593_v37, %v597_v38  ;;  %v10127_v46 = vcombine.high %v594_v39, %v598_v40  ;;  %v10124_v51 = vcombine.low %v593_v37, %v597_v38  ;;  %v10126_v52 = vcombine.low %v594_v39, %v598_v40  ;;  %v649_v39 = vld [vmem:[#allocation4 + $0xf00] sm:$0xff] }
 0x138   :  { %v10173_v37 = vcombine.high %v641_v30, %v645_v31  ;;  %v653_v40 = vld [vmem:[#allocation4 + $0xf20] sm:$0xff] }
 0x139   :  { %3394 = vmatpush1.bf16.msra.mxu0 %v10068_v48  ;;  %3558 = vmatpush1.bf16.msra.mxu1 %v10070_v49  ;;  %v605_v48 = vld [vmem:[#allocation4 + $0xda0] sm:$0xff]  ;;  %v602_v49 = vld [vmem:[#allocation4 + $0xd88] sm:$0xff] }
 0x13a   :  { %3395 = vmatprep.subr.bf16.mxu0 %v10077_v50  ;;  %3559 = vmatprep.subr.bf16.mxu1 %v10079_v55  ;;  %v606_v50 = vld [vmem:[#allocation4 + $0xda8] sm:$0xff]  ;;  %v10133_v16 = vcombine.high %v601_v47, %v605_v48  ;;  %v10132_v61 = vcombine.low %v601_v47, %v605_v48  ;;  %v10181_v47 = vcombine.high %v649_v39, %v653_v40 }
 0x13b   :  { %v10135_v55 = vcombine.high %v602_v49, %v606_v50  ;;  %v10134_v62 = vcombine.low %v602_v49, %v606_v50  ;;  %v657_v49 = vld [vmem:[#allocation4 + $0xf40] sm:$0xff] }
 0x13c   :  { %v661_v50 = vld [vmem:[#allocation4 + $0xf60] sm:$0xff] }
 0x13d   :  { %3396 = vmatpush1.bf16.msra.mxu0 %v10076_v58  ;;  %3560 = vmatpush1.bf16.msra.mxu1 %v10078_v23  ;;  %v613_v58 = vld [vmem:[#allocation4 + $0xde0] sm:$0xff]  ;;  %v610_v23 = vld [vmem:[#allocation4 + $0xdc8] sm:$0xff] }
 0x13e   :  { %3406 = vmatprep.subr.bf16.mxu0 %v10085_v60  ;;  %3570 = vmatprep.subr.bf16.mxu1 %v10087_v1  ;;  %v614_v60 = vld [vmem:[#allocation4 + $0xde8] sm:$0xff]  ;;  %v10141_v0 = vcombine.high %v609_v56, %v613_v58 }
 0x13f   :  { %v10143_v1 = vcombine.high %v610_v23, %v614_v60 }
 0x140   :  { %3398 = vmatmul.mubr.bf16.vlgmr.msra.gmra.mrb[0].mxu0 %v11884_v4  ;;  %3562 = vmatmul.mubr.bf16.vlgmr.msra.gmra.mrb[0].mxu1 %v11884_v4 }
 0x141   :  { %3407 = vmatpush1.bf16.msra.mxu0 %v10084_v5  ;;  %3571 = vmatpush1.bf16.msra.mxu1 %v10086_v6  ;;  %v618_v5 = vld [vmem:[#allocation4 + $0xe08] sm:$0xff] }
 0x142   :  { %3408 = vmatprep.subr.bf16.mxu0 %v10093_v7  ;;  %3572 = vmatprep.subr.bf16.mxu1 %v10095_v8  ;;  %v622_v6 = vld [vmem:[#allocation4 + $0xe28] sm:$0xff]  ;;  %v10140_v7 = vcombine.low %v609_v56, %v613_v58  ;;  %v10142_v8 = vcombine.low %v610_v23, %v614_v60  ;;  %v10189_v56 = vcombine.high %v657_v49, %v661_v50  ;;  %v665_v23 = vld [vmem:[#allocation4 + $0xf80] sm:$0xff] }
 0x143   :  { %3438 = vmatprep.mubr.bf16.mxu0 %v11886_v12  ;;  %3602 = vmatprep.mubr.bf16.mxu1 %v11886_v12  ;;  %v10151_v11 = vcombine.high %v618_v5, %v622_v6  ;;  %v669_v60 = vld [vmem:[#allocation4 + $0xfa0] sm:$0xff] }
 0x145   :  { %3409 = vmatpush1.bf16.msra.mxu0 %v10092_v33  ;;  %3573 = vmatpush1.bf16.msra.mxu1 %v10094_v15  ;;  %v626_v33 = vld [vmem:[#allocation4 + $0xe48] sm:$0xff] }
 0x146   :  { %3410 = vmatprep.subr.bf16.mxu0 %v10101_v17  ;;  %3574 = vmatprep.subr.bf16.mxu1 %v10103_v18  ;;  %v630_v15 = vld [vmem:[#allocation4 + $0xe68] sm:$0xff]  ;;  %v10148_v17 = vcombine.low %v617_v2, %v621_v3  ;;  %v10150_v18 = vcombine.low %v618_v5, %v622_v6  ;;  %v10197_v2 = vcombine.high %v665_v23, %v669_v60  ;;  %v673_v5 = vld [vmem:[#allocation4 + $0xfc0] sm:$0xff] }
 0x147   :  { %v10159_v59 = vcombine.high %v626_v33, %v630_v15  ;;  %v677_v6 = vld [vmem:[#allocation4 + $0xfe0] sm:$0xff] }
 0x149   :  { %3411 = vmatpush1.bf16.msra.mxu0 %v10100_v22  ;;  %3575 = vmatpush1.bf16.msra.mxu1 %v10102_v24  ;;  %v634_v22 = vld [vmem:[#allocation4 + $0xe88] sm:$0xff] }
 0x14a   :  { %3412 = vmatprep.subr.bf16.mxu0 %v10109_v26  ;;  %3576 = vmatprep.subr.bf16.mxu1 %v10111_v27  ;;  %v638_v24 = vld [vmem:[#allocation4 + $0xea8] sm:$0xff]  ;;  %v10156_v26 = vcombine.low %v625_v13, %v629_v14  ;;  %v10158_v27 = vcombine.low %v626_v33, %v630_v15  ;;  %v10205_v13 = vcombine.high %v673_v5, %v677_v6  ;;  %v171_v33 = vld [vmem:[#allocation4 + $0x10] sm:$0xff] }
 0x14b   :  { %v10167_v29 = vcombine.high %v634_v22, %v638_v24  ;;  %v175_v15 = vld [vmem:[#allocation4 + $0x30] sm:$0xff] }
 0x14d   :  { %3413 = vmatpush1.bf16.msra.mxu0 %v10108_v32  ;;  %3577 = vmatpush1.bf16.msra.mxu1 %v10110_v34  ;;  %v642_v32 = vld [vmem:[#allocation4 + $0xec8] sm:$0xff] }
 0x14e   :  { %3414 = vmatprep.subr.bf16.mxu0 %v10117_v35  ;;  %3578 = vmatprep.subr.bf16.mxu1 %v10119_v63  ;;  %v646_v34 = vld [vmem:[#allocation4 + $0xee8] sm:$0xff]  ;;  %v10164_v35 = vcombine.low %v633_v20, %v637_v21  ;;  %v10166_v63 = vcombine.low %v634_v22, %v638_v24  ;;  %v9705_v20 = vcombine.high %v171_v33, %v175_v15  ;;  %v179_v22 = vld [vmem:[#allocation4 + $0x50] sm:$0xff] }
 0x14f   :  { %v10175_v38 = vcombine.high %v642_v32, %v646_v34  ;;  %v183_v24 = vld [vmem:[#allocation4 + $0x70] sm:$0xff] }
 0x151   :  { %3415 = vmatpush1.bf16.msra.mxu0 %v10116_v41  ;;  %3579 = vmatpush1.bf16.msra.mxu1 %v10118_v42  ;;  %v650_v41 = vld [vmem:[#allocation4 + $0xf08] sm:$0xff] }
 0x152   :  { %3416 = vmatprep.subr.bf16.mxu0 %v10125_v45  ;;  %3580 = vmatprep.subr.bf16.mxu1 %v10127_v46  ;;  %v654_v42 = vld [vmem:[#allocation4 + $0xf28] sm:$0xff]  ;;  %v10172_v45 = vcombine.low %v641_v30, %v645_v31  ;;  %v10174_v46 = vcombine.low %v642_v32, %v646_v34  ;;  %v9713_v31 = vcombine.high %v179_v22, %v183_v24  ;;  %v187_v34 = vld [vmem:[#allocation4 + $0x90] sm:$0xff] }
 0x153   :  { %v10183_v48 = vcombine.high %v650_v41, %v654_v42 }
 0x155   :  { %3417 = vmatpush1.bf16.msra.mxu0 %v10124_v51  ;;  %3581 = vmatpush1.bf16.msra.mxu1 %v10126_v52  ;;  %v658_v51 = vld [vmem:[#allocation4 + $0xf48] sm:$0xff] }
 0x156   :  { %3418 = vmatprep.subr.bf16.mxu0 %v10133_v16  ;;  %3582 = vmatprep.subr.bf16.mxu1 %v10135_v55  ;;  %v662_v52 = vld [vmem:[#allocation4 + $0xf68] sm:$0xff]  ;;  %v10180_v16 = vcombine.low %v649_v39, %v653_v40  ;;  %v10182_v55 = vcombine.low %v650_v41, %v654_v42  ;;  %v195_v41 = vld [vmem:[#allocation4 + $0xd0] sm:$0xff] }
 0x157   :  { %v10191_v58 = vcombine.high %v658_v51, %v662_v52  ;;  %v199_v42 = vld [vmem:[#allocation4 + $0xf0] sm:$0xff] }
 0x159   :  { %3419 = vmatpush1.bf16.msra.mxu0 %v10132_v61  ;;  %3583 = vmatpush1.bf16.msra.mxu1 %v10134_v62  ;;  %v666_v61 = vld [vmem:[#allocation4 + $0xf88] sm:$0xff] }
 0x15a   :  { %3420 = vmatprep.subr.bf16.mxu0 %v10141_v0  ;;  %3584 = vmatprep.subr.bf16.mxu1 %v10143_v1  ;;  %v670_v62 = vld [vmem:[#allocation4 + $0xfa8] sm:$0xff]  ;;  %v10188_v0 = vcombine.low %v657_v49, %v661_v50  ;;  %v10190_v1 = vcombine.low %v658_v51, %v662_v52  ;;  %v9729_v49 = vcombine.high %v195_v41, %v199_v42  ;;  %v203_v51 = vld [vmem:[#allocation4 + $0x110] sm:$0xff] }
 0x15b   :  { %v10199_v3 = vcombine.high %v666_v61, %v670_v62  ;;  %v207_v52 = vld [vmem:[#allocation4 + $0x130] sm:$0xff] }
 0x15d   :  { %3421 = vmatpush1.bf16.msra.mxu0 %v10140_v7  ;;  %3585 = vmatpush1.bf16.msra.mxu1 %v10142_v8  ;;  %v674_v7 = vld [vmem:[#allocation4 + $0xfc8] sm:$0xff] }
 0x15e   :  { %3422 = vmatprep.subr.bf16.mxu0 %v10149_v10  ;;  %3586 = vmatprep.subr.bf16.mxu1 %v10151_v11  ;;  %v678_v8 = vld [vmem:[#allocation4 + $0xfe8] sm:$0xff]  ;;  %v10196_v10 = vcombine.low %v665_v23, %v669_v60  ;;  %v10198_v11 = vcombine.low %v666_v61, %v670_v62  ;;  %v9737_v23 = vcombine.high %v203_v51, %v207_v52  ;;  %v211_v61 = vld [vmem:[#allocation4 + $0x150] sm:$0xff] }
 0x15f   :  { %v10207_v14 = vcombine.high %v674_v7, %v678_v8  ;;  %v215_v62 = vld [vmem:[#allocation4 + $0x170] sm:$0xff] }
 0x161   :  { %3423 = vmatpush1.bf16.msra.mxu0 %v10148_v17  ;;  %3587 = vmatpush1.bf16.msra.mxu1 %v10150_v18  ;;  %v172_v17 = vld [vmem:[#allocation4 + $0x18] sm:$0xff] }
 0x162   :  { %3424 = vmatprep.subr.bf16.mxu0 %v10157_v19  ;;  %3588 = vmatprep.subr.bf16.mxu1 %v10159_v59  ;;  %v176_v18 = vld [vmem:[#allocation4 + $0x38] sm:$0xff]  ;;  %v10204_v19 = vcombine.low %v673_v5, %v677_v6  ;;  %v10206_v59 = vcombine.low %v674_v7, %v678_v8  ;;  %v9745_v5 = vcombine.high %v211_v61, %v215_v62  ;;  %v219_v7 = vld [vmem:[#allocation4 + $0x190] sm:$0xff] }
 0x163   :  { %v9707_v21 = vcombine.high %v172_v17, %v176_v18  ;;  %v9706_v30 = vcombine.low %v172_v17, %v176_v18  ;;  %v223_v8 = vld [vmem:[#allocation4 + $0x1b0] sm:$0xff] }
 0x164   :  { %v227_v17 = vld [vmem:[#allocation4 + $0x1d0] sm:$0xff] }
 0x165   :  { %3425 = vmatpush1.bf16.msra.mxu0 %v10156_v26  ;;  %3589 = vmatpush1.bf16.msra.mxu1 %v10158_v27  ;;  %v11894_v26 = vpack.c.bf16 %v11878_v57, %v11878_v57  ;;  %v180_v27 = vld [vmem:[#allocation4 + $0x58] sm:$0xff]  ;;  %v9712_v57 = vcombine.low %v179_v22, %v183_v24  ;;  %v231_v18 = vld [vmem:[#allocation4 + $0x1f0] sm:$0xff] }
 0x166   :  { %3426 = vmatprep.subr.bf16.mxu0 %v10165_v28  ;;  %3590 = vmatprep.subr.bf16.mxu1 %v10167_v29  ;;  %v184_v28 = vld [vmem:[#allocation4 + $0x78] sm:$0xff]  ;;  %v9704_v29 = vcombine.low %v171_v33, %v175_v15  ;;  %v9753_v33 = vcombine.high %v219_v7, %v223_v8  ;;  %v9761_v22 = vcombine.high %v227_v17, %v231_v18 }
 0x167   :  { %v9715_v32 = vcombine.high %v180_v27, %v184_v28 }
 0x169   :  { %3427 = vmatpush1.bf16.msra.mxu0 %v10164_v35  ;;  %3591 = vmatpush1.bf16.msra.mxu1 %v10166_v63  ;;  %v191_v35 = vld [vmem:[#allocation4 + $0xb0] sm:$0xff]  ;;  %v188_v63 = vld [vmem:[#allocation4 + $0x98] sm:$0xff] }
 0x16a   :  { %3428 = vmatprep.subr.bf16.mxu0 %v10173_v37  ;;  %3592 = vmatprep.subr.bf16.mxu1 %v10175_v38  ;;  %v192_v37 = vld [vmem:[#allocation4 + $0xb8] sm:$0xff]  ;;  %v9714_v38 = vcombine.low %v180_v27, %v184_v28  ;;  %v9721_v39 = vcombine.high %v187_v34, %v191_v35  ;;  %v235_v27 = vld [vmem:[#allocation4 + $0x210] sm:$0xff] }
 0x16b   :  { %v9723_v40 = vcombine.high %v188_v63, %v192_v37  ;;  %v239_v28 = vld [vmem:[#allocation4 + $0x230] sm:$0xff] }
 0x16d   :  { %3429 = vmatpush1.bf16.msra.mxu0 %v10172_v45  ;;  %3593 = vmatpush1.bf16.msra.mxu1 %v10174_v46  ;;  %v196_v45 = vld [vmem:[#allocation4 + $0xd8] sm:$0xff] }
 0x16e   :  { %3430 = vmatprep.subr.bf16.mxu0 %v10181_v47  ;;  %3594 = vmatprep.subr.bf16.mxu1 %v10183_v48  ;;  %v200_v46 = vld [vmem:[#allocation4 + $0xf8] sm:$0xff]  ;;  %v9720_v47 = vcombine.low %v187_v34, %v191_v35  ;;  %v9722_v48 = vcombine.low %v188_v63, %v192_v37  ;;  %v9769_v34 = vcombine.high %v235_v27, %v239_v28  ;;  %v243_v63 = vld [vmem:[#allocation4 + $0x250] sm:$0xff] }
 0x16f   :  { %v9731_v50 = vcombine.high %v196_v45, %v200_v46  ;;  %v247_v37 = vld [vmem:[#allocation4 + $0x270] sm:$0xff] }
 0x171   :  { %3431 = vmatpush1.bf16.msra.mxu0 %v10180_v16  ;;  %3595 = vmatpush1.bf16.msra.mxu1 %v10182_v55  ;;  %v204_v16 = vld [vmem:[#allocation4 + $0x118] sm:$0xff] }
 0x172   :  { %3432 = vmatprep.subr.bf16.mxu0 %v10189_v56  ;;  %3596 = vmatprep.subr.bf16.mxu1 %v10191_v58  ;;  %v208_v55 = vld [vmem:[#allocation4 + $0x138] sm:$0xff]  ;;  %v9728_v56 = vcombine.low %v195_v41, %v199_v42  ;;  %v9730_v58 = vcombine.low %v196_v45, %v200_v46  ;;  %v9777_v41 = vcombine.high %v243_v63, %v247_v37  ;;  %v251_v45 = vld [vmem:[#allocation4 + $0x290] sm:$0xff] }
 0x173   :  { %v9739_v60 = vcombine.high %v204_v16, %v208_v55  ;;  %v255_v46 = vld [vmem:[#allocation4 + $0x2b0] sm:$0xff] }
 0x175   :  { %3433 = vmatpush1.bf16.msra.mxu0 %v10188_v0  ;;  %3597 = vmatpush1.bf16.msra.mxu1 %v10190_v1  ;;  %v212_v0 = vld [vmem:[#allocation4 + $0x158] sm:$0xff] }
 0x176   :  { %3434 = vmatprep.subr.bf16.mxu0 %v10197_v2  ;;  %3598 = vmatprep.subr.bf16.mxu1 %v10199_v3  ;;  %v216_v1 = vld [vmem:[#allocation4 + $0x178] sm:$0xff]  ;;  %v9736_v2 = vcombine.low %v203_v51, %v207_v52  ;;  %v9738_v3 = vcombine.low %v204_v16, %v208_v55  ;;  %v9785_v51 = vcombine.high %v251_v45, %v255_v46  ;;  %v259_v16 = vld [vmem:[#allocation4 + $0x2d0] sm:$0xff] }
 0x177   :  { %v9747_v6 = vcombine.high %v212_v0, %v216_v1  ;;  %v263_v55 = vld [vmem:[#allocation4 + $0x2f0] sm:$0xff] }
 0x179   :  { %3435 = vmatpush1.bf16.msra.mxu0 %v10196_v10  ;;  %3599 = vmatpush1.bf16.msra.mxu1 %v10198_v11  ;;  %v220_v10 = vld [vmem:[#allocation4 + $0x198] sm:$0xff] }
 0x17a   :  { %3436 = vmatprep.subr.bf16.mxu0 %v10205_v13  ;;  %3600 = vmatprep.subr.bf16.mxu1 %v10207_v14  ;;  %v224_v11 = vld [vmem:[#allocation4 + $0x1b8] sm:$0xff]  ;;  %v9744_v13 = vcombine.low %v211_v61, %v215_v62  ;;  %v9746_v14 = vcombine.low %v212_v0, %v216_v1  ;;  %v9793_v61 = vcombine.high %v259_v16, %v263_v55  ;;  %v267_v0 = vld [vmem:[#allocation4 + $0x310] sm:$0xff] }
 0x17b   :  { %v9755_v15 = vcombine.high %v220_v10, %v224_v11  ;;  %v271_v1 = vld [vmem:[#allocation4 + $0x330] sm:$0xff] }
 0x17d   :  { %3437 = vmatpush1.bf16.msra.mxu0 %v10204_v19  ;;  %3601 = vmatpush1.bf16.msra.mxu1 %v10206_v59  ;;  %v228_v19 = vld [vmem:[#allocation4 + $0x1d8] sm:$0xff] }
 0x17e   :  { %3611 = vmatprep.subr.bf16.mxu0 %v9705_v20  ;;  %3775 = vmatprep.subr.bf16.mxu1 %v9707_v21  ;;  %v232_v59 = vld [vmem:[#allocation4 + $0x1f8] sm:$0xff]  ;;  %v9752_v20 = vcombine.low %v219_v7, %v223_v8  ;;  %v9754_v21 = vcombine.low %v220_v10, %v224_v11  ;;  %v9801_v7 = vcombine.high %v267_v0, %v271_v1  ;;  %v275_v10 = vld [vmem:[#allocation4 + $0x350] sm:$0xff] }
 0x17f   :  { %v9763_v24 = vcombine.high %v228_v19, %v232_v59  ;;  %v279_v11 = vld [vmem:[#allocation4 + $0x370] sm:$0xff] }
 0x180   :  { %3439 = vmatmul.mubr.bf16.vlgmr.msra.gmra.mrb[0].mxu0 %v11894_v26  ;;  %3603 = vmatmul.mubr.bf16.vlgmr.msra.gmra.mrb[0].mxu1 %v11894_v26 }
 0x181   :  { %3612 = vmatpush1.bf16.msra.mxu0 %v9704_v29  ;;  %3776 = vmatpush1.bf16.msra.mxu1 %v9706_v30  ;;  %v236_v29 = vld [vmem:[#allocation4 + $0x218] sm:$0xff] }
 0x182   :  { %3613 = vmatprep.subr.bf16.mxu0 %v9713_v31  ;;  %3777 = vmatprep.subr.bf16.mxu1 %v9715_v32  ;;  %v240_v30 = vld [vmem:[#allocation4 + $0x238] sm:$0xff]  ;;  %v9760_v31 = vcombine.low %v227_v17, %v231_v18  ;;  %v9762_v32 = vcombine.low %v228_v19, %v232_v59  ;;  %v9809_v17 = vcombine.high %v275_v10, %v279_v11  ;;  %v283_v19 = vld [vmem:[#allocation4 + $0x390] sm:$0xff] }
 0x183   :  { %3643 = vmatprep.mubr.bf16.mxu0 %v11836_v9  ;;  %3807 = vmatprep.mubr.bf16.mxu1 %v11836_v9  ;;  %v9771_v35 = vcombine.high %v236_v29, %v240_v30  ;;  %v287_v59 = vld [vmem:[#allocation4 + $0x3b0] sm:$0xff] }
 0x185   :  { %3614 = vmatpush1.bf16.msra.mxu0 %v9712_v57  ;;  %3778 = vmatpush1.bf16.msra.mxu1 %v9714_v38  ;;  %v244_v57 = vld [vmem:[#allocation4 + $0x258] sm:$0xff] }
 0x186   :  { %3615 = vmatprep.subr.bf16.mxu0 %v9721_v39  ;;  %3779 = vmatprep.subr.bf16.mxu1 %v9723_v40  ;;  %v248_v38 = vld [vmem:[#allocation4 + $0x278] sm:$0xff]  ;;  %v9768_v39 = vcombine.low %v235_v27, %v239_v28  ;;  %v9770_v40 = vcombine.low %v236_v29, %v240_v30  ;;  %v9817_v27 = vcombine.high %v283_v19, %v287_v59  ;;  %v291_v29 = vld [vmem:[#allocation4 + $0x3d0] sm:$0xff] }
 0x187   :  { %v9779_v42 = vcombine.high %v244_v57, %v248_v38  ;;  %v295_v30 = vld [vmem:[#allocation4 + $0x3f0] sm:$0xff] }
 0x189   :  { %3616 = vmatpush1.bf16.msra.mxu0 %v9720_v47  ;;  %3780 = vmatpush1.bf16.msra.mxu1 %v9722_v48  ;;  %v252_v47 = vld [vmem:[#allocation4 + $0x298] sm:$0xff] }
 0x18a   :  { %3617 = vmatprep.subr.bf16.mxu0 %v9729_v49  ;;  %3781 = vmatprep.subr.bf16.mxu1 %v9731_v50  ;;  %v256_v48 = vld [vmem:[#allocation4 + $0x2b8] sm:$0xff]  ;;  %v9776_v49 = vcombine.low %v243_v63, %v247_v37  ;;  %v9778_v50 = vcombine.low %v244_v57, %v248_v38  ;;  %v9825_v63 = vcombine.high %v291_v29, %v295_v30  ;;  %v299_v57 = vld [vmem:[#allocation4 + $0x410] sm:$0xff] }
 0x18b   :  { %v9787_v52 = vcombine.high %v252_v47, %v256_v48  ;;  %v303_v38 = vld [vmem:[#allocation4 + $0x430] sm:$0xff] }
 0x18d   :  { %3618 = vmatpush1.bf16.msra.mxu0 %v9728_v56  ;;  %3782 = vmatpush1.bf16.msra.mxu1 %v9730_v58  ;;  %v260_v56 = vld [vmem:[#allocation4 + $0x2d8] sm:$0xff] }
 0x18e   :  { %3619 = vmatprep.subr.bf16.mxu0 %v9737_v23  ;;  %3783 = vmatprep.subr.bf16.mxu1 %v9739_v60  ;;  %v264_v58 = vld [vmem:[#allocation4 + $0x2f8] sm:$0xff]  ;;  %v9784_v23 = vcombine.low %v251_v45, %v255_v46  ;;  %v9786_v60 = vcombine.low %v252_v47, %v256_v48  ;;  %v9833_v45 = vcombine.high %v299_v57, %v303_v38  ;;  %v307_v47 = vld [vmem:[#allocation4 + $0x450] sm:$0xff] }
 0x18f   :  { %v9795_v62 = vcombine.high %v260_v56, %v264_v58  ;;  %v311_v48 = vld [vmem:[#allocation4 + $0x470] sm:$0xff] }
 0x191   :  { %3620 = vmatpush1.bf16.msra.mxu0 %v9736_v2  ;;  %3784 = vmatpush1.bf16.msra.mxu1 %v9738_v3  ;;  %v268_v2 = vld [vmem:[#allocation4 + $0x318] sm:$0xff] }
 0x192   :  { %3621 = vmatprep.subr.bf16.mxu0 %v9745_v5  ;;  %3785 = vmatprep.subr.bf16.mxu1 %v9747_v6  ;;  %v272_v3 = vld [vmem:[#allocation4 + $0x338] sm:$0xff]  ;;  %v9792_v5 = vcombine.low %v259_v16, %v263_v55  ;;  %v9794_v6 = vcombine.low %v260_v56, %v264_v58  ;;  %v9841_v16 = vcombine.high %v307_v47, %v311_v48  ;;  %v315_v56 = vld [vmem:[#allocation4 + $0x490] sm:$0xff] }
 0x193   :  { %v9803_v8 = vcombine.high %v268_v2, %v272_v3  ;;  %v319_v58 = vld [vmem:[#allocation4 + $0x4b0] sm:$0xff] }
 0x195   :  { %3622 = vmatpush1.bf16.msra.mxu0 %v9744_v13  ;;  %3786 = vmatpush1.bf16.msra.mxu1 %v9746_v14  ;;  %v276_v13 = vld [vmem:[#allocation4 + $0x358] sm:$0xff] }
 0x196   :  { %3623 = vmatprep.subr.bf16.mxu0 %v9753_v33  ;;  %3787 = vmatprep.subr.bf16.mxu1 %v9755_v15  ;;  %v280_v14 = vld [vmem:[#allocation4 + $0x378] sm:$0xff]  ;;  %v9800_v33 = vcombine.low %v267_v0, %v271_v1  ;;  %v9802_v15 = vcombine.low %v268_v2, %v272_v3  ;;  %v9849_v0 = vcombine.high %v315_v56, %v319_v58  ;;  %v323_v2 = vld [vmem:[#allocation4 + $0x4d0] sm:$0xff] }
 0x197   :  { %v9811_v18 = vcombine.high %v276_v13, %v280_v14  ;;  %v327_v3 = vld [vmem:[#allocation4 + $0x4f0] sm:$0xff] }
 0x199   :  { %3624 = vmatpush1.bf16.msra.mxu0 %v9752_v20  ;;  %3788 = vmatpush1.bf16.msra.mxu1 %v9754_v21  ;;  %v284_v20 = vld [vmem:[#allocation4 + $0x398] sm:$0xff] }
 0x19a   :  { %3625 = vmatprep.subr.bf16.mxu0 %v9761_v22  ;;  %3789 = vmatprep.subr.bf16.mxu1 %v9763_v24  ;;  %v288_v21 = vld [vmem:[#allocation4 + $0x3b8] sm:$0xff]  ;;  %v9808_v22 = vcombine.low %v275_v10, %v279_v11  ;;  %v9810_v24 = vcombine.low %v276_v13, %v280_v14  ;;  %v9857_v10 = vcombine.high %v323_v2, %v327_v3  ;;  %v331_v13 = vld [vmem:[#allocation4 + $0x510] sm:$0xff] }
 0x19b   :  { %v9819_v28 = vcombine.high %v284_v20, %v288_v21  ;;  %v335_v14 = vld [vmem:[#allocation4 + $0x530] sm:$0xff] }
 0x19d   :  { %3626 = vmatpush1.bf16.msra.mxu0 %v9760_v31  ;;  %3790 = vmatpush1.bf16.msra.mxu1 %v9762_v32  ;;  %v292_v31 = vld [vmem:[#allocation4 + $0x3d8] sm:$0xff] }
 0x19e   :  { %3627 = vmatprep.subr.bf16.mxu0 %v9769_v34  ;;  %3791 = vmatprep.subr.bf16.mxu1 %v9771_v35  ;;  %v296_v32 = vld [vmem:[#allocation4 + $0x3f8] sm:$0xff]  ;;  %v9816_v34 = vcombine.low %v283_v19, %v287_v59  ;;  %v9818_v35 = vcombine.low %v284_v20, %v288_v21  ;;  %v9865_v19 = vcombine.high %v331_v13, %v335_v14  ;;  %v339_v20 = vld [vmem:[#allocation4 + $0x550] sm:$0xff] }
 0x19f   :  { %v9827_v37 = vcombine.high %v292_v31, %v296_v32  ;;  %v343_v21 = vld [vmem:[#allocation4 + $0x570] sm:$0xff] }
 0x1a1   :  { %3628 = vmatpush1.bf16.msra.mxu0 %v9768_v39  ;;  %3792 = vmatpush1.bf16.msra.mxu1 %v9770_v40  ;;  %v300_v39 = vld [vmem:[#allocation4 + $0x418] sm:$0xff] }
 0x1a2   :  { %3629 = vmatprep.subr.bf16.mxu0 %v9777_v41  ;;  %3793 = vmatprep.subr.bf16.mxu1 %v9779_v42  ;;  %v304_v40 = vld [vmem:[#allocation4 + $0x438] sm:$0xff]  ;;  %v9824_v41 = vcombine.low %v291_v29, %v295_v30  ;;  %v9826_v42 = vcombine.low %v292_v31, %v296_v32  ;;  %v9873_v29 = vcombine.high %v339_v20, %v343_v21  ;;  %v347_v31 = vld [vmem:[#allocation4 + $0x590] sm:$0xff] }
 0x1a3   :  { %v9835_v46 = vcombine.high %v300_v39, %v304_v40  ;;  %v351_v32 = vld [vmem:[#allocation4 + $0x5b0] sm:$0xff] }
 0x1a5   :  { %3630 = vmatpush1.bf16.msra.mxu0 %v9776_v49  ;;  %3794 = vmatpush1.bf16.msra.mxu1 %v9778_v50  ;;  %v308_v49 = vld [vmem:[#allocation4 + $0x458] sm:$0xff] }
 0x1a6   :  { %3631 = vmatprep.subr.bf16.mxu0 %v9785_v51  ;;  %3795 = vmatprep.subr.bf16.mxu1 %v9787_v52  ;;  %v312_v50 = vld [vmem:[#allocation4 + $0x478] sm:$0xff]  ;;  %v9832_v51 = vcombine.low %v299_v57, %v303_v38  ;;  %v9834_v52 = vcombine.low %v300_v39, %v304_v40  ;;  %v9881_v57 = vcombine.high %v347_v31, %v351_v32  ;;  %v355_v39 = vld [vmem:[#allocation4 + $0x5d0] sm:$0xff] }
 0x1a7   :  { %v9843_v55 = vcombine.high %v308_v49, %v312_v50  ;;  %v359_v40 = vld [vmem:[#allocation4 + $0x5f0] sm:$0xff] }
 0x1a9   :  { %3632 = vmatpush1.bf16.msra.mxu0 %v9784_v23  ;;  %3796 = vmatpush1.bf16.msra.mxu1 %v9786_v60  ;;  %v316_v23 = vld [vmem:[#allocation4 + $0x498] sm:$0xff] }
 0x1aa   :  { %3633 = vmatprep.subr.bf16.mxu0 %v9793_v61  ;;  %3797 = vmatprep.subr.bf16.mxu1 %v9795_v62  ;;  %v320_v60 = vld [vmem:[#allocation4 + $0x4b8] sm:$0xff]  ;;  %v9840_v61 = vcombine.low %v307_v47, %v311_v48  ;;  %v9842_v62 = vcombine.low %v308_v49, %v312_v50  ;;  %v9889_v47 = vcombine.high %v355_v39, %v359_v40  ;;  %v363_v49 = vld [vmem:[#allocation4 + $0x610] sm:$0xff] }
 0x1ab   :  { %v9851_v1 = vcombine.high %v316_v23, %v320_v60  ;;  %v367_v50 = vld [vmem:[#allocation4 + $0x630] sm:$0xff] }
 0x1ad   :  { %3634 = vmatpush1.bf16.msra.mxu0 %v9792_v5  ;;  %3798 = vmatpush1.bf16.msra.mxu1 %v9794_v6  ;;  %v324_v5 = vld [vmem:[#allocation4 + $0x4d8] sm:$0xff] }
 0x1ae   :  { %3635 = vmatprep.subr.bf16.mxu0 %v9801_v7  ;;  %3799 = vmatprep.subr.bf16.mxu1 %v9803_v8  ;;  %v328_v6 = vld [vmem:[#allocation4 + $0x4f8] sm:$0xff]  ;;  %v9848_v7 = vcombine.low %v315_v56, %v319_v58  ;;  %v9850_v8 = vcombine.low %v316_v23, %v320_v60  ;;  %v9897_v56 = vcombine.high %v363_v49, %v367_v50  ;;  %v371_v23 = vld [vmem:[#allocation4 + $0x650] sm:$0xff] }
 0x1af   :  { %v9859_v11 = vcombine.high %v324_v5, %v328_v6  ;;  %v375_v60 = vld [vmem:[#allocation4 + $0x670] sm:$0xff] }
 0x1b1   :  { %3636 = vmatpush1.bf16.msra.mxu0 %v9800_v33  ;;  %3800 = vmatpush1.bf16.msra.mxu1 %v9802_v15  ;;  %v332_v33 = vld [vmem:[#allocation4 + $0x518] sm:$0xff] }
 0x1b2   :  { %3637 = vmatprep.subr.bf16.mxu0 %v9809_v17  ;;  %3801 = vmatprep.subr.bf16.mxu1 %v9811_v18  ;;  %v336_v15 = vld [vmem:[#allocation4 + $0x538] sm:$0xff]  ;;  %v9856_v17 = vcombine.low %v323_v2, %v327_v3  ;;  %v9858_v18 = vcombine.low %v324_v5, %v328_v6  ;;  %v9905_v2 = vcombine.high %v371_v23, %v375_v60  ;;  %v379_v5 = vld [vmem:[#allocation4 + $0x690] sm:$0xff] }
 0x1b3   :  { %v9867_v59 = vcombine.high %v332_v33, %v336_v15  ;;  %v383_v6 = vld [vmem:[#allocation4 + $0x6b0] sm:$0xff] }
 0x1b5   :  { %3638 = vmatpush1.bf16.msra.mxu0 %v9808_v22  ;;  %3802 = vmatpush1.bf16.msra.mxu1 %v9810_v24  ;;  %v340_v22 = vld [vmem:[#allocation4 + $0x558] sm:$0xff] }
 0x1b6   :  { %3639 = vmatprep.subr.bf16.mxu0 %v9817_v27  ;;  %3803 = vmatprep.subr.bf16.mxu1 %v9819_v28  ;;  %v344_v24 = vld [vmem:[#allocation4 + $0x578] sm:$0xff]  ;;  %v9864_v27 = vcombine.low %v331_v13, %v335_v14  ;;  %v9866_v28 = vcombine.low %v332_v33, %v336_v15  ;;  %v9913_v13 = vcombine.high %v379_v5, %v383_v6  ;;  %v387_v33 = vld [vmem:[#allocation4 + $0x6d0] sm:$0xff] }
 0x1b7   :  { %v9875_v30 = vcombine.high %v340_v22, %v344_v24  ;;  %v391_v15 = vld [vmem:[#allocation4 + $0x6f0] sm:$0xff] }
 0x1b9   :  { %3640 = vmatpush1.bf16.msra.mxu0 %v9816_v34  ;;  %3804 = vmatpush1.bf16.msra.mxu1 %v9818_v35  ;;  %v348_v34 = vld [vmem:[#allocation4 + $0x598] sm:$0xff] }
 0x1ba   :  { %3641 = vmatprep.subr.bf16.mxu0 %v9825_v63  ;;  %3805 = vmatprep.subr.bf16.mxu1 %v9827_v37  ;;  %v352_v35 = vld [vmem:[#allocation4 + $0x5b8] sm:$0xff]  ;;  %v9872_v63 = vcombine.low %v339_v20, %v343_v21  ;;  %v9874_v37 = vcombine.low %v340_v22, %v344_v24  ;;  %v9921_v20 = vcombine.high %v387_v33, %v391_v15  ;;  %v395_v22 = vld [vmem:[#allocation4 + $0x710] sm:$0xff] }
 0x1bb   :  { %v9883_v38 = vcombine.high %v348_v34, %v352_v35  ;;  %v399_v24 = vld [vmem:[#allocation4 + $0x730] sm:$0xff] }
 0x1bd   :  { %3642 = vmatpush1.bf16.msra.mxu0 %v9824_v41  ;;  %3806 = vmatpush1.bf16.msra.mxu1 %v9826_v42  ;;  %v356_v41 = vld [vmem:[#allocation4 + $0x5d8] sm:$0xff] }
 0x1be   :  { %3652 = vmatprep.subr.bf16.mxu0 %v9833_v45  ;;  %3816 = vmatprep.subr.bf16.mxu1 %v9835_v46  ;;  %v360_v42 = vld [vmem:[#allocation4 + $0x5f8] sm:$0xff]  ;;  %v9880_v45 = vcombine.low %v347_v31, %v351_v32  ;;  %v9882_v46 = vcombine.low %v348_v34, %v352_v35  ;;  %v9929_v31 = vcombine.high %v395_v22, %v399_v24  ;;  %v403_v34 = vld [vmem:[#allocation4 + $0x750] sm:$0xff] }
 0x1bf   :  { %v9891_v48 = vcombine.high %v356_v41, %v360_v42  ;;  %v407_v35 = vld [vmem:[#allocation4 + $0x770] sm:$0xff] }
 0x1c0   :  { %3644 = vmatmul.mubr.bf16.vlgmr.msra.gmra.mrb[4].mxu0 %v11849_v25  ;;  %3808 = vmatmul.mubr.bf16.vlgmr.msra.gmra.mrb[4].mxu1 %v11849_v25 }
 0x1c1   :  { %3653 = vmatpush1.bf16.msra.mxu0 %v9832_v51  ;;  %3817 = vmatpush1.bf16.msra.mxu1 %v9834_v52  ;;  %v364_v51 = vld [vmem:[#allocation4 + $0x618] sm:$0xff] }
 0x1c2   :  { %3654 = vmatprep.subr.bf16.mxu0 %v9841_v16  ;;  %3818 = vmatprep.subr.bf16.mxu1 %v9843_v55  ;;  %v368_v52 = vld [vmem:[#allocation4 + $0x638] sm:$0xff]  ;;  %v9888_v16 = vcombine.low %v355_v39, %v359_v40  ;;  %v9890_v55 = vcombine.low %v356_v41, %v360_v42  ;;  %v9937_v39 = vcombine.high %v403_v34, %v407_v35  ;;  %v411_v41 = vld [vmem:[#allocation4 + $0x790] sm:$0xff] }
 0x1c3   :  { %3684 = vmatprep.mubr.bf16.mxu0 %v11851_v36  ;;  %3848 = vmatprep.mubr.bf16.mxu1 %v11851_v36  ;;  %v9899_v58 = vcombine.high %v364_v51, %v368_v52  ;;  %v415_v42 = vld [vmem:[#allocation4 + $0x7b0] sm:$0xff] }
 0x1c5   :  { %3655 = vmatpush1.bf16.msra.mxu0 %v9840_v61  ;;  %3819 = vmatpush1.bf16.msra.mxu1 %v9842_v62  ;;  %v372_v61 = vld [vmem:[#allocation4 + $0x658] sm:$0xff] }
 0x1c6   :  { %3656 = vmatprep.subr.bf16.mxu0 %v9849_v0  ;;  %3820 = vmatprep.subr.bf16.mxu1 %v9851_v1  ;;  %v376_v62 = vld [vmem:[#allocation4 + $0x678] sm:$0xff]  ;;  %v9896_v0 = vcombine.low %v363_v49, %v367_v50  ;;  %v9898_v1 = vcombine.low %v364_v51, %v368_v52  ;;  %v9945_v49 = vcombine.high %v411_v41, %v415_v42  ;;  %v419_v51 = vld [vmem:[#allocation4 + $0x7d0] sm:$0xff] }
 0x1c7   :  { %v9907_v3 = vcombine.high %v372_v61, %v376_v62  ;;  %v423_v52 = vld [vmem:[#allocation4 + $0x7f0] sm:$0xff] }
 0x1c9   :  { %3657 = vmatpush1.bf16.msra.mxu0 %v9848_v7  ;;  %3821 = vmatpush1.bf16.msra.mxu1 %v9850_v8  ;;  %v380_v7 = vld [vmem:[#allocation4 + $0x698] sm:$0xff] }
 0x1ca   :  { %3658 = vmatprep.subr.bf16.mxu0 %v9857_v10  ;;  %3822 = vmatprep.subr.bf16.mxu1 %v9859_v11  ;;  %v384_v8 = vld [vmem:[#allocation4 + $0x6b8] sm:$0xff]  ;;  %v9904_v10 = vcombine.low %v371_v23, %v375_v60  ;;  %v9906_v11 = vcombine.low %v372_v61, %v376_v62  ;;  %v9953_v23 = vcombine.high %v419_v51, %v423_v52  ;;  %v427_v61 = vld [vmem:[#allocation4 + $0x810] sm:$0xff] }
 0x1cb   :  { %v9915_v14 = vcombine.high %v380_v7, %v384_v8  ;;  %v431_v62 = vld [vmem:[#allocation4 + $0x830] sm:$0xff] }
 0x1cd   :  { %3659 = vmatpush1.bf16.msra.mxu0 %v9856_v17  ;;  %3823 = vmatpush1.bf16.msra.mxu1 %v9858_v18  ;;  %v388_v17 = vld [vmem:[#allocation4 + $0x6d8] sm:$0xff] }
 0x1ce   :  { %3660 = vmatprep.subr.bf16.mxu0 %v9865_v19  ;;  %3824 = vmatprep.subr.bf16.mxu1 %v9867_v59  ;;  %v392_v18 = vld [vmem:[#allocation4 + $0x6f8] sm:$0xff]  ;;  %v9912_v19 = vcombine.low %v379_v5, %v383_v6  ;;  %v9914_v59 = vcombine.low %v380_v7, %v384_v8  ;;  %v9961_v5 = vcombine.high %v427_v61, %v431_v62  ;;  %v435_v7 = vld [vmem:[#allocation4 + $0x850] sm:$0xff] }
 0x1cf   :  { %v9923_v21 = vcombine.high %v388_v17, %v392_v18  ;;  %v439_v8 = vld [vmem:[#allocation4 + $0x870] sm:$0xff] }
 0x1d1   :  { %3661 = vmatpush1.bf16.msra.mxu0 %v9864_v27  ;;  %3825 = vmatpush1.bf16.msra.mxu1 %v9866_v28  ;;  %v396_v27 = vld [vmem:[#allocation4 + $0x718] sm:$0xff] }
 0x1d2   :  { %3662 = vmatprep.subr.bf16.mxu0 %v9873_v29  ;;  %3826 = vmatprep.subr.bf16.mxu1 %v9875_v30  ;;  %v400_v28 = vld [vmem:[#allocation4 + $0x738] sm:$0xff]  ;;  %v9920_v29 = vcombine.low %v387_v33, %v391_v15  ;;  %v9922_v30 = vcombine.low %v388_v17, %v392_v18  ;;  %v9969_v33 = vcombine.high %v435_v7, %v439_v8  ;;  %v443_v17 = vld [vmem:[#allocation4 + $0x890] sm:$0xff] }
 0x1d3   :  { %v9931_v32 = vcombine.high %v396_v27, %v400_v28  ;;  %v447_v18 = vld [vmem:[#allocation4 + $0x8b0] sm:$0xff] }
 0x1d5   :  { %3663 = vmatpush1.bf16.msra.mxu0 %v9872_v63  ;;  %3827 = vmatpush1.bf16.msra.mxu1 %v9874_v37  ;;  %v404_v63 = vld [vmem:[#allocation4 + $0x758] sm:$0xff] }
 0x1d6   :  { %3664 = vmatprep.subr.bf16.mxu0 %v9881_v57  ;;  %3828 = vmatprep.subr.bf16.mxu1 %v9883_v38  ;;  %v408_v37 = vld [vmem:[#allocation4 + $0x778] sm:$0xff]  ;;  %v9928_v57 = vcombine.low %v395_v22, %v399_v24  ;;  %v9930_v38 = vcombine.low %v396_v27, %v400_v28  ;;  %v9977_v22 = vcombine.high %v443_v17, %v447_v18  ;;  %v451_v27 = vld [vmem:[#allocation4 + $0x8d0] sm:$0xff] }
 0x1d7   :  { %v9939_v40 = vcombine.high %v404_v63, %v408_v37  ;;  %v455_v28 = vld [vmem:[#allocation4 + $0x8f0] sm:$0xff] }
 0x1d9   :  { %3665 = vmatpush1.bf16.msra.mxu0 %v9880_v45  ;;  %3829 = vmatpush1.bf16.msra.mxu1 %v9882_v46  ;;  %v412_v45 = vld [vmem:[#allocation4 + $0x798] sm:$0xff] }
 0x1da   :  { %3666 = vmatprep.subr.bf16.mxu0 %v9889_v47  ;;  %3830 = vmatprep.subr.bf16.mxu1 %v9891_v48  ;;  %v416_v46 = vld [vmem:[#allocation4 + $0x7b8] sm:$0xff]  ;;  %v9936_v47 = vcombine.low %v403_v34, %v407_v35  ;;  %v9938_v48 = vcombine.low %v404_v63, %v408_v37  ;;  %v9985_v34 = vcombine.high %v451_v27, %v455_v28  ;;  %v459_v63 = vld [vmem:[#allocation4 + $0x910] sm:$0xff] }
 0x1db   :  { %v9947_v50 = vcombine.high %v412_v45, %v416_v46  ;;  %v463_v37 = vld [vmem:[#allocation4 + $0x930] sm:$0xff] }
 0x1dd   :  { %3667 = vmatpush1.bf16.msra.mxu0 %v9888_v16  ;;  %3831 = vmatpush1.bf16.msra.mxu1 %v9890_v55  ;;  %v420_v16 = vld [vmem:[#allocation4 + $0x7d8] sm:$0xff] }
 0x1de   :  { %3668 = vmatprep.subr.bf16.mxu0 %v9897_v56  ;;  %3832 = vmatprep.subr.bf16.mxu1 %v9899_v58  ;;  %v424_v55 = vld [vmem:[#allocation4 + $0x7f8] sm:$0xff]  ;;  %v9944_v56 = vcombine.low %v411_v41, %v415_v42  ;;  %v9946_v58 = vcombine.low %v412_v45, %v416_v46  ;;  %v9993_v41 = vcombine.high %v459_v63, %v463_v37  ;;  %v467_v45 = vld [vmem:[#allocation4 + $0x950] sm:$0xff] }
 0x1df   :  { %v9955_v60 = vcombine.high %v420_v16, %v424_v55  ;;  %v471_v46 = vld [vmem:[#allocation4 + $0x970] sm:$0xff] }
 0x1e1   :  { %3669 = vmatpush1.bf16.msra.mxu0 %v9896_v0  ;;  %3833 = vmatpush1.bf16.msra.mxu1 %v9898_v1  ;;  %v428_v0 = vld [vmem:[#allocation4 + $0x818] sm:$0xff] }
 0x1e2   :  { %3670 = vmatprep.subr.bf16.mxu0 %v9905_v2  ;;  %3834 = vmatprep.subr.bf16.mxu1 %v9907_v3  ;;  %v432_v1 = vld [vmem:[#allocation4 + $0x838] sm:$0xff]  ;;  %v9952_v2 = vcombine.low %v419_v51, %v423_v52  ;;  %v9954_v3 = vcombine.low %v420_v16, %v424_v55  ;;  %v10001_v51 = vcombine.high %v467_v45, %v471_v46  ;;  %v475_v16 = vld [vmem:[#allocation4 + $0x990] sm:$0xff] }
 0x1e3   :  { %v9963_v6 = vcombine.high %v428_v0, %v432_v1  ;;  %v479_v55 = vld [vmem:[#allocation4 + $0x9b0] sm:$0xff] }
 0x1e5   :  { %3671 = vmatpush1.bf16.msra.mxu0 %v9904_v10  ;;  %3835 = vmatpush1.bf16.msra.mxu1 %v9906_v11  ;;  %v436_v10 = vld [vmem:[#allocation4 + $0x858] sm:$0xff] }
 0x1e6   :  { %3672 = vmatprep.subr.bf16.mxu0 %v9913_v13  ;;  %3836 = vmatprep.subr.bf16.mxu1 %v9915_v14  ;;  %v440_v11 = vld [vmem:[#allocation4 + $0x878] sm:$0xff]  ;;  %v9960_v13 = vcombine.low %v427_v61, %v431_v62  ;;  %v9962_v14 = vcombine.low %v428_v0, %v432_v1  ;;  %v10009_v61 = vcombine.high %v475_v16, %v479_v55  ;;  %v483_v0 = vld [vmem:[#allocation4 + $0x9d0] sm:$0xff] }
 0x1e7   :  { %v9971_v15 = vcombine.high %v436_v10, %v440_v11  ;;  %v487_v1 = vld [vmem:[#allocation4 + $0x9f0] sm:$0xff] }
 0x1e9   :  { %3673 = vmatpush1.bf16.msra.mxu0 %v9912_v19  ;;  %3837 = vmatpush1.bf16.msra.mxu1 %v9914_v59  ;;  %v444_v19 = vld [vmem:[#allocation4 + $0x898] sm:$0xff] }
 0x1ea   :  { %3674 = vmatprep.subr.bf16.mxu0 %v9921_v20  ;;  %3838 = vmatprep.subr.bf16.mxu1 %v9923_v21  ;;  %v448_v59 = vld [vmem:[#allocation4 + $0x8b8] sm:$0xff]  ;;  %v9968_v20 = vcombine.low %v435_v7, %v439_v8  ;;  %v9970_v21 = vcombine.low %v436_v10, %v440_v11  ;;  %v10017_v7 = vcombine.high %v483_v0, %v487_v1  ;;  %v491_v10 = vld [vmem:[#allocation4 + $0xa10] sm:$0xff] }
 0x1eb   :  { %v9979_v24 = vcombine.high %v444_v19, %v448_v59  ;;  %v495_v11 = vld [vmem:[#allocation4 + $0xa30] sm:$0xff] }
 0x1ed   :  { %3675 = vmatpush1.bf16.msra.mxu0 %v9920_v29  ;;  %3839 = vmatpush1.bf16.msra.mxu1 %v9922_v30  ;;  %v452_v29 = vld [vmem:[#allocation4 + $0x8d8] sm:$0xff] }
 0x1ee   :  { %3676 = vmatprep.subr.bf16.mxu0 %v9929_v31  ;;  %3840 = vmatprep.subr.bf16.mxu1 %v9931_v32  ;;  %v456_v30 = vld [vmem:[#allocation4 + $0x8f8] sm:$0xff]  ;;  %v9976_v31 = vcombine.low %v443_v17, %v447_v18  ;;  %v9978_v32 = vcombine.low %v444_v19, %v448_v59  ;;  %v10025_v17 = vcombine.high %v491_v10, %v495_v11  ;;  %v499_v19 = vld [vmem:[#allocation4 + $0xa50] sm:$0xff] }
 0x1ef   :  { %v9987_v35 = vcombine.high %v452_v29, %v456_v30  ;;  %v503_v59 = vld [vmem:[#allocation4 + $0xa70] sm:$0xff] }
 0x1f1   :  { %3677 = vmatpush1.bf16.msra.mxu0 %v9928_v57  ;;  %3841 = vmatpush1.bf16.msra.mxu1 %v9930_v38  ;;  %v460_v57 = vld [vmem:[#allocation4 + $0x918] sm:$0xff] }
 0x1f2   :  { %3678 = vmatprep.subr.bf16.mxu0 %v9937_v39  ;;  %3842 = vmatprep.subr.bf16.mxu1 %v9939_v40  ;;  %v464_v38 = vld [vmem:[#allocation4 + $0x938] sm:$0xff]  ;;  %v9984_v39 = vcombine.low %v451_v27, %v455_v28  ;;  %v9986_v40 = vcombine.low %v452_v29, %v456_v30  ;;  %v10033_v27 = vcombine.high %v499_v19, %v503_v59  ;;  %v507_v29 = vld [vmem:[#allocation4 + $0xa90] sm:$0xff] }
 0x1f3   :  { %v9995_v42 = vcombine.high %v460_v57, %v464_v38  ;;  %v511_v30 = vld [vmem:[#allocation4 + $0xab0] sm:$0xff] }
 0x1f5   :  { %3679 = vmatpush1.bf16.msra.mxu0 %v9936_v47  ;;  %3843 = vmatpush1.bf16.msra.mxu1 %v9938_v48  ;;  %v468_v47 = vld [vmem:[#allocation4 + $0x958] sm:$0xff] }
 0x1f6   :  { %3680 = vmatprep.subr.bf16.mxu0 %v9945_v49  ;;  %3844 = vmatprep.subr.bf16.mxu1 %v9947_v50  ;;  %v472_v48 = vld [vmem:[#allocation4 + $0x978] sm:$0xff]  ;;  %v9992_v49 = vcombine.low %v459_v63, %v463_v37  ;;  %v9994_v50 = vcombine.low %v460_v57, %v464_v38  ;;  %v10041_v63 = vcombine.high %v507_v29, %v511_v30  ;;  %v515_v57 = vld [vmem:[#allocation4 + $0xad0] sm:$0xff] }
 0x1f7   :  { %v10003_v52 = vcombine.high %v468_v47, %v472_v48  ;;  %v519_v38 = vld [vmem:[#allocation4 + $0xaf0] sm:$0xff] }
 0x1f9   :  { %3681 = vmatpush1.bf16.msra.mxu0 %v9944_v56  ;;  %3845 = vmatpush1.bf16.msra.mxu1 %v9946_v58  ;;  %v476_v56 = vld [vmem:[#allocation4 + $0x998] sm:$0xff] }
 0x1fa   :  { %3682 = vmatprep.subr.bf16.mxu0 %v9953_v23  ;;  %3846 = vmatprep.subr.bf16.mxu1 %v9955_v60  ;;  %v480_v58 = vld [vmem:[#allocation4 + $0x9b8] sm:$0xff]  ;;  %v10000_v23 = vcombine.low %v467_v45, %v471_v46  ;;  %v10002_v60 = vcombine.low %v468_v47, %v472_v48  ;;  %v10049_v45 = vcombine.high %v515_v57, %v519_v38  ;;  %v523_v47 = vld [vmem:[#allocation4 + $0xb10] sm:$0xff] }
 0x1fb   :  { %v10011_v62 = vcombine.high %v476_v56, %v480_v58  ;;  %v527_v48 = vld [vmem:[#allocation4 + $0xb30] sm:$0xff] }
 0x1fd   :  { %3683 = vmatpush1.bf16.msra.mxu0 %v9952_v2  ;;  %3847 = vmatpush1.bf16.msra.mxu1 %v9954_v3  ;;  %v484_v2 = vld [vmem:[#allocation4 + $0x9d8] sm:$0xff] }
 0x1fe   :  { %3693 = vmatprep.subr.bf16.mxu0 %v9961_v5  ;;  %3857 = vmatprep.subr.bf16.mxu1 %v9963_v6  ;;  %v488_v3 = vld [vmem:[#allocation4 + $0x9f8] sm:$0xff]  ;;  %v10008_v5 = vcombine.low %v475_v16, %v479_v55  ;;  %v10010_v6 = vcombine.low %v476_v56, %v480_v58  ;;  %v10057_v16 = vcombine.high %v523_v47, %v527_v48  ;;  %v531_v56 = vld [vmem:[#allocation4 + $0xb50] sm:$0xff] }
 0x1ff   :  { %v10019_v8 = vcombine.high %v484_v2, %v488_v3  ;;  %v535_v58 = vld [vmem:[#allocation4 + $0xb70] sm:$0xff] }
 0x200   :  { %3685 = vmatmul.mubr.bf16.vlgmr.msra.gmra.mrb[4].mxu0 %v11867_v43  ;;  %3849 = vmatmul.mubr.bf16.vlgmr.msra.gmra.mrb[4].mxu1 %v11867_v43 }
 0x201   :  { %3694 = vmatpush1.bf16.msra.mxu0 %v9960_v13  ;;  %3858 = vmatpush1.bf16.msra.mxu1 %v9962_v14  ;;  %v492_v13 = vld [vmem:[#allocation4 + $0xa18] sm:$0xff] }
 0x202   :  { %3695 = vmatprep.subr.bf16.mxu0 %v9969_v33  ;;  %3859 = vmatprep.subr.bf16.mxu1 %v9971_v15  ;;  %v496_v14 = vld [vmem:[#allocation4 + $0xa38] sm:$0xff]  ;;  %v10016_v33 = vcombine.low %v483_v0, %v487_v1  ;;  %v10018_v15 = vcombine.low %v484_v2, %v488_v3  ;;  %v10065_v0 = vcombine.high %v531_v56, %v535_v58  ;;  %v539_v2 = vld [vmem:[#allocation4 + $0xb90] sm:$0xff] }
 0x203   :  { %3725 = vmatprep.mubr.bf16.mxu0 %v11869_v54  ;;  %3889 = vmatprep.mubr.bf16.mxu1 %v11869_v54  ;;  %v10027_v18 = vcombine.high %v492_v13, %v496_v14  ;;  %v543_v3 = vld [vmem:[#allocation4 + $0xbb0] sm:$0xff] }
 0x205   :  { %3696 = vmatpush1.bf16.msra.mxu0 %v9968_v20  ;;  %3860 = vmatpush1.bf16.msra.mxu1 %v9970_v21  ;;  %v500_v20 = vld [vmem:[#allocation4 + $0xa58] sm:$0xff] }
 0x206   :  { %3697 = vmatprep.subr.bf16.mxu0 %v9977_v22  ;;  %3861 = vmatprep.subr.bf16.mxu1 %v9979_v24  ;;  %v504_v21 = vld [vmem:[#allocation4 + $0xa78] sm:$0xff]  ;;  %v10024_v22 = vcombine.low %v491_v10, %v495_v11  ;;  %v10026_v24 = vcombine.low %v492_v13, %v496_v14  ;;  %v10073_v10 = vcombine.high %v539_v2, %v543_v3  ;;  %v547_v13 = vld [vmem:[#allocation4 + $0xbd0] sm:$0xff] }
 0x207   :  { %v10035_v28 = vcombine.high %v500_v20, %v504_v21  ;;  %v551_v14 = vld [vmem:[#allocation4 + $0xbf0] sm:$0xff] }
 0x209   :  { %3698 = vmatpush1.bf16.msra.mxu0 %v9976_v31  ;;  %3862 = vmatpush1.bf16.msra.mxu1 %v9978_v32  ;;  %v508_v31 = vld [vmem:[#allocation4 + $0xa98] sm:$0xff] }
 0x20a   :  { %3699 = vmatprep.subr.bf16.mxu0 %v9985_v34  ;;  %3863 = vmatprep.subr.bf16.mxu1 %v9987_v35  ;;  %v512_v32 = vld [vmem:[#allocation4 + $0xab8] sm:$0xff]  ;;  %v10032_v34 = vcombine.low %v499_v19, %v503_v59  ;;  %v10034_v35 = vcombine.low %v500_v20, %v504_v21  ;;  %v10081_v19 = vcombine.high %v547_v13, %v551_v14  ;;  %v555_v20 = vld [vmem:[#allocation4 + $0xc10] sm:$0xff] }
 0x20b   :  { %v10043_v37 = vcombine.high %v508_v31, %v512_v32  ;;  %v559_v21 = vld [vmem:[#allocation4 + $0xc30] sm:$0xff] }
 0x20d   :  { %3700 = vmatpush1.bf16.msra.mxu0 %v9984_v39  ;;  %3864 = vmatpush1.bf16.msra.mxu1 %v9986_v40  ;;  %v516_v39 = vld [vmem:[#allocation4 + $0xad8] sm:$0xff] }
 0x20e   :  { %3701 = vmatprep.subr.bf16.mxu0 %v9993_v41  ;;  %3865 = vmatprep.subr.bf16.mxu1 %v9995_v42  ;;  %v520_v40 = vld [vmem:[#allocation4 + $0xaf8] sm:$0xff]  ;;  %v10040_v41 = vcombine.low %v507_v29, %v511_v30  ;;  %v10042_v42 = vcombine.low %v508_v31, %v512_v32  ;;  %v10089_v29 = vcombine.high %v555_v20, %v559_v21  ;;  %v563_v31 = vld [vmem:[#allocation4 + $0xc50] sm:$0xff] }
 0x20f   :  { %v10051_v46 = vcombine.high %v516_v39, %v520_v40  ;;  %v567_v32 = vld [vmem:[#allocation4 + $0xc70] sm:$0xff] }
 0x211   :  { %3702 = vmatpush1.bf16.msra.mxu0 %v9992_v49  ;;  %3866 = vmatpush1.bf16.msra.mxu1 %v9994_v50  ;;  %v524_v49 = vld [vmem:[#allocation4 + $0xb18] sm:$0xff] }
 0x212   :  { %3703 = vmatprep.subr.bf16.mxu0 %v10001_v51  ;;  %3867 = vmatprep.subr.bf16.mxu1 %v10003_v52  ;;  %v528_v50 = vld [vmem:[#allocation4 + $0xb38] sm:$0xff]  ;;  %v10048_v51 = vcombine.low %v515_v57, %v519_v38  ;;  %v10050_v52 = vcombine.low %v516_v39, %v520_v40  ;;  %v10097_v57 = vcombine.high %v563_v31, %v567_v32  ;;  %v571_v39 = vld [vmem:[#allocation4 + $0xc90] sm:$0xff] }
 0x213   :  { %v10059_v55 = vcombine.high %v524_v49, %v528_v50  ;;  %v575_v40 = vld [vmem:[#allocation4 + $0xcb0] sm:$0xff] }
 0x215   :  { %3704 = vmatpush1.bf16.msra.mxu0 %v10000_v23  ;;  %3868 = vmatpush1.bf16.msra.mxu1 %v10002_v60  ;;  %v532_v23 = vld [vmem:[#allocation4 + $0xb58] sm:$0xff] }
 0x216   :  { %3705 = vmatprep.subr.bf16.mxu0 %v10009_v61  ;;  %3869 = vmatprep.subr.bf16.mxu1 %v10011_v62  ;;  %v536_v60 = vld [vmem:[#allocation4 + $0xb78] sm:$0xff]  ;;  %v10056_v61 = vcombine.low %v523_v47, %v527_v48  ;;  %v10058_v62 = vcombine.low %v524_v49, %v528_v50  ;;  %v10105_v47 = vcombine.high %v571_v39, %v575_v40  ;;  %v579_v49 = vld [vmem:[#allocation4 + $0xcd0] sm:$0xff] }
 0x217   :  { %v10067_v1 = vcombine.high %v532_v23, %v536_v60  ;;  %v583_v50 = vld [vmem:[#allocation4 + $0xcf0] sm:$0xff] }
 0x219   :  { %3706 = vmatpush1.bf16.msra.mxu0 %v10008_v5  ;;  %3870 = vmatpush1.bf16.msra.mxu1 %v10010_v6  ;;  %v540_v5 = vld [vmem:[#allocation4 + $0xb98] sm:$0xff] }
 0x21a   :  { %3707 = vmatprep.subr.bf16.mxu0 %v10017_v7  ;;  %3871 = vmatprep.subr.bf16.mxu1 %v10019_v8  ;;  %v544_v6 = vld [vmem:[#allocation4 + $0xbb8] sm:$0xff]  ;;  %v10064_v7 = vcombine.low %v531_v56, %v535_v58  ;;  %v10066_v8 = vcombine.low %v532_v23, %v536_v60  ;;  %v10113_v56 = vcombine.high %v579_v49, %v583_v50  ;;  %v587_v23 = vld [vmem:[#allocation4 + $0xd10] sm:$0xff] }
 0x21b   :  { %v10075_v11 = vcombine.high %v540_v5, %v544_v6  ;;  %v591_v60 = vld [vmem:[#allocation4 + $0xd30] sm:$0xff] }
 0x21d   :  { %3708 = vmatpush1.bf16.msra.mxu0 %v10016_v33  ;;  %3872 = vmatpush1.bf16.msra.mxu1 %v10018_v15  ;;  %v548_v33 = vld [vmem:[#allocation4 + $0xbd8] sm:$0xff] }
 0x21e   :  { %3709 = vmatprep.subr.bf16.mxu0 %v10025_v17  ;;  %3873 = vmatprep.subr.bf16.mxu1 %v10027_v18  ;;  %v552_v15 = vld [vmem:[#allocation4 + $0xbf8] sm:$0xff]  ;;  %v10072_v17 = vcombine.low %v539_v2, %v543_v3  ;;  %v10074_v18 = vcombine.low %v540_v5, %v544_v6  ;;  %v10121_v2 = vcombine.high %v587_v23, %v591_v60  ;;  %v595_v5 = vld [vmem:[#allocation4 + $0xd50] sm:$0xff] }
 0x21f   :  { %v10083_v59 = vcombine.high %v548_v33, %v552_v15  ;;  %v599_v6 = vld [vmem:[#allocation4 + $0xd70] sm:$0xff] }
 0x221   :  { %3710 = vmatpush1.bf16.msra.mxu0 %v10024_v22  ;;  %3874 = vmatpush1.bf16.msra.mxu1 %v10026_v24  ;;  %v556_v22 = vld [vmem:[#allocation4 + $0xc18] sm:$0xff] }
 0x222   :  { %3711 = vmatprep.subr.bf16.mxu0 %v10033_v27  ;;  %3875 = vmatprep.subr.bf16.mxu1 %v10035_v28  ;;  %v560_v24 = vld [vmem:[#allocation4 + $0xc38] sm:$0xff]  ;;  %v10080_v27 = vcombine.low %v547_v13, %v551_v14  ;;  %v10082_v28 = vcombine.low %v548_v33, %v552_v15  ;;  %v10129_v13 = vcombine.high %v595_v5, %v599_v6  ;;  %v603_v33 = vld [vmem:[#allocation4 + $0xd90] sm:$0xff] }
 0x223   :  { %v10091_v30 = vcombine.high %v556_v22, %v560_v24  ;;  %v607_v15 = vld [vmem:[#allocation4 + $0xdb0] sm:$0xff] }
 0x225   :  { %3712 = vmatpush1.bf16.msra.mxu0 %v10032_v34  ;;  %3876 = vmatpush1.bf16.msra.mxu1 %v10034_v35  ;;  %v564_v34 = vld [vmem:[#allocation4 + $0xc58] sm:$0xff] }
 0x226   :  { %3713 = vmatprep.subr.bf16.mxu0 %v10041_v63  ;;  %3877 = vmatprep.subr.bf16.mxu1 %v10043_v37  ;;  %v568_v35 = vld [vmem:[#allocation4 + $0xc78] sm:$0xff]  ;;  %v10088_v63 = vcombine.low %v555_v20, %v559_v21  ;;  %v10090_v37 = vcombine.low %v556_v22, %v560_v24  ;;  %v10137_v20 = vcombine.high %v603_v33, %v607_v15  ;;  %v611_v24 = vld [vmem:[#allocation4 + $0xdd0] sm:$0xff] }
 0x227   :  { %v10099_v38 = vcombine.high %v564_v34, %v568_v35 }
 0x229   :  { %3714 = vmatpush1.bf16.msra.mxu0 %v10040_v41  ;;  %3878 = vmatpush1.bf16.msra.mxu1 %v10042_v42  ;;  %v572_v41 = vld [vmem:[#allocation4 + $0xc98] sm:$0xff] }
 0x22a   :  { %3715 = vmatprep.subr.bf16.mxu0 %v10049_v45  ;;  %3879 = vmatprep.subr.bf16.mxu1 %v10051_v46  ;;  %v576_v42 = vld [vmem:[#allocation4 + $0xcb8] sm:$0xff]  ;;  %v10096_v45 = vcombine.low %v563_v31, %v567_v32  ;;  %v10098_v46 = vcombine.low %v564_v34, %v568_v35  ;;  %v10136_v35 = vcombine.low %v603_v33, %v607_v15 }
 0x22b   :  { %v10107_v48 = vcombine.high %v572_v41, %v576_v42  ;;  %v616_v31 = vld [vmem:[#allocation4 + $0xdf8] sm:$0xff] }
 0x22d   :  { %3716 = vmatpush1.bf16.msra.mxu0 %v10048_v51  ;;  %3880 = vmatpush1.bf16.msra.mxu1 %v10050_v52  ;;  %v580_v51 = vld [vmem:[#allocation4 + $0xcd8] sm:$0xff] }
 0x22e   :  { %3717 = vmatprep.subr.bf16.mxu0 %v10057_v16  ;;  %3881 = vmatprep.subr.bf16.mxu1 %v10059_v55  ;;  %v584_v52 = vld [vmem:[#allocation4 + $0xcf8] sm:$0xff]  ;;  %v10104_v16 = vcombine.low %v571_v39, %v575_v40  ;;  %v10106_v55 = vcombine.low %v572_v41, %v576_v42  ;;  %v619_v41 = vld [vmem:[#allocation4 + $0xe10] sm:$0xff] }
 0x22f   :  { %v10115_v58 = vcombine.high %v580_v51, %v584_v52  ;;  %v623_v42 = vld [vmem:[#allocation4 + $0xe30] sm:$0xff] }
 0x231   :  { %3718 = vmatpush1.bf16.msra.mxu0 %v10056_v61  ;;  %3882 = vmatpush1.bf16.msra.mxu1 %v10058_v62  ;;  %v588_v61 = vld [vmem:[#allocation4 + $0xd18] sm:$0xff] }
 0x232   :  { %3719 = vmatprep.subr.bf16.mxu0 %v10065_v0  ;;  %3883 = vmatprep.subr.bf16.mxu1 %v10067_v1  ;;  %v592_v62 = vld [vmem:[#allocation4 + $0xd38] sm:$0xff]  ;;  %v10112_v0 = vcombine.low %v579_v49, %v583_v50  ;;  %v10114_v1 = vcombine.low %v580_v51, %v584_v52  ;;  %v10153_v49 = vcombine.high %v619_v41, %v623_v42  ;;  %v627_v51 = vld [vmem:[#allocation4 + $0xe50] sm:$0xff] }
 0x233   :  { %v10123_v3 = vcombine.high %v588_v61, %v592_v62  ;;  %v631_v52 = vld [vmem:[#allocation4 + $0xe70] sm:$0xff] }
 0x235   :  { %3720 = vmatpush1.bf16.msra.mxu0 %v10064_v7  ;;  %3884 = vmatpush1.bf16.msra.mxu1 %v10066_v8  ;;  %v596_v7 = vld [vmem:[#allocation4 + $0xd58] sm:$0xff] }
 0x236   :  { %3721 = vmatprep.subr.bf16.mxu0 %v10073_v10  ;;  %3885 = vmatprep.subr.bf16.mxu1 %v10075_v11  ;;  %v600_v8 = vld [vmem:[#allocation4 + $0xd78] sm:$0xff]  ;;  %v10120_v10 = vcombine.low %v587_v23, %v591_v60  ;;  %v10122_v11 = vcombine.low %v588_v61, %v592_v62  ;;  %v10161_v23 = vcombine.high %v627_v51, %v631_v52  ;;  %v635_v61 = vld [vmem:[#allocation4 + $0xe90] sm:$0xff] }
 0x237   :  { %v10131_v14 = vcombine.high %v596_v7, %v600_v8  ;;  %v639_v62 = vld [vmem:[#allocation4 + $0xeb0] sm:$0xff] }
 0x239   :  { %3722 = vmatpush1.bf16.msra.mxu0 %v10072_v17  ;;  %3886 = vmatpush1.bf16.msra.mxu1 %v10074_v18  ;;  %v604_v17 = vld [vmem:[#allocation4 + $0xd98] sm:$0xff] }
 0x23a   :  { %3723 = vmatprep.subr.bf16.mxu0 %v10081_v19  ;;  %3887 = vmatprep.subr.bf16.mxu1 %v10083_v59  ;;  %v608_v18 = vld [vmem:[#allocation4 + $0xdb8] sm:$0xff]  ;;  %v10128_v19 = vcombine.low %v595_v5, %v599_v6  ;;  %v10130_v59 = vcombine.low %v596_v7, %v600_v8  ;;  %v10169_v5 = vcombine.high %v635_v61, %v639_v62  ;;  %v643_v7 = vld [vmem:[#allocation4 + $0xed0] sm:$0xff] }
 0x23b   :  { %v10139_v22 = vcombine.high %v604_v17, %v608_v18  ;;  %v647_v8 = vld [vmem:[#allocation4 + $0xef0] sm:$0xff] }
 0x23c   :  { %v10177_v33 = vcombine.high %v643_v7, %v647_v8 }
 0x23d   :  { %3724 = vmatpush1.bf16.msra.mxu0 %v10080_v27  ;;  %3888 = vmatpush1.bf16.msra.mxu1 %v10082_v28  ;;  %v615_v27 = vld [vmem:[#allocation4 + $0xdf0] sm:$0xff] }
 0x23e   :  { %3734 = vmatprep.subr.bf16.mxu0 %v10089_v29  ;;  %3898 = vmatprep.subr.bf16.mxu1 %v10091_v30  ;;  %v612_v30 = vld [vmem:[#allocation4 + $0xdd8] sm:$0xff] }
 0x23f   :  { %v10147_v40 = vcombine.high %v612_v30, %v616_v31 }
 0x240   :  { %3726 = vmatmul.mubr.bf16.vlgmr.msra.gmra.mrb[4].mxu0 %v11884_v4  ;;  %3890 = vmatmul.mubr.bf16.vlgmr.msra.gmra.mrb[4].mxu1 %v11884_v4 }
 0x241   :  { %3735 = vmatpush1.bf16.msra.mxu0 %v10088_v63  ;;  %3899 = vmatpush1.bf16.msra.mxu1 %v10090_v37 }
 0x242   :  { %3736 = vmatprep.subr.bf16.mxu0 %v10097_v57  ;;  %3900 = vmatprep.subr.bf16.mxu1 %v10099_v38  ;;  %v10138_v57 = vcombine.low %v604_v17, %v608_v18  ;;  %v10145_v38 = vcombine.high %v611_v24, %v615_v27  ;;  %v651_v17 = vld [vmem:[#allocation4 + $0xf10] sm:$0xff] }
 0x243   :  { %3766 = vmatprep.mubr.bf16.mxu0 %v11886_v12  ;;  %3930 = vmatprep.mubr.bf16.mxu1 %v11886_v12  ;;  %v655_v18 = vld [vmem:[#allocation4 + $0xf30] sm:$0xff] }
 0x245   :  { %3737 = vmatpush1.bf16.msra.mxu0 %v10096_v45  ;;  %3901 = vmatpush1.bf16.msra.mxu1 %v10098_v46  ;;  %v620_v45 = vld [vmem:[#allocation4 + $0xe18] sm:$0xff] }
 0x246   :  { %3738 = vmatprep.subr.bf16.mxu0 %v10105_v47  ;;  %3902 = vmatprep.subr.bf16.mxu1 %v10107_v48  ;;  %v624_v46 = vld [vmem:[#allocation4 + $0xe38] sm:$0xff]  ;;  %v10144_v47 = vcombine.low %v611_v24, %v615_v27  ;;  %v10146_v48 = vcombine.low %v612_v30, %v616_v31  ;;  %v10185_v24 = vcombine.high %v651_v17, %v655_v18  ;;  %v659_v30 = vld [vmem:[#allocation4 + $0xf50] sm:$0xff] }
 0x247   :  { %v10155_v50 = vcombine.high %v620_v45, %v624_v46  ;;  %v663_v31 = vld [vmem:[#allocation4 + $0xf70] sm:$0xff] }
 0x249   :  { %3739 = vmatpush1.bf16.msra.mxu0 %v10104_v16  ;;  %3903 = vmatpush1.bf16.msra.mxu1 %v10106_v55  ;;  %v628_v16 = vld [vmem:[#allocation4 + $0xe58] sm:$0xff] }
 0x24a   :  { %3740 = vmatprep.subr.bf16.mxu0 %v10113_v56  ;;  %3904 = vmatprep.subr.bf16.mxu1 %v10115_v58  ;;  %v632_v55 = vld [vmem:[#allocation4 + $0xe78] sm:$0xff]  ;;  %v10152_v56 = vcombine.low %v619_v41, %v623_v42  ;;  %v10154_v58 = vcombine.low %v620_v45, %v624_v46  ;;  %v11921_v41 = vsub.s32 1, %v11823_v44  ;;  %v11923_v46 = vld [vmem:[#allocation6] sm:$0xff] }
 0x24b   :  { %v10163_v60 = vcombine.high %v628_v16, %v632_v55  ;;  %v668_v42 = vld [vmem:[#allocation4 + $0xf98] sm:$0xff] }
 0x24c   :  { %v672_v45 = vld [vmem:[#allocation4 + $0xfb8] sm:$0xff] }
 0x24d   :  { %3741 = vmatpush1.bf16.msra.mxu0 %v10112_v0  ;;  %3905 = vmatpush1.bf16.msra.mxu1 %v10114_v1  ;;  %v636_v0 = vld [vmem:[#allocation4 + $0xe98] sm:$0xff] }
 0x24e   :  { %3742 = vmatprep.subr.bf16.mxu0 %v10121_v2  ;;  %3906 = vmatprep.subr.bf16.mxu1 %v10123_v3  ;;  %v640_v1 = vld [vmem:[#allocation4 + $0xeb8] sm:$0xff]  ;;  %v10160_v2 = vcombine.low %v627_v51, %v631_v52  ;;  %v10162_v3 = vcombine.low %v628_v16, %v632_v55  ;;  %v675_v51 = vld [vmem:[#allocation4 + $0xfd0] sm:$0xff]  ;;  %v690_v16 = vrot.slane %v11923_v46, %v11921_v41 }
 0x24f   :  { %v10171_v6 = vcombine.high %v636_v0, %v640_v1  ;;  %v679_v52 = vld [vmem:[#allocation4 + $0xff0] sm:$0xff]  ;;  %v676_v55 = vld [vmem:[#allocation4 + $0xfd8] sm:$0xff] }
 0x251   :  { %3743 = vmatpush1.bf16.msra.mxu0 %v10120_v10  ;;  %3907 = vmatpush1.bf16.msra.mxu1 %v10122_v11  ;;  %v644_v10 = vld [vmem:[#allocation4 + $0xed8] sm:$0xff] }
 0x252   :  { %3744 = vmatprep.subr.bf16.mxu0 %v10129_v13  ;;  %3908 = vmatprep.subr.bf16.mxu1 %v10131_v14  ;;  %v648_v11 = vld [vmem:[#allocation4 + $0xef8] sm:$0xff]  ;;  %v10168_v13 = vcombine.low %v635_v61, %v639_v62  ;;  %v10170_v14 = vcombine.low %v636_v0, %v640_v1  ;;  %v3955_v62 = vld [vmem:[#allocation7] sm:$0xff] }
 0x253   :  { %v11912_v21 = vpop.f32.mrb[0].mxu0  ;;  %v11914_v28 = vpop.f32.mrb[0].mxu1  ;;  %v10179_v15 = vcombine.high %v644_v10, %v648_v11  ;;  %v3959_v0 = vld [vmem:[#allocation7 + $0x20] sm:$0xff] }
 0x254   :  { %v11916_v29 = vpop.f32.mrb[1].mxu0  ;;  %v11918_v32 = vpop.f32.mrb[1].mxu1 }
 0x255   :  { %v3444_v34 = vpop.f32.mrb[2].mxu0  ;;  %3745 = vmatpush1.bf16.msra.mxu0 %v10128_v19  ;;  %v3608_v63 = vpop.f32.mrb[2].mxu1  ;;  %3909 = vmatpush1.bf16.msra.mxu1 %v10130_v59  ;;  %v652_v19 = vld [vmem:[#allocation4 + $0xf18] sm:$0xff]  ;;  %v10981_v1 = vadd.f32 %v11916_v29, %v690_v16 }
 0x256   :  { %v3445_v37 = vpop.f32.mrb[3].mxu0  ;;  %3746 = vmatprep.subr.bf16.mxu0 %v10137_v20  ;;  %v3609_v39 = vpop.f32.mrb[3].mxu1  ;;  %3910 = vmatprep.subr.bf16.mxu1 %v10139_v22  ;;  %v656_v59 = vld [vmem:[#allocation4 + $0xf38] sm:$0xff]  ;;  %v10176_v20 = vcombine.low %v643_v7, %v647_v8  ;;  %v10178_v22 = vcombine.low %v644_v10, %v648_v11  ;;  %v10184_v63 = vcombine.low %v651_v17, %v655_v18  ;;  %v3963_v11 = vld [vmem:[#allocation7 + $0x40] sm:$0xff] }
 0x257   :  { %v10187_v27 = vcombine.high %v652_v19, %v656_v59  ;;  %v660_v34 = vld [vmem:[#allocation4 + $0xf58] sm:$0xff]  ;;  %v10186_v37 = vcombine.low %v652_v19, %v656_v59  ;;  %v667_v39 = vld [vmem:[#allocation4 + $0xf90] sm:$0xff]  ;;  %v10213_v7 = vcombine.high %v3955_v62, %v3959_v0  ;;  %v3940_v10 = vmax.f32 %v10981_v1, 0.0  ;;  %v3971_v18 = vld [vmem:[#allocation7 + $0x80] sm:$0xff] }
 0x258   :  { %v3975_v19 = vld [vmem:[#allocation7 + $0xa0] sm:$0xff] }
 0x259   :  { %3747 = vmatpush1.bf16.msra.mxu0 %v10136_v35  ;;  %3911 = vmatpush1.bf16.msra.mxu1 %v10138_v57  ;;  %v664_v35 = vld [vmem:[#allocation4 + $0xf78] sm:$0xff]  ;;  %v10193_v57 = vcombine.high %v659_v30, %v663_v31  ;;  %v11928_v59 = vpack.c.bf16 %v3940_v10, %v3940_v10  ;;  %v4003_v1 = vld [vmem:[#allocation7 + $0x180] sm:$0xff] }
 0x25a   :  { %3748 = vmatprep.subr.bf16.mxu0 %v10145_v38  ;;  %3912 = vmatprep.subr.bf16.mxu1 %v10147_v40  ;;  %v10195_v38 = vcombine.high %v660_v34, %v664_v35  ;;  %v671_v40 = vld [vmem:[#allocation4 + $0xfb0] sm:$0xff] }
 0x25d   :  { %3749 = vmatpush1.bf16.msra.mxu0 %v10144_v47  ;;  %3913 = vmatpush1.bf16.msra.mxu1 %v10146_v48  ;;  %v10192_v47 = vcombine.low %v659_v30, %v663_v31  ;;  %v10194_v48 = vcombine.low %v660_v34, %v664_v35  ;;  %v10229_v31 = vcombine.high %v3971_v18, %v3975_v19  ;;  %v3979_v35 = vld [vmem:[#allocation7 + $0xc0] sm:$0xff] }
 0x25e   :  { %3750 = vmatprep.subr.bf16.mxu0 %v10153_v49  ;;  %3914 = vmatprep.subr.bf16.mxu1 %v10155_v50  ;;  %v10201_v49 = vcombine.high %v667_v39, %v671_v40  ;;  %v10203_v50 = vcombine.high %v668_v42, %v672_v45 }
 0x261   :  { %3751 = vmatpush1.bf16.msra.mxu0 %v10152_v56  ;;  %3915 = vmatpush1.bf16.msra.mxu1 %v10154_v58  ;;  %v680_v56 = vld [vmem:[#allocation4 + $0xff8] sm:$0xff]  ;;  %v10200_v58 = vcombine.low %v667_v39, %v671_v40 }
 0x262   :  { %3752 = vmatprep.subr.bf16.mxu0 %v10161_v23  ;;  %3916 = vmatprep.subr.bf16.mxu1 %v10163_v60  ;;  %v10202_v23 = vcombine.low %v668_v42, %v672_v45  ;;  %v10209_v60 = vcombine.high %v675_v51, %v679_v52  ;;  %v10211_v61 = vcombine.high %v676_v55, %v680_v56  ;;  %v3987_v45 = vld [vmem:[#allocation7 + $0x100] sm:$0xff] }
 0x265   :  { %3753 = vmatpush1.bf16.msra.mxu0 %v10160_v2  ;;  %3917 = vmatpush1.bf16.msra.mxu1 %v10162_v3  ;;  %v3956_v2 = vld [vmem:[#allocation7 + $0x8] sm:$0xff] }
 0x266   :  { %3754 = vmatprep.subr.bf16.mxu0 %v10169_v5  ;;  %3918 = vmatprep.subr.bf16.mxu1 %v10171_v6  ;;  %v3960_v3 = vld [vmem:[#allocation7 + $0x28] sm:$0xff]  ;;  %v10208_v5 = vcombine.low %v675_v51, %v679_v52  ;;  %v10210_v6 = vcombine.low %v676_v55, %v680_v56  ;;  %v3995_v55 = vld [vmem:[#allocation7 + $0x140] sm:$0xff] }
 0x267   :  { %v10215_v8 = vcombine.high %v3956_v2, %v3960_v3  ;;  %v10214_v29 = vcombine.low %v3956_v2, %v3960_v3  ;;  %v3999_v56 = vld [vmem:[#allocation7 + $0x160] sm:$0xff]  ;;  %v4004_v3 = vld [vmem:[#allocation7 + $0x188] sm:$0xff] }
 0x268   :  { %v4007_v2 = vld [vmem:[#allocation7 + $0x1a0] sm:$0xff] }
 0x269   :  { %3755 = vmatpush1.bf16.msra.mxu0 %v10168_v13  ;;  %3919 = vmatpush1.bf16.msra.mxu1 %v10170_v14  ;;  %v3967_v13 = vld [vmem:[#allocation7 + $0x60] sm:$0xff]  ;;  %v10212_v14 = vcombine.low %v3955_v62, %v3959_v0  ;;  %v10253_v62 = vcombine.high %v3995_v55, %v3999_v56 }
 0x26a   :  { %3756 = vmatprep.subr.bf16.mxu0 %v10177_v33  ;;  %3920 = vmatprep.subr.bf16.mxu1 %v10179_v15  ;;  %v3964_v33 = vld [vmem:[#allocation7 + $0x48] sm:$0xff]  ;;  %v10221_v17 = vcombine.high %v3963_v11, %v3967_v13 }
 0x26b   :  { %v3968_v15 = vld [vmem:[#allocation7 + $0x68] sm:$0xff] }
 0x26c   :  { %v10222_v30 = vcombine.low %v3964_v33, %v3968_v15 }
 0x26d   :  { %3757 = vmatpush1.bf16.msra.mxu0 %v10176_v20  ;;  %3921 = vmatpush1.bf16.msra.mxu1 %v10178_v22  ;;  %v10223_v20 = vcombine.high %v3964_v33, %v3968_v15  ;;  %v3972_v22 = vld [vmem:[#allocation7 + $0x88] sm:$0xff]  ;;  %v10260_v15 = vcombine.low %v4003_v1, %v4007_v2 }
 0x26e   :  { %3758 = vmatprep.subr.bf16.mxu0 %v10185_v24  ;;  %3922 = vmatprep.subr.bf16.mxu1 %v10187_v27  ;;  %v3976_v24 = vld [vmem:[#allocation7 + $0xa8] sm:$0xff]  ;;  %v10220_v27 = vcombine.low %v3963_v11, %v3967_v13  ;;  %v4011_v11 = vld [vmem:[#allocation7 + $0x1c0] sm:$0xff] }
 0x26f   :  { %v10231_v34 = vcombine.high %v3972_v22, %v3976_v24  ;;  %v10230_v39 = vcombine.low %v3972_v22, %v3976_v24  ;;  %v4015_v13 = vld [vmem:[#allocation7 + $0x1e0] sm:$0xff]  ;;  %v4016_v33 = vld [vmem:[#allocation7 + $0x1e8] sm:$0xff] }
 0x270   :  { %v4020_v22 = vld [vmem:[#allocation7 + $0x208] sm:$0xff] }
 0x271   :  { %3759 = vmatpush1.bf16.msra.mxu0 %v10184_v63  ;;  %3923 = vmatpush1.bf16.msra.mxu1 %v10186_v37  ;;  %v3983_v63 = vld [vmem:[#allocation7 + $0xe0] sm:$0xff]  ;;  %v3980_v37 = vld [vmem:[#allocation7 + $0xc8] sm:$0xff] }
 0x272   :  { %3760 = vmatprep.subr.bf16.mxu0 %v10193_v57  ;;  %3924 = vmatprep.subr.bf16.mxu1 %v10195_v38  ;;  %v3984_v57 = vld [vmem:[#allocation7 + $0xe8] sm:$0xff]  ;;  %v10228_v38 = vcombine.low %v3971_v18, %v3975_v19  ;;  %v10237_v40 = vcombine.high %v3979_v35, %v3983_v63  ;;  %v4019_v19 = vld [vmem:[#allocation7 + $0x200] sm:$0xff] }
 0x273   :  { %v10239_v42 = vcombine.high %v3980_v37, %v3984_v57  ;;  %v10238_v51 = vcombine.low %v3980_v37, %v3984_v57  ;;  %v4024_v24 = vld [vmem:[#allocation7 + $0x228] sm:$0xff] }
 0x274   :  { %v4028_v37 = vld [vmem:[#allocation7 + $0x248] sm:$0xff] }
 0x275   :  { %3761 = vmatpush1.bf16.msra.mxu0 %v10192_v47  ;;  %3925 = vmatpush1.bf16.msra.mxu1 %v10194_v48  ;;  %v3991_v47 = vld [vmem:[#allocation7 + $0x120] sm:$0xff]  ;;  %v3988_v48 = vld [vmem:[#allocation7 + $0x108] sm:$0xff] }
 0x276   :  { %3762 = vmatprep.subr.bf16.mxu0 %v10201_v49  ;;  %3926 = vmatprep.subr.bf16.mxu1 %v10203_v50  ;;  %v3992_v49 = vld [vmem:[#allocation7 + $0x128] sm:$0xff]  ;;  %v10236_v50 = vcombine.low %v3979_v35, %v3983_v63  ;;  %v10245_v52 = vcombine.high %v3987_v45, %v3991_v47  ;;  %v4027_v35 = vld [vmem:[#allocation7 + $0x240] sm:$0xff] }
 0x277   :  { %v10247_v16 = vcombine.high %v3988_v48, %v3992_v49  ;;  %v4031_v63 = vld [vmem:[#allocation7 + $0x260] sm:$0xff]  ;;  %v4032_v57 = vld [vmem:[#allocation7 + $0x268] sm:$0xff] }
 0x279   :  { %3763 = vmatpush1.bf16.msra.mxu0 %v10200_v58  ;;  %3927 = vmatpush1.bf16.msra.mxu1 %v10202_v23  ;;  %v3996_v58 = vld [vmem:[#allocation7 + $0x148] sm:$0xff] }
 0x27a   :  { %3764 = vmatprep.subr.bf16.mxu0 %v10209_v60  ;;  %3928 = vmatprep.subr.bf16.mxu1 %v10211_v61  ;;  %v4000_v23 = vld [vmem:[#allocation7 + $0x168] sm:$0xff]  ;;  %v10244_v60 = vcombine.low %v3987_v45, %v3991_v47  ;;  %v10246_v61 = vcombine.low %v3988_v48, %v3992_v49  ;;  %v4035_v45 = vld [vmem:[#allocation7 + $0x280] sm:$0xff] }
 0x27b   :  { %v10255_v0 = vcombine.high %v3996_v58, %v4000_v23  ;;  %v4039_v47 = vld [vmem:[#allocation7 + $0x2a0] sm:$0xff]  ;;  %v4036_v48 = vld [vmem:[#allocation7 + $0x288] sm:$0xff] }
 0x27c   :  { %v4040_v49 = vld [vmem:[#allocation7 + $0x2a8] sm:$0xff] }
 0x27d   :  { %3765 = vmatpush1.bf16.msra.mxu0 %v10208_v5  ;;  %3929 = vmatpush1.bf16.msra.mxu1 %v10210_v6  ;;  %v4008_v5 = vld [vmem:[#allocation7 + $0x1a8] sm:$0xff]  ;;  %v10252_v6 = vcombine.low %v3995_v55, %v3999_v56  ;;  %v4043_v55 = vld [vmem:[#allocation7 + $0x2c0] sm:$0xff] }
 0x27e   :  { %7069 = vmatprep.subr.bf16.mxu0 %v10213_v7  ;;  %7233 = vmatprep.subr.bf16.mxu1 %v10215_v8  ;;  %v10254_v7 = vcombine.low %v3996_v58, %v4000_v23  ;;  %v10261_v8 = vcombine.high %v4003_v1, %v4007_v2  ;;  %v10263_v10 = vcombine.high %v4004_v3, %v4008_v5  ;;  %v4047_v56 = vld [vmem:[#allocation7 + $0x2e0] sm:$0xff]  ;;  %v4044_v58 = vld [vmem:[#allocation7 + $0x2c8] sm:$0xff] }
 0x27f   :  { %v4048_v23 = vld [vmem:[#allocation7 + $0x2e8] sm:$0xff]  ;;  %v4051_v1 = vld [vmem:[#allocation7 + $0x300] sm:$0xff] }
 0x280   :  { %3767 = vmatmul.mubr.bf16.vlgmr.msra.gmra.mrb[4].mxu0 %v11894_v26  ;;  %3931 = vmatmul.mubr.bf16.vlgmr.msra.gmra.mrb[4].mxu1 %v11894_v26  ;;  %v4055_v2 = vld [vmem:[#allocation7 + $0x320] sm:$0xff] }
 0x281   :  { %7070 = vmatpush1.bf16.msra.mxu0 %v10212_v14  ;;  %7101 = vmatprep.mubr.bf16.mxu0 %v11928_v59  ;;  %v4012_v14 = vld [vmem:[#allocation7 + $0x1c8] sm:$0xff] }
 0x282   :  { %7234 = vmatpush1.bf16.msra.mxu1 %v10214_v29  ;;  %7265 = vmatprep.mubr.bf16.mxu1 %v11928_v59  ;;  %v10262_v29 = vcombine.low %v4004_v3, %v4008_v5  ;;  %v10271_v18 = vcombine.high %v4012_v14, %v4016_v33  ;;  %v4052_v3 = vld [vmem:[#allocation7 + $0x308] sm:$0xff] }
 0x283   :  { %7071 = vmatprep.subr.bf16.mxu0 %v10221_v17  ;;  %7235 = vmatprep.subr.bf16.mxu1 %v10223_v20  ;;  %v10269_v17 = vcombine.high %v4011_v11, %v4015_v13  ;;  %v4023_v20 = vld [vmem:[#allocation7 + $0x220] sm:$0xff]  ;;  %v4056_v5 = vld [vmem:[#allocation7 + $0x328] sm:$0xff] }
 0x285   :  { %7072 = vmatpush1.bf16.msra.mxu0 %v10220_v27  ;;  %v10268_v27 = vcombine.low %v4011_v11, %v4015_v13  ;;  %v4059_v11 = vld [vmem:[#allocation7 + $0x340] sm:$0xff] }
 0x286   :  { %7236 = vmatpush1.bf16.msra.mxu1 %v10222_v30  ;;  %7073 = vmatprep.subr.bf16.mxu0 %v10229_v31  ;;  %v10270_v30 = vcombine.low %v4012_v14, %v4016_v33  ;;  %v10277_v31 = vcombine.high %v4019_v19, %v4023_v20  ;;  %v4063_v13 = vld [vmem:[#allocation7 + $0x360] sm:$0xff]  ;;  %v4060_v14 = vld [vmem:[#allocation7 + $0x348] sm:$0xff] }
 0x287   :  { %7237 = vmatprep.subr.bf16.mxu1 %v10231_v34  ;;  %v10279_v34 = vcombine.high %v4020_v22, %v4024_v24  ;;  %v4064_v33 = vld [vmem:[#allocation7 + $0x368] sm:$0xff] }
 0x289   :  { %7074 = vmatpush1.bf16.msra.mxu0 %v10228_v38  ;;  %v10276_v38 = vcombine.low %v4019_v19, %v4023_v20  ;;  %v10319_v19 = vcombine.high %v4060_v14, %v4064_v33  ;;  %v4067_v20 = vld [vmem:[#allocation7 + $0x380] sm:$0xff] }
 0x28a   :  { %7238 = vmatpush1.bf16.msra.mxu1 %v10230_v39  ;;  %7075 = vmatprep.subr.bf16.mxu0 %v10237_v40  ;;  %v10278_v39 = vcombine.low %v4020_v22, %v4024_v24  ;;  %v10285_v40 = vcombine.high %v4027_v35, %v4031_v63  ;;  %v4071_v22 = vld [vmem:[#allocation7 + $0x3a0] sm:$0xff]  ;;  %v11938_v24 = vsub.s32 3, %v11823_v44 }
 0x28b   :  { %7239 = vmatprep.subr.bf16.mxu1 %v10239_v42  ;;  %v10287_v42 = vcombine.high %v4028_v37, %v4032_v57 }
 0x28d   :  { %7076 = vmatpush1.bf16.msra.mxu0 %v10236_v50  ;;  %v10284_v50 = vcombine.low %v4027_v35, %v4031_v63  ;;  %v10318_v35 = vcombine.low %v4060_v14, %v4064_v33  ;;  %v10325_v63 = vcombine.high %v4067_v20, %v4071_v22  ;;  %v4100_v14 = vld [vmem:[#allocation7 + $0x488] sm:$0xff] }
 0x28e   :  { %7240 = vmatpush1.bf16.msra.mxu1 %v10238_v51  ;;  %7077 = vmatprep.subr.bf16.mxu0 %v10245_v52  ;;  %v10286_v51 = vcombine.low %v4028_v37, %v4032_v57  ;;  %v10293_v52 = vcombine.high %v4035_v45, %v4039_v47  ;;  %v4075_v57 = vld [vmem:[#allocation7 + $0x3c0] sm:$0xff]  ;;  %v4104_v33 = vld [vmem:[#allocation7 + $0x4a8] sm:$0xff] }
 0x28f   :  { %7241 = vmatprep.subr.bf16.mxu1 %v10247_v16  ;;  %v10295_v16 = vcombine.high %v4036_v48, %v4040_v49 }
 0x291   :  { %7078 = vmatpush1.bf16.msra.mxu0 %v10244_v60  ;;  %v10292_v60 = vcombine.low %v4035_v45, %v4039_v47  ;;  %v10324_v45 = vcombine.low %v4067_v20, %v4071_v22  ;;  %v4107_v20 = vld [vmem:[#allocation7 + $0x4c0] sm:$0xff] }
 0x292   :  { %7242 = vmatpush1.bf16.msra.mxu1 %v10246_v61  ;;  %7079 = vmatprep.subr.bf16.mxu0 %v10253_v62  ;;  %v10294_v61 = vcombine.low %v4036_v48, %v4040_v49  ;;  %v10301_v62 = vcombine.high %v4043_v55, %v4047_v56  ;;  %v4111_v22 = vld [vmem:[#allocation7 + $0x4e0] sm:$0xff] }
 0x293   :  { %7243 = vmatprep.subr.bf16.mxu1 %v10255_v0  ;;  %v10303_v0 = vcombine.high %v4044_v58, %v4048_v23 }
 0x295   :  { %7080 = vmatpush1.bf16.msra.mxu0 %v10252_v6  ;;  %v10300_v6 = vcombine.low %v4043_v55, %v4047_v56  ;;  %v4084_v55 = vld [vmem:[#allocation7 + $0x408] sm:$0xff] }
 0x296   :  { %7244 = vmatpush1.bf16.msra.mxu1 %v10254_v7  ;;  %7081 = vmatprep.subr.bf16.mxu0 %v10261_v8  ;;  %v10302_v7 = vcombine.low %v4044_v58, %v4048_v23  ;;  %v10309_v8 = vcombine.high %v4051_v1, %v4055_v2  ;;  %v4088_v56 = vld [vmem:[#allocation7 + $0x428] sm:$0xff] }
 0x297   :  { %7245 = vmatprep.subr.bf16.mxu1 %v10263_v10  ;;  %v10311_v10 = vcombine.high %v4052_v3, %v4056_v5 }
 0x299   :  { %7082 = vmatpush1.bf16.msra.mxu0 %v10260_v15  ;;  %v10308_v15 = vcombine.low %v4051_v1, %v4055_v2  ;;  %v4095_v1 = vld [vmem:[#allocation7 + $0x460] sm:$0xff] }
 0x29a   :  { %7246 = vmatpush1.bf16.msra.mxu1 %v10262_v29  ;;  %7083 = vmatprep.subr.bf16.mxu0 %v10269_v17  ;;  %v11935_v29 = vsub.s32 0, %v11823_v44  ;;  %v10310_v17 = vcombine.low %v4052_v3, %v4056_v5  ;;  %v4092_v3 = vld [vmem:[#allocation7 + $0x448] sm:$0xff] }
 0x29b   :  { %7247 = vmatprep.subr.bf16.mxu1 %v10271_v18  ;;  %v10317_v18 = vcombine.high %v4059_v11, %v4063_v13  ;;  %v4096_v5 = vld [vmem:[#allocation7 + $0x468] sm:$0xff] }
 0x29d   :  { %7084 = vmatpush1.bf16.msra.mxu0 %v10268_v27  ;;  %v4068_v27 = vld [vmem:[#allocation7 + $0x388] sm:$0xff] }
 0x29e   :  { %7248 = vmatpush1.bf16.msra.mxu1 %v10270_v30  ;;  %7085 = vmatprep.subr.bf16.mxu0 %v10277_v31  ;;  %v4072_v30 = vld [vmem:[#allocation7 + $0x3a8] sm:$0xff]  ;;  %v10316_v31 = vcombine.low %v4059_v11, %v4063_v13  ;;  %v10351_v13 = vcombine.high %v4092_v3, %v4096_v5 }
 0x29f   :  { %7249 = vmatprep.subr.bf16.mxu1 %v10279_v34  ;;  %v686_v34 = vrot.slane %v11923_v46, %v11935_v29  ;;  %v10327_v37 = vcombine.high %v4068_v27, %v4072_v30  ;;  %v10326_v48 = vcombine.low %v4068_v27, %v4072_v30  ;;  %v4108_v27 = vld [vmem:[#allocation7 + $0x4c8] sm:$0xff] }
 0x2a0   :  { %v4112_v30 = vld [vmem:[#allocation7 + $0x4e8] sm:$0xff] }
 0x2a1   :  { %7086 = vmatpush1.bf16.msra.mxu0 %v10276_v38  ;;  %v4079_v38 = vld [vmem:[#allocation7 + $0x3e0] sm:$0xff]  ;;  %v10980_v47 = vadd.f32 %v11912_v21, %v686_v34  ;;  %v10343_v21 = vcombine.high %v4084_v55, %v4088_v56  ;;  %v10358_v34 = vcombine.low %v4100_v14, %v4104_v33 }
 0x2a2   :  { %7250 = vmatpush1.bf16.msra.mxu1 %v10278_v39  ;;  %7087 = vmatprep.subr.bf16.mxu0 %v10285_v40  ;;  %v698_v39 = vrot.slane %v11923_v46, %v11938_v24  ;;  %v4076_v40 = vld [vmem:[#allocation7 + $0x3c8] sm:$0xff]  ;;  %v10333_v49 = vcombine.high %v4075_v57, %v4079_v38  ;;  %v10332_v58 = vcombine.low %v4075_v57, %v4079_v38  ;;  %v4119_v57 = vld [vmem:[#allocation7 + $0x520] sm:$0xff] }
 0x2a3   :  { %7251 = vmatprep.subr.bf16.mxu1 %v10287_v42  ;;  %v4080_v42 = vld [vmem:[#allocation7 + $0x3e8] sm:$0xff]  ;;  %v3939_v23 = vmax.f32 %v10980_v47, 0.0 }
 0x2a4   :  { %v4116_v38 = vld [vmem:[#allocation7 + $0x508] sm:$0xff] }
 0x2a5   :  { %7088 = vmatpush1.bf16.msra.mxu0 %v10284_v50  ;;  %v10335_v50 = vcombine.high %v4076_v40, %v4080_v42 }
 0x2a6   :  { %7252 = vmatpush1.bf16.msra.mxu1 %v10286_v51  ;;  %7089 = vmatprep.subr.bf16.mxu0 %v10293_v52  ;;  %v4083_v51 = vld [vmem:[#allocation7 + $0x400] sm:$0xff] }
 0x2a7   :  { %7253 = vmatprep.subr.bf16.mxu1 %v10295_v16  ;;  %v4087_v52 = vld [vmem:[#allocation7 + $0x420] sm:$0xff]  ;;  %v10983_v16 = vadd.f32 %v11918_v32, %v698_v39  ;;  %v10342_v32 = vcombine.low %v4084_v55, %v4088_v56  ;;  %v4120_v39 = vld [vmem:[#allocation7 + $0x528] sm:$0xff] }
 0x2a8   :  { %v10340_v2 = vcombine.low %v4083_v51, %v4087_v52  ;;  %v10375_v47 = vcombine.high %v4116_v38, %v4120_v39 }
 0x2a9   :  { %7090 = vmatpush1.bf16.msra.mxu0 %v10292_v60  ;;  %v10334_v60 = vcombine.low %v4076_v40, %v4080_v42  ;;  %v10364_v40 = vcombine.low %v4107_v20, %v4111_v22  ;;  %v10366_v42 = vcombine.low %v4108_v27, %v4112_v30 }
 0x2aa   :  { %7254 = vmatpush1.bf16.msra.mxu1 %v10294_v61  ;;  %7091 = vmatprep.subr.bf16.mxu0 %v10301_v62  ;;  %v10341_v61 = vcombine.high %v4083_v51, %v4087_v52  ;;  %v3942_v62 = vmax.f32 %v10983_v16, 0.0  ;;  %v4128_v51 = vld [vmem:[#allocation7 + $0x568] sm:$0xff]  ;;  %v10374_v16 = vcombine.low %v4116_v38, %v4120_v39  ;;  %v4163_v38 = vld [vmem:[#allocation7 + $0x680] sm:$0xff] }
 0x2ab   :  { %7255 = vmatprep.subr.bf16.mxu1 %v10303_v0  ;;  %v4091_v0 = vld [vmem:[#allocation7 + $0x440] sm:$0xff] }
 0x2ac   :  { %v11948_v11 = vpack.c.bf16 %v3942_v62, %v3942_v62  ;;  %v4167_v39 = vld [vmem:[#allocation7 + $0x6a0] sm:$0xff] }
 0x2ad   :  { %7092 = vmatpush1.bf16.msra.mxu0 %v10300_v6  ;;  %v11946_v6 = vpack.c.bf16 %v3939_v23, %v3939_v23  ;;  %v4135_v23 = vld [vmem:[#allocation7 + $0x5a0] sm:$0xff] }
 0x2ae   :  { %7256 = vmatpush1.bf16.msra.mxu1 %v10302_v7  ;;  %7093 = vmatprep.subr.bf16.mxu0 %v10309_v8  ;;  %v10349_v7 = vcombine.high %v4091_v0, %v4095_v1  ;;  %v4099_v8 = vld [vmem:[#allocation7 + $0x480] sm:$0xff] }
 0x2af   :  { %7257 = vmatprep.subr.bf16.mxu1 %v10311_v10  ;;  %v4103_v10 = vld [vmem:[#allocation7 + $0x4a0] sm:$0xff] }
 0x2b1   :  { %7094 = vmatpush1.bf16.msra.mxu0 %v10308_v15  ;;  %v10348_v15 = vcombine.low %v4091_v0, %v4095_v1 }
 0x2b2   :  { %7258 = vmatpush1.bf16.msra.mxu1 %v10310_v17  ;;  %7095 = vmatprep.subr.bf16.mxu0 %v10317_v18  ;;  %v10350_v17 = vcombine.low %v4092_v3, %v4096_v5  ;;  %v10357_v18 = vcombine.high %v4099_v8, %v4103_v10  ;;  %v4143_v3 = vld [vmem:[#allocation7 + $0x5e0] sm:$0xff]  ;;  %v4140_v5 = vld [vmem:[#allocation7 + $0x5c8] sm:$0xff] }
 0x2b3   :  { %7259 = vmatprep.subr.bf16.mxu1 %v10319_v19  ;;  %v10359_v19 = vcombine.high %v4100_v14, %v4104_v33  ;;  %v4147_v14 = vld [vmem:[#allocation7 + $0x600] sm:$0xff] }
 0x2b4   :  { %v4151_v33 = vld [vmem:[#allocation7 + $0x620] sm:$0xff] }
 0x2b5   :  { %7096 = vmatpush1.bf16.msra.mxu0 %v10316_v31  ;;  %v10356_v31 = vcombine.low %v4099_v8, %v4103_v10 }
 0x2b6   :  { %7260 = vmatpush1.bf16.msra.mxu1 %v10318_v35  ;;  %7097 = vmatprep.subr.bf16.mxu0 %v10325_v63  ;;  %v10365_v35 = vcombine.high %v4107_v20, %v4111_v22  ;;  %v10367_v63 = vcombine.high %v4108_v27, %v4112_v30  ;;  %v10405_v20 = vcombine.high %v4147_v14, %v4151_v33  ;;  %v4155_v27 = vld [vmem:[#allocation7 + $0x640] sm:$0xff] }
 0x2b7   :  { %7261 = vmatprep.subr.bf16.mxu1 %v10327_v37  ;;  %v4115_v37 = vld [vmem:[#allocation7 + $0x500] sm:$0xff] }
 0x2b8   :  { %v10372_v52 = vcombine.low %v4115_v37, %v4119_v57  ;;  %v4159_v30 = vld [vmem:[#allocation7 + $0x660] sm:$0xff] }
 0x2b9   :  { %7098 = vmatpush1.bf16.msra.mxu0 %v10324_v45  ;;  %v10373_v45 = vcombine.high %v4115_v37, %v4119_v57  ;;  %v10413_v37 = vcombine.high %v4155_v27, %v4159_v30 }
 0x2ba   :  { %7262 = vmatpush1.bf16.msra.mxu1 %v10326_v48  ;;  %7099 = vmatprep.subr.bf16.mxu0 %v10333_v49  ;;  %v4123_v48 = vld [vmem:[#allocation7 + $0x540] sm:$0xff] }
 0x2bb   :  { %7263 = vmatprep.subr.bf16.mxu1 %v10335_v50  ;;  %v4127_v49 = vld [vmem:[#allocation7 + $0x560] sm:$0xff]  ;;  %v4124_v50 = vld [vmem:[#allocation7 + $0x548] sm:$0xff] }
 0x2bc   :  { %v10381_v55 = vcombine.high %v4123_v48, %v4127_v49  ;;  %v10383_v56 = vcombine.high %v4124_v50, %v4128_v51  ;;  %v10382_v62 = vcombine.low %v4124_v50, %v4128_v51  ;;  %v4171_v50 = vld [vmem:[#allocation7 + $0x6c0] sm:$0xff] }
 0x2bd   :  { %7100 = vmatpush1.bf16.msra.mxu0 %v10332_v58  ;;  %v4131_v58 = vld [vmem:[#allocation7 + $0x580] sm:$0xff] }
 0x2be   :  { %7264 = vmatpush1.bf16.msra.mxu1 %v10334_v60  ;;  %7110 = vmatprep.subr.bf16.mxu0 %v10341_v61  ;;  %v4132_v60 = vld [vmem:[#allocation7 + $0x588] sm:$0xff]  ;;  %v10389_v0 = vcombine.high %v4131_v58, %v4135_v23  ;;  %v4175_v51 = vld [vmem:[#allocation7 + $0x6e0] sm:$0xff] }
 0x2bf   :  { %7274 = vmatprep.subr.bf16.mxu1 %v10343_v21  ;;  %v4136_v61 = vld [vmem:[#allocation7 + $0x5a8] sm:$0xff]  ;;  %v10380_v21 = vcombine.low %v4123_v48, %v4127_v49  ;;  %v10421_v48 = vcombine.high %v4163_v38, %v4167_v39 }
 0x2c0   :  { %7102 = vmatmul.mubr.bf16.vlgmr.msra.gmra.mrb[8].mxu0 %v11946_v6  ;;  %v10391_v1 = vcombine.high %v4132_v60, %v4136_v61  ;;  %v10390_v8 = vcombine.low %v4132_v60, %v4136_v61  ;;  %v4179_v60 = vld [vmem:[#allocation7 + $0x700] sm:$0xff] }
 0x2c1   :  { %7266 = vmatmul.mubr.bf16.vlgmr.msra.gmra.mrb[8].mxu1 %v11946_v6  ;;  %7111 = vmatpush1.bf16.msra.mxu0 %v10340_v2  ;;  %v4139_v2 = vld [vmem:[#allocation7 + $0x5c0] sm:$0xff] }
 0x2c2   :  { %7142 = vmatprep.mubr.bf16.mxu0 %v11948_v11  ;;  %7275 = vmatpush1.bf16.msra.mxu1 %v10342_v32  ;;  %v4144_v32 = vld [vmem:[#allocation7 + $0x5e8] sm:$0xff]  ;;  %v10397_v10 = vcombine.high %v4139_v2, %v4143_v3  ;;  %v4183_v61 = vld [vmem:[#allocation7 + $0x720] sm:$0xff] }
 0x2c3   :  { %7306 = vmatprep.mubr.bf16.mxu1 %v11948_v11  ;;  %7112 = vmatprep.subr.bf16.mxu0 %v10349_v7  ;;  %v10388_v7 = vcombine.low %v4131_v58, %v4135_v23  ;;  %v10429_v58 = vcombine.high %v4171_v50, %v4175_v51 }
 0x2c4   :  { %7276 = vmatprep.subr.bf16.mxu1 %v10351_v13  ;;  %v10399_v13 = vcombine.high %v4140_v5, %v4144_v32 }
 0x2c5   :  { %7113 = vmatpush1.bf16.msra.mxu0 %v10348_v15  ;;  %v4148_v15 = vld [vmem:[#allocation7 + $0x608] sm:$0xff] }
 0x2c6   :  { %7277 = vmatpush1.bf16.msra.mxu1 %v10350_v17  ;;  %7114 = vmatprep.subr.bf16.mxu0 %v10357_v18  ;;  %v4152_v17 = vld [vmem:[#allocation7 + $0x628] sm:$0xff]  ;;  %v10396_v18 = vcombine.low %v4139_v2, %v4143_v3  ;;  %v10437_v2 = vcombine.high %v4179_v60, %v4183_v61 }
 0x2c7   :  { %7278 = vmatprep.subr.bf16.mxu1 %v10359_v19  ;;  %v10398_v19 = vcombine.low %v4140_v5, %v4144_v32  ;;  %v10407_v22 = vcombine.high %v4148_v15, %v4152_v17  ;;  %v4187_v5 = vld [vmem:[#allocation7 + $0x740] sm:$0xff] }
 0x2c8   :  { %v4191_v32 = vld [vmem:[#allocation7 + $0x760] sm:$0xff] }
 0x2c9   :  { %7115 = vmatpush1.bf16.msra.mxu0 %v10356_v31  ;;  %v4156_v31 = vld [vmem:[#allocation7 + $0x648] sm:$0xff] }
 0x2ca   :  { %7279 = vmatpush1.bf16.msra.mxu1 %v10358_v34  ;;  %7116 = vmatprep.subr.bf16.mxu0 %v10365_v35  ;;  %v4160_v34 = vld [vmem:[#allocation7 + $0x668] sm:$0xff]  ;;  %v10404_v35 = vcombine.low %v4147_v14, %v4151_v33  ;;  %v10445_v33 = vcombine.high %v4187_v5, %v4191_v32 }
 0x2cb   :  { %7280 = vmatprep.subr.bf16.mxu1 %v10367_v63  ;;  %v10406_v63 = vcombine.low %v4148_v15, %v4152_v17  ;;  %v10415_v57 = vcombine.high %v4156_v31, %v4160_v34  ;;  %v4195_v17 = vld [vmem:[#allocation7 + $0x780] sm:$0xff] }
 0x2cd   :  { %7117 = vmatpush1.bf16.msra.mxu0 %v10364_v40  ;;  %v4164_v40 = vld [vmem:[#allocation7 + $0x688] sm:$0xff] }
 0x2ce   :  { %7281 = vmatpush1.bf16.msra.mxu1 %v10366_v42  ;;  %7118 = vmatprep.subr.bf16.mxu0 %v10373_v45  ;;  %v4168_v42 = vld [vmem:[#allocation7 + $0x6a8] sm:$0xff]  ;;  %v10412_v45 = vcombine.low %v4155_v27, %v4159_v30 }
 0x2cf   :  { %7282 = vmatprep.subr.bf16.mxu1 %v10375_v47  ;;  %v10414_v47 = vcombine.low %v4156_v31, %v4160_v34  ;;  %v10423_v49 = vcombine.high %v4164_v40, %v4168_v42 }
 0x2d1   :  { %7119 = vmatpush1.bf16.msra.mxu0 %v10372_v52  ;;  %v4172_v52 = vld [vmem:[#allocation7 + $0x6c8] sm:$0xff] }
 0x2d2   :  { %7283 = vmatpush1.bf16.msra.mxu1 %v10374_v16  ;;  %7120 = vmatprep.subr.bf16.mxu0 %v10381_v55  ;;  %v4176_v16 = vld [vmem:[#allocation7 + $0x6e8] sm:$0xff]  ;;  %v10420_v55 = vcombine.low %v4163_v38, %v4167_v39 }
 0x2d3   :  { %7284 = vmatprep.subr.bf16.mxu1 %v10383_v56  ;;  %v10422_v56 = vcombine.low %v4164_v40, %v4168_v42  ;;  %v10431_v23 = vcombine.high %v4172_v52, %v4176_v16 }
 0x2d5   :  { %7121 = vmatpush1.bf16.msra.mxu0 %v10380_v21  ;;  %v4180_v21 = vld [vmem:[#allocation7 + $0x708] sm:$0xff] }
 0x2d6   :  { %7285 = vmatpush1.bf16.msra.mxu1 %v10382_v62  ;;  %7122 = vmatprep.subr.bf16.mxu0 %v10389_v0  ;;  %v4184_v62 = vld [vmem:[#allocation7 + $0x728] sm:$0xff]  ;;  %v10428_v0 = vcombine.low %v4171_v50, %v4175_v51 }
 0x2d7   :  { %7286 = vmatprep.subr.bf16.mxu1 %v10391_v1  ;;  %v10430_v1 = vcombine.low %v4172_v52, %v4176_v16  ;;  %v10439_v3 = vcombine.high %v4180_v21, %v4184_v62  ;;  %v10438_v14 = vcombine.low %v4180_v21, %v4184_v62 }
 0x2d9   :  { %7123 = vmatpush1.bf16.msra.mxu0 %v10388_v7  ;;  %v4188_v7 = vld [vmem:[#allocation7 + $0x748] sm:$0xff] }
 0x2da   :  { %7287 = vmatpush1.bf16.msra.mxu1 %v10390_v8  ;;  %7124 = vmatprep.subr.bf16.mxu0 %v10397_v10  ;;  %v4192_v8 = vld [vmem:[#allocation7 + $0x768] sm:$0xff]  ;;  %v10436_v10 = vcombine.low %v4179_v60, %v4183_v61 }
 0x2db   :  { %7288 = vmatprep.subr.bf16.mxu1 %v10399_v13  ;;  %v11955_v13 = vsub.s32 2, %v11823_v44  ;;  %v10447_v15 = vcombine.high %v4188_v7, %v4192_v8  ;;  %v10446_v30 = vcombine.low %v4188_v7, %v4192_v8 }
 0x2dd   :  { %7125 = vmatpush1.bf16.msra.mxu0 %v10396_v18  ;;  %v4199_v18 = vld [vmem:[#allocation7 + $0x7a0] sm:$0xff]  ;;  %v694_v27 = vrot.slane %v11923_v46, %v11955_v13 }
 0x2de   :  { %7289 = vmatpush1.bf16.msra.mxu1 %v10398_v19  ;;  %7126 = vmatprep.subr.bf16.mxu0 %v10405_v20  ;;  %v4196_v19 = vld [vmem:[#allocation7 + $0x788] sm:$0xff]  ;;  %v10453_v31 = vcombine.high %v4195_v17, %v4199_v18  ;;  %v10452_v38 = vcombine.low %v4195_v17, %v4199_v18 }
 0x2df   :  { %7290 = vmatprep.subr.bf16.mxu1 %v10407_v22  ;;  %v4200_v20 = vld [vmem:[#allocation7 + $0x7a8] sm:$0xff]  ;;  %v10444_v22 = vcombine.low %v4187_v5, %v4191_v32  ;;  %v10982_v39 = vadd.f32 %v11914_v28, %v694_v27  ;;  %v4219_v28 = vld [vmem:[#allocation7 + $0x840] sm:$0xff] }
 0x2e0   :  { %v10455_v34 = vcombine.high %v4196_v19, %v4200_v20  ;;  %v10454_v40 = vcombine.low %v4196_v19, %v4200_v20  ;;  %v4232_v5 = vld [vmem:[#allocation7 + $0x8a8] sm:$0xff]  ;;  %v4243_v27 = vld [vmem:[#allocation7 + $0x900] sm:$0xff] }
 0x2e1   :  { %7127 = vmatpush1.bf16.msra.mxu0 %v10404_v35  ;;  %v4203_v35 = vld [vmem:[#allocation7 + $0x7c0] sm:$0xff]  ;;  %v3941_v51 = vmax.f32 %v10982_v39, 0.0  ;;  %v4240_v17 = vld [vmem:[#allocation7 + $0x8e8] sm:$0xff] }
 0x2e2   :  { %7291 = vmatpush1.bf16.msra.mxu1 %v10406_v63  ;;  %7128 = vmatprep.subr.bf16.mxu0 %v10413_v37  ;;  %v4207_v63 = vld [vmem:[#allocation7 + $0x7e0] sm:$0xff]  ;;  %v4204_v37 = vld [vmem:[#allocation7 + $0x7c8] sm:$0xff] }
 0x2e3   :  { %7292 = vmatprep.subr.bf16.mxu1 %v10415_v57  ;;  %v4208_v57 = vld [vmem:[#allocation7 + $0x7e8] sm:$0xff]  ;;  %v10461_v42 = vcombine.high %v4203_v35, %v4207_v63  ;;  %v10460_v50 = vcombine.low %v4203_v35, %v4207_v63  ;;  %v11960_v61 = vpack.c.bf16 %v3941_v51, %v3941_v51  ;;  %v4255_v39 = vld [vmem:[#allocation7 + $0x960] sm:$0xff] }
 0x2e4   :  { %v10463_v46 = vcombine.high %v4204_v37, %v4208_v57  ;;  %v10462_v52 = vcombine.low %v4204_v37, %v4208_v57  ;;  %v4260_v51 = vld [vmem:[#allocation7 + $0x988] sm:$0xff] }
 0x2e5   :  { %7129 = vmatpush1.bf16.msra.mxu0 %v10412_v45  ;;  %v4211_v45 = vld [vmem:[#allocation7 + $0x800] sm:$0xff] }
 0x2e6   :  { %7293 = vmatpush1.bf16.msra.mxu1 %v10414_v47  ;;  %7130 = vmatprep.subr.bf16.mxu0 %v10421_v48  ;;  %v4215_v47 = vld [vmem:[#allocation7 + $0x820] sm:$0xff]  ;;  %v4212_v48 = vld [vmem:[#allocation7 + $0x808] sm:$0xff] }
 0x2e7   :  { %7294 = vmatprep.subr.bf16.mxu1 %v10423_v49  ;;  %v4216_v49 = vld [vmem:[#allocation7 + $0x828] sm:$0xff]  ;;  %v10469_v16 = vcombine.high %v4211_v45, %v4215_v47  ;;  %v10468_v60 = vcombine.low %v4211_v45, %v4215_v47 }
 0x2e8   :  { %v10470_v21 = vcombine.low %v4212_v48, %v4216_v49 }
 0x2e9   :  { %7131 = vmatpush1.bf16.msra.mxu0 %v10420_v55  ;;  %v10471_v55 = vcombine.high %v4212_v48, %v4216_v49  ;;  %v4259_v49 = vld [vmem:[#allocation7 + $0x980] sm:$0xff] }
 0x2ea   :  { %7295 = vmatpush1.bf16.msra.mxu1 %v10422_v56  ;;  %7132 = vmatprep.subr.bf16.mxu0 %v10429_v58  ;;  %v4223_v56 = vld [vmem:[#allocation7 + $0x860] sm:$0xff]  ;;  %v4220_v58 = vld [vmem:[#allocation7 + $0x848] sm:$0xff] }
 0x2eb   :  { %7296 = vmatprep.subr.bf16.mxu1 %v10431_v23  ;;  %v4224_v23 = vld [vmem:[#allocation7 + $0x868] sm:$0xff]  ;;  %v10477_v62 = vcombine.high %v4219_v28, %v4223_v56  ;;  %v10476_v32 = vcombine.low %v4219_v28, %v4223_v56 }
 0x2ec   :  { %v10478_v7 = vcombine.low %v4220_v58, %v4224_v23 }
 0x2ed   :  { %7133 = vmatpush1.bf16.msra.mxu0 %v10428_v0  ;;  %v10479_v0 = vcombine.high %v4220_v58, %v4224_v23  ;;  %v4267_v58 = vld [vmem:[#allocation7 + $0x9c0] sm:$0xff] }
 0x2ee   :  { %7297 = vmatpush1.bf16.msra.mxu1 %v10430_v1  ;;  %7134 = vmatprep.subr.bf16.mxu0 %v10437_v2  ;;  %v4227_v1 = vld [vmem:[#allocation7 + $0x880] sm:$0xff] }
 0x2ef   :  { %7298 = vmatprep.subr.bf16.mxu1 %v10439_v3  ;;  %v4231_v2 = vld [vmem:[#allocation7 + $0x8a0] sm:$0xff]  ;;  %v4228_v3 = vld [vmem:[#allocation7 + $0x888] sm:$0xff] }
 0x2f0   :  { %v10485_v8 = vcombine.high %v4227_v1, %v4231_v2  ;;  %v10484_v18 = vcombine.low %v4227_v1, %v4231_v2  ;;  %v10486_v19 = vcombine.low %v4228_v3, %v4232_v5  ;;  %v4271_v23 = vld [vmem:[#allocation7 + $0x9e0] sm:$0xff] }
 0x2f1   :  { %7135 = vmatpush1.bf16.msra.mxu0 %v10436_v10  ;;  %v10487_v10 = vcombine.high %v4228_v3, %v4232_v5  ;;  %v10525_v1 = vcombine.high %v4267_v58, %v4271_v23  ;;  %v4275_v3 = vld [vmem:[#allocation7 + $0xa00] sm:$0xff] }
 0x2f2   :  { %7299 = vmatpush1.bf16.msra.mxu1 %v10438_v14  ;;  %7136 = vmatprep.subr.bf16.mxu0 %v10445_v33  ;;  %v4235_v14 = vld [vmem:[#allocation7 + $0x8c0] sm:$0xff] }
 0x2f3   :  { %7300 = vmatprep.subr.bf16.mxu1 %v10447_v15  ;;  %v4239_v33 = vld [vmem:[#allocation7 + $0x8e0] sm:$0xff]  ;;  %v4236_v15 = vld [vmem:[#allocation7 + $0x8c8] sm:$0xff] }
 0x2f4   :  { %v10493_v20 = vcombine.high %v4235_v14, %v4239_v33  ;;  %v10492_v35 = vcombine.low %v4235_v14, %v4239_v33  ;;  %v10494_v63 = vcombine.low %v4236_v15, %v4240_v17  ;;  %v4279_v5 = vld [vmem:[#allocation7 + $0xa20] sm:$0xff] }
 0x2f5   :  { %7137 = vmatpush1.bf16.msra.mxu0 %v10444_v22  ;;  %v10495_v22 = vcombine.high %v4236_v15, %v4240_v17  ;;  %v10533_v14 = vcombine.high %v4275_v3, %v4279_v5  ;;  %v4283_v15 = vld [vmem:[#allocation7 + $0xa40] sm:$0xff] }
 0x2f6   :  { %7301 = vmatpush1.bf16.msra.mxu1 %v10446_v30  ;;  %7138 = vmatprep.subr.bf16.mxu0 %v10453_v31  ;;  %v4247_v30 = vld [vmem:[#allocation7 + $0x920] sm:$0xff]  ;;  %v4244_v31 = vld [vmem:[#allocation7 + $0x908] sm:$0xff] }
 0x2f7   :  { %7302 = vmatprep.subr.bf16.mxu1 %v10455_v34  ;;  %v4248_v34 = vld [vmem:[#allocation7 + $0x928] sm:$0xff]  ;;  %v10501_v37 = vcombine.high %v4243_v27, %v4247_v30  ;;  %v4287_v17 = vld [vmem:[#allocation7 + $0xa60] sm:$0xff] }
 0x2f8   :  { %v10503_v57 = vcombine.high %v4244_v31, %v4248_v34  ;;  %v10502_v45 = vcombine.low %v4244_v31, %v4248_v34  ;;  %v4291_v31 = vld [vmem:[#allocation7 + $0xa80] sm:$0xff] }
 0x2f9   :  { %7139 = vmatpush1.bf16.msra.mxu0 %v10452_v38  ;;  %v4251_v38 = vld [vmem:[#allocation7 + $0x940] sm:$0xff] }
 0x2fa   :  { %7303 = vmatpush1.bf16.msra.mxu1 %v10454_v40  ;;  %7140 = vmatprep.subr.bf16.mxu0 %v10461_v42  ;;  %v4252_v40 = vld [vmem:[#allocation7 + $0x948] sm:$0xff]  ;;  %v10509_v47 = vcombine.high %v4251_v38, %v4255_v39  ;;  %v4295_v34 = vld [vmem:[#allocation7 + $0xaa0] sm:$0xff] }
 0x2fb   :  { %7304 = vmatprep.subr.bf16.mxu1 %v10463_v46  ;;  %v4256_v42 = vld [vmem:[#allocation7 + $0x968] sm:$0xff]  ;;  %v10500_v46 = vcombine.low %v4243_v27, %v4247_v30  ;;  %v10541_v27 = vcombine.high %v4283_v15, %v4287_v17 }
 0x2fc   :  { %v10511_v48 = vcombine.high %v4252_v40, %v4256_v42 }
 0x2fd   :  { %7141 = vmatpush1.bf16.msra.mxu0 %v10460_v50  ;;  %v4263_v50 = vld [vmem:[#allocation7 + $0x9a0] sm:$0xff] }
 0x2fe   :  { %7305 = vmatpush1.bf16.msra.mxu1 %v10462_v52  ;;  %7151 = vmatprep.subr.bf16.mxu0 %v10469_v16  ;;  %v4264_v52 = vld [vmem:[#allocation7 + $0x9a8] sm:$0xff]  ;;  %v10508_v16 = vcombine.low %v4251_v38, %v4255_v39  ;;  %v10517_v28 = vcombine.high %v4259_v49, %v4263_v50  ;;  %v10549_v38 = vcombine.high %v4291_v31, %v4295_v34 }
 0x2ff   :  { %7315 = vmatprep.subr.bf16.mxu1 %v10471_v55  ;;  %v10510_v55 = vcombine.low %v4252_v40, %v4256_v42  ;;  %v10519_v56 = vcombine.high %v4260_v51, %v4264_v52  ;;  %v4299_v40 = vld [vmem:[#allocation7 + $0xac0] sm:$0xff] }
 0x300   :  { %7143 = vmatmul.mubr.bf16.vlgmr.msra.gmra.mrb[8].mxu0 %v11960_v61  ;;  %v4303_v42 = vld [vmem:[#allocation7 + $0xae0] sm:$0xff] }
 0x301   :  { %7307 = vmatmul.mubr.bf16.vlgmr.msra.gmra.mrb[8].mxu1 %v11960_v61  ;;  %7152 = vmatpush1.bf16.msra.mxu0 %v10468_v60  ;;  %v4268_v60 = vld [vmem:[#allocation7 + $0x9c8] sm:$0xff] }
 0x302   :  { %7316 = vmatpush1.bf16.msra.mxu1 %v10470_v21  ;;  %7153 = vmatprep.subr.bf16.mxu0 %v10477_v62  ;;  %v4272_v21 = vld [vmem:[#allocation7 + $0x9e8] sm:$0xff]  ;;  %v10516_v62 = vcombine.low %v4259_v49, %v4263_v50  ;;  %v10557_v49 = vcombine.high %v4299_v40, %v4303_v42 }
 0x303   :  { %7317 = vmatprep.subr.bf16.mxu1 %v10479_v0  ;;  %v10518_v0 = vcombine.low %v4260_v51, %v4264_v52  ;;  %v10527_v2 = vcombine.high %v4268_v60, %v4272_v21  ;;  %v4307_v51 = vld [vmem:[#allocation7 + $0xb00] sm:$0xff] }
 0x304   :  { %v4311_v52 = vld [vmem:[#allocation7 + $0xb20] sm:$0xff] }
 0x305   :  { %7154 = vmatpush1.bf16.msra.mxu0 %v10476_v32  ;;  %v4276_v32 = vld [vmem:[#allocation7 + $0xa08] sm:$0xff] }
 0x306   :  { %7318 = vmatpush1.bf16.msra.mxu1 %v10478_v7  ;;  %7155 = vmatprep.subr.bf16.mxu0 %v10485_v8  ;;  %v4280_v7 = vld [vmem:[#allocation7 + $0xa28] sm:$0xff]  ;;  %v10524_v8 = vcombine.low %v4267_v58, %v4271_v23  ;;  %v10565_v58 = vcombine.high %v4307_v51, %v4311_v52 }
 0x307   :  { %7319 = vmatprep.subr.bf16.mxu1 %v10487_v10  ;;  %v10526_v10 = vcombine.low %v4268_v60, %v4272_v21  ;;  %v10535_v33 = vcombine.high %v4276_v32, %v4280_v7  ;;  %v4315_v60 = vld [vmem:[#allocation7 + $0xb40] sm:$0xff] }
 0x308   :  { %v4319_v21 = vld [vmem:[#allocation7 + $0xb60] sm:$0xff] }
 0x309   :  { %7156 = vmatpush1.bf16.msra.mxu0 %v10484_v18  ;;  %v4284_v18 = vld [vmem:[#allocation7 + $0xa48] sm:$0xff] }
 0x30a   :  { %7320 = vmatpush1.bf16.msra.mxu1 %v10486_v19  ;;  %7157 = vmatprep.subr.bf16.mxu0 %v10493_v20  ;;  %v4288_v19 = vld [vmem:[#allocation7 + $0xa68] sm:$0xff]  ;;  %v10532_v20 = vcombine.low %v4275_v3, %v4279_v5  ;;  %v10573_v3 = vcombine.high %v4315_v60, %v4319_v21 }
 0x30b   :  { %7321 = vmatprep.subr.bf16.mxu1 %v10495_v22  ;;  %v10534_v22 = vcombine.low %v4276_v32, %v4280_v7  ;;  %v10543_v30 = vcombine.high %v4284_v18, %v4288_v19  ;;  %v4323_v32 = vld [vmem:[#allocation7 + $0xb80] sm:$0xff] }
 0x30c   :  { %v4327_v7 = vld [vmem:[#allocation7 + $0xba0] sm:$0xff] }
 0x30d   :  { %7158 = vmatpush1.bf16.msra.mxu0 %v10492_v35  ;;  %v4292_v35 = vld [vmem:[#allocation7 + $0xa88] sm:$0xff] }
 0x30e   :  { %7322 = vmatpush1.bf16.msra.mxu1 %v10494_v63  ;;  %7159 = vmatprep.subr.bf16.mxu0 %v10501_v37  ;;  %v4296_v63 = vld [vmem:[#allocation7 + $0xaa8] sm:$0xff]  ;;  %v10540_v37 = vcombine.low %v4283_v15, %v4287_v17  ;;  %v10581_v15 = vcombine.high %v4323_v32, %v4327_v7 }
 0x30f   :  { %7323 = vmatprep.subr.bf16.mxu1 %v10503_v57  ;;  %v10542_v57 = vcombine.low %v4284_v18, %v4288_v19  ;;  %v10551_v39 = vcombine.high %v4292_v35, %v4296_v63  ;;  %v4331_v18 = vld [vmem:[#allocation7 + $0xbc0] sm:$0xff] }
 0x310   :  { %v4335_v19 = vld [vmem:[#allocation7 + $0xbe0] sm:$0xff] }
 0x311   :  { %7160 = vmatpush1.bf16.msra.mxu0 %v10500_v46  ;;  %v4300_v46 = vld [vmem:[#allocation7 + $0xac8] sm:$0xff] }
 0x312   :  { %7324 = vmatpush1.bf16.msra.mxu1 %v10502_v45  ;;  %7161 = vmatprep.subr.bf16.mxu0 %v10509_v47  ;;  %v4304_v45 = vld [vmem:[#allocation7 + $0xae8] sm:$0xff]  ;;  %v10548_v47 = vcombine.low %v4291_v31, %v4295_v34  ;;  %v10589_v31 = vcombine.high %v4331_v18, %v4335_v19 }
 0x313   :  { %7325 = vmatprep.subr.bf16.mxu1 %v10511_v48  ;;  %v10550_v48 = vcombine.low %v4292_v35, %v4296_v63  ;;  %v10559_v50 = vcombine.high %v4300_v46, %v4304_v45  ;;  %v4339_v35 = vld [vmem:[#allocation7 + $0xc00] sm:$0xff] }
 0x314   :  { %v4343_v63 = vld [vmem:[#allocation7 + $0xc20] sm:$0xff] }
 0x315   :  { %7162 = vmatpush1.bf16.msra.mxu0 %v10508_v16  ;;  %v4308_v16 = vld [vmem:[#allocation7 + $0xb08] sm:$0xff] }
 0x316   :  { %7326 = vmatpush1.bf16.msra.mxu1 %v10510_v55  ;;  %7163 = vmatprep.subr.bf16.mxu0 %v10517_v28  ;;  %v4312_v55 = vld [vmem:[#allocation7 + $0xb28] sm:$0xff]  ;;  %v10556_v28 = vcombine.low %v4299_v40, %v4303_v42  ;;  %v10597_v40 = vcombine.high %v4339_v35, %v4343_v63 }
 0x317   :  { %7327 = vmatprep.subr.bf16.mxu1 %v10519_v56  ;;  %v10558_v56 = vcombine.low %v4300_v46, %v4304_v45  ;;  %v10567_v23 = vcombine.high %v4308_v16, %v4312_v55  ;;  %v701_v46 = vsub.s32 4, %v11823_v44  ;;  %v705_v45 = vsub.s32 5, %v11823_v44 }
 0x319   :  { %7164 = vmatpush1.bf16.msra.mxu0 %v10516_v62  ;;  %v4316_v62 = vld [vmem:[#allocation7 + $0xb48] sm:$0xff] }
 0x31a   :  { %7328 = vmatpush1.bf16.msra.mxu1 %v10518_v0  ;;  %7165 = vmatprep.subr.bf16.mxu0 %v10525_v1  ;;  %v4320_v0 = vld [vmem:[#allocation7 + $0xb68] sm:$0xff]  ;;  %v10564_v1 = vcombine.low %v4307_v51, %v4311_v52 }
 0x31b   :  { %7329 = vmatprep.subr.bf16.mxu1 %v10527_v2  ;;  %v10566_v2 = vcombine.low %v4308_v16, %v4312_v55  ;;  %v10575_v5 = vcombine.high %v4316_v62, %v4320_v0 }
 0x31d   :  { %7166 = vmatpush1.bf16.msra.mxu0 %v10524_v8  ;;  %v4324_v8 = vld [vmem:[#allocation7 + $0xb88] sm:$0xff] }
 0x31e   :  { %7330 = vmatpush1.bf16.msra.mxu1 %v10526_v10  ;;  %7167 = vmatprep.subr.bf16.mxu0 %v10533_v14  ;;  %v4328_v10 = vld [vmem:[#allocation7 + $0xba8] sm:$0xff]  ;;  %v10572_v14 = vcombine.low %v4315_v60, %v4319_v21 }
 0x31f   :  { %7331 = vmatprep.subr.bf16.mxu1 %v10535_v33  ;;  %v10574_v33 = vcombine.low %v4316_v62, %v4320_v0  ;;  %v10583_v17 = vcombine.high %v4324_v8, %v4328_v10 }
 0x321   :  { %7168 = vmatpush1.bf16.msra.mxu0 %v10532_v20  ;;  %v4332_v20 = vld [vmem:[#allocation7 + $0xbc8] sm:$0xff] }
 0x322   :  { %7332 = vmatpush1.bf16.msra.mxu1 %v10534_v22  ;;  %7169 = vmatprep.subr.bf16.mxu0 %v10541_v27  ;;  %v4336_v22 = vld [vmem:[#allocation7 + $0xbe8] sm:$0xff]  ;;  %v10580_v27 = vcombine.low %v4323_v32, %v4327_v7  ;;  %v4351_v32 = vld [vmem:[#allocation7 + $0xc60] sm:$0xff] }
 0x323   :  { %7333 = vmatprep.subr.bf16.mxu1 %v10543_v30  ;;  %v10582_v30 = vcombine.low %v4324_v8, %v4328_v10  ;;  %v10591_v34 = vcombine.high %v4332_v20, %v4336_v22  ;;  %v4348_v7 = vld [vmem:[#allocation7 + $0xc48] sm:$0xff] }
 0x324   :  { %v4352_v8 = vld [vmem:[#allocation7 + $0xc68] sm:$0xff] }
 0x325   :  { %7170 = vmatpush1.bf16.msra.mxu0 %v10540_v37  ;;  %v4340_v37 = vld [vmem:[#allocation7 + $0xc08] sm:$0xff] }
 0x326   :  { %7334 = vmatpush1.bf16.msra.mxu1 %v10542_v57  ;;  %7171 = vmatprep.subr.bf16.mxu0 %v10549_v38  ;;  %v4344_v57 = vld [vmem:[#allocation7 + $0xc28] sm:$0xff]  ;;  %v10588_v38 = vcombine.low %v4331_v18, %v4335_v19  ;;  %v10607_v19 = vcombine.high %v4348_v7, %v4352_v8 }
 0x327   :  { %7335 = vmatprep.subr.bf16.mxu1 %v10551_v39  ;;  %v10590_v39 = vcombine.low %v4332_v20, %v4336_v22  ;;  %v10599_v42 = vcombine.high %v4340_v37, %v4344_v57  ;;  %v4359_v20 = vld [vmem:[#allocation7 + $0xca0] sm:$0xff]  ;;  %v4356_v22 = vld [vmem:[#allocation7 + $0xc88] sm:$0xff] }
 0x329   :  { %7172 = vmatpush1.bf16.msra.mxu0 %v10548_v47  ;;  %v713_v47 = vsub.s32 7, %v11823_v44 }
 0x32a   :  { %7336 = vmatpush1.bf16.msra.mxu1 %v10550_v48  ;;  %7173 = vmatprep.subr.bf16.mxu0 %v10557_v49  ;;  %v11967_v48 = vld [vmem:[#allocation6] sm:$0xff] }
 0x32b   :  { %7337 = vmatprep.subr.bf16.mxu1 %v10559_v50  ;;  %v702_v49 = vrot.slane %v11967_v48, %v701_v46  ;;  %v706_v50 = vrot.slane %v11967_v48, %v705_v45  ;;  %v714_v51 = vrot.slane %v11967_v48, %v713_v47 }
 0x32d   :  { %7174 = vmatpush1.bf16.msra.mxu0 %v10556_v28 }
 0x32e   :  { %7338 = vmatpush1.bf16.msra.mxu1 %v10558_v56  ;;  %7175 = vmatprep.subr.bf16.mxu0 %v10565_v58 }
 0x32f   :  { %7339 = vmatprep.subr.bf16.mxu1 %v10567_v23 }
 0x331   :  { %7176 = vmatpush1.bf16.msra.mxu0 %v10564_v1 }
 0x332   :  { %7340 = vmatpush1.bf16.msra.mxu1 %v10566_v2  ;;  %7177 = vmatprep.subr.bf16.mxu0 %v10573_v3  ;;  %v4347_v3 = vld [vmem:[#allocation7 + $0xc40] sm:$0xff] }
 0x333   :  { %7341 = vmatprep.subr.bf16.mxu1 %v10575_v5  ;;  %v10605_v18 = vcombine.high %v4347_v3, %v4351_v32 }
 0x335   :  { %7178 = vmatpush1.bf16.msra.mxu0 %v10572_v14  ;;  %v10596_v14 = vcombine.low %v4339_v35, %v4343_v63 }
 0x336   :  { %7342 = vmatpush1.bf16.msra.mxu1 %v10574_v33  ;;  %7179 = vmatprep.subr.bf16.mxu0 %v10581_v15  ;;  %v10598_v33 = vcombine.low %v4340_v37, %v4344_v57  ;;  %v4363_v37 = vld [vmem:[#allocation7 + $0xcc0] sm:$0xff] }
 0x337   :  { %7343 = vmatprep.subr.bf16.mxu1 %v10583_v17  ;;  %v4355_v17 = vld [vmem:[#allocation7 + $0xc80] sm:$0xff] }
 0x338   :  { %v10613_v35 = vcombine.high %v4355_v17, %v4359_v20  ;;  %v4367_v57 = vld [vmem:[#allocation7 + $0xce0] sm:$0xff] }
 0x339   :  { %7180 = vmatpush1.bf16.msra.mxu0 %v10580_v27  ;;  %v4360_v27 = vld [vmem:[#allocation7 + $0xca8] sm:$0xff] }
 0x33a   :  { %7344 = vmatpush1.bf16.msra.mxu1 %v10582_v30  ;;  %7181 = vmatprep.subr.bf16.mxu0 %v10589_v31  ;;  %v10604_v31 = vcombine.low %v4347_v3, %v4351_v32  ;;  %v10615_v63 = vcombine.high %v4356_v22, %v4360_v27 }
 0x33b   :  { %7345 = vmatprep.subr.bf16.mxu1 %v10591_v34  ;;  %v10606_v34 = vcombine.low %v4348_v7, %v4352_v8  ;;  %v4387_v7 = vld [vmem:[#allocation7 + $0xd80] sm:$0xff] }
 0x33c   :  { %v4391_v8 = vld [vmem:[#allocation7 + $0xda0] sm:$0xff] }
 0x33d   :  { %7182 = vmatpush1.bf16.msra.mxu0 %v10588_v38  ;;  %v4364_v38 = vld [vmem:[#allocation7 + $0xcc8] sm:$0xff] }
 0x33e   :  { %7346 = vmatpush1.bf16.msra.mxu1 %v10590_v39  ;;  %7192 = vmatprep.subr.bf16.mxu0 %v10597_v40  ;;  %v4368_v39 = vld [vmem:[#allocation7 + $0xce8] sm:$0xff]  ;;  %v10612_v40 = vcombine.low %v4355_v17, %v4359_v20 }
 0x33f   :  { %7356 = vmatprep.subr.bf16.mxu1 %v10599_v42  ;;  %v10614_v42 = vcombine.low %v4356_v22, %v4360_v27  ;;  %v4395_v22 = vld [vmem:[#allocation7 + $0xdc0] sm:$0xff] }
 0x340   :  { %v4399_v27 = vld [vmem:[#allocation7 + $0xde0] sm:$0xff] }
 0x353   :  { %v3768_v52 = vpop.f32.mrb[4].mxu0  ;;  %v11978_v55 = vpop.f32.mrb[4].mxu1 }
 0x354   :  { %v10984_v16 = vadd.f32 %v3768_v52, %v702_v49  ;;  %v3770_v28 = vpop.f32.mrb[5].mxu0  ;;  %v3934_v58 = vpop.f32.mrb[5].mxu1  ;;  %v10621_v49 = vcombine.high %v4363_v37, %v4367_v57  ;;  %v4375_v52 = vld [vmem:[#allocation7 + $0xd20] sm:$0xff] }
 0x355   :  { %v10985_v56 = vadd.f32 %v3770_v28, %v706_v50  ;;  %v3772_v23 = vpop.f32.mrb[6].mxu0  ;;  %v10987_v21 = vadd.f32 %v3934_v58, %v714_v51  ;;  %v3936_v62 = vpop.f32.mrb[6].mxu1  ;;  %v10623_v50 = vcombine.high %v4364_v38, %v4368_v39  ;;  %v4371_v51 = vld [vmem:[#allocation7 + $0xd00] sm:$0xff]  ;;  %v4376_v28 = vld [vmem:[#allocation7 + $0xd28] sm:$0xff]  ;;  %v10622_v58 = vcombine.low %v4364_v38, %v4368_v39 }
 0x356   :  { %v3943_v60 = vmax.f32 %v10984_v16, 0.0  ;;  %v3773_v0 = vpop.f32.mrb[7].mxu0  ;;  %v3937_v2 = vpop.f32.mrb[7].mxu1  ;;  %v4372_v16 = vld [vmem:[#allocation7 + $0xd08] sm:$0xff]  ;;  %v10629_v23 = vcombine.high %v4371_v51, %v4375_v52  ;;  %v4383_v62 = vld [vmem:[#allocation7 + $0xd60] sm:$0xff] }
 0x357   :  { %v3944_v1 = vmax.f32 %v10985_v56, 0.0  ;;  %v3946_v5 = vmax.f32 %v10987_v21, 0.0  ;;  %v10620_v56 = vcombine.low %v4363_v37, %v4367_v57  ;;  %v4379_v21 = vld [vmem:[#allocation7 + $0xd40] sm:$0xff]  ;;  %v4380_v0 = vld [vmem:[#allocation7 + $0xd48] sm:$0xff]  ;;  %v10628_v2 = vcombine.low %v4371_v51, %v4375_v52 }
 0x358   :  { %v11982_v15 = vpack.c.bf16 %v3943_v60, %v3943_v60  ;;  %v10631_v60 = vcombine.high %v4372_v16, %v4376_v28  ;;  %v10630_v3 = vcombine.low %v4372_v16, %v4376_v28  ;;  %v10636_v17 = vcombine.low %v4379_v21, %v4383_v62  ;;  %v4403_v38 = vld [vmem:[#allocation7 + $0xe00] sm:$0xff] }
 0x359   :  { %v11980_v10 = vpack.c.bf16 %v3944_v1, %v3944_v1  ;;  %v11986_v30 = vpack.c.bf16 %v3946_v5, %v3946_v5  ;;  %v4384_v1 = vld [vmem:[#allocation7 + $0xd68] sm:$0xff]  ;;  %v10637_v5 = vcombine.high %v4379_v21, %v4383_v62  ;;  %v10653_v37 = vcombine.high %v4395_v22, %v4399_v27  ;;  %v4407_v39 = vld [vmem:[#allocation7 + $0xe20] sm:$0xff] }
 0x35a   :  { %v10639_v32 = vcombine.high %v4380_v0, %v4384_v1  ;;  %v10661_v51 = vcombine.high %v4403_v38, %v4407_v39  ;;  %v4411_v16 = vld [vmem:[#allocation7 + $0xe40] sm:$0xff] }
 0x35b   :  { %7183 = vmatprep.mubr.bf16.mxu0 %v11980_v10  ;;  %7347 = vmatprep.mubr.bf16.mxu1 %v11980_v10  ;;  %v4415_v28 = vld [vmem:[#allocation7 + $0xe60] sm:$0xff] }
 0x35c   :  { %7184 = vmatmul.mubr.bf16.vlgmr.msra.gmra.mrb[8].mxu0 %v11982_v15  ;;  %7348 = vmatmul.mubr.bf16.vlgmr.msra.gmra.mrb[8].mxu1 %v11982_v15  ;;  %v10669_v21 = vcombine.high %v4411_v16, %v4415_v28 }
 0x35d   :  { %7193 = vmatpush1.bf16.msra.mxu0 %v10596_v14  ;;  %7357 = vmatpush1.bf16.msra.mxu1 %v10598_v33  ;;  %v4388_v14 = vld [vmem:[#allocation7 + $0xd88] sm:$0xff] }
 0x35e   :  { %7224 = vmatprep.mubr.bf16.mxu0 %v11986_v30  ;;  %7388 = vmatprep.mubr.bf16.mxu1 %v11986_v30  ;;  %v4392_v33 = vld [vmem:[#allocation7 + $0xda8] sm:$0xff] }
 0x35f   :  { %7194 = vmatprep.subr.bf16.mxu0 %v10605_v18  ;;  %7358 = vmatprep.subr.bf16.mxu1 %v10607_v19  ;;  %v10638_v18 = vcombine.low %v4380_v0, %v4384_v1  ;;  %v10645_v19 = vcombine.high %v4387_v7, %v4391_v8  ;;  %v10647_v20 = vcombine.high %v4388_v14, %v4392_v33  ;;  %v4419_v0 = vld [vmem:[#allocation7 + $0xe80] sm:$0xff] }
 0x360   :  { %v4423_v1 = vld [vmem:[#allocation7 + $0xea0] sm:$0xff] }
 0x361   :  { %7195 = vmatpush1.bf16.msra.mxu0 %v10604_v31  ;;  %7359 = vmatpush1.bf16.msra.mxu1 %v10606_v34  ;;  %v4396_v31 = vld [vmem:[#allocation7 + $0xdc8] sm:$0xff] }
 0x362   :  { %7196 = vmatprep.subr.bf16.mxu0 %v10613_v35  ;;  %7360 = vmatprep.subr.bf16.mxu1 %v10615_v63  ;;  %v4400_v34 = vld [vmem:[#allocation7 + $0xde8] sm:$0xff]  ;;  %v10644_v35 = vcombine.low %v4387_v7, %v4391_v8  ;;  %v10646_v63 = vcombine.low %v4388_v14, %v4392_v33  ;;  %v10677_v7 = vcombine.high %v4419_v0, %v4423_v1  ;;  %v4427_v14 = vld [vmem:[#allocation7 + $0xec0] sm:$0xff] }
 0x363   :  { %v10655_v57 = vcombine.high %v4396_v31, %v4400_v34  ;;  %v4431_v33 = vld [vmem:[#allocation7 + $0xee0] sm:$0xff] }
 0x365   :  { %7197 = vmatpush1.bf16.msra.mxu0 %v10612_v40  ;;  %7361 = vmatpush1.bf16.msra.mxu1 %v10614_v42  ;;  %v4404_v40 = vld [vmem:[#allocation7 + $0xe08] sm:$0xff] }
 0x366   :  { %7198 = vmatprep.subr.bf16.mxu0 %v10621_v49  ;;  %7362 = vmatprep.subr.bf16.mxu1 %v10623_v50  ;;  %v4408_v42 = vld [vmem:[#allocation7 + $0xe28] sm:$0xff]  ;;  %v10652_v49 = vcombine.low %v4395_v22, %v4399_v27  ;;  %v10654_v50 = vcombine.low %v4396_v31, %v4400_v34  ;;  %v10685_v22 = vcombine.high %v4427_v14, %v4431_v33  ;;  %v4435_v31 = vld [vmem:[#allocation7 + $0xf00] sm:$0xff] }
 0x367   :  { %v10663_v52 = vcombine.high %v4404_v40, %v4408_v42  ;;  %v4439_v34 = vld [vmem:[#allocation7 + $0xf20] sm:$0xff] }
 0x369   :  { %7199 = vmatpush1.bf16.msra.mxu0 %v10620_v56  ;;  %7363 = vmatpush1.bf16.msra.mxu1 %v10622_v58  ;;  %v4412_v56 = vld [vmem:[#allocation7 + $0xe48] sm:$0xff] }
 0x36a   :  { %7200 = vmatprep.subr.bf16.mxu0 %v10629_v23  ;;  %7364 = vmatprep.subr.bf16.mxu1 %v10631_v60  ;;  %v4416_v58 = vld [vmem:[#allocation7 + $0xe68] sm:$0xff]  ;;  %v10660_v23 = vcombine.low %v4403_v38, %v4407_v39  ;;  %v10662_v60 = vcombine.low %v4404_v40, %v4408_v42  ;;  %v10693_v38 = vcombine.high %v4435_v31, %v4439_v34  ;;  %v4443_v40 = vld [vmem:[#allocation7 + $0xf40] sm:$0xff] }
 0x36b   :  { %v10671_v62 = vcombine.high %v4412_v56, %v4416_v58  ;;  %v4447_v42 = vld [vmem:[#allocation7 + $0xf60] sm:$0xff] }
 0x36d   :  { %7201 = vmatpush1.bf16.msra.mxu0 %v10628_v2  ;;  %7365 = vmatpush1.bf16.msra.mxu1 %v10630_v3  ;;  %v4420_v2 = vld [vmem:[#allocation7 + $0xe88] sm:$0xff] }
 0x36e   :  { %7202 = vmatprep.subr.bf16.mxu0 %v10637_v5  ;;  %7366 = vmatprep.subr.bf16.mxu1 %v10639_v32  ;;  %v4424_v3 = vld [vmem:[#allocation7 + $0xea8] sm:$0xff]  ;;  %v10668_v5 = vcombine.low %v4411_v16, %v4415_v28  ;;  %v10670_v32 = vcombine.low %v4412_v56, %v4416_v58  ;;  %v709_v16 = vsub.s32 6, %v11823_v44  ;;  %v10701_v28 = vcombine.high %v4443_v40, %v4447_v42  ;;  %v4451_v58 = vld [vmem:[#allocation7 + $0xf80] sm:$0xff] }
 0x36f   :  { %v10679_v8 = vcombine.high %v4420_v2, %v4424_v3 }
 0x371   :  { %7203 = vmatpush1.bf16.msra.mxu0 %v10636_v17  ;;  %7367 = vmatpush1.bf16.msra.mxu1 %v10638_v18  ;;  %v4428_v17 = vld [vmem:[#allocation7 + $0xec8] sm:$0xff] }
 0x372   :  { %7204 = vmatprep.subr.bf16.mxu0 %v10645_v19  ;;  %7368 = vmatprep.subr.bf16.mxu1 %v10647_v20  ;;  %v4432_v18 = vld [vmem:[#allocation7 + $0xee8] sm:$0xff]  ;;  %v10676_v19 = vcombine.low %v4419_v0, %v4423_v1  ;;  %v10678_v20 = vcombine.low %v4420_v2, %v4424_v3  ;;  %v710_v1 = vrot.slane %v11967_v48, %v709_v16  ;;  %v3961_v48 = vld [vmem:[#allocation7 + $0x30] sm:$0xff] }
 0x373   :  { %v10687_v27 = vcombine.high %v4428_v17, %v4432_v18 }
 0x375   :  { %7205 = vmatpush1.bf16.msra.mxu0 %v10644_v35  ;;  %7369 = vmatpush1.bf16.msra.mxu1 %v10646_v63  ;;  %v4436_v35 = vld [vmem:[#allocation7 + $0xf08] sm:$0xff] }
 0x376   :  { %7206 = vmatprep.subr.bf16.mxu0 %v10653_v37  ;;  %7370 = vmatprep.subr.bf16.mxu1 %v10655_v57  ;;  %v4440_v63 = vld [vmem:[#allocation7 + $0xf28] sm:$0xff]  ;;  %v10684_v37 = vcombine.low %v4427_v14, %v4431_v33  ;;  %v10686_v57 = vcombine.low %v4428_v17, %v4432_v18  ;;  %v10986_v17 = vadd.f32 %v11978_v55, %v710_v1  ;;  %v3966_v55 = vld [vmem:[#allocation7 + $0x58] sm:$0xff]  ;;  %v3985_v1 = vld [vmem:[#allocation7 + $0xf0] sm:$0xff] }
 0x377   :  { %v10695_v39 = vcombine.high %v4436_v35, %v4440_v63 }
 0x379   :  { %7207 = vmatpush1.bf16.msra.mxu0 %v10652_v49  ;;  %7371 = vmatpush1.bf16.msra.mxu1 %v10654_v50  ;;  %v4444_v49 = vld [vmem:[#allocation7 + $0xf48] sm:$0xff] }
 0x37a   :  { %7208 = vmatprep.subr.bf16.mxu0 %v10661_v51  ;;  %7372 = vmatprep.subr.bf16.mxu1 %v10663_v52  ;;  %v4448_v50 = vld [vmem:[#allocation7 + $0xf68] sm:$0xff]  ;;  %v10692_v51 = vcombine.low %v4435_v31, %v4439_v34  ;;  %v10694_v52 = vcombine.low %v4436_v35, %v4440_v63  ;;  %v3945_v35 = vmax.f32 %v10986_v17, 0.0  ;;  %v3994_v17 = vld [vmem:[#allocation7 + $0x138] sm:$0xff] }
 0x37b   :  { %v10703_v56 = vcombine.high %v4444_v49, %v4448_v50  ;;  %v10702_v0 = vcombine.low %v4444_v49, %v4448_v50 }
 0x37d   :  { %7209 = vmatpush1.bf16.msra.mxu0 %v10660_v23  ;;  %7373 = vmatpush1.bf16.msra.mxu1 %v10662_v60  ;;  %v4455_v23 = vld [vmem:[#allocation7 + $0xfa0] sm:$0xff]  ;;  %v4452_v60 = vld [vmem:[#allocation7 + $0xf88] sm:$0xff] }
 0x37e   :  { %7210 = vmatprep.subr.bf16.mxu0 %v10669_v21  ;;  %7374 = vmatprep.subr.bf16.mxu1 %v10671_v62  ;;  %v4456_v21 = vld [vmem:[#allocation7 + $0xfa8] sm:$0xff]  ;;  %v10700_v62 = vcombine.low %v4443_v40, %v4447_v42  ;;  %v10709_v2 = vcombine.high %v4451_v58, %v4455_v23  ;;  %v10708_v14 = vcombine.low %v4451_v58, %v4455_v23  ;;  %v3978_v58 = vld [vmem:[#allocation7 + $0xb8] sm:$0xff] }
 0x37f   :  { %v10711_v3 = vcombine.high %v4452_v60, %v4456_v21  ;;  %v10710_v33 = vcombine.low %v4452_v60, %v4456_v21  ;;  %v11997_v42 = vpack.c.bf16 %v3945_v35, %v3945_v35 }
 0x381   :  { %7211 = vmatpush1.bf16.msra.mxu0 %v10668_v5  ;;  %7375 = vmatpush1.bf16.msra.mxu1 %v10670_v32  ;;  %v4459_v5 = vld [vmem:[#allocation7 + $0xfc0] sm:$0xff] }
 0x382   :  { %7212 = vmatprep.subr.bf16.mxu0 %v10677_v7  ;;  %7376 = vmatprep.subr.bf16.mxu1 %v10679_v8  ;;  %v4463_v32 = vld [vmem:[#allocation7 + $0xfe0] sm:$0xff]  ;;  %v4460_v7 = vld [vmem:[#allocation7 + $0xfc8] sm:$0xff] }
 0x383   :  { %v4464_v8 = vld [vmem:[#allocation7 + $0xfe8] sm:$0xff]  ;;  %v10717_v18 = vcombine.high %v4459_v5, %v4463_v32  ;;  %v10716_v31 = vcombine.low %v4459_v5, %v4463_v32 }
 0x384   :  { %v10718_v34 = vcombine.low %v4460_v7, %v4464_v8 }
 0x385   :  { %7213 = vmatpush1.bf16.msra.mxu0 %v10676_v19  ;;  %7377 = vmatpush1.bf16.msra.mxu1 %v10678_v20  ;;  %v10719_v19 = vcombine.high %v4460_v7, %v4464_v8  ;;  %v3957_v20 = vld [vmem:[#allocation7 + $0x10] sm:$0xff] }
 0x386   :  { %7214 = vmatprep.subr.bf16.mxu0 %v10685_v22  ;;  %7378 = vmatprep.subr.bf16.mxu1 %v10687_v27  ;;  %v3958_v22 = vld [vmem:[#allocation7 + $0x18] sm:$0xff]  ;;  %v10217_v63 = vcombine.high %v3957_v20, %v3961_v48  ;;  %v10216_v40 = vcombine.low %v3957_v20, %v3961_v48 }
 0x387   :  { %v3962_v27 = vld [vmem:[#allocation7 + $0x38] sm:$0xff] }
 0x388   :  { %v10218_v49 = vcombine.low %v3958_v22, %v3962_v27 }
 0x389   :  { %7215 = vmatpush1.bf16.msra.mxu0 %v10684_v37  ;;  %7379 = vmatpush1.bf16.msra.mxu1 %v10686_v57  ;;  %v10219_v37 = vcombine.high %v3958_v22, %v3962_v27  ;;  %v3965_v57 = vld [vmem:[#allocation7 + $0x50] sm:$0xff] }
 0x38a   :  { %7216 = vmatprep.subr.bf16.mxu0 %v10693_v38  ;;  %7380 = vmatprep.subr.bf16.mxu1 %v10695_v39  ;;  %v3969_v38 = vld [vmem:[#allocation7 + $0x70] sm:$0xff]  ;;  %v3970_v39 = vld [vmem:[#allocation7 + $0x78] sm:$0xff] }
 0x38b   :  { %v10225_v50 = vcombine.high %v3965_v57, %v3969_v38  ;;  %v10224_v23 = vcombine.low %v3965_v57, %v3969_v38  ;;  %v10226_v60 = vcombine.low %v3966_v55, %v3970_v39  ;;  %v3997_v22 = vld [vmem:[#allocation7 + $0x150] sm:$0xff] }
 0x38c   :  { %v4001_v27 = vld [vmem:[#allocation7 + $0x170] sm:$0xff] }
 0x38d   :  { %7217 = vmatpush1.bf16.msra.mxu0 %v10692_v51  ;;  %7381 = vmatpush1.bf16.msra.mxu1 %v10694_v52  ;;  %v10227_v51 = vcombine.high %v3966_v55, %v3970_v39  ;;  %v3973_v52 = vld [vmem:[#allocation7 + $0x90] sm:$0xff]  ;;  %v4006_v39 = vld [vmem:[#allocation7 + $0x198] sm:$0xff] }
 0x38e   :  { %7218 = vmatprep.subr.bf16.mxu0 %v10701_v28  ;;  %7382 = vmatprep.subr.bf16.mxu1 %v10703_v56  ;;  %v3977_v28 = vld [vmem:[#allocation7 + $0xb0] sm:$0xff]  ;;  %v3974_v56 = vld [vmem:[#allocation7 + $0x98] sm:$0xff] }
 0x38f   :  { %v10233_v21 = vcombine.high %v3973_v52, %v3977_v28  ;;  %v10232_v5 = vcombine.low %v3973_v52, %v3977_v28  ;;  %v10234_v32 = vcombine.low %v3974_v56, %v3978_v58  ;;  %v4005_v38 = vld [vmem:[#allocation7 + $0x190] sm:$0xff] }
 0x390   :  { %v4009_v55 = vld [vmem:[#allocation7 + $0x1b0] sm:$0xff] }
 0x391   :  { %7219 = vmatpush1.bf16.msra.mxu0 %v10700_v62  ;;  %7383 = vmatpush1.bf16.msra.mxu1 %v10702_v0  ;;  %v10235_v62 = vcombine.high %v3974_v56, %v3978_v58  ;;  %v3981_v0 = vld [vmem:[#allocation7 + $0xd0] sm:$0xff]  ;;  %v4014_v58 = vld [vmem:[#allocation7 + $0x1d8] sm:$0xff] }
 0x392   :  { %7220 = vmatprep.subr.bf16.mxu0 %v10709_v2  ;;  %7384 = vmatprep.subr.bf16.mxu1 %v10711_v3  ;;  %v3982_v2 = vld [vmem:[#allocation7 + $0xd8] sm:$0xff]  ;;  %v10241_v7 = vcombine.high %v3981_v0, %v3985_v1  ;;  %v4013_v28 = vld [vmem:[#allocation7 + $0x1d0] sm:$0xff] }
 0x393   :  { %v3986_v3 = vld [vmem:[#allocation7 + $0xf8] sm:$0xff]  ;;  %v4017_v56 = vld [vmem:[#allocation7 + $0x1f0] sm:$0xff] }
 0x394   :  { %v10243_v8 = vcombine.high %v3982_v2, %v3986_v3 }
 0x395   :  { %7221 = vmatpush1.bf16.msra.mxu0 %v10708_v14  ;;  %7385 = vmatpush1.bf16.msra.mxu1 %v10710_v33  ;;  %v3989_v14 = vld [vmem:[#allocation7 + $0x110] sm:$0xff] }
 0x396   :  { %7222 = vmatprep.subr.bf16.mxu0 %v10717_v18  ;;  %7386 = vmatprep.subr.bf16.mxu1 %v10719_v19  ;;  %v3993_v33 = vld [vmem:[#allocation7 + $0x130] sm:$0xff]  ;;  %v10240_v18 = vcombine.low %v3981_v0, %v3985_v1  ;;  %v10242_v19 = vcombine.low %v3982_v2, %v3986_v3  ;;  %v4022_v3 = vld [vmem:[#allocation7 + $0x218] sm:$0xff] }
 0x397   :  { %v10249_v20 = vcombine.high %v3989_v14, %v3993_v33  ;;  %v10248_v35 = vcombine.low %v3989_v14, %v3993_v33  ;;  %v4021_v1 = vld [vmem:[#allocation7 + $0x210] sm:$0xff] }
 0x398   :  { %v4025_v2 = vld [vmem:[#allocation7 + $0x230] sm:$0xff] }
 0x399   :  { %7223 = vmatpush1.bf16.msra.mxu0 %v10716_v31  ;;  %7387 = vmatpush1.bf16.msra.mxu1 %v10718_v34  ;;  %v3998_v31 = vld [vmem:[#allocation7 + $0x158] sm:$0xff]  ;;  %v4029_v33 = vld [vmem:[#allocation7 + $0x250] sm:$0xff] }
 0x39a   :  { %7397 = vmatprep.subr.bf16.mxu0 %v10217_v63  ;;  %7561 = vmatprep.subr.bf16.mxu1 %v10219_v37  ;;  %v4002_v34 = vld [vmem:[#allocation7 + $0x178] sm:$0xff]  ;;  %v10257_v37 = vcombine.high %v3997_v22, %v4001_v27 }
 0x39b   :  { %v10259_v57 = vcombine.high %v3998_v31, %v4002_v34 }
 0x39c   :  { %7225 = vmatmul.mubr.bf16.vlgmr.msra.gmra.mrb[8].mxu0 %v11997_v42  ;;  %7389 = vmatmul.mubr.bf16.vlgmr.msra.gmra.mrb[8].mxu1 %v11997_v42 }
 0x39d   :  { %7398 = vmatpush1.bf16.msra.mxu0 %v10216_v40  ;;  %7429 = vmatprep.mubr.bf16.mxu0 %v11928_v59  ;;  %v4010_v40 = vld [vmem:[#allocation7 + $0x1b8] sm:$0xff] }
 0x39e   :  { %7562 = vmatpush1.bf16.msra.mxu1 %v10218_v49  ;;  %7593 = vmatprep.mubr.bf16.mxu1 %v11928_v59  ;;  %v3990_v59 = vld [vmem:[#allocation7 + $0x118] sm:$0xff]  ;;  %v10256_v49 = vcombine.low %v3997_v22, %v4001_v27  ;;  %v10267_v52 = vcombine.high %v4006_v39, %v4010_v40  ;;  %v4037_v27 = vld [vmem:[#allocation7 + $0x290] sm:$0xff] }
 0x39f   :  { %7399 = vmatprep.subr.bf16.mxu0 %v10225_v50  ;;  %7563 = vmatprep.subr.bf16.mxu1 %v10227_v51  ;;  %v10251_v48 = vcombine.high %v3990_v59, %v3994_v17  ;;  %v10250_v63 = vcombine.low %v3990_v59, %v3994_v17  ;;  %v10258_v50 = vcombine.low %v3998_v31, %v4002_v34  ;;  %v4033_v59 = vld [vmem:[#allocation7 + $0x270] sm:$0xff]  ;;  %v4030_v17 = vld [vmem:[#allocation7 + $0x258] sm:$0xff] }
 0x3a0   :  { %v10265_v51 = vcombine.high %v4005_v38, %v4009_v55  ;;  %v4041_v31 = vld [vmem:[#allocation7 + $0x2b0] sm:$0xff]  ;;  %v4038_v34 = vld [vmem:[#allocation7 + $0x298] sm:$0xff] }
 0x3a1   :  { %7400 = vmatpush1.bf16.msra.mxu0 %v10224_v23  ;;  %v4018_v23 = vld [vmem:[#allocation7 + $0x1f8] sm:$0xff] }
 0x3a2   :  { %7564 = vmatpush1.bf16.msra.mxu1 %v10226_v60  ;;  %7401 = vmatprep.subr.bf16.mxu0 %v10233_v21  ;;  %v10264_v60 = vcombine.low %v4005_v38, %v4009_v55  ;;  %v10266_v21 = vcombine.low %v4006_v39, %v4010_v40  ;;  %v10275_v0 = vcombine.high %v4014_v58, %v4018_v23  ;;  %v4045_v55 = vld [vmem:[#allocation7 + $0x2d0] sm:$0xff]  ;;  %v4046_v40 = vld [vmem:[#allocation7 + $0x2d8] sm:$0xff] }
 0x3a3   :  { %7565 = vmatprep.subr.bf16.mxu1 %v10235_v62  ;;  %v10273_v62 = vcombine.high %v4013_v28, %v4017_v56  ;;  %v4049_v39 = vld [vmem:[#allocation7 + $0x2f0] sm:$0xff] }
 0x3a5   :  { %7402 = vmatpush1.bf16.msra.mxu0 %v10232_v5  ;;  %v4026_v5 = vld [vmem:[#allocation7 + $0x238] sm:$0xff] }
 0x3a6   :  { %7566 = vmatpush1.bf16.msra.mxu1 %v10234_v32  ;;  %7403 = vmatprep.subr.bf16.mxu0 %v10241_v7  ;;  %v10272_v32 = vcombine.low %v4013_v28, %v4017_v56  ;;  %v10274_v7 = vcombine.low %v4014_v58, %v4018_v23  ;;  %v10283_v14 = vcombine.high %v4022_v3, %v4026_v5  ;;  %v4053_v56 = vld [vmem:[#allocation7 + $0x310] sm:$0xff]  ;;  %v4054_v23 = vld [vmem:[#allocation7 + $0x318] sm:$0xff] }
 0x3a7   :  { %7567 = vmatprep.subr.bf16.mxu1 %v10243_v8  ;;  %v10281_v8 = vcombine.high %v4021_v1, %v4025_v2  ;;  %v4057_v58 = vld [vmem:[#allocation7 + $0x330] sm:$0xff] }
 0x3a9   :  { %7404 = vmatpush1.bf16.msra.mxu0 %v10240_v18  ;;  %v4034_v18 = vld [vmem:[#allocation7 + $0x278] sm:$0xff] }
 0x3aa   :  { %7568 = vmatpush1.bf16.msra.mxu1 %v10242_v19  ;;  %7405 = vmatprep.subr.bf16.mxu0 %v10249_v20  ;;  %v10280_v19 = vcombine.low %v4021_v1, %v4025_v2  ;;  %v10282_v20 = vcombine.low %v4022_v3, %v4026_v5  ;;  %v10291_v22 = vcombine.high %v4030_v17, %v4034_v18  ;;  %v4061_v2 = vld [vmem:[#allocation7 + $0x350] sm:$0xff]  ;;  %v4062_v5 = vld [vmem:[#allocation7 + $0x358] sm:$0xff] }
 0x3ab   :  { %7569 = vmatprep.subr.bf16.mxu1 %v10251_v48  ;;  %v10289_v48 = vcombine.high %v4029_v33, %v4033_v59  ;;  %v4065_v3 = vld [vmem:[#allocation7 + $0x370] sm:$0xff] }
 0x3ad   :  { %7406 = vmatpush1.bf16.msra.mxu0 %v10248_v35  ;;  %v4042_v35 = vld [vmem:[#allocation7 + $0x2b8] sm:$0xff] }
 0x3ae   :  { %7570 = vmatpush1.bf16.msra.mxu1 %v10250_v63  ;;  %7407 = vmatprep.subr.bf16.mxu0 %v10257_v37  ;;  %v10288_v63 = vcombine.low %v4029_v33, %v4033_v59  ;;  %v10290_v37 = vcombine.low %v4030_v17, %v4034_v18  ;;  %v10299_v38 = vcombine.high %v4038_v34, %v4042_v35  ;;  %v4069_v59 = vld [vmem:[#allocation7 + $0x390] sm:$0xff]  ;;  %v4070_v18 = vld [vmem:[#allocation7 + $0x398] sm:$0xff] }
 0x3af   :  { %7571 = vmatprep.subr.bf16.mxu1 %v10259_v57  ;;  %v10297_v57 = vcombine.high %v4037_v27, %v4041_v31  ;;  %v4073_v17 = vld [vmem:[#allocation7 + $0x3b0] sm:$0xff] }
 0x3b1   :  { %7408 = vmatpush1.bf16.msra.mxu0 %v10256_v49  ;;  %v4050_v49 = vld [vmem:[#allocation7 + $0x2f8] sm:$0xff] }
 0x3b2   :  { %7572 = vmatpush1.bf16.msra.mxu1 %v10258_v50  ;;  %7409 = vmatprep.subr.bf16.mxu0 %v10265_v51  ;;  %v10296_v50 = vcombine.low %v4037_v27, %v4041_v31  ;;  %v10298_v51 = vcombine.low %v4038_v34, %v4042_v35  ;;  %v10307_v28 = vcombine.high %v4046_v40, %v4050_v49  ;;  %v4077_v31 = vld [vmem:[#allocation7 + $0x3d0] sm:$0xff]  ;;  %v4078_v35 = vld [vmem:[#allocation7 + $0x3d8] sm:$0xff] }
 0x3b3   :  { %7573 = vmatprep.subr.bf16.mxu1 %v10267_v52  ;;  %v10305_v52 = vcombine.high %v4045_v55, %v4049_v39  ;;  %v4081_v34 = vld [vmem:[#allocation7 + $0x3f0] sm:$0xff] }
 0x3b5   :  { %7410 = vmatpush1.bf16.msra.mxu0 %v10264_v60  ;;  %v4058_v60 = vld [vmem:[#allocation7 + $0x338] sm:$0xff] }
 0x3b6   :  { %7574 = vmatpush1.bf16.msra.mxu1 %v10266_v21  ;;  %7411 = vmatprep.subr.bf16.mxu0 %v10273_v62  ;;  %v10304_v21 = vcombine.low %v4045_v55, %v4049_v39  ;;  %v10306_v62 = vcombine.low %v4046_v40, %v4050_v49  ;;  %v10315_v1 = vcombine.high %v4054_v23, %v4058_v60  ;;  %v4085_v39 = vld [vmem:[#allocation7 + $0x410] sm:$0xff]  ;;  %v4086_v49 = vld [vmem:[#allocation7 + $0x418] sm:$0xff] }
 0x3b7   :  { %7575 = vmatprep.subr.bf16.mxu1 %v10275_v0  ;;  %v10313_v0 = vcombine.high %v4053_v56, %v4057_v58  ;;  %v4089_v40 = vld [vmem:[#allocation7 + $0x430] sm:$0xff] }
 0x3b9   :  { %7412 = vmatpush1.bf16.msra.mxu0 %v10272_v32  ;;  %v4066_v32 = vld [vmem:[#allocation7 + $0x378] sm:$0xff] }
 0x3ba   :  { %7576 = vmatpush1.bf16.msra.mxu1 %v10274_v7  ;;  %7413 = vmatprep.subr.bf16.mxu0 %v10281_v8  ;;  %v10312_v7 = vcombine.low %v4053_v56, %v4057_v58  ;;  %v10314_v8 = vcombine.low %v4054_v23, %v4058_v60  ;;  %v10323_v33 = vcombine.high %v4062_v5, %v4066_v32  ;;  %v4093_v58 = vld [vmem:[#allocation7 + $0x450] sm:$0xff] }
 0x3bb   :  { %7577 = vmatprep.subr.bf16.mxu1 %v10283_v14  ;;  %v10321_v14 = vcombine.high %v4061_v2, %v4065_v3  ;;  %v4097_v23 = vld [vmem:[#allocation7 + $0x470] sm:$0xff]  ;;  %v10344_v60 = vcombine.low %v4085_v39, %v4089_v40 }
 0x3bd   :  { %7414 = vmatpush1.bf16.msra.mxu0 %v10280_v19  ;;  %v4074_v19 = vld [vmem:[#allocation7 + $0x3b8] sm:$0xff] }
 0x3be   :  { %7578 = vmatpush1.bf16.msra.mxu1 %v10282_v20  ;;  %7415 = vmatprep.subr.bf16.mxu0 %v10289_v48  ;;  %v10320_v20 = vcombine.low %v4061_v2, %v4065_v3  ;;  %v10322_v48 = vcombine.low %v4062_v5, %v4066_v32  ;;  %v10331_v27 = vcombine.high %v4070_v18, %v4074_v19  ;;  %v4101_v2 = vld [vmem:[#allocation7 + $0x490] sm:$0xff]  ;;  %v4102_v32 = vld [vmem:[#allocation7 + $0x498] sm:$0xff] }
 0x3bf   :  { %7579 = vmatprep.subr.bf16.mxu1 %v10291_v22  ;;  %v10329_v22 = vcombine.high %v4069_v59, %v4073_v17  ;;  %v4105_v3 = vld [vmem:[#allocation7 + $0x4b0] sm:$0xff] }
 0x3c1   :  { %7416 = vmatpush1.bf16.msra.mxu0 %v10288_v63  ;;  %v4082_v63 = vld [vmem:[#allocation7 + $0x3f8] sm:$0xff] }
 0x3c2   :  { %7580 = vmatpush1.bf16.msra.mxu1 %v10290_v37  ;;  %7417 = vmatprep.subr.bf16.mxu0 %v10297_v57  ;;  %v10328_v37 = vcombine.low %v4069_v59, %v4073_v17  ;;  %v10330_v57 = vcombine.low %v4070_v18, %v4074_v19  ;;  %v10339_v55 = vcombine.high %v4078_v35, %v4082_v63  ;;  %v4109_v17 = vld [vmem:[#allocation7 + $0x4d0] sm:$0xff]  ;;  %v4110_v19 = vld [vmem:[#allocation7 + $0x4d8] sm:$0xff] }
 0x3c3   :  { %7581 = vmatprep.subr.bf16.mxu1 %v10299_v38  ;;  %v10337_v38 = vcombine.high %v4077_v31, %v4081_v34  ;;  %v4113_v18 = vld [vmem:[#allocation7 + $0x4f0] sm:$0xff] }
 0x3c5   :  { %7418 = vmatpush1.bf16.msra.mxu0 %v10296_v50  ;;  %v4090_v50 = vld [vmem:[#allocation7 + $0x438] sm:$0xff] }
 0x3c6   :  { %7582 = vmatpush1.bf16.msra.mxu1 %v10298_v51  ;;  %7419 = vmatprep.subr.bf16.mxu0 %v10305_v52  ;;  %v10336_v51 = vcombine.low %v4077_v31, %v4081_v34  ;;  %v10338_v52 = vcombine.low %v4078_v35, %v4082_v63  ;;  %v10347_v56 = vcombine.high %v4086_v49, %v4090_v50  ;;  %v4117_v31 = vld [vmem:[#allocation7 + $0x510] sm:$0xff]  ;;  %v4118_v35 = vld [vmem:[#allocation7 + $0x518] sm:$0xff] }
 0x3c7   :  { %7583 = vmatprep.subr.bf16.mxu1 %v10307_v28  ;;  %v10345_v28 = vcombine.high %v4085_v39, %v4089_v40  ;;  %v4121_v34 = vld [vmem:[#allocation7 + $0x530] sm:$0xff]  ;;  %v4122_v63 = vld [vmem:[#allocation7 + $0x538] sm:$0xff] }
 0x3c8   :  { %v4129_v39 = vld [vmem:[#allocation7 + $0x570] sm:$0xff]  ;;  %v4126_v40 = vld [vmem:[#allocation7 + $0x558] sm:$0xff] }
 0x3c9   :  { %7420 = vmatpush1.bf16.msra.mxu0 %v10304_v21  ;;  %v4094_v21 = vld [vmem:[#allocation7 + $0x458] sm:$0xff] }
 0x3ca   :  { %7584 = vmatpush1.bf16.msra.mxu1 %v10306_v62  ;;  %7421 = vmatprep.subr.bf16.mxu0 %v10313_v0  ;;  %v4098_v62 = vld [vmem:[#allocation7 + $0x478] sm:$0xff]  ;;  %v10346_v0 = vcombine.low %v4086_v49, %v4090_v50  ;;  %v10376_v50 = vcombine.low %v4117_v31, %v4121_v34 }
 0x3cb   :  { %7585 = vmatprep.subr.bf16.mxu1 %v10315_v1  ;;  %v10353_v1 = vcombine.high %v4093_v58, %v4097_v23  ;;  %v10355_v5 = vcombine.high %v4094_v21, %v4098_v62  ;;  %v4130_v49 = vld [vmem:[#allocation7 + $0x578] sm:$0xff] }
 0x3cd   :  { %7422 = vmatpush1.bf16.msra.mxu0 %v10312_v7  ;;  %v4106_v7 = vld [vmem:[#allocation7 + $0x4b8] sm:$0xff] }
 0x3ce   :  { %7586 = vmatpush1.bf16.msra.mxu1 %v10314_v8  ;;  %7423 = vmatprep.subr.bf16.mxu0 %v10321_v14  ;;  %v10352_v8 = vcombine.low %v4093_v58, %v4097_v23  ;;  %v10354_v14 = vcombine.low %v4094_v21, %v4098_v62  ;;  %v10363_v59 = vcombine.high %v4102_v32, %v4106_v7  ;;  %v4137_v58 = vld [vmem:[#allocation7 + $0x5b0] sm:$0xff]  ;;  %v4134_v23 = vld [vmem:[#allocation7 + $0x598] sm:$0xff] }
 0x3cf   :  { %7587 = vmatprep.subr.bf16.mxu1 %v10323_v33  ;;  %v10361_v33 = vcombine.high %v4101_v2, %v4105_v3  ;;  %v10386_v62 = vcombine.low %v4126_v40, %v4130_v49 }
 0x3d1   :  { %7424 = vmatpush1.bf16.msra.mxu0 %v10320_v20  ;;  %v4114_v20 = vld [vmem:[#allocation7 + $0x4f8] sm:$0xff] }
 0x3d2   :  { %7588 = vmatpush1.bf16.msra.mxu1 %v10322_v48  ;;  %7425 = vmatprep.subr.bf16.mxu0 %v10329_v22  ;;  %v10360_v48 = vcombine.low %v4101_v2, %v4105_v3  ;;  %v10369_v22 = vcombine.high %v4109_v17, %v4113_v18  ;;  %v4141_v2 = vld [vmem:[#allocation7 + $0x5d0] sm:$0xff] }
 0x3d3   :  { %7589 = vmatprep.subr.bf16.mxu1 %v10331_v27  ;;  %v10371_v27 = vcombine.high %v4110_v19, %v4114_v20  ;;  %v4145_v3 = vld [vmem:[#allocation7 + $0x5f0] sm:$0xff] }
 0x3d5   :  { %7426 = vmatpush1.bf16.msra.mxu0 %v10328_v37  ;;  %v10370_v37 = vcombine.low %v4110_v19, %v4114_v20  ;;  %v4154_v19 = vld [vmem:[#allocation7 + $0x638] sm:$0xff]  ;;  %v10400_v20 = vcombine.low %v4141_v2, %v4145_v3 }
 0x3d6   :  { %7590 = vmatpush1.bf16.msra.mxu1 %v10330_v57  ;;  %7427 = vmatprep.subr.bf16.mxu0 %v10337_v38  ;;  %v10377_v57 = vcombine.high %v4117_v31, %v4121_v34  ;;  %v10379_v38 = vcombine.high %v4118_v35, %v4122_v63  ;;  %v4161_v31 = vld [vmem:[#allocation7 + $0x670] sm:$0xff]  ;;  %v4158_v34 = vld [vmem:[#allocation7 + $0x658] sm:$0xff] }
 0x3d7   :  { %7591 = vmatprep.subr.bf16.mxu1 %v10339_v55  ;;  %v4125_v55 = vld [vmem:[#allocation7 + $0x550] sm:$0xff] }
 0x3d8   :  { %v10384_v21 = vcombine.low %v4125_v55, %v4129_v39 }
 0x3d9   :  { %7428 = vmatpush1.bf16.msra.mxu0 %v10336_v51  ;;  %v10378_v51 = vcombine.low %v4118_v35, %v4122_v63  ;;  %v4162_v35 = vld [vmem:[#allocation7 + $0x678] sm:$0xff] }
 0x3da   :  { %7592 = vmatpush1.bf16.msra.mxu1 %v10338_v52  ;;  %7438 = vmatprep.subr.bf16.mxu0 %v10345_v28  ;;  %v10385_v52 = vcombine.high %v4125_v55, %v4129_v39  ;;  %v10387_v28 = vcombine.high %v4126_v40, %v4130_v49  ;;  %v4169_v55 = vld [vmem:[#allocation7 + $0x6b0] sm:$0xff]  ;;  %v4166_v39 = vld [vmem:[#allocation7 + $0x698] sm:$0xff] }
 0x3db   :  { %7602 = vmatprep.subr.bf16.mxu1 %v10347_v56  ;;  %v4133_v56 = vld [vmem:[#allocation7 + $0x590] sm:$0xff]  ;;  %v4170_v40 = vld [vmem:[#allocation7 + $0x6b8] sm:$0xff] }
 0x3dc   :  { %7430 = vmatmul.mubr.bf16.vlgmr.msra.gmra.mrb[12].mxu0 %v11946_v6 }
 0x3dd   :  { %7594 = vmatmul.mubr.bf16.vlgmr.msra.gmra.mrb[12].mxu1 %v11946_v6  ;;  %7439 = vmatpush1.bf16.msra.mxu0 %v10344_v60  ;;  %v10362_v6 = vcombine.low %v4102_v32, %v4106_v7  ;;  %v4138_v60 = vld [vmem:[#allocation7 + $0x5b8] sm:$0xff]  ;;  %v10392_v7 = vcombine.low %v4133_v56, %v4137_v58 }
 0x3de   :  { %7470 = vmatprep.mubr.bf16.mxu0 %v11948_v11  ;;  %7603 = vmatpush1.bf16.msra.mxu1 %v10346_v0  ;;  %v10393_v0 = vcombine.high %v4133_v56, %v4137_v58  ;;  %v4146_v32 = vld [vmem:[#allocation7 + $0x5f8] sm:$0xff]  ;;  %v4177_v56 = vld [vmem:[#allocation7 + $0x6f0] sm:$0xff] }
 0x3df   :  { %7634 = vmatprep.mubr.bf16.mxu1 %v11948_v11  ;;  %7440 = vmatprep.subr.bf16.mxu0 %v10353_v1  ;;  %v10368_v11 = vcombine.low %v4109_v17, %v4113_v18  ;;  %v10395_v1 = vcombine.high %v4134_v23, %v4138_v60  ;;  %v4153_v17 = vld [vmem:[#allocation7 + $0x630] sm:$0xff]  ;;  %v4150_v18 = vld [vmem:[#allocation7 + $0x618] sm:$0xff] }
 0x3e0   :  { %7604 = vmatprep.subr.bf16.mxu1 %v10355_v5  ;;  %v4142_v5 = vld [vmem:[#allocation7 + $0x5d8] sm:$0xff] }
 0x3e1   :  { %7441 = vmatpush1.bf16.msra.mxu0 %v10352_v8  ;;  %v10394_v8 = vcombine.low %v4134_v23, %v4138_v60  ;;  %v4174_v58 = vld [vmem:[#allocation7 + $0x6d8] sm:$0xff] }
 0x3e2   :  { %7605 = vmatpush1.bf16.msra.mxu1 %v10354_v14  ;;  %7442 = vmatprep.subr.bf16.mxu0 %v10361_v33  ;;  %v10401_v14 = vcombine.high %v4141_v2, %v4145_v3  ;;  %v10403_v33 = vcombine.high %v4142_v5, %v4146_v32  ;;  %v4178_v23 = vld [vmem:[#allocation7 + $0x6f8] sm:$0xff]  ;;  %v4185_v2 = vld [vmem:[#allocation7 + $0x730] sm:$0xff] }
 0x3e3   :  { %7606 = vmatprep.subr.bf16.mxu1 %v10363_v59  ;;  %v4149_v59 = vld [vmem:[#allocation7 + $0x610] sm:$0xff]  ;;  %v4182_v3 = vld [vmem:[#allocation7 + $0x718] sm:$0xff] }
 0x3e4   :  { %v10408_v63 = vcombine.low %v4149_v59, %v4153_v17 }
 0x3e5   :  { %7443 = vmatpush1.bf16.msra.mxu0 %v10360_v48  ;;  %v10402_v48 = vcombine.low %v4142_v5, %v4146_v32  ;;  %v4186_v5 = vld [vmem:[#allocation7 + $0x738] sm:$0xff] }
 0x3e6   :  { %7607 = vmatpush1.bf16.msra.mxu1 %v10362_v6  ;;  %7444 = vmatprep.subr.bf16.mxu0 %v10369_v22  ;;  %v10409_v6 = vcombine.high %v4149_v59, %v4153_v17  ;;  %v10411_v22 = vcombine.high %v4150_v18, %v4154_v19  ;;  %v4193_v59 = vld [vmem:[#allocation7 + $0x770] sm:$0xff]  ;;  %v4190_v17 = vld [vmem:[#allocation7 + $0x758] sm:$0xff] }
 0x3e7   :  { %7608 = vmatprep.subr.bf16.mxu1 %v10371_v27  ;;  %v4157_v27 = vld [vmem:[#allocation7 + $0x650] sm:$0xff] }
 0x3e8   :  { %v10416_v49 = vcombine.low %v4157_v27, %v4161_v31 }
 0x3e9   :  { %7445 = vmatpush1.bf16.msra.mxu0 %v10368_v11  ;;  %v10410_v11 = vcombine.low %v4150_v18, %v4154_v19  ;;  %v4194_v18 = vld [vmem:[#allocation7 + $0x778] sm:$0xff] }
 0x3ea   :  { %7609 = vmatpush1.bf16.msra.mxu1 %v10370_v37  ;;  %7446 = vmatprep.subr.bf16.mxu0 %v10377_v57  ;;  %v10417_v37 = vcombine.high %v4157_v27, %v4161_v31  ;;  %v10419_v57 = vcombine.high %v4158_v34, %v4162_v35  ;;  %v4201_v27 = vld [vmem:[#allocation7 + $0x7b0] sm:$0xff]  ;;  %v4198_v31 = vld [vmem:[#allocation7 + $0x798] sm:$0xff] }
 0x3eb   :  { %7610 = vmatprep.subr.bf16.mxu1 %v10379_v38  ;;  %v4165_v38 = vld [vmem:[#allocation7 + $0x690] sm:$0xff] }
 0x3ec   :  { %v10424_v60 = vcombine.low %v4165_v38, %v4169_v55 }
 0x3ed   :  { %7447 = vmatpush1.bf16.msra.mxu0 %v10376_v50  ;;  %v10418_v50 = vcombine.low %v4158_v34, %v4162_v35  ;;  %v4202_v34 = vld [vmem:[#allocation7 + $0x7b8] sm:$0xff] }
 0x3ee   :  { %7611 = vmatpush1.bf16.msra.mxu1 %v10378_v51  ;;  %7448 = vmatprep.subr.bf16.mxu0 %v10385_v52  ;;  %v10425_v51 = vcombine.high %v4165_v38, %v4169_v55  ;;  %v10427_v52 = vcombine.high %v4166_v39, %v4170_v40  ;;  %v4209_v38 = vld [vmem:[#allocation7 + $0x7f0] sm:$0xff]  ;;  %v4206_v55 = vld [vmem:[#allocation7 + $0x7d8] sm:$0xff] }
 0x3ef   :  { %7612 = vmatprep.subr.bf16.mxu1 %v10387_v28  ;;  %v4173_v28 = vld [vmem:[#allocation7 + $0x6d0] sm:$0xff] }
 0x3f0   :  { %v10432_v32 = vcombine.low %v4173_v28, %v4177_v56 }
 0x3f1   :  { %7449 = vmatpush1.bf16.msra.mxu0 %v10384_v21  ;;  %v10426_v21 = vcombine.low %v4166_v39, %v4170_v40  ;;  %v4210_v39 = vld [vmem:[#allocation7 + $0x7f8] sm:$0xff] }
 0x3f2   :  { %7613 = vmatpush1.bf16.msra.mxu1 %v10386_v62  ;;  %7450 = vmatprep.subr.bf16.mxu0 %v10393_v0  ;;  %v10433_v62 = vcombine.high %v4173_v28, %v4177_v56  ;;  %v10435_v0 = vcombine.high %v4174_v58, %v4178_v23  ;;  %v4217_v28 = vld [vmem:[#allocation7 + $0x830] sm:$0xff]  ;;  %v4214_v56 = vld [vmem:[#allocation7 + $0x818] sm:$0xff] }
 0x3f3   :  { %7614 = vmatprep.subr.bf16.mxu1 %v10395_v1  ;;  %v4181_v1 = vld [vmem:[#allocation7 + $0x710] sm:$0xff] }
 0x3f4   :  { %v10440_v19 = vcombine.low %v4181_v1, %v4185_v2 }
 0x3f5   :  { %7451 = vmatpush1.bf16.msra.mxu0 %v10392_v7  ;;  %v10434_v7 = vcombine.low %v4174_v58, %v4178_v23  ;;  %v4218_v58 = vld [vmem:[#allocation7 + $0x838] sm:$0xff] }
 0x3f6   :  { %7615 = vmatpush1.bf16.msra.mxu1 %v10394_v8  ;;  %7452 = vmatprep.subr.bf16.mxu0 %v10401_v14  ;;  %v10441_v8 = vcombine.high %v4181_v1, %v4185_v2  ;;  %v10443_v14 = vcombine.high %v4182_v3, %v4186_v5  ;;  %v4225_v1 = vld [vmem:[#allocation7 + $0x870] sm:$0xff] }
 0x3f7   :  { %7616 = vmatprep.subr.bf16.mxu1 %v10403_v33  ;;  %v4189_v33 = vld [vmem:[#allocation7 + $0x750] sm:$0xff] }
 0x3f8   :  { %v10448_v35 = vcombine.low %v4189_v33, %v4193_v59 }
 0x3f9   :  { %7453 = vmatpush1.bf16.msra.mxu0 %v10400_v20  ;;  %v10442_v20 = vcombine.low %v4182_v3, %v4186_v5  ;;  %v4222_v3 = vld [vmem:[#allocation7 + $0x858] sm:$0xff] }
 0x3fa   :  { %7617 = vmatpush1.bf16.msra.mxu1 %v10402_v48  ;;  %7454 = vmatprep.subr.bf16.mxu0 %v10409_v6  ;;  %v10449_v48 = vcombine.high %v4189_v33, %v4193_v59  ;;  %v10451_v6 = vcombine.high %v4190_v17, %v4194_v18  ;;  %v4226_v5 = vld [vmem:[#allocation7 + $0x878] sm:$0xff] }
 0x3fb   :  { %7618 = vmatprep.subr.bf16.mxu1 %v10411_v22  ;;  %v4197_v22 = vld [vmem:[#allocation7 + $0x790] sm:$0xff]  ;;  %v10483_v33 = vcombine.high %v4222_v3, %v4226_v5  ;;  %v4230_v59 = vld [vmem:[#allocation7 + $0x898] sm:$0xff] }
 0x3fc   :  { %v10456_v40 = vcombine.low %v4197_v22, %v4201_v27 }
 0x3fd   :  { %7455 = vmatpush1.bf16.msra.mxu0 %v10408_v63  ;;  %v10450_v63 = vcombine.low %v4190_v17, %v4194_v18  ;;  %v4234_v17 = vld [vmem:[#allocation7 + $0x8b8] sm:$0xff] }
 0x3fe   :  { %7619 = vmatpush1.bf16.msra.mxu1 %v10410_v11  ;;  %7456 = vmatprep.subr.bf16.mxu0 %v10417_v37  ;;  %v10457_v11 = vcombine.high %v4197_v22, %v4201_v27  ;;  %v10459_v37 = vcombine.high %v4198_v31, %v4202_v34  ;;  %v4241_v22 = vld [vmem:[#allocation7 + $0x8f0] sm:$0xff]  ;;  %v4238_v27 = vld [vmem:[#allocation7 + $0x8d8] sm:$0xff] }
 0x3ff   :  { %7620 = vmatprep.subr.bf16.mxu1 %v10419_v57  ;;  %v4205_v57 = vld [vmem:[#allocation7 + $0x7d0] sm:$0xff] }
 0x400   :  { %v10464_v23 = vcombine.low %v4205_v57, %v4209_v38 }
 0x401   :  { %7457 = vmatpush1.bf16.msra.mxu0 %v10416_v49  ;;  %v10458_v49 = vcombine.low %v4198_v31, %v4202_v34  ;;  %v4242_v31 = vld [vmem:[#allocation7 + $0x8f8] sm:$0xff] }
 0x402   :  { %7621 = vmatpush1.bf16.msra.mxu1 %v10418_v50  ;;  %7458 = vmatprep.subr.bf16.mxu0 %v10425_v51  ;;  %v10465_v50 = vcombine.high %v4205_v57, %v4209_v38  ;;  %v10467_v51 = vcombine.high %v4206_v55, %v4210_v39  ;;  %v4246_v57 = vld [vmem:[#allocation7 + $0x918] sm:$0xff] }
 0x403   :  { %7622 = vmatprep.subr.bf16.mxu1 %v10427_v52  ;;  %v4213_v52 = vld [vmem:[#allocation7 + $0x810] sm:$0xff]  ;;  %v4250_v38 = vld [vmem:[#allocation7 + $0x938] sm:$0xff] }
 0x404   :  { %v10472_v2 = vcombine.low %v4213_v52, %v4217_v28 }
 0x405   :  { %7459 = vmatpush1.bf16.msra.mxu0 %v10424_v60  ;;  %v10466_v60 = vcombine.low %v4206_v55, %v4210_v39  ;;  %v10498_v55 = vcombine.low %v4238_v27, %v4242_v31 }
 0x406   :  { %7623 = vmatpush1.bf16.msra.mxu1 %v10426_v21  ;;  %7460 = vmatprep.subr.bf16.mxu0 %v10433_v62  ;;  %v10473_v21 = vcombine.high %v4213_v52, %v4217_v28  ;;  %v10475_v62 = vcombine.high %v4214_v56, %v4218_v58  ;;  %v4258_v52 = vld [vmem:[#allocation7 + $0x978] sm:$0xff] }
 0x407   :  { %7624 = vmatprep.subr.bf16.mxu1 %v10435_v0  ;;  %v4221_v0 = vld [vmem:[#allocation7 + $0x850] sm:$0xff] }
 0x408   :  { %v10480_v18 = vcombine.low %v4221_v0, %v4225_v1 }
 0x409   :  { %7461 = vmatpush1.bf16.msra.mxu0 %v10432_v32  ;;  %v10474_v32 = vcombine.low %v4214_v56, %v4218_v58  ;;  %v10506_v56 = vcombine.low %v4246_v57, %v4250_v38 }
 0x40a   :  { %7625 = vmatpush1.bf16.msra.mxu1 %v10434_v7  ;;  %7462 = vmatprep.subr.bf16.mxu0 %v10441_v8  ;;  %v10481_v7 = vcombine.high %v4221_v0, %v4225_v1  ;;  %v4229_v8 = vld [vmem:[#allocation7 + $0x890] sm:$0xff]  ;;  %v4266_v0 = vld [vmem:[#allocation7 + $0x9b8] sm:$0xff] }
 0x40b   :  { %7626 = vmatprep.subr.bf16.mxu1 %v10443_v14  ;;  %v4233_v14 = vld [vmem:[#allocation7 + $0x8b0] sm:$0xff] }
 0x40c   :  { %v10488_v34 = vcombine.low %v4229_v8, %v4233_v14 }
 0x40d   :  { %7463 = vmatpush1.bf16.msra.mxu0 %v10440_v19  ;;  %v10482_v19 = vcombine.low %v4222_v3, %v4226_v5 }
 0x40e   :  { %7627 = vmatpush1.bf16.msra.mxu1 %v10442_v20  ;;  %7464 = vmatprep.subr.bf16.mxu0 %v10449_v48  ;;  %v10489_v20 = vcombine.high %v4229_v8, %v4233_v14  ;;  %v10491_v48 = vcombine.high %v4230_v59, %v4234_v17  ;;  %v4270_v8 = vld [vmem:[#allocation7 + $0x9d8] sm:$0xff] }
 0x40f   :  { %7628 = vmatprep.subr.bf16.mxu1 %v10451_v6  ;;  %v4237_v6 = vld [vmem:[#allocation7 + $0x8d0] sm:$0xff]  ;;  %v4274_v14 = vld [vmem:[#allocation7 + $0x9f8] sm:$0xff] }
 0x411   :  { %7465 = vmatpush1.bf16.msra.mxu0 %v10448_v35  ;;  %v10497_v35 = vcombine.high %v4237_v6, %v4241_v22 }
 0x412   :  { %7629 = vmatpush1.bf16.msra.mxu1 %v10450_v63  ;;  %7466 = vmatprep.subr.bf16.mxu0 %v10457_v11  ;;  %v10499_v63 = vcombine.high %v4238_v27, %v4242_v31  ;;  %v4245_v11 = vld [vmem:[#allocation7 + $0x910] sm:$0xff]  ;;  %v10530_v27 = vcombine.low %v4270_v8, %v4274_v14 }
 0x413   :  { %7630 = vmatprep.subr.bf16.mxu1 %v10459_v37  ;;  %v4249_v37 = vld [vmem:[#allocation7 + $0x930] sm:$0xff] }
 0x414   :  { %v10505_v39 = vcombine.high %v4245_v11, %v4249_v37  ;;  %v10504_v28 = vcombine.low %v4245_v11, %v4249_v37  ;;  %v4290_v11 = vld [vmem:[#allocation7 + $0xa78] sm:$0xff] }
 0x415   :  { %7467 = vmatpush1.bf16.msra.mxu0 %v10456_v40  ;;  %v10507_v40 = vcombine.high %v4246_v57, %v4250_v38 }
 0x416   :  { %7631 = vmatpush1.bf16.msra.mxu1 %v10458_v49  ;;  %7468 = vmatprep.subr.bf16.mxu0 %v10465_v50  ;;  %v4253_v49 = vld [vmem:[#allocation7 + $0x950] sm:$0xff] }
 0x417   :  { %7632 = vmatprep.subr.bf16.mxu1 %v10467_v51  ;;  %v4257_v50 = vld [vmem:[#allocation7 + $0x970] sm:$0xff]  ;;  %v4254_v51 = vld [vmem:[#allocation7 + $0x958] sm:$0xff] }
 0x418   :  { %v10513_v58 = vcombine.high %v4253_v49, %v4257_v50  ;;  %v10512_v1 = vcombine.low %v4253_v49, %v4257_v50  ;;  %v4298_v49 = vld [vmem:[#allocation7 + $0xab8] sm:$0xff] }
 0x419   :  { %7469 = vmatpush1.bf16.msra.mxu0 %v10464_v23  ;;  %v10515_v23 = vcombine.high %v4254_v51, %v4258_v52 }
 0x41a   :  { %7633 = vmatpush1.bf16.msra.mxu1 %v10466_v60  ;;  %7479 = vmatprep.subr.bf16.mxu0 %v10473_v21  ;;  %v4261_v60 = vld [vmem:[#allocation7 + $0x990] sm:$0xff] }
 0x41b   :  { %7643 = vmatprep.subr.bf16.mxu1 %v10475_v62  ;;  %v4265_v21 = vld [vmem:[#allocation7 + $0x9b0] sm:$0xff]  ;;  %v4262_v62 = vld [vmem:[#allocation7 + $0x998] sm:$0xff] }
 0x41c   :  { %7471 = vmatmul.mubr.bf16.vlgmr.msra.gmra.mrb[12].mxu0 %v11960_v61  ;;  %v10521_v3 = vcombine.high %v4261_v60, %v4265_v21  ;;  %v10523_v5 = vcombine.high %v4262_v62, %v4266_v0 }
 0x41d   :  { %7635 = vmatmul.mubr.bf16.vlgmr.msra.gmra.mrb[12].mxu1 %v11960_v61  ;;  %7480 = vmatpush1.bf16.msra.mxu0 %v10472_v2  ;;  %v10490_v61 = vcombine.low %v4230_v59, %v4234_v17  ;;  %v10514_v2 = vcombine.low %v4254_v51, %v4258_v52  ;;  %v10522_v59 = vcombine.low %v4262_v62, %v4266_v0 }
 0x41e   :  { %7511 = vmatprep.mubr.bf16.mxu0 %v11980_v10  ;;  %7644 = vmatpush1.bf16.msra.mxu1 %v10474_v32  ;;  %v4269_v32 = vld [vmem:[#allocation7 + $0x9d0] sm:$0xff] }
 0x41f   :  { %7675 = vmatprep.mubr.bf16.mxu1 %v11980_v10  ;;  %7481 = vmatprep.subr.bf16.mxu0 %v10481_v7  ;;  %v10496_v10 = vcombine.low %v4237_v6, %v4241_v22  ;;  %v4273_v7 = vld [vmem:[#allocation7 + $0x9f0] sm:$0xff]  ;;  %v4282_v6 = vld [vmem:[#allocation7 + $0xa38] sm:$0xff] }
 0x420   :  { %7645 = vmatprep.subr.bf16.mxu1 %v10483_v33  ;;  %v10520_v33 = vcombine.low %v4261_v60, %v4265_v21  ;;  %v10529_v17 = vcombine.high %v4269_v32, %v4273_v7  ;;  %v10528_v22 = vcombine.low %v4269_v32, %v4273_v7  ;;  %v4306_v60 = vld [vmem:[#allocation7 + $0xaf8] sm:$0xff] }
 0x421   :  { %7482 = vmatpush1.bf16.msra.mxu0 %v10480_v18  ;;  %v10531_v18 = vcombine.high %v4270_v8, %v4274_v14  ;;  %v4314_v32 = vld [vmem:[#allocation7 + $0xb38] sm:$0xff] }
 0x422   :  { %7646 = vmatpush1.bf16.msra.mxu1 %v10482_v19  ;;  %7483 = vmatprep.subr.bf16.mxu0 %v10489_v20  ;;  %v4277_v19 = vld [vmem:[#allocation7 + $0xa10] sm:$0xff] }
 0x423   :  { %7647 = vmatprep.subr.bf16.mxu1 %v10491_v48  ;;  %v4281_v20 = vld [vmem:[#allocation7 + $0xa30] sm:$0xff]  ;;  %v4278_v48 = vld [vmem:[#allocation7 + $0xa18] sm:$0xff] }
 0x424   :  { %v10537_v31 = vcombine.high %v4277_v19, %v4281_v20  ;;  %v10536_v37 = vcombine.low %v4277_v19, %v4281_v20  ;;  %v10538_v57 = vcombine.low %v4278_v48, %v4282_v6  ;;  %v4322_v19 = vld [vmem:[#allocation7 + $0xb78] sm:$0xff] }
 0x425   :  { %7484 = vmatpush1.bf16.msra.mxu0 %v10488_v34  ;;  %v10539_v34 = vcombine.high %v4278_v48, %v4282_v6 }
 0x426   :  { %7648 = vmatpush1.bf16.msra.mxu1 %v10490_v61  ;;  %7485 = vmatprep.subr.bf16.mxu0 %v10497_v35  ;;  %v4285_v61 = vld [vmem:[#allocation7 + $0xa50] sm:$0xff] }
 0x427   :  { %7649 = vmatprep.subr.bf16.mxu1 %v10499_v63  ;;  %v4289_v35 = vld [vmem:[#allocation7 + $0xa70] sm:$0xff]  ;;  %v4286_v63 = vld [vmem:[#allocation7 + $0xa58] sm:$0xff] }
 0x428   :  { %v10545_v38 = vcombine.high %v4285_v61, %v4289_v35  ;;  %v10544_v50 = vcombine.low %v4285_v61, %v4289_v35  ;;  %v10546_v51 = vcombine.low %v4286_v63, %v4290_v11  ;;  %v4330_v61 = vld [vmem:[#allocation7 + $0xbb8] sm:$0xff] }
 0x429   :  { %7486 = vmatpush1.bf16.msra.mxu0 %v10496_v10  ;;  %v10547_v10 = vcombine.high %v4286_v63, %v4290_v11 }
 0x42a   :  { %7650 = vmatpush1.bf16.msra.mxu1 %v10498_v55  ;;  %7487 = vmatprep.subr.bf16.mxu0 %v10505_v39  ;;  %v4293_v55 = vld [vmem:[#allocation7 + $0xa90] sm:$0xff] }
 0x42b   :  { %7651 = vmatprep.subr.bf16.mxu1 %v10507_v40  ;;  %v4297_v39 = vld [vmem:[#allocation7 + $0xab0] sm:$0xff]  ;;  %v4294_v40 = vld [vmem:[#allocation7 + $0xa98] sm:$0xff] }
 0x42c   :  { %v10553_v52 = vcombine.high %v4293_v55, %v4297_v39  ;;  %v10552_v21 = vcombine.low %v4293_v55, %v4297_v39  ;;  %v10554_v62 = vcombine.low %v4294_v40, %v4298_v49  ;;  %v4338_v55 = vld [vmem:[#allocation7 + $0xbf8] sm:$0xff] }
 0x42d   :  { %7488 = vmatpush1.bf16.msra.mxu0 %v10504_v28  ;;  %v10555_v28 = vcombine.high %v4294_v40, %v4298_v49 }
 0x42e   :  { %7652 = vmatpush1.bf16.msra.mxu1 %v10506_v56  ;;  %7489 = vmatprep.subr.bf16.mxu0 %v10513_v58  ;;  %v4301_v56 = vld [vmem:[#allocation7 + $0xad0] sm:$0xff] }
 0x42f   :  { %7653 = vmatprep.subr.bf16.mxu1 %v10515_v23  ;;  %v4305_v58 = vld [vmem:[#allocation7 + $0xaf0] sm:$0xff]  ;;  %v4302_v23 = vld [vmem:[#allocation7 + $0xad8] sm:$0xff] }
 0x430   :  { %v10561_v0 = vcombine.high %v4301_v56, %v4305_v58  ;;  %v10560_v7 = vcombine.low %v4301_v56, %v4305_v58  ;;  %v10562_v8 = vcombine.low %v4302_v23, %v4306_v60  ;;  %v4346_v56 = vld [vmem:[#allocation7 + $0xc38] sm:$0xff] }
 0x431   :  { %7490 = vmatpush1.bf16.msra.mxu0 %v10512_v1  ;;  %v10563_v1 = vcombine.high %v4302_v23, %v4306_v60 }
 0x432   :  { %7654 = vmatpush1.bf16.msra.mxu1 %v10514_v2  ;;  %7491 = vmatprep.subr.bf16.mxu0 %v10521_v3  ;;  %v4309_v2 = vld [vmem:[#allocation7 + $0xb10] sm:$0xff] }
 0x433   :  { %7655 = vmatprep.subr.bf16.mxu1 %v10523_v5  ;;  %v4313_v3 = vld [vmem:[#allocation7 + $0xb30] sm:$0xff]  ;;  %v4310_v5 = vld [vmem:[#allocation7 + $0xb18] sm:$0xff] }
 0x434   :  { %v10569_v14 = vcombine.high %v4309_v2, %v4313_v3  ;;  %v10568_v20 = vcombine.low %v4309_v2, %v4313_v3  ;;  %v10570_v48 = vcombine.low %v4310_v5, %v4314_v32  ;;  %v4350_v2 = vld [vmem:[#allocation7 + $0xc58] sm:$0xff] }
 0x435   :  { %7492 = vmatpush1.bf16.msra.mxu0 %v10520_v33  ;;  %v10571_v33 = vcombine.high %v4310_v5, %v4314_v32  ;;  %v4354_v3 = vld [vmem:[#allocation7 + $0xc78] sm:$0xff] }
 0x436   :  { %7656 = vmatpush1.bf16.msra.mxu1 %v10522_v59  ;;  %7493 = vmatprep.subr.bf16.mxu0 %v10529_v17  ;;  %v4317_v59 = vld [vmem:[#allocation7 + $0xb50] sm:$0xff] }
 0x437   :  { %7657 = vmatprep.subr.bf16.mxu1 %v10531_v18  ;;  %v4321_v17 = vld [vmem:[#allocation7 + $0xb70] sm:$0xff]  ;;  %v4318_v18 = vld [vmem:[#allocation7 + $0xb58] sm:$0xff] }
 0x438   :  { %v10577_v6 = vcombine.high %v4317_v59, %v4321_v17  ;;  %v10576_v35 = vcombine.low %v4317_v59, %v4321_v17  ;;  %v10578_v63 = vcombine.low %v4318_v18, %v4322_v19  ;;  %v4362_v59 = vld [vmem:[#allocation7 + $0xcb8] sm:$0xff] }
 0x439   :  { %7494 = vmatpush1.bf16.msra.mxu0 %v10528_v22  ;;  %v10579_v22 = vcombine.high %v4318_v18, %v4322_v19  ;;  %v10610_v18 = vcombine.low %v4350_v2, %v4354_v3 }
 0x43a   :  { %7658 = vmatpush1.bf16.msra.mxu1 %v10530_v27  ;;  %7495 = vmatprep.subr.bf16.mxu0 %v10537_v31  ;;  %v4325_v27 = vld [vmem:[#allocation7 + $0xb90] sm:$0xff] }
 0x43b   :  { %7659 = vmatprep.subr.bf16.mxu1 %v10539_v34  ;;  %v4329_v31 = vld [vmem:[#allocation7 + $0xbb0] sm:$0xff]  ;;  %v4326_v34 = vld [vmem:[#allocation7 + $0xb98] sm:$0xff] }
 0x43c   :  { %v10585_v11 = vcombine.high %v4325_v27, %v4329_v31  ;;  %v10584_v39 = vcombine.low %v4325_v27, %v4329_v31  ;;  %v10586_v40 = vcombine.low %v4326_v34, %v4330_v61  ;;  %v4370_v27 = vld [vmem:[#allocation7 + $0xcf8] sm:$0xff] }
 0x43d   :  { %7496 = vmatpush1.bf16.msra.mxu0 %v10536_v37  ;;  %v10587_v37 = vcombine.high %v4326_v34, %v4330_v61 }
 0x43e   :  { %7660 = vmatpush1.bf16.msra.mxu1 %v10538_v57  ;;  %7497 = vmatprep.subr.bf16.mxu0 %v10545_v38  ;;  %v4333_v57 = vld [vmem:[#allocation7 + $0xbd0] sm:$0xff] }
 0x43f   :  { %7661 = vmatprep.subr.bf16.mxu1 %v10547_v10  ;;  %v4337_v38 = vld [vmem:[#allocation7 + $0xbf0] sm:$0xff]  ;;  %v4334_v10 = vld [vmem:[#allocation7 + $0xbd8] sm:$0xff] }
 0x440   :  { %v10593_v49 = vcombine.high %v4333_v57, %v4337_v38  ;;  %v10592_v58 = vcombine.low %v4333_v57, %v4337_v38  ;;  %v10594_v23 = vcombine.low %v4334_v10, %v4338_v55 }
 0x441   :  { %7498 = vmatpush1.bf16.msra.mxu0 %v10544_v50  ;;  %v10595_v50 = vcombine.high %v4334_v10, %v4338_v55  ;;  %v4381_v55 = vld [vmem:[#allocation7 + $0xd50] sm:$0xff] }
 0x442   :  { %7662 = vmatpush1.bf16.msra.mxu1 %v10546_v51  ;;  %7499 = vmatprep.subr.bf16.mxu0 %v10553_v52  ;;  %v4341_v51 = vld [vmem:[#allocation7 + $0xc10] sm:$0xff] }
 0x443   :  { %7663 = vmatprep.subr.bf16.mxu1 %v10555_v28  ;;  %v4345_v52 = vld [vmem:[#allocation7 + $0xc30] sm:$0xff]  ;;  %v4342_v28 = vld [vmem:[#allocation7 + $0xc18] sm:$0xff] }
 0x444   :  { %v10601_v60 = vcombine.high %v4341_v51, %v4345_v52  ;;  %v10602_v5 = vcombine.low %v4342_v28, %v4346_v56 }
 0x445   :  { %7500 = vmatpush1.bf16.msra.mxu0 %v10552_v21  ;;  %v10603_v21 = vcombine.high %v4342_v28, %v4346_v56 }
 0x446   :  { %7664 = vmatpush1.bf16.msra.mxu1 %v10554_v62  ;;  %7501 = vmatprep.subr.bf16.mxu0 %v10561_v0  ;;  %v4349_v62 = vld [vmem:[#allocation7 + $0xc50] sm:$0xff] }
 0x447   :  { %7665 = vmatprep.subr.bf16.mxu1 %v10563_v1  ;;  %v4353_v0 = vld [vmem:[#allocation7 + $0xc70] sm:$0xff]  ;;  %v10600_v1 = vcombine.low %v4341_v51, %v4345_v52  ;;  %v4467_v51 = vld [vmem:[#allocation9] sm:$0xff] }
 0x448   :  { %v10609_v32 = vcombine.high %v4349_v62, %v4353_v0  ;;  %v10608_v17 = vcombine.low %v4349_v62, %v4353_v0  ;;  %v4390_v62 = vld [vmem:[#allocation7 + $0xd98] sm:$0xff] }
 0x449   :  { %7502 = vmatpush1.bf16.msra.mxu0 %v10560_v7  ;;  %v4357_v7 = vld [vmem:[#allocation7 + $0xc90] sm:$0xff]  ;;  %v4394_v0 = vld [vmem:[#allocation7 + $0xdb8] sm:$0xff] }
 0x44a   :  { %7666 = vmatpush1.bf16.msra.mxu1 %v10562_v8  ;;  %7503 = vmatprep.subr.bf16.mxu0 %v10569_v14  ;;  %v4361_v8 = vld [vmem:[#allocation7 + $0xcb0] sm:$0xff]  ;;  %v10611_v14 = vcombine.high %v4350_v2, %v4354_v3  ;;  %v4484_v2 = vrot.slane %v4467_v51, %v11938_v24 }
 0x44b   :  { %7667 = vmatprep.subr.bf16.mxu1 %v10571_v33  ;;  %v4358_v33 = vld [vmem:[#allocation7 + $0xc98] sm:$0xff]  ;;  %v10617_v19 = vcombine.high %v4357_v7, %v4361_v8  ;;  %v10616_v31 = vcombine.low %v4357_v7, %v4361_v8 }
 0x44d   :  { %7504 = vmatpush1.bf16.msra.mxu0 %v10568_v20  ;;  %v10619_v20 = vcombine.high %v4358_v33, %v4362_v59 }
 0x44e   :  { %7668 = vmatpush1.bf16.msra.mxu1 %v10570_v48  ;;  %7505 = vmatprep.subr.bf16.mxu0 %v10577_v6  ;;  %v4365_v48 = vld [vmem:[#allocation7 + $0xcd0] sm:$0xff] }
 0x44f   :  { %7669 = vmatprep.subr.bf16.mxu1 %v10579_v22  ;;  %v4369_v6 = vld [vmem:[#allocation7 + $0xcf0] sm:$0xff]  ;;  %v4366_v22 = vld [vmem:[#allocation7 + $0xcd8] sm:$0xff] }
 0x450   :  { %v10625_v34 = vcombine.high %v4365_v48, %v4369_v6  ;;  %v10627_v61 = vcombine.high %v4366_v22, %v4370_v27  ;;  %v10626_v57 = vcombine.low %v4366_v22, %v4370_v27 }
 0x451   :  { %7506 = vmatpush1.bf16.msra.mxu0 %v10576_v35  ;;  %v4373_v35 = vld [vmem:[#allocation7 + $0xd10] sm:$0xff] }
 0x452   :  { %7670 = vmatpush1.bf16.msra.mxu1 %v10578_v63  ;;  %7507 = vmatprep.subr.bf16.mxu0 %v10585_v11  ;;  %v4377_v63 = vld [vmem:[#allocation7 + $0xd30] sm:$0xff]  ;;  %v4374_v11 = vld [vmem:[#allocation7 + $0xd18] sm:$0xff] }
 0x453   :  { %7671 = vmatprep.subr.bf16.mxu1 %v10587_v37  ;;  %v4378_v37 = vld [vmem:[#allocation7 + $0xd38] sm:$0xff]  ;;  %v10633_v38 = vcombine.high %v4373_v35, %v4377_v63 }
 0x454   :  { %v10635_v10 = vcombine.high %v4374_v11, %v4378_v37  ;;  %v10634_v52 = vcombine.low %v4374_v11, %v4378_v37  ;;  %v10650_v37 = vcombine.low %v4390_v62, %v4394_v0 }
 0x455   :  { %7508 = vmatpush1.bf16.msra.mxu0 %v10584_v39  ;;  %v4385_v39 = vld [vmem:[#allocation7 + $0xd70] sm:$0xff] }
 0x456   :  { %7672 = vmatpush1.bf16.msra.mxu1 %v10586_v40  ;;  %7509 = vmatprep.subr.bf16.mxu0 %v10593_v49  ;;  %v4382_v40 = vld [vmem:[#allocation7 + $0xd58] sm:$0xff]  ;;  %v10641_v28 = vcombine.high %v4381_v55, %v4385_v39  ;;  %v10640_v3 = vcombine.low %v4381_v55, %v4385_v39  ;;  %v4405_v55 = vld [vmem:[#allocation7 + $0xe10] sm:$0xff] }
 0x457   :  { %7673 = vmatprep.subr.bf16.mxu1 %v10595_v50  ;;  %v4386_v49 = vld [vmem:[#allocation7 + $0xd78] sm:$0xff]  ;;  %v10632_v50 = vcombine.low %v4373_v35, %v4377_v63  ;;  %v4409_v39 = vld [vmem:[#allocation7 + $0xe30] sm:$0xff] }
 0x458   :  { %v10643_v56 = vcombine.high %v4382_v40, %v4386_v49 }
 0x459   :  { %7510 = vmatpush1.bf16.msra.mxu0 %v10592_v58  ;;  %v4389_v58 = vld [vmem:[#allocation7 + $0xd90] sm:$0xff] }
 0x45a   :  { %7674 = vmatpush1.bf16.msra.mxu1 %v10594_v23  ;;  %7520 = vmatprep.subr.bf16.mxu0 %v10601_v60  ;;  %v4393_v23 = vld [vmem:[#allocation7 + $0xdb0] sm:$0xff]  ;;  %v4472_v60 = vrot.slane %v4467_v51, %v11935_v29 }
 0x45b   :  { %7684 = vmatprep.subr.bf16.mxu1 %v10603_v21  ;;  %v4480_v21 = vrot.slane %v4467_v51, %v11955_v13 }
 0x45c   :  { %7512 = vmatmul.mubr.bf16.vlgmr.msra.gmra.mrb[12].mxu0 %v11982_v15 }
 0x45d   :  { %7676 = vmatmul.mubr.bf16.vlgmr.msra.gmra.mrb[12].mxu1 %v11982_v15  ;;  %7521 = vmatpush1.bf16.msra.mxu0 %v10600_v1  ;;  %v10618_v15 = vcombine.low %v4358_v33, %v4362_v59  ;;  %v4476_v1 = vrot.slane %v4467_v51, %v11921_v41  ;;  %v4397_v33 = vld [vmem:[#allocation7 + $0xdd0] sm:$0xff] }
 0x45e   :  { %7552 = vmatprep.mubr.bf16.mxu0 %v11986_v30  ;;  %7685 = vmatpush1.bf16.msra.mxu1 %v10602_v5  ;;  %v10642_v5 = vcombine.low %v4382_v40, %v4386_v49  ;;  %v4401_v59 = vld [vmem:[#allocation7 + $0xdf0] sm:$0xff]  ;;  %v4406_v40 = vld [vmem:[#allocation7 + $0xe18] sm:$0xff] }
 0x45f   :  { %7716 = vmatprep.mubr.bf16.mxu1 %v11986_v30  ;;  %7522 = vmatprep.subr.bf16.mxu0 %v10609_v32  ;;  %v10624_v30 = vcombine.low %v4365_v48, %v4369_v6  ;;  %v10649_v32 = vcombine.high %v4389_v58, %v4393_v23  ;;  %v4398_v48 = vld [vmem:[#allocation7 + $0xdd8] sm:$0xff] }
 0x460   :  { %7686 = vmatprep.subr.bf16.mxu1 %v10611_v14  ;;  %v10651_v14 = vcombine.high %v4390_v62, %v4394_v0  ;;  %v4402_v6 = vld [vmem:[#allocation7 + $0xdf8] sm:$0xff]  ;;  %v4417_v62 = vld [vmem:[#allocation7 + $0xe70] sm:$0xff] }
 0x461   :  { %7523 = vmatpush1.bf16.msra.mxu0 %v10608_v17  ;;  %v4410_v49 = vld [vmem:[#allocation7 + $0xe38] sm:$0xff] }
 0x462   :  { %7687 = vmatpush1.bf16.msra.mxu1 %v10610_v18  ;;  %7524 = vmatprep.subr.bf16.mxu0 %v10617_v19  ;;  %v4414_v0 = vld [vmem:[#allocation7 + $0xe58] sm:$0xff] }
 0x463   :  { %7688 = vmatprep.subr.bf16.mxu1 %v10619_v20 }
 0x465   :  { %7525 = vmatpush1.bf16.msra.mxu0 %v10616_v31 }
 0x466   :  { %7689 = vmatpush1.bf16.msra.mxu1 %v10618_v15  ;;  %7526 = vmatprep.subr.bf16.mxu0 %v10625_v34  ;;  %v10648_v34 = vcombine.low %v4389_v58, %v4393_v23 }
 0x467   :  { %7690 = vmatprep.subr.bf16.mxu1 %v10627_v61 }
 0x469   :  { %7527 = vmatpush1.bf16.msra.mxu0 %v10624_v30  ;;  %v10657_v30 = vcombine.high %v4397_v33, %v4401_v59 }
 0x46a   :  { %7691 = vmatpush1.bf16.msra.mxu1 %v10626_v57  ;;  %7528 = vmatprep.subr.bf16.mxu0 %v10633_v38 }
 0x46b   :  { %7692 = vmatprep.subr.bf16.mxu1 %v10635_v10  ;;  %v10659_v10 = vcombine.high %v4398_v48, %v4402_v6 }
 0x46d   :  { %7529 = vmatpush1.bf16.msra.mxu0 %v10632_v50 }
 0x46e   :  { %7693 = vmatpush1.bf16.msra.mxu1 %v10634_v52  ;;  %7530 = vmatprep.subr.bf16.mxu0 %v10641_v28  ;;  %v10656_v52 = vcombine.low %v4397_v33, %v4401_v59  ;;  %v10658_v28 = vcombine.low %v4398_v48, %v4402_v6  ;;  %v4422_v33 = vld [vmem:[#allocation7 + $0xe98] sm:$0xff]  ;;  %v4429_v48 = vld [vmem:[#allocation7 + $0xed0] sm:$0xff] }
 0x46f   :  { %v7226_v7 = vpop.f32.mrb[8].mxu0  ;;  %v7390_v8 = vpop.f32.mrb[8].mxu1  ;;  %7694 = vmatprep.subr.bf16.mxu1 %v10643_v56  ;;  %v10665_v56 = vcombine.high %v4405_v55, %v4409_v39  ;;  %v4426_v59 = vld [vmem:[#allocation7 + $0xeb8] sm:$0xff]  ;;  %v4433_v6 = vld [vmem:[#allocation7 + $0xef0] sm:$0xff] }
 0x470   :  { %v10988_v17 = vadd.f32 %v7226_v7, %v4472_v60  ;;  %v10990_v18 = vadd.f32 %v7390_v8, %v4480_v21  ;;  %v7228_v19 = vpop.f32.mrb[9].mxu0  ;;  %v7392_v20 = vpop.f32.mrb[9].mxu1  ;;  %v10667_v60 = vcombine.high %v4406_v40, %v4410_v49  ;;  %v4413_v21 = vld [vmem:[#allocation7 + $0xe50] sm:$0xff] }
 0x471   :  { %v10989_v22 = vadd.f32 %v7228_v19, %v4476_v1  ;;  %v10991_v27 = vadd.f32 %v7392_v20, %v4484_v2  ;;  %v7230_v31 = vpop.f32.mrb[10].mxu0  ;;  %v7394_v15 = vpop.f32.mrb[10].mxu1  ;;  %7531 = vmatpush1.bf16.msra.mxu0 %v10640_v3  ;;  %v4418_v1 = vld [vmem:[#allocation7 + $0xe78] sm:$0xff]  ;;  %v10664_v3 = vcombine.low %v4405_v55, %v4409_v39  ;;  %v4421_v8 = vld [vmem:[#allocation7 + $0xe90] sm:$0xff]  ;;  %v10683_v20 = vcombine.high %v4422_v33, %v4426_v59 }
 0x472   :  { %v7725_v61 = vmax.f32 %v10988_v17, 0.0  ;;  %v7727_v35 = vmax.f32 %v10990_v18, 0.0  ;;  %7695 = vmatpush1.bf16.msra.mxu1 %v10642_v5  ;;  %v7231_v63 = vpop.f32.mrb[11].mxu0  ;;  %v7395_v11 = vpop.f32.mrb[11].mxu1  ;;  %7532 = vmatprep.subr.bf16.mxu0 %v10649_v32  ;;  %v10666_v5 = vcombine.low %v4406_v40, %v4410_v49  ;;  %v10673_v32 = vcombine.high %v4413_v21, %v4417_v62  ;;  %v4445_v55 = vld [vmem:[#allocation7 + $0xf50] sm:$0xff]  ;;  %v4446_v40 = vld [vmem:[#allocation7 + $0xf58] sm:$0xff] }
 0x473   :  { %v7726_v57 = vmax.f32 %v10989_v22, 0.0  ;;  %v7728_v38 = vmax.f32 %v10991_v27, 0.0  ;;  %7696 = vmatprep.subr.bf16.mxu1 %v10651_v14  ;;  %v10675_v7 = vcombine.high %v4414_v0, %v4418_v1  ;;  %v4425_v14 = vld [vmem:[#allocation7 + $0xeb0] sm:$0xff]  ;;  %v10672_v17 = vcombine.low %v4413_v21, %v4417_v62  ;;  %v4430_v22 = vld [vmem:[#allocation7 + $0xed8] sm:$0xff] }
 0x474   :  { %v10674_v18 = vcombine.low %v4414_v0, %v4418_v1  ;;  %v10681_v19 = vcombine.high %v4421_v8, %v4425_v14  ;;  %v4434_v27 = vld [vmem:[#allocation7 + $0xef8] sm:$0xff]  ;;  %v10680_v31 = vcombine.low %v4421_v8, %v4425_v14  ;;  %v10682_v15 = vcombine.low %v4422_v33, %v4426_v59  ;;  %v4441_v63 = vld [vmem:[#allocation7 + $0xf30] sm:$0xff] }
 0x475   :  { %v7741_v50 = vcombine.low %v7725_v61, %v7726_v57  ;;  %v7742_v51 = vcombine.low %v7727_v35, %v7728_v38  ;;  %7533 = vmatpush1.bf16.msra.mxu0 %v10648_v34  ;;  %v10689_v34 = vcombine.high %v4429_v48, %v4433_v6  ;;  %v10691_v61 = vcombine.high %v4430_v22, %v4434_v27  ;;  %v4437_v35 = vld [vmem:[#allocation7 + $0xf10] sm:$0xff]  ;;  %v4438_v11 = vld [vmem:[#allocation7 + $0xf18] sm:$0xff] }
 0x476   :  { %7697 = vmatpush1.bf16.msra.mxu1 %v10650_v37  ;;  %7534 = vmatprep.subr.bf16.mxu0 %v10657_v30  ;;  %v4442_v37 = vld [vmem:[#allocation7 + $0xf38] sm:$0xff]  ;;  %v10688_v30 = vcombine.low %v4429_v48, %v4433_v6  ;;  %v10690_v57 = vcombine.low %v4430_v22, %v4434_v27  ;;  %v10697_v38 = vcombine.high %v4437_v35, %v4441_v63  ;;  %v4449_v39 = vld [vmem:[#allocation7 + $0xf70] sm:$0xff] }
 0x477   :  { %v7749_v58 = vrot.slane %v7741_v50, %v11826_v53  ;;  %v7756_v23 = vrot.slane %v7742_v51, %v11826_v53  ;;  %7698 = vmatprep.subr.bf16.mxu1 %v10659_v10  ;;  %v10699_v10 = vcombine.high %v4438_v11, %v4442_v37  ;;  %v4450_v49 = vld [vmem:[#allocation7 + $0xf78] sm:$0xff]  ;;  %v10696_v50 = vcombine.low %v4437_v35, %v4441_v63  ;;  %v11137_v48 = vld [vmem:[#allocation10 + $0x8] ss:$16 sps:$4 sm:$0xff]   ;;  %v11145_v22 = vld [vmem:[#allocation10 + $0x2c] ss:$16 sps:$4 sm:$0xff]  }
 0x478   :  { %v10698_v51 = vcombine.low %v4438_v11, %v4442_v37  ;;  %v10704_v21 = vcombine.low %v4445_v55, %v4449_v39  ;;  %v10706_v62 = vcombine.low %v4446_v40, %v4450_v49  ;;  %v11142_v6 = vld [vmem:[#allocation10 + $0x24] ss:$16 sps:$4 sm:$0xff]   ;;  %v11140_v27 = vld [vmem:[#allocation10 + $0x20] ss:$16 sps:$4 sm:$0xff]   ;;  %v11149_v35 = vld [vmem:[#allocation10 + $0x48] ss:$16 sps:$4 sm:$0xff]  }
 0x479   :  { %v7757_v2 = vcombine.low %v7749_v58, %v7756_v23  ;;  %7535 = vmatpush1.bf16.msra.mxu0 %v10656_v52  ;;  %v10705_v52 = vcombine.high %v4445_v55, %v4449_v39  ;;  %v4457_v58 = vld [vmem:[#allocation7 + $0xfb0] sm:$0xff]  ;;  %v4454_v23 = vld [vmem:[#allocation7 + $0xf98] sm:$0xff] }
 0x47a   :  { %7699 = vmatpush1.bf16.msra.mxu1 %v10658_v28  ;;  %7536 = vmatprep.subr.bf16.mxu0 %v10665_v56  ;;  %v10707_v28 = vcombine.high %v4446_v40, %v4450_v49  ;;  %v4453_v56 = vld [vmem:[#allocation7 + $0xf90] sm:$0xff]  ;;  %v11154_v63 = vld [vmem:[#allocation10 + $0x64] ss:$16 sps:$4 sm:$0xff]   ;;  %v11152_v11 = vld [vmem:[#allocation10 + $0x60] ss:$16 sps:$4 sm:$0xff]  }
 0x47b   :  { %7777 = vst [vmem:[%s12071_s7] sm:$0xff] %v7757_v2  ;;  %7700 = vmatprep.subr.bf16.mxu1 %v10667_v60  ;;  %v4458_v60 = vld [vmem:[#allocation7 + $0xfb8] sm:$0xff]  ;;  %v10713_v0 = vcombine.high %v4453_v56, %v4457_v58  ;;  %v4461_v2 = vld [vmem:[#allocation7 + $0xfd0] sm:$0xff] }
 0x47c   :  { %v10715_v1 = vcombine.high %v4454_v23, %v4458_v60  ;;  %v10714_v8 = vcombine.low %v4454_v23, %v4458_v60  ;;  %v11155_v37 = vld [vmem:[#allocation10 + $0x68] ss:$16 sps:$4 sm:$0xff]   ;;  %v11169_v55 = vld [vmem:[#allocation10 + $0xac] ss:$16 sps:$4 sm:$0xff]   ;;  %v11164_v39 = vld [vmem:[#allocation10 + $0xa0] ss:$16 sps:$4 sm:$0xff]  }
 0x47d   :  { %7537 = vmatpush1.bf16.msra.mxu0 %v10664_v3  ;;  %v4465_v3 = vld [vmem:[#allocation7 + $0xff0] sm:$0xff]  ;;  %v11172_v49 = vld [vmem:[#allocation10 + $0xc4] ss:$16 sps:$4 sm:$0xff]  }
 0x47e   :  { %7701 = vmatpush1.bf16.msra.mxu1 %v10666_v5  ;;  %7538 = vmatprep.subr.bf16.mxu0 %v10673_v32  ;;  %v4462_v5 = vld [vmem:[#allocation7 + $0xfd8] sm:$0xff]  ;;  %v10721_v14 = vcombine.high %v4461_v2, %v4465_v3  ;;  %v10720_v59 = vcombine.low %v4461_v2, %v4465_v3  ;;  %v11167_v40 = vld [vmem:[#allocation10 + $0xa8] ss:$16 sps:$4 sm:$0xff]   ;;  %v11193_v2 = vld [vmem:[#allocation10 + $0x12c] ss:$16 sps:$4 sm:$0xff]  }
 0x47f   :  { %7702 = vmatprep.subr.bf16.mxu1 %v10675_v7  ;;  %v4466_v32 = vld [vmem:[#allocation7 + $0xff8] sm:$0xff]  ;;  %v10712_v7 = vcombine.low %v4453_v56, %v4457_v58  ;;  %v11181_v56 = vld [vmem:[#allocation10 + $0xec] ss:$16 sps:$4 sm:$0xff]   ;;  %v11179_v23 = vld [vmem:[#allocation10 + $0xe8] ss:$16 sps:$4 sm:$0xff]  }
 0x480   :  { %v10723_v33 = vcombine.high %v4462_v5, %v4466_v32  ;;  %v11176_v58 = vld [vmem:[#allocation10 + $0xe0] ss:$16 sps:$4 sm:$0xff]   ;;  %v11184_v60 = vld [vmem:[#allocation10 + $0x104] ss:$16 sps:$4 sm:$0xff]  }
 0x481   :  { %7539 = vmatpush1.bf16.msra.mxu0 %v10672_v17  ;;  %v10722_v17 = vcombine.low %v4462_v5, %v4466_v32  ;;  %v11188_v3 = vld [vmem:[#allocation10 + $0x120] ss:$16 sps:$4 sm:$0xff]   ;;  %v11191_v5 = vld [vmem:[#allocation10 + $0x128] ss:$16 sps:$4 sm:$0xff]   ;;  %v11196_v32 = vld [vmem:[#allocation10 + $0x144] ss:$16 sps:$4 sm:$0xff]  }
 0x482   :  { %7703 = vmatpush1.bf16.msra.mxu1 %v10674_v18  ;;  %7540 = vmatprep.subr.bf16.mxu0 %v10681_v19  ;;  %v11136_v18 = vld [vmem:[#allocation10 + $0x4] ss:$16 sps:$4 sm:$0xff]   ;;  %v11139_v19 = vld [vmem:[#allocation10 + $0xc] ss:$16 sps:$4 sm:$0xff]  }
 0x483   :  { %7704 = vmatprep.subr.bf16.mxu1 %v10683_v20  ;;  %v11134_v20 = vld [vmem:[#allocation10] ss:$16 sps:$4 sm:$0xff]  }
 0x485   :  { %7541 = vmatpush1.bf16.msra.mxu0 %v10680_v31  ;;  %v11143_v31 = vld [vmem:[#allocation10 + $0x28] ss:$16 sps:$4 sm:$0xff]  }
 0x486   :  { %7705 = vmatpush1.bf16.msra.mxu1 %v10682_v15  ;;  %7542 = vmatprep.subr.bf16.mxu0 %v10689_v34  ;;  %v11148_v15 = vld [vmem:[#allocation10 + $0x44] ss:$16 sps:$4 sm:$0xff]   ;;  %v11151_v34 = vld [vmem:[#allocation10 + $0x4c] ss:$16 sps:$4 sm:$0xff]  }
 0x487   :  { %7706 = vmatprep.subr.bf16.mxu1 %v10691_v61  ;;  %v11146_v61 = vld [vmem:[#allocation10 + $0x40] ss:$16 sps:$4 sm:$0xff]  }
 0x489   :  { %7543 = vmatpush1.bf16.msra.mxu0 %v10688_v30  ;;  %v11160_v30 = vld [vmem:[#allocation10 + $0x84] ss:$16 sps:$4 sm:$0xff]  }
 0x48a   :  { %7707 = vmatpush1.bf16.msra.mxu1 %v10690_v57  ;;  %7544 = vmatprep.subr.bf16.mxu0 %v10697_v38  ;;  %v11163_v57 = vld [vmem:[#allocation10 + $0x8c] ss:$16 sps:$4 sm:$0xff]   ;;  %v11158_v38 = vld [vmem:[#allocation10 + $0x80] ss:$16 sps:$4 sm:$0xff]  }
 0x48b   :  { %7708 = vmatprep.subr.bf16.mxu1 %v10699_v10  ;;  %v11166_v10 = vld [vmem:[#allocation10 + $0xa4] ss:$16 sps:$4 sm:$0xff]  }
 0x48d   :  { %7545 = vmatpush1.bf16.msra.mxu0 %v10696_v50  ;;  %v11175_v50 = vld [vmem:[#allocation10 + $0xcc] ss:$16 sps:$4 sm:$0xff]  }
 0x48e   :  { %7709 = vmatpush1.bf16.msra.mxu1 %v10698_v51  ;;  %7546 = vmatprep.subr.bf16.mxu0 %v10705_v52  ;;  %v11170_v51 = vld [vmem:[#allocation10 + $0xc0] ss:$16 sps:$4 sm:$0xff]   ;;  %v11173_v52 = vld [vmem:[#allocation10 + $0xc8] ss:$16 sps:$4 sm:$0xff]  }
 0x48f   :  { %7710 = vmatprep.subr.bf16.mxu1 %v10707_v28  ;;  %v11178_v28 = vld [vmem:[#allocation10 + $0xe4] ss:$16 sps:$4 sm:$0xff]  }
 0x491   :  { %7547 = vmatpush1.bf16.msra.mxu0 %v10704_v21  ;;  %v11187_v21 = vld [vmem:[#allocation10 + $0x10c] ss:$16 sps:$4 sm:$0xff]  }
 0x492   :  { %7711 = vmatpush1.bf16.msra.mxu1 %v10706_v62  ;;  %7548 = vmatprep.subr.bf16.mxu0 %v10713_v0  ;;  %v11182_v62 = vld [vmem:[#allocation10 + $0x100] ss:$16 sps:$4 sm:$0xff]   ;;  %v11185_v0 = vld [vmem:[#allocation10 + $0x108] ss:$16 sps:$4 sm:$0xff]  }
 0x493   :  { %7712 = vmatprep.subr.bf16.mxu1 %v10715_v1  ;;  %v11190_v1 = vld [vmem:[#allocation10 + $0x124] ss:$16 sps:$4 sm:$0xff]  }
 0x495   :  { %7549 = vmatpush1.bf16.msra.mxu0 %v10712_v7  ;;  %v11199_v7 = vld [vmem:[#allocation10 + $0x14c] ss:$16 sps:$4 sm:$0xff]  }
 0x496   :  { %7713 = vmatpush1.bf16.msra.mxu1 %v10714_v8  ;;  %7550 = vmatprep.subr.bf16.mxu0 %v10721_v14  ;;  %v11194_v8 = vld [vmem:[#allocation10 + $0x140] ss:$16 sps:$4 sm:$0xff]   ;;  %v11197_v14 = vld [vmem:[#allocation10 + $0x148] ss:$16 sps:$4 sm:$0xff]  }
 0x497   :  { %7714 = vmatprep.subr.bf16.mxu1 %v10723_v33  ;;  %v11202_v33 = vld [vmem:[#allocation10 + $0x164] ss:$16 sps:$4 sm:$0xff]  }
 0x499   :  { %7551 = vmatpush1.bf16.msra.mxu0 %v10720_v59  ;;  %v11205_v59 = vld [vmem:[#allocation10 + $0x16c] ss:$16 sps:$4 sm:$0xff]  }
 0x49a   :  { %7715 = vmatpush1.bf16.msra.mxu1 %v10722_v17  ;;  %9337 = vmatprep.subr.bf16.mxu0 %v11136_v18  ;;  %v11200_v17 = vld [vmem:[#allocation10 + $0x160] ss:$16 sps:$4 sm:$0xff]   ;;  %v11203_v18 = vld [vmem:[#allocation10 + $0x168] ss:$16 sps:$4 sm:$0xff]  }
 0x49b   :  { %9501 = vmatprep.subr.bf16.mxu1 %v11139_v19  ;;  %v11208_v19 = vld [vmem:[#allocation10 + $0x184] ss:$16 sps:$4 sm:$0xff]  }
 0x49c   :  { %7553 = vmatmul.mubr.bf16.vlgmr.msra.gmra.mrb[12].mxu0 %v11997_v42 }
 0x49d   :  { %7717 = vmatmul.mubr.bf16.vlgmr.msra.gmra.mrb[12].mxu1 %v11997_v42  ;;  %9338 = vmatpush1.bf16.msra.mxu0 %v11134_v20  ;;  %v11157_v42 = vld [vmem:[#allocation10 + $0x6c] ss:$16 sps:$4 sm:$0xff]  }
 0x49e   :  { %9502 = vmatpush1.bf16.msra.mxu1 %v11137_v48  ;;  %9339 = vmatprep.subr.bf16.mxu0 %v11142_v6  ;;  %v11211_v20 = vld [vmem:[#allocation10 + $0x18c] ss:$16 sps:$4 sm:$0xff]   ;;  %v11206_v48 = vld [vmem:[#allocation10 + $0x180] ss:$16 sps:$4 sm:$0xff]   ;;  %v11209_v6 = vld [vmem:[#allocation10 + $0x188] ss:$16 sps:$4 sm:$0xff]  }
 0x49f   :  { %9503 = vmatprep.subr.bf16.mxu1 %v11145_v22  ;;  %9369 = vmatprep.mubr.bf16.mxu0 %v11836_v9  ;;  %v11214_v22 = vld [vmem:[#allocation10 + $0x1a4] ss:$16 sps:$4 sm:$0xff]  }
 0x4a0   :  { %9533 = vmatprep.mubr.bf16.mxu1 %v11836_v9  ;;  %v11161_v9 = vld [vmem:[#allocation10 + $0x88] ss:$16 sps:$4 sm:$0xff]  }
 0x4a1   :  { %9340 = vmatpush1.bf16.msra.mxu0 %v11140_v27  ;;  %v11217_v27 = vld [vmem:[#allocation10 + $0x1ac] ss:$16 sps:$4 sm:$0xff]  }
 0x4a2   :  { %9504 = vmatpush1.bf16.msra.mxu1 %v11143_v31  ;;  %9341 = vmatprep.subr.bf16.mxu0 %v11148_v15  ;;  %v11212_v31 = vld [vmem:[#allocation10 + $0x1a0] ss:$16 sps:$4 sm:$0xff]   ;;  %v11215_v15 = vld [vmem:[#allocation10 + $0x1a8] ss:$16 sps:$4 sm:$0xff]  }
 0x4a3   :  { %9505 = vmatprep.subr.bf16.mxu1 %v11151_v34  ;;  %v11220_v34 = vld [vmem:[#allocation10 + $0x1c4] ss:$16 sps:$4 sm:$0xff]  }
 0x4a5   :  { %9342 = vmatpush1.bf16.msra.mxu0 %v11146_v61  ;;  %v11223_v61 = vld [vmem:[#allocation10 + $0x1cc] ss:$16 sps:$4 sm:$0xff]  }
 0x4a6   :  { %9506 = vmatpush1.bf16.msra.mxu1 %v11149_v35  ;;  %9343 = vmatprep.subr.bf16.mxu0 %v11154_v63  ;;  %v11218_v35 = vld [vmem:[#allocation10 + $0x1c0] ss:$16 sps:$4 sm:$0xff]   ;;  %v11221_v63 = vld [vmem:[#allocation10 + $0x1c8] ss:$16 sps:$4 sm:$0xff]  }
 0x4a7   :  { %9507 = vmatprep.subr.bf16.mxu1 %v11157_v42  ;;  %v11226_v42 = vld [vmem:[#allocation10 + $0x1e4] ss:$16 sps:$4 sm:$0xff]  }
 0x4a9   :  { %9344 = vmatpush1.bf16.msra.mxu0 %v11152_v11  ;;  %v11229_v11 = vld [vmem:[#allocation10 + $0x1ec] ss:$16 sps:$4 sm:$0xff]  }
 0x4aa   :  { %9508 = vmatpush1.bf16.msra.mxu1 %v11155_v37  ;;  %9345 = vmatprep.subr.bf16.mxu0 %v11160_v30  ;;  %v11224_v37 = vld [vmem:[#allocation10 + $0x1e0] ss:$16 sps:$4 sm:$0xff]   ;;  %v11227_v30 = vld [vmem:[#allocation10 + $0x1e8] ss:$16 sps:$4 sm:$0xff]  }
 0x4ab   :  { %9509 = vmatprep.subr.bf16.mxu1 %v11163_v57  ;;  %v11232_v57 = vld [vmem:[#allocation10 + $0x204] ss:$16 sps:$4 sm:$0xff]  }
 0x4ad   :  { %9346 = vmatpush1.bf16.msra.mxu0 %v11158_v38  ;;  %v11235_v38 = vld [vmem:[#allocation10 + $0x20c] ss:$16 sps:$4 sm:$0xff]  }
 0x4ae   :  { %9510 = vmatpush1.bf16.msra.mxu1 %v11161_v9  ;;  %9347 = vmatprep.subr.bf16.mxu0 %v11166_v10  ;;  %v11230_v9 = vld [vmem:[#allocation10 + $0x200] ss:$16 sps:$4 sm:$0xff]   ;;  %v11233_v10 = vld [vmem:[#allocation10 + $0x208] ss:$16 sps:$4 sm:$0xff]  }
 0x4af   :  { %9511 = vmatprep.subr.bf16.mxu1 %v11169_v55  ;;  %v11238_v55 = vld [vmem:[#allocation10 + $0x224] ss:$16 sps:$4 sm:$0xff]  }
 0x4b1   :  { %9348 = vmatpush1.bf16.msra.mxu0 %v11164_v39  ;;  %v11241_v39 = vld [vmem:[#allocation10 + $0x22c] ss:$16 sps:$4 sm:$0xff]  }
 0x4b2   :  { %9512 = vmatpush1.bf16.msra.mxu1 %v11167_v40  ;;  %9349 = vmatprep.subr.bf16.mxu0 %v11172_v49  ;;  %v11236_v40 = vld [vmem:[#allocation10 + $0x220] ss:$16 sps:$4 sm:$0xff]   ;;  %v11239_v49 = vld [vmem:[#allocation10 + $0x228] ss:$16 sps:$4 sm:$0xff]  }
 0x4b3   :  { %9513 = vmatprep.subr.bf16.mxu1 %v11175_v50  ;;  %v11244_v50 = vld [vmem:[#allocation10 + $0x244] ss:$16 sps:$4 sm:$0xff]  }
 0x4b5   :  { %9350 = vmatpush1.bf16.msra.mxu0 %v11170_v51  ;;  %v11247_v51 = vld [vmem:[#allocation10 + $0x24c] ss:$16 sps:$4 sm:$0xff]  }
 0x4b6   :  { %9514 = vmatpush1.bf16.msra.mxu1 %v11173_v52  ;;  %9351 = vmatprep.subr.bf16.mxu0 %v11178_v28  ;;  %v11242_v52 = vld [vmem:[#allocation10 + $0x240] ss:$16 sps:$4 sm:$0xff]   ;;  %v11245_v28 = vld [vmem:[#allocation10 + $0x248] ss:$16 sps:$4 sm:$0xff]  }
 0x4b7   :  { %9515 = vmatprep.subr.bf16.mxu1 %v11181_v56  ;;  %v11250_v56 = vld [vmem:[#allocation10 + $0x264] ss:$16 sps:$4 sm:$0xff]  }
 0x4b9   :  { %9352 = vmatpush1.bf16.msra.mxu0 %v11176_v58  ;;  %v11253_v58 = vld [vmem:[#allocation10 + $0x26c] ss:$16 sps:$4 sm:$0xff]  }
 0x4ba   :  { %9516 = vmatpush1.bf16.msra.mxu1 %v11179_v23  ;;  %9353 = vmatprep.subr.bf16.mxu0 %v11184_v60  ;;  %v11251_v23 = vld [vmem:[#allocation10 + $0x268] ss:$16 sps:$4 sm:$0xff]   ;;  %v11256_v60 = vld [vmem:[#allocation10 + $0x284] ss:$16 sps:$4 sm:$0xff]  }
 0x4bb   :  { %9517 = vmatprep.subr.bf16.mxu1 %v11187_v21  ;;  %v11259_v21 = vld [vmem:[#allocation10 + $0x28c] ss:$16 sps:$4 sm:$0xff]  }
 0x4bd   :  { %9354 = vmatpush1.bf16.msra.mxu0 %v11182_v62  ;;  %v11254_v62 = vld [vmem:[#allocation10 + $0x280] ss:$16 sps:$4 sm:$0xff]  }
 0x4be   :  { %9518 = vmatpush1.bf16.msra.mxu1 %v11185_v0  ;;  %9355 = vmatprep.subr.bf16.mxu0 %v11190_v1  ;;  %v11262_v0 = vld [vmem:[#allocation10 + $0x2a4] ss:$16 sps:$4 sm:$0xff]   ;;  %v11265_v1 = vld [vmem:[#allocation10 + $0x2ac] ss:$16 sps:$4 sm:$0xff]  }
 0x4bf   :  { %9519 = vmatprep.subr.bf16.mxu1 %v11193_v2  ;;  %v11260_v2 = vld [vmem:[#allocation10 + $0x2a0] ss:$16 sps:$4 sm:$0xff]  }
 0x4c1   :  { %9356 = vmatpush1.bf16.msra.mxu0 %v11188_v3  ;;  %v11263_v3 = vld [vmem:[#allocation10 + $0x2a8] ss:$16 sps:$4 sm:$0xff]  }
 0x4c2   :  { %9520 = vmatpush1.bf16.msra.mxu1 %v11191_v5  ;;  %9357 = vmatprep.subr.bf16.mxu0 %v11196_v32  ;;  %v11268_v5 = vld [vmem:[#allocation10 + $0x2c4] ss:$16 sps:$4 sm:$0xff]   ;;  %v11271_v32 = vld [vmem:[#allocation10 + $0x2cc] ss:$16 sps:$4 sm:$0xff]  }
 0x4c3   :  { %9521 = vmatprep.subr.bf16.mxu1 %v11199_v7  ;;  %v11266_v7 = vld [vmem:[#allocation10 + $0x2c0] ss:$16 sps:$4 sm:$0xff]  }
 0x4c5   :  { %9358 = vmatpush1.bf16.msra.mxu0 %v11194_v8  ;;  %v11269_v8 = vld [vmem:[#allocation10 + $0x2c8] ss:$16 sps:$4 sm:$0xff]  }
 0x4c6   :  { %9522 = vmatpush1.bf16.msra.mxu1 %v11197_v14  ;;  %9359 = vmatprep.subr.bf16.mxu0 %v11202_v33  ;;  %v11274_v14 = vld [vmem:[#allocation10 + $0x2e4] ss:$16 sps:$4 sm:$0xff]   ;;  %v11277_v33 = vld [vmem:[#allocation10 + $0x2ec] ss:$16 sps:$4 sm:$0xff]  }
 0x4c7   :  { %9523 = vmatprep.subr.bf16.mxu1 %v11205_v59  ;;  %v11272_v59 = vld [vmem:[#allocation10 + $0x2e0] ss:$16 sps:$4 sm:$0xff]  }
 0x4c9   :  { %9360 = vmatpush1.bf16.msra.mxu0 %v11200_v17  ;;  %v11275_v17 = vld [vmem:[#allocation10 + $0x2e8] ss:$16 sps:$4 sm:$0xff]  }
 0x4ca   :  { %9524 = vmatpush1.bf16.msra.mxu1 %v11203_v18  ;;  %9361 = vmatprep.subr.bf16.mxu0 %v11208_v19  ;;  %v11280_v18 = vld [vmem:[#allocation10 + $0x304] ss:$16 sps:$4 sm:$0xff]   ;;  %v11283_v19 = vld [vmem:[#allocation10 + $0x30c] ss:$16 sps:$4 sm:$0xff]  }
 0x4cb   :  { %9525 = vmatprep.subr.bf16.mxu1 %v11211_v20  ;;  %v11278_v20 = vld [vmem:[#allocation10 + $0x300] ss:$16 sps:$4 sm:$0xff]  }
 0x4cd   :  { %9362 = vmatpush1.bf16.msra.mxu0 %v11206_v48  ;;  %v11281_v48 = vld [vmem:[#allocation10 + $0x308] ss:$16 sps:$4 sm:$0xff]  }
 0x4ce   :  { %9526 = vmatpush1.bf16.msra.mxu1 %v11209_v6  ;;  %9363 = vmatprep.subr.bf16.mxu0 %v11214_v22  ;;  %v11286_v6 = vld [vmem:[#allocation10 + $0x324] ss:$16 sps:$4 sm:$0xff]   ;;  %v11289_v22 = vld [vmem:[#allocation10 + $0x32c] ss:$16 sps:$4 sm:$0xff]  }
 0x4cf   :  { %9527 = vmatprep.subr.bf16.mxu1 %v11217_v27  ;;  %v11284_v27 = vld [vmem:[#allocation10 + $0x320] ss:$16 sps:$4 sm:$0xff]  }
 0x4d1   :  { %9364 = vmatpush1.bf16.msra.mxu0 %v11212_v31  ;;  %v11287_v31 = vld [vmem:[#allocation10 + $0x328] ss:$16 sps:$4 sm:$0xff]  }
 0x4d2   :  { %9528 = vmatpush1.bf16.msra.mxu1 %v11215_v15  ;;  %9365 = vmatprep.subr.bf16.mxu0 %v11220_v34  ;;  %v11292_v15 = vld [vmem:[#allocation10 + $0x344] ss:$16 sps:$4 sm:$0xff]   ;;  %v11295_v34 = vld [vmem:[#allocation10 + $0x34c] ss:$16 sps:$4 sm:$0xff]  }
 0x4d3   :  { %9529 = vmatprep.subr.bf16.mxu1 %v11223_v61  ;;  %v11290_v61 = vld [vmem:[#allocation10 + $0x340] ss:$16 sps:$4 sm:$0xff]  }
 0x4d5   :  { %9366 = vmatpush1.bf16.msra.mxu0 %v11218_v35  ;;  %v11293_v35 = vld [vmem:[#allocation10 + $0x348] ss:$16 sps:$4 sm:$0xff]  }
 0x4d6   :  { %9530 = vmatpush1.bf16.msra.mxu1 %v11221_v63  ;;  %9367 = vmatprep.subr.bf16.mxu0 %v11226_v42  ;;  %v11298_v63 = vld [vmem:[#allocation10 + $0x364] ss:$16 sps:$4 sm:$0xff]   ;;  %v11301_v42 = vld [vmem:[#allocation10 + $0x36c] ss:$16 sps:$4 sm:$0xff]  }
 0x4d7   :  { %9531 = vmatprep.subr.bf16.mxu1 %v11229_v11  ;;  %v11296_v11 = vld [vmem:[#allocation10 + $0x360] ss:$16 sps:$4 sm:$0xff]  }
 0x4d9   :  { %9368 = vmatpush1.bf16.msra.mxu0 %v11224_v37  ;;  %v11299_v37 = vld [vmem:[#allocation10 + $0x368] ss:$16 sps:$4 sm:$0xff]  }
 0x4da   :  { %9532 = vmatpush1.bf16.msra.mxu1 %v11227_v30  ;;  %9378 = vmatprep.subr.bf16.mxu0 %v11232_v57  ;;  %v11304_v30 = vld [vmem:[#allocation10 + $0x384] ss:$16 sps:$4 sm:$0xff]   ;;  %v11307_v57 = vld [vmem:[#allocation10 + $0x38c] ss:$16 sps:$4 sm:$0xff]  }
 0x4db   :  { %9542 = vmatprep.subr.bf16.mxu1 %v11235_v38  ;;  %v11302_v38 = vld [vmem:[#allocation10 + $0x380] ss:$16 sps:$4 sm:$0xff]  }
 0x4dc   :  { %9370 = vmatmul.mubr.bf16.vlgmr.msra.gmra.mrb[16].mxu0 %v11849_v25 }
 0x4dd   :  { %9379 = vmatpush1.bf16.msra.mxu0 %v11230_v9  ;;  %9534 = vmatmul.mubr.bf16.vlgmr.msra.gmra.mrb[16].mxu1 %v11849_v25  ;;  %v11248_v25 = vld [vmem:[#allocation10 + $0x260] ss:$16 sps:$4 sm:$0xff]   ;;  %v11305_v9 = vld [vmem:[#allocation10 + $0x388] ss:$16 sps:$4 sm:$0xff]  }
 0x4de   :  { %9543 = vmatpush1.bf16.msra.mxu1 %v11233_v10  ;;  %9380 = vmatprep.subr.bf16.mxu0 %v11238_v55  ;;  %v11310_v10 = vld [vmem:[#allocation10 + $0x3a4] ss:$16 sps:$4 sm:$0xff]   ;;  %v11313_v55 = vld [vmem:[#allocation10 + $0x3ac] ss:$16 sps:$4 sm:$0xff]  }
 0x4df   :  { %9544 = vmatprep.subr.bf16.mxu1 %v11241_v39  ;;  %9410 = vmatprep.mubr.bf16.mxu0 %v11851_v36  ;;  %v11308_v39 = vld [vmem:[#allocation10 + $0x3a0] ss:$16 sps:$4 sm:$0xff]  }
 0x4e0   :  { %9574 = vmatprep.mubr.bf16.mxu1 %v11851_v36  ;;  %v11257_v36 = vld [vmem:[#allocation10 + $0x288] ss:$16 sps:$4 sm:$0xff]  }
 0x4e1   :  { %9381 = vmatpush1.bf16.msra.mxu0 %v11236_v40  ;;  %v11311_v40 = vld [vmem:[#allocation10 + $0x3a8] ss:$16 sps:$4 sm:$0xff]  }
 0x4e2   :  { %9545 = vmatpush1.bf16.msra.mxu1 %v11239_v49  ;;  %9382 = vmatprep.subr.bf16.mxu0 %v11244_v50  ;;  %v11316_v49 = vld [vmem:[#allocation10 + $0x3c4] ss:$16 sps:$4 sm:$0xff]   ;;  %v11319_v50 = vld [vmem:[#allocation10 + $0x3cc] ss:$16 sps:$4 sm:$0xff]  }
 0x4e3   :  { %9546 = vmatprep.subr.bf16.mxu1 %v11247_v51  ;;  %v11314_v51 = vld [vmem:[#allocation10 + $0x3c0] ss:$16 sps:$4 sm:$0xff]  }
 0x4e5   :  { %9383 = vmatpush1.bf16.msra.mxu0 %v11242_v52  ;;  %v11317_v52 = vld [vmem:[#allocation10 + $0x3c8] ss:$16 sps:$4 sm:$0xff]  }
 0x4e6   :  { %9547 = vmatpush1.bf16.msra.mxu1 %v11245_v28  ;;  %9384 = vmatprep.subr.bf16.mxu0 %v11250_v56  ;;  %v11322_v28 = vld [vmem:[#allocation10 + $0x3e4] ss:$16 sps:$4 sm:$0xff]   ;;  %v11325_v56 = vld [vmem:[#allocation10 + $0x3ec] ss:$16 sps:$4 sm:$0xff]  }
 0x4e7   :  { %9548 = vmatprep.subr.bf16.mxu1 %v11253_v58  ;;  %v11320_v58 = vld [vmem:[#allocation10 + $0x3e0] ss:$16 sps:$4 sm:$0xff]  }
 0x4e9   :  { %9385 = vmatpush1.bf16.msra.mxu0 %v11248_v25  ;;  %v11323_v25 = vld [vmem:[#allocation10 + $0x3e8] ss:$16 sps:$4 sm:$0xff]  }
 0x4ea   :  { %9549 = vmatpush1.bf16.msra.mxu1 %v11251_v23  ;;  %9386 = vmatprep.subr.bf16.mxu0 %v11256_v60  ;;  %v11328_v23 = vld [vmem:[#allocation10 + $0x404] ss:$16 sps:$4 sm:$0xff]   ;;  %v11331_v60 = vld [vmem:[#allocation10 + $0x40c] ss:$16 sps:$4 sm:$0xff]  }
 0x4eb   :  { %9550 = vmatprep.subr.bf16.mxu1 %v11259_v21  ;;  %v11326_v21 = vld [vmem:[#allocation10 + $0x400] ss:$16 sps:$4 sm:$0xff]  }
 0x4ed   :  { %9387 = vmatpush1.bf16.msra.mxu0 %v11254_v62  ;;  %v11329_v62 = vld [vmem:[#allocation10 + $0x408] ss:$16 sps:$4 sm:$0xff]  }
 0x4ee   :  { %9551 = vmatpush1.bf16.msra.mxu1 %v11257_v36  ;;  %9388 = vmatprep.subr.bf16.mxu0 %v11262_v0  ;;  %v11334_v36 = vld [vmem:[#allocation10 + $0x424] ss:$16 sps:$4 sm:$0xff]   ;;  %v11337_v0 = vld [vmem:[#allocation10 + $0x42c] ss:$16 sps:$4 sm:$0xff]  }
 0x4ef   :  { %9552 = vmatprep.subr.bf16.mxu1 %v11265_v1  ;;  %v11332_v1 = vld [vmem:[#allocation10 + $0x420] ss:$16 sps:$4 sm:$0xff]  }
 0x4f1   :  { %9389 = vmatpush1.bf16.msra.mxu0 %v11260_v2  ;;  %v11335_v2 = vld [vmem:[#allocation10 + $0x428] ss:$16 sps:$4 sm:$0xff]  }
 0x4f2   :  { %9553 = vmatpush1.bf16.msra.mxu1 %v11263_v3  ;;  %9390 = vmatprep.subr.bf16.mxu0 %v11268_v5  ;;  %v11340_v3 = vld [vmem:[#allocation10 + $0x444] ss:$16 sps:$4 sm:$0xff]   ;;  %v11343_v5 = vld [vmem:[#allocation10 + $0x44c] ss:$16 sps:$4 sm:$0xff]  }
 0x4f3   :  { %9554 = vmatprep.subr.bf16.mxu1 %v11271_v32  ;;  %v11338_v32 = vld [vmem:[#allocation10 + $0x440] ss:$16 sps:$4 sm:$0xff]  }
 0x4f5   :  { %9391 = vmatpush1.bf16.msra.mxu0 %v11266_v7  ;;  %v11341_v7 = vld [vmem:[#allocation10 + $0x448] ss:$16 sps:$4 sm:$0xff]  }
 0x4f6   :  { %9555 = vmatpush1.bf16.msra.mxu1 %v11269_v8  ;;  %9392 = vmatprep.subr.bf16.mxu0 %v11274_v14  ;;  %v11346_v8 = vld [vmem:[#allocation10 + $0x464] ss:$16 sps:$4 sm:$0xff]   ;;  %v11349_v14 = vld [vmem:[#allocation10 + $0x46c] ss:$16 sps:$4 sm:$0xff]  }
 0x4f7   :  { %9556 = vmatprep.subr.bf16.mxu1 %v11277_v33  ;;  %v11347_v33 = vld [vmem:[#allocation10 + $0x468] ss:$16 sps:$4 sm:$0xff]  }
 0x4f9   :  { %9393 = vmatpush1.bf16.msra.mxu0 %v11272_v59  ;;  %v11352_v59 = vld [vmem:[#allocation10 + $0x484] ss:$16 sps:$4 sm:$0xff]  }
 0x4fa   :  { %9557 = vmatpush1.bf16.msra.mxu1 %v11275_v17  ;;  %9394 = vmatprep.subr.bf16.mxu0 %v11280_v18  ;;  %v11355_v17 = vld [vmem:[#allocation10 + $0x48c] ss:$16 sps:$4 sm:$0xff]   ;;  %v11350_v18 = vld [vmem:[#allocation10 + $0x480] ss:$16 sps:$4 sm:$0xff]  }
 0x4fb   :  { %9558 = vmatprep.subr.bf16.mxu1 %v11283_v19  ;;  %v11358_v19 = vld [vmem:[#allocation10 + $0x4a4] ss:$16 sps:$4 sm:$0xff]  }
 0x4fd   :  { %9395 = vmatpush1.bf16.msra.mxu0 %v11278_v20  ;;  %v11361_v20 = vld [vmem:[#allocation10 + $0x4ac] ss:$16 sps:$4 sm:$0xff]  }
 0x4fe   :  { %9559 = vmatpush1.bf16.msra.mxu1 %v11281_v48  ;;  %9396 = vmatprep.subr.bf16.mxu0 %v11286_v6  ;;  %v11356_v48 = vld [vmem:[#allocation10 + $0x4a0] ss:$16 sps:$4 sm:$0xff]   ;;  %v11359_v6 = vld [vmem:[#allocation10 + $0x4a8] ss:$16 sps:$4 sm:$0xff]  }
 0x4ff   :  { %9560 = vmatprep.subr.bf16.mxu1 %v11289_v22  ;;  %v11364_v22 = vld [vmem:[#allocation10 + $0x4c4] ss:$16 sps:$4 sm:$0xff]  }
 0x501   :  { %9397 = vmatpush1.bf16.msra.mxu0 %v11284_v27  ;;  %v11367_v27 = vld [vmem:[#allocation10 + $0x4cc] ss:$16 sps:$4 sm:$0xff]  }
 0x502   :  { %9561 = vmatpush1.bf16.msra.mxu1 %v11287_v31  ;;  %9398 = vmatprep.subr.bf16.mxu0 %v11292_v15  ;;  %v11362_v31 = vld [vmem:[#allocation10 + $0x4c0] ss:$16 sps:$4 sm:$0xff]   ;;  %v11365_v15 = vld [vmem:[#allocation10 + $0x4c8] ss:$16 sps:$4 sm:$0xff]  }
 0x503   :  { %9562 = vmatprep.subr.bf16.mxu1 %v11295_v34  ;;  %v11370_v34 = vld [vmem:[#allocation10 + $0x4e4] ss:$16 sps:$4 sm:$0xff]  }
 0x505   :  { %9399 = vmatpush1.bf16.msra.mxu0 %v11290_v61  ;;  %v11373_v61 = vld [vmem:[#allocation10 + $0x4ec] ss:$16 sps:$4 sm:$0xff]  }
 0x506   :  { %9563 = vmatpush1.bf16.msra.mxu1 %v11293_v35  ;;  %9400 = vmatprep.subr.bf16.mxu0 %v11298_v63  ;;  %v11368_v35 = vld [vmem:[#allocation10 + $0x4e0] ss:$16 sps:$4 sm:$0xff]   ;;  %v11371_v63 = vld [vmem:[#allocation10 + $0x4e8] ss:$16 sps:$4 sm:$0xff]  }
 0x507   :  { %9564 = vmatprep.subr.bf16.mxu1 %v11301_v42  ;;  %v11376_v42 = vld [vmem:[#allocation10 + $0x504] ss:$16 sps:$4 sm:$0xff]  }
 0x509   :  { %9401 = vmatpush1.bf16.msra.mxu0 %v11296_v11  ;;  %v11379_v11 = vld [vmem:[#allocation10 + $0x50c] ss:$16 sps:$4 sm:$0xff]  }
 0x50a   :  { %9565 = vmatpush1.bf16.msra.mxu1 %v11299_v37  ;;  %9402 = vmatprep.subr.bf16.mxu0 %v11304_v30  ;;  %v11374_v37 = vld [vmem:[#allocation10 + $0x500] ss:$16 sps:$4 sm:$0xff]   ;;  %v11377_v30 = vld [vmem:[#allocation10 + $0x508] ss:$16 sps:$4 sm:$0xff]  }
 0x50b   :  { %9566 = vmatprep.subr.bf16.mxu1 %v11307_v57  ;;  %v11382_v57 = vld [vmem:[#allocation10 + $0x524] ss:$16 sps:$4 sm:$0xff]  }
 0x50d   :  { %9403 = vmatpush1.bf16.msra.mxu0 %v11302_v38  ;;  %v11385_v38 = vld [vmem:[#allocation10 + $0x52c] ss:$16 sps:$4 sm:$0xff]  }
 0x50e   :  { %9567 = vmatpush1.bf16.msra.mxu1 %v11305_v9  ;;  %9404 = vmatprep.subr.bf16.mxu0 %v11310_v10  ;;  %v11380_v9 = vld [vmem:[#allocation10 + $0x520] ss:$16 sps:$4 sm:$0xff]   ;;  %v11383_v10 = vld [vmem:[#allocation10 + $0x528] ss:$16 sps:$4 sm:$0xff]  }
 0x50f   :  { %9568 = vmatprep.subr.bf16.mxu1 %v11313_v55  ;;  %v11388_v55 = vld [vmem:[#allocation10 + $0x544] ss:$16 sps:$4 sm:$0xff]  }
 0x511   :  { %9405 = vmatpush1.bf16.msra.mxu0 %v11308_v39  ;;  %v11391_v39 = vld [vmem:[#allocation10 + $0x54c] ss:$16 sps:$4 sm:$0xff]  }
 0x512   :  { %9569 = vmatpush1.bf16.msra.mxu1 %v11311_v40  ;;  %9406 = vmatprep.subr.bf16.mxu0 %v11316_v49  ;;  %v11386_v40 = vld [vmem:[#allocation10 + $0x540] ss:$16 sps:$4 sm:$0xff]   ;;  %v11389_v49 = vld [vmem:[#allocation10 + $0x548] ss:$16 sps:$4 sm:$0xff]  }
 0x513   :  { %9570 = vmatprep.subr.bf16.mxu1 %v11319_v50  ;;  %v11394_v50 = vld [vmem:[#allocation10 + $0x564] ss:$16 sps:$4 sm:$0xff]  }
 0x515   :  { %9407 = vmatpush1.bf16.msra.mxu0 %v11314_v51  ;;  %v11397_v51 = vld [vmem:[#allocation10 + $0x56c] ss:$16 sps:$4 sm:$0xff]  }
 0x516   :  { %9571 = vmatpush1.bf16.msra.mxu1 %v11317_v52  ;;  %9408 = vmatprep.subr.bf16.mxu0 %v11322_v28  ;;  %v11392_v52 = vld [vmem:[#allocation10 + $0x560] ss:$16 sps:$4 sm:$0xff]   ;;  %v11395_v28 = vld [vmem:[#allocation10 + $0x568] ss:$16 sps:$4 sm:$0xff]  }
 0x517   :  { %9572 = vmatprep.subr.bf16.mxu1 %v11325_v56  ;;  %v11400_v56 = vld [vmem:[#allocation10 + $0x584] ss:$16 sps:$4 sm:$0xff]  }
 0x519   :  { %9409 = vmatpush1.bf16.msra.mxu0 %v11320_v58  ;;  %v11403_v58 = vld [vmem:[#allocation10 + $0x58c] ss:$16 sps:$4 sm:$0xff]  }
 0x51a   :  { %9573 = vmatpush1.bf16.msra.mxu1 %v11323_v25  ;;  %9419 = vmatprep.subr.bf16.mxu0 %v11328_v23  ;;  %v11398_v25 = vld [vmem:[#allocation10 + $0x580] ss:$16 sps:$4 sm:$0xff]   ;;  %v11401_v23 = vld [vmem:[#allocation10 + $0x588] ss:$16 sps:$4 sm:$0xff]  }
 0x51b   :  { %9583 = vmatprep.subr.bf16.mxu1 %v11331_v60  ;;  %v11406_v60 = vld [vmem:[#allocation10 + $0x5a4] ss:$16 sps:$4 sm:$0xff]  }
 0x51c   :  { %9411 = vmatmul.mubr.bf16.vlgmr.msra.gmra.mrb[16].mxu0 %v11867_v43 }
 0x51d   :  { %9420 = vmatpush1.bf16.msra.mxu0 %v11326_v21  ;;  %9575 = vmatmul.mubr.bf16.vlgmr.msra.gmra.mrb[16].mxu1 %v11867_v43  ;;  %v11344_v43 = vld [vmem:[#allocation10 + $0x460] ss:$16 sps:$4 sm:$0xff]   ;;  %v11409_v21 = vld [vmem:[#allocation10 + $0x5ac] ss:$16 sps:$4 sm:$0xff]  }
 0x51e   :  { %9584 = vmatpush1.bf16.msra.mxu1 %v11329_v62  ;;  %9421 = vmatprep.subr.bf16.mxu0 %v11334_v36  ;;  %v11404_v62 = vld [vmem:[#allocation10 + $0x5a0] ss:$16 sps:$4 sm:$0xff]   ;;  %v11407_v36 = vld [vmem:[#allocation10 + $0x5a8] ss:$16 sps:$4 sm:$0xff]  }
 0x51f   :  { %9585 = vmatprep.subr.bf16.mxu1 %v11337_v0  ;;  %9451 = vmatprep.mubr.bf16.mxu0 %v11869_v54  ;;  %v11412_v0 = vld [vmem:[#allocation10 + $0x5c4] ss:$16 sps:$4 sm:$0xff]  }
 0x520   :  { %9615 = vmatprep.mubr.bf16.mxu1 %v11869_v54  ;;  %v11353_v54 = vld [vmem:[#allocation10 + $0x488] ss:$16 sps:$4 sm:$0xff]  }
 0x521   :  { %9422 = vmatpush1.bf16.msra.mxu0 %v11332_v1  ;;  %v11415_v1 = vld [vmem:[#allocation10 + $0x5cc] ss:$16 sps:$4 sm:$0xff]  }
 0x522   :  { %9586 = vmatpush1.bf16.msra.mxu1 %v11335_v2  ;;  %9423 = vmatprep.subr.bf16.mxu0 %v11340_v3  ;;  %v11410_v2 = vld [vmem:[#allocation10 + $0x5c0] ss:$16 sps:$4 sm:$0xff]   ;;  %v11413_v3 = vld [vmem:[#allocation10 + $0x5c8] ss:$16 sps:$4 sm:$0xff]  }
 0x523   :  { %9587 = vmatprep.subr.bf16.mxu1 %v11343_v5  ;;  %v11418_v5 = vld [vmem:[#allocation10 + $0x5e4] ss:$16 sps:$4 sm:$0xff]  }
 0x525   :  { %9424 = vmatpush1.bf16.msra.mxu0 %v11338_v32  ;;  %v11421_v32 = vld [vmem:[#allocation10 + $0x5ec] ss:$16 sps:$4 sm:$0xff]  }
 0x526   :  { %9588 = vmatpush1.bf16.msra.mxu1 %v11341_v7  ;;  %9425 = vmatprep.subr.bf16.mxu0 %v11346_v8  ;;  %v11416_v7 = vld [vmem:[#allocation10 + $0x5e0] ss:$16 sps:$4 sm:$0xff]   ;;  %v11419_v8 = vld [vmem:[#allocation10 + $0x5e8] ss:$16 sps:$4 sm:$0xff]  }
 0x527   :  { %9589 = vmatprep.subr.bf16.mxu1 %v11349_v14  ;;  %v11424_v14 = vld [vmem:[#allocation10 + $0x604] ss:$16 sps:$4 sm:$0xff]  }
 0x529   :  { %9426 = vmatpush1.bf16.msra.mxu0 %v11344_v43  ;;  %v11427_v43 = vld [vmem:[#allocation10 + $0x60c] ss:$16 sps:$4 sm:$0xff]  }
 0x52a   :  { %9590 = vmatpush1.bf16.msra.mxu1 %v11347_v33  ;;  %9427 = vmatprep.subr.bf16.mxu0 %v11352_v59  ;;  %v11422_v33 = vld [vmem:[#allocation10 + $0x600] ss:$16 sps:$4 sm:$0xff]   ;;  %v11425_v59 = vld [vmem:[#allocation10 + $0x608] ss:$16 sps:$4 sm:$0xff]  }
 0x52b   :  { %9591 = vmatprep.subr.bf16.mxu1 %v11355_v17  ;;  %v11430_v17 = vld [vmem:[#allocation10 + $0x624] ss:$16 sps:$4 sm:$0xff]  }
 0x52d   :  { %9428 = vmatpush1.bf16.msra.mxu0 %v11350_v18  ;;  %v11433_v18 = vld [vmem:[#allocation10 + $0x62c] ss:$16 sps:$4 sm:$0xff]  }
 0x52e   :  { %9592 = vmatpush1.bf16.msra.mxu1 %v11353_v54  ;;  %9429 = vmatprep.subr.bf16.mxu0 %v11358_v19  ;;  %v11428_v54 = vld [vmem:[#allocation10 + $0x620] ss:$16 sps:$4 sm:$0xff]   ;;  %v11431_v19 = vld [vmem:[#allocation10 + $0x628] ss:$16 sps:$4 sm:$0xff]  }
 0x52f   :  { %9593 = vmatprep.subr.bf16.mxu1 %v11361_v20  ;;  %v11436_v20 = vld [vmem:[#allocation10 + $0x644] ss:$16 sps:$4 sm:$0xff]  }
 0x531   :  { %9430 = vmatpush1.bf16.msra.mxu0 %v11356_v48  ;;  %v11439_v48 = vld [vmem:[#allocation10 + $0x64c] ss:$16 sps:$4 sm:$0xff]  }
 0x532   :  { %9594 = vmatpush1.bf16.msra.mxu1 %v11359_v6  ;;  %9431 = vmatprep.subr.bf16.mxu0 %v11364_v22  ;;  %v11434_v6 = vld [vmem:[#allocation10 + $0x640] ss:$16 sps:$4 sm:$0xff]   ;;  %v11437_v22 = vld [vmem:[#allocation10 + $0x648] ss:$16 sps:$4 sm:$0xff]  }
 0x533   :  { %9595 = vmatprep.subr.bf16.mxu1 %v11367_v27  ;;  %v11442_v27 = vld [vmem:[#allocation10 + $0x664] ss:$16 sps:$4 sm:$0xff]  }
 0x535   :  { %9432 = vmatpush1.bf16.msra.mxu0 %v11362_v31  ;;  %v11445_v31 = vld [vmem:[#allocation10 + $0x66c] ss:$16 sps:$4 sm:$0xff]  }
 0x536   :  { %9596 = vmatpush1.bf16.msra.mxu1 %v11365_v15  ;;  %9433 = vmatprep.subr.bf16.mxu0 %v11370_v34  ;;  %v11443_v15 = vld [vmem:[#allocation10 + $0x668] ss:$16 sps:$4 sm:$0xff]   ;;  %v11448_v34 = vld [vmem:[#allocation10 + $0x684] ss:$16 sps:$4 sm:$0xff]  }
 0x537   :  { %9597 = vmatprep.subr.bf16.mxu1 %v11373_v61  ;;  %v11451_v61 = vld [vmem:[#allocation10 + $0x68c] ss:$16 sps:$4 sm:$0xff]  }
 0x539   :  { %9434 = vmatpush1.bf16.msra.mxu0 %v11368_v35  ;;  %v11446_v35 = vld [vmem:[#allocation10 + $0x680] ss:$16 sps:$4 sm:$0xff]  }
 0x53a   :  { %9598 = vmatpush1.bf16.msra.mxu1 %v11371_v63  ;;  %9435 = vmatprep.subr.bf16.mxu0 %v11376_v42  ;;  %v11454_v63 = vld [vmem:[#allocation10 + $0x6a4] ss:$16 sps:$4 sm:$0xff]   ;;  %v11457_v42 = vld [vmem:[#allocation10 + $0x6ac] ss:$16 sps:$4 sm:$0xff]  }
 0x53b   :  { %9599 = vmatprep.subr.bf16.mxu1 %v11379_v11  ;;  %v11519_v11 = vld [vmem:[#allocation9] sm:$0xff] }
 0x53d   :  { %9436 = vmatpush1.bf16.msra.mxu0 %v11374_v37  ;;  %v4488_v37 = vrot.slane %v11519_v11, %v701_v46 }
 0x53e   :  { %9600 = vmatpush1.bf16.msra.mxu1 %v11377_v30  ;;  %9437 = vmatprep.subr.bf16.mxu0 %v11382_v57  ;;  %v4496_v30 = vrot.slane %v11519_v11, %v709_v16  ;;  %v4492_v57 = vrot.slane %v11519_v11, %v705_v45  ;;  %v11458_v45 = vld [vmem:[#allocation10 + $0x6c0] ss:$16 sps:$4 sm:$0xff]  }
 0x53f   :  { %9601 = vmatprep.subr.bf16.mxu1 %v11385_v38  ;;  %v11452_v38 = vld [vmem:[#allocation10 + $0x6a0] ss:$16 sps:$4 sm:$0xff]  }
 0x541   :  { %9438 = vmatpush1.bf16.msra.mxu0 %v11380_v9  ;;  %v4500_v9 = vrot.slane %v11519_v11, %v713_v47  ;;  %v11500_v11 = vld [vmem:[#allocation10 + $0x7a0] ss:$16 sps:$4 sm:$0xff]  }
 0x542   :  { %9602 = vmatpush1.bf16.msra.mxu1 %v11383_v10  ;;  %9439 = vmatprep.subr.bf16.mxu0 %v11388_v55  ;;  %v11455_v10 = vld [vmem:[#allocation10 + $0x6a8] ss:$16 sps:$4 sm:$0xff]   ;;  %v11460_v55 = vld [vmem:[#allocation10 + $0x6c4] ss:$16 sps:$4 sm:$0xff]  }
 0x543   :  { %9603 = vmatprep.subr.bf16.mxu1 %v11391_v39 }
 0x545   :  { %9440 = vmatpush1.bf16.msra.mxu0 %v11386_v40  ;;  %v11463_v40 = vld [vmem:[#allocation10 + $0x6cc] ss:$16 sps:$4 sm:$0xff]  }
 0x546   :  { %9604 = vmatpush1.bf16.msra.mxu1 %v11389_v49  ;;  %9441 = vmatprep.subr.bf16.mxu0 %v11394_v50 }
 0x547   :  { %9605 = vmatprep.subr.bf16.mxu1 %v11397_v51 }
 0x549   :  { %9442 = vmatpush1.bf16.msra.mxu0 %v11392_v52 }
 0x54a   :  { %9606 = vmatpush1.bf16.msra.mxu1 %v11395_v28  ;;  %9443 = vmatprep.subr.bf16.mxu0 %v11400_v56  ;;  %v11461_v56 = vld [vmem:[#allocation10 + $0x6c8] ss:$16 sps:$4 sm:$0xff]  }
 0x54b   :  { %9607 = vmatprep.subr.bf16.mxu1 %v11403_v58 }
 0x54d   :  { %9444 = vmatpush1.bf16.msra.mxu0 %v11398_v25 }
 0x54e   :  { %9608 = vmatpush1.bf16.msra.mxu1 %v11401_v23  ;;  %9445 = vmatprep.subr.bf16.mxu0 %v11406_v60  ;;  %v11466_v23 = vld [vmem:[#allocation10 + $0x6e4] ss:$16 sps:$4 sm:$0xff]  }
 0x54f   :  { %9609 = vmatprep.subr.bf16.mxu1 %v11409_v21 }
 0x551   :  { %9446 = vmatpush1.bf16.msra.mxu0 %v11404_v62 }
 0x552   :  { %9610 = vmatpush1.bf16.msra.mxu1 %v11407_v36  ;;  %9447 = vmatprep.subr.bf16.mxu0 %v11412_v0  ;;  %v11469_v36 = vld [vmem:[#allocation10 + $0x6ec] ss:$16 sps:$4 sm:$0xff]  }
 0x553   :  { %9611 = vmatprep.subr.bf16.mxu1 %v11415_v1 }
 0x555   :  { %9448 = vmatpush1.bf16.msra.mxu0 %v11410_v2  ;;  %v11464_v2 = vld [vmem:[#allocation10 + $0x6e0] ss:$16 sps:$4 sm:$0xff]  }
 0x556   :  { %9612 = vmatpush1.bf16.msra.mxu1 %v11413_v3  ;;  %9449 = vmatprep.subr.bf16.mxu0 %v11418_v5  ;;  %v11467_v5 = vld [vmem:[#allocation10 + $0x6e8] ss:$16 sps:$4 sm:$0xff]  }
 0x557   :  { %9613 = vmatprep.subr.bf16.mxu1 %v11421_v32  ;;  %v11472_v32 = vld [vmem:[#allocation10 + $0x704] ss:$16 sps:$4 sm:$0xff]  }
 0x559   :  { %9450 = vmatpush1.bf16.msra.mxu0 %v11416_v7 }
 0x55a   :  { %9614 = vmatpush1.bf16.msra.mxu1 %v11419_v8  ;;  %9460 = vmatprep.subr.bf16.mxu0 %v11424_v14  ;;  %v11475_v8 = vld [vmem:[#allocation10 + $0x70c] ss:$16 sps:$4 sm:$0xff]  }
 0x55b   :  { %9624 = vmatprep.subr.bf16.mxu1 %v11427_v43  ;;  %v11470_v43 = vld [vmem:[#allocation10 + $0x700] ss:$16 sps:$4 sm:$0xff]  }
 0x55c   :  { %9452 = vmatmul.mubr.bf16.vlgmr.msra.gmra.mrb[16].mxu0 %v11884_v4 }
 0x55d   :  { %9461 = vmatpush1.bf16.msra.mxu0 %v11422_v33  ;;  %9616 = vmatmul.mubr.bf16.vlgmr.msra.gmra.mrb[16].mxu1 %v11884_v4  ;;  %v11440_v4 = vld [vmem:[#allocation10 + $0x660] ss:$16 sps:$4 sm:$0xff]  }
 0x55e   :  { %9625 = vmatpush1.bf16.msra.mxu1 %v11425_v59  ;;  %9462 = vmatprep.subr.bf16.mxu0 %v11430_v17  ;;  %v11473_v59 = vld [vmem:[#allocation10 + $0x708] ss:$16 sps:$4 sm:$0xff]   ;;  %v11478_v17 = vld [vmem:[#allocation10 + $0x724] ss:$16 sps:$4 sm:$0xff]  }
 0x55f   :  { %9626 = vmatprep.subr.bf16.mxu1 %v11433_v18  ;;  %9492 = vmatprep.mubr.bf16.mxu0 %v11886_v12  ;;  %v11481_v18 = vld [vmem:[#allocation10 + $0x72c] ss:$16 sps:$4 sm:$0xff]  }
 0x560   :  { %9656 = vmatprep.mubr.bf16.mxu1 %v11886_v12  ;;  %v11449_v12 = vld [vmem:[#allocation10 + $0x688] ss:$16 sps:$4 sm:$0xff]  }
 0x561   :  { %9463 = vmatpush1.bf16.msra.mxu0 %v11428_v54  ;;  %v11476_v54 = vld [vmem:[#allocation10 + $0x720] ss:$16 sps:$4 sm:$0xff]  }
 0x562   :  { %9627 = vmatpush1.bf16.msra.mxu1 %v11431_v19  ;;  %9464 = vmatprep.subr.bf16.mxu0 %v11436_v20  ;;  %v11479_v19 = vld [vmem:[#allocation10 + $0x728] ss:$16 sps:$4 sm:$0xff]   ;;  %v11484_v20 = vld [vmem:[#allocation10 + $0x744] ss:$16 sps:$4 sm:$0xff]  }
 0x563   :  { %9628 = vmatprep.subr.bf16.mxu1 %v11439_v48  ;;  %v11487_v48 = vld [vmem:[#allocation10 + $0x74c] ss:$16 sps:$4 sm:$0xff]  }
 0x565   :  { %9465 = vmatpush1.bf16.msra.mxu0 %v11434_v6  ;;  %v11482_v6 = vld [vmem:[#allocation10 + $0x740] ss:$16 sps:$4 sm:$0xff]  }
 0x566   :  { %9629 = vmatpush1.bf16.msra.mxu1 %v11437_v22  ;;  %9466 = vmatprep.subr.bf16.mxu0 %v11442_v27  ;;  %v11485_v22 = vld [vmem:[#allocation10 + $0x748] ss:$16 sps:$4 sm:$0xff]   ;;  %v11490_v27 = vld [vmem:[#allocation10 + $0x764] ss:$16 sps:$4 sm:$0xff]  }
 0x567   :  { %9630 = vmatprep.subr.bf16.mxu1 %v11445_v31  ;;  %v11493_v31 = vld [vmem:[#allocation10 + $0x76c] ss:$16 sps:$4 sm:$0xff]  }
 0x569   :  { %9467 = vmatpush1.bf16.msra.mxu0 %v11440_v4  ;;  %v11488_v4 = vld [vmem:[#allocation10 + $0x760] ss:$16 sps:$4 sm:$0xff]  }
 0x56a   :  { %9631 = vmatpush1.bf16.msra.mxu1 %v11443_v15  ;;  %9468 = vmatprep.subr.bf16.mxu0 %v11448_v34  ;;  %v11491_v15 = vld [vmem:[#allocation10 + $0x768] ss:$16 sps:$4 sm:$0xff]   ;;  %v11496_v34 = vld [vmem:[#allocation10 + $0x784] ss:$16 sps:$4 sm:$0xff]  }
 0x56b   :  { %9632 = vmatprep.subr.bf16.mxu1 %v11451_v61  ;;  %v11499_v61 = vld [vmem:[#allocation10 + $0x78c] ss:$16 sps:$4 sm:$0xff]  }
 0x56d   :  { %9469 = vmatpush1.bf16.msra.mxu0 %v11446_v35  ;;  %v11494_v35 = vld [vmem:[#allocation10 + $0x780] ss:$16 sps:$4 sm:$0xff]  }
 0x56e   :  { %9633 = vmatpush1.bf16.msra.mxu1 %v11449_v12  ;;  %9470 = vmatprep.subr.bf16.mxu0 %v11454_v63  ;;  %v11497_v12 = vld [vmem:[#allocation10 + $0x788] ss:$16 sps:$4 sm:$0xff]   ;;  %v11502_v63 = vld [vmem:[#allocation10 + $0x7a4] ss:$16 sps:$4 sm:$0xff]  }
 0x56f   :  { %v7554_v39 = vpop.f32.mrb[12].mxu0  ;;  %9634 = vmatprep.subr.bf16.mxu1 %v11457_v42  ;;  %v11505_v42 = vld [vmem:[#allocation10 + $0x7ac] ss:$16 sps:$4 sm:$0xff]  }
 0x570   :  { %v10992_v49 = vadd.f32 %v7554_v39, %v4488_v37  ;;  %v7718_v46 = vpop.f32.mrb[12].mxu1  ;;  %v7556_v50 = vpop.f32.mrb[13].mxu0  ;;  %v11503_v37 = vld [vmem:[#allocation10 + $0x7a8] ss:$16 sps:$4 sm:$0xff]   ;;  %v11512_v39 = vld [vmem:[#allocation10 + $0x7e0] ss:$16 sps:$4 sm:$0xff]  }
 0x571   :  { %v10994_v51 = vadd.f32 %v7718_v46, %v4496_v30  ;;  %v10993_v52 = vadd.f32 %v7556_v50, %v4492_v57  ;;  %v7720_v16 = vpop.f32.mrb[13].mxu1  ;;  %v7558_v28 = vpop.f32.mrb[14].mxu0  ;;  %9471 = vmatpush1.bf16.msra.mxu0 %v11452_v38  ;;  %v11508_v30 = vld [vmem:[#allocation10 + $0x7c4] ss:$16 sps:$4 sm:$0xff]   ;;  %v11511_v57 = vld [vmem:[#allocation10 + $0x7cc] ss:$16 sps:$4 sm:$0xff]  }
 0x572   :  { %v7729_v58 = vmax.f32 %v10992_v49, 0.0  ;;  %v10995_v25 = vadd.f32 %v7720_v16, %v4500_v9  ;;  %v7722_v44 = vpop.f32.mrb[14].mxu1  ;;  %9635 = vmatpush1.bf16.msra.mxu1 %v11455_v10  ;;  %v7559_v47 = vpop.f32.mrb[15].mxu0  ;;  %9472 = vmatprep.subr.bf16.mxu0 %v11460_v55  ;;  %v11506_v38 = vld [vmem:[#allocation10 + $0x7c0] ss:$16 sps:$4 sm:$0xff]  }
 0x573   :  { %v7731_v60 = vmax.f32 %v10994_v51, 0.0  ;;  %v7730_v21 = vmax.f32 %v10993_v52, 0.0  ;;  %v7723_v62 = vpop.f32.mrb[15].mxu1  ;;  %9636 = vmatprep.subr.bf16.mxu1 %v11463_v40  ;;  %v11509_v9 = vld [vmem:[#allocation10 + $0x7c8] ss:$16 sps:$4 sm:$0xff]  }
 0x574   :  { %v7732_v0 = vmax.f32 %v10995_v25, 0.0  ;;  %v11514_v10 = vld [vmem:[#allocation10 + $0x7e4] ss:$16 sps:$4 sm:$0xff]   ;;  %v11517_v55 = vld [vmem:[#allocation10 + $0x7ec] ss:$16 sps:$4 sm:$0xff]  }
 0x575   :  { %v7758_v1 = vcombine.low %v7729_v58, %v7730_v21  ;;  %9473 = vmatpush1.bf16.msra.mxu0 %v11458_v45  ;;  %v11515_v40 = vld [vmem:[#allocation10 + $0x7e8] ss:$16 sps:$4 sm:$0xff]   ;;  %v8035_v49 = vld [vmem:[#allocation12] sm:$0xf] }
 0x576   :  { %v7759_v3 = vcombine.low %v7731_v60, %v7732_v0  ;;  %9637 = vmatpush1.bf16.msra.mxu1 %v11461_v56  ;;  %9474 = vmatprep.subr.bf16.mxu0 %v11466_v23  ;;  %v8040_v46 = vrot.slane %v8035_v49, %v11935_v29  ;;  %v8048_v50 = vrot.slane %v8035_v49, %v11955_v13 }
 0x577   :  { %v7766_v7 = vrot.slane %v7758_v1, %v11826_v53  ;;  %9638 = vmatprep.subr.bf16.mxu1 %v11469_v36  ;;  %v8044_v51 = vrot.slane %v8035_v49, %v11921_v41  ;;  %v8052_v52 = vrot.slane %v8035_v49, %v11938_v24 }
 0x578   :  { %v7773_v14 = vrot.slane %v7759_v3, %v11826_v53 }
 0x579   :  { %9475 = vmatpush1.bf16.msra.mxu0 %v11464_v2 }
 0x57a   :  { %v7774_v33 = vcombine.low %v7766_v7, %v7773_v14  ;;  %9639 = vmatpush1.bf16.msra.mxu1 %v11467_v5  ;;  %9476 = vmatprep.subr.bf16.mxu0 %v11472_v32 }
 0x57b   :  { %9640 = vmatprep.subr.bf16.mxu1 %v11475_v8 }
 0x57c   :  { %7778 = vst [vmem:[%s12071_s7 + $0x8] sm:$0xff] %v7774_v33 }
 0x57d   :  { %9477 = vmatpush1.bf16.msra.mxu0 %v11470_v43 }
 0x57e   :  { %9641 = vmatpush1.bf16.msra.mxu1 %v11473_v59  ;;  %9478 = vmatprep.subr.bf16.mxu0 %v11478_v17 }
 0x57f   :  { %9642 = vmatprep.subr.bf16.mxu1 %v11481_v18 }
 0x581   :  { %9479 = vmatpush1.bf16.msra.mxu0 %v11476_v54 }
 0x582   :  { %9643 = vmatpush1.bf16.msra.mxu1 %v11479_v19  ;;  %9480 = vmatprep.subr.bf16.mxu0 %v11484_v20 }
 0x583   :  { %9644 = vmatprep.subr.bf16.mxu1 %v11487_v48 }
 0x585   :  { %9481 = vmatpush1.bf16.msra.mxu0 %v11482_v6 }
 0x586   :  { %9645 = vmatpush1.bf16.msra.mxu1 %v11485_v22  ;;  %9482 = vmatprep.subr.bf16.mxu0 %v11490_v27 }
 0x587   :  { %9646 = vmatprep.subr.bf16.mxu1 %v11493_v31 }
 0x589   :  { %9483 = vmatpush1.bf16.msra.mxu0 %v11488_v4 }
 0x58a   :  { %9647 = vmatpush1.bf16.msra.mxu1 %v11491_v15  ;;  %9484 = vmatprep.subr.bf16.mxu0 %v11496_v34 }
 0x58b   :  { %9648 = vmatprep.subr.bf16.mxu1 %v11499_v61 }
 0x58d   :  { %9485 = vmatpush1.bf16.msra.mxu0 %v11494_v35 }
 0x58e   :  { %9649 = vmatpush1.bf16.msra.mxu1 %v11497_v12  ;;  %9486 = vmatprep.subr.bf16.mxu0 %v11502_v63 }
 0x58f   :  { %9650 = vmatprep.subr.bf16.mxu1 %v11505_v42 }
 0x591   :  { %9487 = vmatpush1.bf16.msra.mxu0 %v11500_v11 }
 0x592   :  { %9651 = vmatpush1.bf16.msra.mxu1 %v11503_v37  ;;  %9488 = vmatprep.subr.bf16.mxu0 %v11508_v30 }
 0x593   :  { %9652 = vmatprep.subr.bf16.mxu1 %v11511_v57 }
 0x595   :  { %9489 = vmatpush1.bf16.msra.mxu0 %v11506_v38 }
 0x596   :  { %9653 = vmatpush1.bf16.msra.mxu1 %v11509_v9  ;;  %9490 = vmatprep.subr.bf16.mxu0 %v11514_v10 }
 0x597   :  { %9654 = vmatprep.subr.bf16.mxu1 %v11517_v55 }
 0x599   :  { %9491 = vmatpush1.bf16.msra.mxu0 %v11512_v39 }
 0x59a   :  { %9655 = vmatpush1.bf16.msra.mxu1 %v11515_v40 }
 0x59c   :  { %9493 = vmatmul.mubr.bf16.vlgmr.msra.gmra.mrb[16].mxu0 %v11894_v26 }
 0x59d   :  { %9657 = vmatmul.mubr.bf16.vlgmr.msra.gmra.mrb[16].mxu1 %v11894_v26 }
 0x66f   :  { %v9494_v16 = vpop.f32.mrb[16].mxu0 }
 0x670   :  { %v10996_v28 = vadd.f32 %v9494_v16, %v8040_v46  ;;  %v9658_v45 = vpop.f32.mrb[16].mxu1  ;;  %v9496_v56 = vpop.f32.mrb[17].mxu0 }
 0x671   :  { %v10998_v58 = vadd.f32 %v9658_v45, %v8048_v50  ;;  %v10997_v25 = vadd.f32 %v9496_v56, %v8044_v51  ;;  %v9660_v44 = vpop.f32.mrb[17].mxu1  ;;  %v9498_v47 = vpop.f32.mrb[18].mxu0 }
 0x672   :  { %v10999_v23 = vadd.f32 %v9660_v44, %v8052_v52  ;;  %v9662_v60 = vpop.f32.mrb[18].mxu1  ;;  %v9499_v26 = vpop.f32.mrb[19].mxu0 }
 0x673   :  { %v9669_v21 = vcombine.low %v10996_v28, %v10997_v25  ;;  %v9663_v62 = vpop.f32.mrb[19].mxu1 }
 0x674   :  { %v9670_v29 = vcombine.low %v10998_v58, %v10999_v23 }
 0x675   :  { %v9677_v13 = vrot.slane %v9669_v21, %v11826_v53 }
 0x676   :  { %v9684_v41 = vrot.slane %v9670_v29, %v11826_v53 }
 0x678   :  { %v9685_v36 = vcombine.low %v9677_v13, %v9684_v41 }
 0x67a   :  { %9687 = vst [vmem:[%s12072_s8] sm:$0xff] %v9685_v36 }
 0x67b   :  { %9696 = vsyncpa [#allocation3], 1 }
 0x67c   :  { %9697 = vsyncpa [#allocation5], 1 }
 0x67d   :  { %9698 = vsyncpa [#allocation8], 1 }
 0x67e   :  { %9699 = vsyncpa [#allocation11], 1 }

</bundles_post_ra>
